<compile_context>
chip_gen: v7x
topology: tpu7x:2x2x1
jax: 0.10.0
libtpu: 0.0.40
codegen_flags: <defaults>
</compile_context>

<pallas_src>
import math
from functools import partial

import jax
import jax.numpy as jnp
from jax.experimental import pallas as pl
from jax.experimental.pallas import tpu as pltpu


def _transformer_block_kernel(x_ref, w_ref, b_ref, o_ref, *,
                              num_heads, head_dim, seq_len, channels):
    # x_ref: (C, S)   channel-major activations for the current batch element
    # w_ref: (6C, C)  row-blocks: [linear | q_eff(scaled) | k_eff | v_eff | out_proj | ffn]
    # b_ref: (5C, 1)  row-blocks: [linear | q_in(scaled)  | k_in  | v_in  | out_proj]
    C, Hn, Dh, S = channels, num_heads, head_dim, seq_len
    x = x_ref[...]                                        # (C, S)

    def mm(a, b):
        return jnp.dot(a, b, preferred_element_type=jnp.float32)

    def w(r0, rows):
        return w_ref[pl.ds(r0, rows), :]                  # static, tile-aligned slice

    def bias(r0, rows):
        return b_ref[pl.ds(r0, rows), :]                  # (rows, 1) -> broadcasts over S

    # --- TransformerBlock: p + linear(p)
    y0 = x + mm(w(0, C), x) + bias(0, C)                  # (C, S)

    # --- fused (q|k|v) Linear followed by MHA in-projection: one (3C, C) @ (C, S)
    #     matmul; the 1/sqrt(Dh) attention scale is already folded into the q rows.
    qkv = mm(w(C, 3 * C), y0) + bias(C, 3 * C)            # (3C, S)

    # (3C, S) -> (3H, Dh, S) -> (3H, S, Dh) -> q/k/v each (H, S, Dh)
    qkv_h = jnp.swapaxes(qkv.reshape(3 * Hn, Dh, S), 1, 2).reshape(3, Hn, S, Dh)
    q3, k3, v3 = qkv_h[0], qkv_h[1], qkv_h[2]

    # batched attention over all heads at once (no per-head loop, no lane concat)
    s = jnp.einsum("hqd,hkd->hqk", q3, k3, preferred_element_type=jnp.float32)
    m = jnp.max(s, axis=-1, keepdims=True)
    e = jnp.exp(s - m)
    probs = e / jnp.sum(e, axis=-1, keepdims=True)
    attn = jnp.einsum("hqk,hkd->hqd", probs, v3, preferred_element_type=jnp.float32)
    attn_cm = jnp.swapaxes(attn, 1, 2).reshape(Hn * Dh, S)   # back to (C, S)

    # --- MHA out-projection + residual
    y1 = mm(w(4 * C, C), attn_cm) + bias(4 * C, C) + y0
    # --- fused fc2(fc1(.)) + residual (no nonlinearity between fc1 and fc2)
    y2 = mm(w(5 * C, C), y1) + y1

    o_ref[...] = y2.astype(o_ref.dtype)


def transformer_block_pallas(x, params, num_heads):
    """x: (B, C, W, H) float32.  Returns (B, C, W, H)."""
    B, C, W, H = x.shape
    S = W * H
    head_dim = C // num_heads
    scale = 1.0 / math.sqrt(head_dim)
    hp = jax.lax.Precision.HIGHEST

    in_w = params["in_proj_weight"]
    in_b = params["in_proj_bias"]

    # nn.Linear (y = x W^T + b) in channel-major form is Y = W X + b[:, None];
    # chained Linear layers with no nonlinearity compose by weight product, so we
    # fuse host-side: Wiq@Wq (scaled), Wik@Wk, Wiv@Wv, Wfc2@Wfc1.
    w_q = scale * jnp.dot(in_w[0:C],         params["wq"], precision=hp)
    w_k = jnp.dot(in_w[C:2 * C],             params["wk"], precision=hp)
    w_v = jnp.dot(in_w[2 * C:3 * C],         params["wv"], precision=hp)
    w_ffn = jnp.dot(params["wfc2"], params["wfc1"], precision=hp)
    w_cat = jnp.concatenate(
        [params["wlin"], w_q, w_k, w_v, params["out_proj_weight"], w_ffn], axis=0)  # (6C, C)

    b_cat = jnp.concatenate(
        [params["blin"], scale * in_b[0:C], in_b[C:2 * C], in_b[2 * C:3 * C],
         params["out_proj_bias"]], axis=0)[:, None]                                  # (5C, 1)

    # No transposes: NCHW flattened is already channel-major per batch element.
    x_cs = x.reshape(B, C, S)

    out = pl.pallas_call(
        partial(_transformer_block_kernel, num_heads=num_heads,
                head_dim=head_dim, seq_len=S, channels=C),
        out_shape=jax.ShapeDtypeStruct((B, C, S), jnp.float32),
        grid_spec=pltpu.PrefetchScalarGridSpec(
            num_scalar_prefetch=0,
            grid=(B,),
            in_specs=[
                pl.BlockSpec((None, C, S), lambda b: (b, 0, 0)),   # activation block
                pl.BlockSpec((6 * C, C), lambda b: (0, 0)),        # stacked weights
                pl.BlockSpec((5 * C, 1), lambda b: (0, 0)),        # stacked biases
            ],
            out_specs=pl.BlockSpec((None, C, S), lambda b: (b, 0, 0)),
        ),
        compiler_params=pltpu.CompilerParams(dimension_semantics=("parallel",)),
    )(x_cs, w_cat, b_cat)

    return out.reshape(B, C, W, H)


def transformer_block_ref(x, params, num_heads):
    """Pure-JAX reference mirroring the PyTorch forward (unfused), for validation."""
    B, C, W, H = x.shape
    S = W * H
    head_dim = C // num_heads
    hp = jax.lax.Precision.HIGHEST

    def mm(a, b):
        return jnp.dot(a, b, precision=hp)

    p = jnp.transpose(x.reshape(B, C, S), (0, 2, 1))               # (B, S, C)
    y0 = p + mm(p, params["wlin"].T) + params["blin"]
    q = mm(y0, params["wq"].T)
    k = mm(y0, params["wk"].T)
    v = mm(y0, params["wv"].T)
    in_w, in_b = params["in_proj_weight"], params["in_proj_bias"]
    qin = mm(q, in_w[0:C].T) + in_b[0:C]
    kin = mm(k, in_w[C:2 * C].T) + in_b[C:2 * C]
    vin = mm(v, in_w[2 * C:3 * C].T) + in_b[2 * C:3 * C]

    qh = qin.reshape(B, S, num_heads, head_dim)
    kh = kin.reshape(B, S, num_heads, head_dim)
    vh = vin.reshape(B, S, num_heads, head_dim)
    scores = jnp.einsum("bqhd,bkhd->bhqk", qh / math.sqrt(head_dim), kh, precision=hp)
    probs = jax.nn.softmax(scores, axis=-1)
    attn = jnp.einsum("bhqk,bkhd->bqhd", probs, vh, precision=hp).reshape(B, S, C)
    attn_out = mm(attn, params["out_proj_weight"].T) + params["out_proj_bias"]
    y1 = attn_out + y0
    y2 = mm(mm(y1, params["wfc1"].T), params["wfc2"].T) + y1
    return jnp.transpose(y2, (0, 2, 1)).reshape(B, C, W, H)


def init_params(key, C):
    keys = jax.random.split(key, 12)

    def w(k, shape, scale=0.1):
        return (scale * jax.random.normal(k, shape)).astype(jnp.float32)

    return {
        "wlin": w(keys[0], (C, C)),
        "blin": w(keys[1], (C,)),
        "wq": w(keys[2], (C, C)),
        "wk": w(keys[3], (C, C)),
        "wv": w(keys[4], (C, C)),
        "in_proj_weight": w(keys[5], (3 * C, C)),
        "in_proj_bias": w(keys[6], (3 * C,)),
        "out_proj_weight": w(keys[7], (C, C)),
        "out_proj_bias": w(keys[8], (C,)),
        "wfc1": w(keys[9], (C, C)),
        "wfc2": w(keys[10], (C, C)),
    }


if __name__ == "__main__":
    # out_channels=32, spatial 16x16 -> seq len 256 (multiple of 128 => lane-dense blocks)
    B, C, W, H = 2, 32, 16, 16
    NUM_HEADS = 4

    key = jax.random.PRNGKey(0)
    kx, kp = jax.random.split(key)
    x = jax.random.normal(kx, (B, C, W, H), dtype=jnp.float32)
    params = init_params(kp, C)

    out = jax.block_until_ready(transformer_block_pallas(x, params, NUM_HEADS))
    ref = transformer_block_ref(x, params, NUM_HEADS)

    assert out.shape == (B, C, W, H)
    max_err = jnp.max(jnp.abs(out - ref))
    assert jnp.allclose(out, ref, atol=2e-4, rtol=2e-4), f"max abs err = {max_err}"

    print("KERNEL_OK")
</pallas_src>

<mosaic_0001>
module attributes {stable_mosaic.version = 11 : i64} {
  func.func @_transformer_block_kernel(%arg0: i32, %arg1: memref<1x32x256xf32, #tpu.memory_space<vmem>>, %arg2: memref<192x32xf32, #tpu.memory_space<vmem>>, %arg3: memref<160x1xf32, #tpu.memory_space<vmem>>, %arg4: memref<1x32x256xf32, #tpu.memory_space<vmem>>) attributes {dimension_semantics = [#tpu.dimension_semantics<parallel>], iteration_bounds = array<i64: 2>, scalar_prefetch = 0 : i64, scratch_operands = 0 : i64, tpu.core_type = #tpu.core_type<tc>, window_params = [{transform_indices = @transform_0, window_bounds = array<i64: 1, 32, 256>}, {pipeline_mode = #tpu.pipeline_mode<synchronous>, transform_indices = @transform_1, window_bounds = array<i64: 192, 32>}, {pipeline_mode = #tpu.pipeline_mode<synchronous>, transform_indices = @transform_2, window_bounds = array<i64: 160, 1>}, {transform_indices = @transform_3, window_bounds = array<i64: 1, 32, 256>}]} {
    %c0 = arith.constant 0 : index
    %c0_0 = arith.constant 0 : index
    %c0_1 = arith.constant 0 : index
    %0 = vector.load %arg1[%c0, %c0_0, %c0_1] : memref<1x32x256xf32, #tpu.memory_space<vmem>>, vector<1x32x256xf32>
    %1 = vector.shape_cast %0 : vector<1x32x256xf32> to vector<32x256xf32>
    %c0_2 = arith.constant 0 : index
    %c0_3 = arith.constant 0 : index
    %2 = vector.load %arg2[%c0_2, %c0_3] : memref<192x32xf32, #tpu.memory_space<vmem>>, vector<32x32xf32>
    %cst = arith.constant dense<0.000000e+00> : vector<32x256xf32>
    %3 = tpu.matmul %2, %1, %cst {dimension_numbers = #tpu.dot_dimension_numbers<[1], [0], [0], [1], [0, 0, 1, 1], [], []>} : vector<32x32xf32>, vector<32x256xf32>, vector<32x256xf32> -> vector<32x256xf32>
    %4 = arith.addf %1, %3 : vector<32x256xf32>
    %c0_4 = arith.constant 0 : index
    %c0_5 = arith.constant 0 : index
    %5 = vector.load %arg3[%c0_4, %c0_5] : memref<160x1xf32, #tpu.memory_space<vmem>>, vector<32x1xf32>
    %6 = vector.broadcast %5 : vector<32x1xf32> to vector<32x256xf32>
    %7 = arith.addf %4, %6 : vector<32x256xf32>
    %c32 = arith.constant 32 : index
    %c0_6 = arith.constant 0 : index
    %8 = vector.load %arg2[%c32, %c0_6] : memref<192x32xf32, #tpu.memory_space<vmem>>, vector<96x32xf32>
    %cst_7 = arith.constant dense<0.000000e+00> : vector<96x256xf32>
    %9 = tpu.matmul %8, %7, %cst_7 {dimension_numbers = #tpu.dot_dimension_numbers<[1], [0], [0], [1], [0, 0, 1, 1], [], []>} : vector<96x32xf32>, vector<32x256xf32>, vector<96x256xf32> -> vector<96x256xf32>
    %c32_8 = arith.constant 32 : index
    %c0_9 = arith.constant 0 : index
    %10 = vector.load %arg3[%c32_8, %c0_9] : memref<160x1xf32, #tpu.memory_space<vmem>>, vector<96x1xf32>
    %11 = vector.broadcast %10 : vector<96x1xf32> to vector<96x256xf32>
    %12 = arith.addf %9, %11 : vector<96x256xf32>
    %13 = vector.shape_cast %12 : vector<96x256xf32> to vector<12x8x256xf32>
    %14 = tpu.transpose %13, [0, 2, 1] : vector<12x8x256xf32> -> vector<12x256x8xf32>
    %15 = vector.shape_cast %14 : vector<12x256x8xf32> to vector<3x4x256x8xf32>
    %16 = vector.extract_strided_slice %15 {offsets = [0, 0, 0, 0], sizes = [1, 4, 256, 8], strides = [1, 1, 1, 1]} : vector<3x4x256x8xf32> to vector<1x4x256x8xf32>
    %17 = vector.shape_cast %16 : vector<1x4x256x8xf32> to vector<4x256x8xf32>
    %18 = vector.extract_strided_slice %15 {offsets = [1, 0, 0, 0], sizes = [1, 4, 256, 8], strides = [1, 1, 1, 1]} : vector<3x4x256x8xf32> to vector<1x4x256x8xf32>
    %19 = vector.shape_cast %18 : vector<1x4x256x8xf32> to vector<4x256x8xf32>
    %20 = vector.extract_strided_slice %15 {offsets = [2, 0, 0, 0], sizes = [1, 4, 256, 8], strides = [1, 1, 1, 1]} : vector<3x4x256x8xf32> to vector<1x4x256x8xf32>
    %21 = vector.shape_cast %20 : vector<1x4x256x8xf32> to vector<4x256x8xf32>
    "tpu.trace_start"() <{level = 10 : i32, message = "hqd,hkd->hqk"}> : () -> ()
    %cst_10 = arith.constant dense<0.000000e+00> : vector<4x256x256xf32>
    %22 = tpu.matmul %17, %19, %cst_10 {dimension_numbers = #tpu.dot_dimension_numbers<[2], [2], [1], [1], [0, 0, 0, 1, 1, 1], [0], [0]>} : vector<4x256x8xf32>, vector<4x256x8xf32>, vector<4x256x256xf32> -> vector<4x256x256xf32>
    "tpu.trace_stop"() : () -> ()
    %cst_11 = arith.constant dense<0xFF800000> : vector<4x256xf32>
    %23 = vector.multi_reduction <maximumf>, %22, %cst_11 [2] : vector<4x256x256xf32> to vector<4x256xf32>
    %24 = vector.shape_cast %23 : vector<4x256xf32> to vector<4x256x1xf32>
    %25 = vector.broadcast %24 : vector<4x256x1xf32> to vector<4x256x256xf32>
    %26 = arith.subf %22, %25 : vector<4x256x256xf32>
    %27 = math.exp %26 : vector<4x256x256xf32>
    %cst_12 = arith.constant dense<0.000000e+00> : vector<4x256xf32>
    %28 = vector.multi_reduction <add>, %27, %cst_12 [2] : vector<4x256x256xf32> to vector<4x256xf32>
    %29 = vector.shape_cast %28 : vector<4x256xf32> to vector<4x256x1xf32>
    %30 = vector.broadcast %29 : vector<4x256x1xf32> to vector<4x256x256xf32>
    %31 = arith.divf %27, %30 : vector<4x256x256xf32>
    "tpu.trace_start"() <{level = 10 : i32, message = "hqk,hkd->hqd"}> : () -> ()
    %cst_13 = arith.constant dense<0.000000e+00> : vector<4x256x8xf32>
    %32 = tpu.matmul %31, %21, %cst_13 {dimension_numbers = #tpu.dot_dimension_numbers<[2], [1], [1], [2], [0, 0, 0, 1, 1, 2], [0], [0]>} : vector<4x256x256xf32>, vector<4x256x8xf32>, vector<4x256x8xf32> -> vector<4x256x8xf32>
    "tpu.trace_stop"() : () -> ()
    %33 = tpu.transpose %32, [0, 2, 1] : vector<4x256x8xf32> -> vector<4x8x256xf32>
    %34 = vector.shape_cast %33 : vector<4x8x256xf32> to vector<32x256xf32>
    %c128 = arith.constant 128 : index
    %c0_14 = arith.constant 0 : index
    %35 = vector.load %arg2[%c128, %c0_14] : memref<192x32xf32, #tpu.memory_space<vmem>>, vector<32x32xf32>
    %cst_15 = arith.constant dense<0.000000e+00> : vector<32x256xf32>
    %36 = tpu.matmul %35, %34, %cst_15 {dimension_numbers = #tpu.dot_dimension_numbers<[1], [0], [0], [1], [0, 0, 1, 1], [], []>} : vector<32x32xf32>, vector<32x256xf32>, vector<32x256xf32> -> vector<32x256xf32>
    %c128_16 = arith.constant 128 : index
    %c0_17 = arith.constant 0 : index
    %37 = vector.load %arg3[%c128_16, %c0_17] : memref<160x1xf32, #tpu.memory_space<vmem>>, vector<32x1xf32>
    %38 = vector.broadcast %37 : vector<32x1xf32> to vector<32x256xf32>
    %39 = arith.addf %36, %38 : vector<32x256xf32>
    %40 = arith.addf %39, %7 : vector<32x256xf32>
    %c160 = arith.constant 160 : index
    %c0_18 = arith.constant 0 : index
    %41 = vector.load %arg2[%c160, %c0_18] : memref<192x32xf32, #tpu.memory_space<vmem>>, vector<32x32xf32>
    %cst_19 = arith.constant dense<0.000000e+00> : vector<32x256xf32>
    %42 = tpu.matmul %41, %40, %cst_19 {dimension_numbers = #tpu.dot_dimension_numbers<[1], [0], [0], [1], [0, 0, 1, 1], [], []>} : vector<32x32xf32>, vector<32x256xf32>, vector<32x256xf32> -> vector<32x256xf32>
    %43 = arith.addf %42, %40 : vector<32x256xf32>
    %c0_20 = arith.constant 0 : index
    %c0_21 = arith.constant 0 : index
    %c0_22 = arith.constant 0 : index
    %44 = vector.load %arg4[%c0_20, %c0_21, %c0_22] : memref<1x32x256xf32, #tpu.memory_space<vmem>>, vector<1x32x256xf32>
    %45 = vector.shape_cast %44 : vector<1x32x256xf32> to vector<32x256xf32>
    %46 = vector.shape_cast %43 : vector<32x256xf32> to vector<1x32x256xf32>
    tpu.vector_store %arg4[%c0_20, %c0_21, %c0_22], %46 {strides = array<i32>} : memref<1x32x256xf32, #tpu.memory_space<vmem>>, vector<1x32x256xf32>,
    return
  }
  func.func @transform_0(%arg0: i32) -> (i32, i32, i32) {
    %c0_i32 = arith.constant 0 : i32
    %c0_i32_0 = arith.constant 0 : i32
    %c0_i32_1 = arith.constant 0 : i32
    return %arg0, %c0_i32, %c0_i32_0 : i32, i32, i32
  }
  func.func @transform_1(%arg0: i32) -> (i32, i32) {
    %c0_i32 = arith.constant 0 : i32
    %c0_i32_0 = arith.constant 0 : i32
    %c0_i32_1 = arith.constant 0 : i32
    return %c0_i32, %c0_i32_0 : i32, i32
  }
  func.func @transform_2(%arg0: i32) -> (i32, i32) {
    %c0_i32 = arith.constant 0 : i32
    %c0_i32_0 = arith.constant 0 : i32
    %c0_i32_1 = arith.constant 0 : i32
    return %c0_i32, %c0_i32_0 : i32, i32
  }
  func.func @transform_3(%arg0: i32) -> (i32, i32, i32) {
    %c0_i32 = arith.constant 0 : i32
    %c0_i32_0 = arith.constant 0 : i32
    %c0_i32_1 = arith.constant 0 : i32
    return %arg0, %c0_i32, %c0_i32_0 : i32, i32, i32
  }
}

</mosaic_0001>

<bundles_post_ra>
// kernel: tpu_custom_call.1
= control target key start
LH: loop header
LB: loop body
LE: loop exit
PB: predicated region body
PF: predicated region fallthrough
CT: control target
= control target key end

     0   :  { %8 = vsyncpa [#allocation3], 0  ;;  %s14409_s0 = inlined_call_operand.vmem [shape: f32[2,32,256], index: 0, kind: input, shape index: {}]   ;;  %s14410_s1 = inlined_call_operand.vmem [shape: f32[192,32], index: 1, kind: input, shape index: {}]   ;;  %s14411_s2 = inlined_call_operand.vmem [shape: f32[160,1], index: 2, kind: input, shape index: {}]   ;;  %s14412_s3 = inlined_call_operand.hbm [shape: f32[2,32,256], index: 3, kind: output, shape index: {}]  }
   0x1   :  { %10 = vsyncpa [#allocation3 + $0x1], 0  ;;  %s9349_s12 = smov 0   ;;  %s9351_s13 = smov 0  }
   0x2   :  { %s9353_s14 = smov 0   ;;  %s9355_s15 = smov 0  }
   0x3 LB: > { %s9370_s16 = sadd.s32 4294967295, %s9321_s15   ;;  %s6547_s17 = sadd.s32 4294967294, %s9321_s15   ;;  %s9321_s15 = sphi %s9355_s15, %s16958_s15   ;;  %s9317_s14 = sphi %s9353_s14, %s16957_s14   ;;  %s9313_s13 = sphi %s9351_s13, %s16956_s13   ;;  %s9309_s12 = sphi %s9349_s12, %s16955_s12  }
   0x4   : > { %s9374_s18 = sadd.s32 1, %s9321_s15   ;;  %s91_s19 = sadd.s32 1, %s9317_s14 }
   0x5   : > { %s88_s20 = ssub.s32 %s9321_s15, %s9374_s18  ;;  %p101_p0 = scmp.ne.s32.totalorder %s9317_s14, %s9313_s13 }
   0x6   : > { %p89_p1 = scmp.eq.s32.totalorder %s88_s20, 0  ;;  %p102_p2 = scmp.eq.s32.totalorder %s9370_s16, 1 }
   0x7   : > { %p107_p3 = scmp.ne.s32.totalorder %s9313_s13, %s9309_s12  ;;  %p108_p4 = scmp.eq.s32.totalorder %s6547_s17, 1 }
   0x8   : > { %s9385_s21 = scalar_select %p89_p1, %s9317_s14, %s91_s19  }
   0x9   : > { %p9387_p5 = por %p102_p2, %p101_p0  ;;  %p9391_p6 = por %p108_p4, %p107_p3 }
   0xa   : > { %p6550_p7 = scmp.ge.s32.totalorder %s9321_s15, 1  ;;  %p140_p8 = scmp.lt.s32.totalorder %s9321_s15, 3 }
   0xc   : > { %p141_p9 = pnand %p6550_p7, %p140_p8 }
   0xe   : > { %144 = sbr.rel (%p141_p9) target bundleno = 2857 (0xb29), region = 32 }
  0x15   : > { %p164_p10 = scmp.lt.s32.totalorder %s9370_s16, 1  ;;  %v14413_v0 = vmov 0.0   ;;  %v291_v1 = vld [vmem:[%s14411_s2] sm:$0xff]  ;;  %v293_v2 = vld [vmem:[%s14411_s2 + $0x10] sm:$0xff]  ;;  %v9324_v3 = vmov 0   ;;  %v292_v4 = vld [vmem:[%s14411_s2 + $0x8] sm:$0xff] }
  0x16   : > { %258 = vmatprep.mubr.f32.mxu0 %v14413_v0  ;;  %507 = vmatprep.mubr.f32.mxu1 %v14413_v0  ;;  %v294_v5 = vld [vmem:[%s14411_s2 + $0x18] sm:$0xff]  ;;  %v335_v17 = vld [vmem:[%s14411_s2 + $0x20] sm:$0xff]  ;;  %v336_v18 = vld [vmem:[%s14411_s2 + $0x28] sm:$0xff]  ;;  %vm181_vm0 = vcmask 261120   ;;  %vm1348_vm1 = vcmask 64512   ;;  %s161_s27 = sand.u32 1, %s9313_s13  }
  0x17   : > { %s165_s28 = scalar_select %p164_p10, %s9370_s16, 1  ;;  %7685 = vset.pattern.permute.xlu0 %v9324_v3  ;;  %7686 = vset.pattern.permute.xlu1 %v9324_v3  ;;  %v337_v20 = vld [vmem:[%s14411_s2 + $0x30] sm:$0xff]  ;;  %v338_v21 = vld [vmem:[%s14411_s2 + $0x38] sm:$0xff]  ;;  %v177_v22 = vld [vmem:[%s14410_s1] sm:$0xff] }
  0x18   : > { %297 = vperm.xlu0 %7685, %v291_v1   ;;  %307 = vperm.xlu1 %7686, %v293_v2   ;;  %v339_v23 = vld [vmem:[%s14411_s2 + $0x40] sm:$0xff]  ;;  %v340_v24 = vld [vmem:[%s14411_s2 + $0x48] sm:$0xff]  ;;  %v341_v26 = vld [vmem:[%s14411_s2 + $0x50] sm:$0xff]  ;;  %s6840_s30 = sshll.u32 %s9370_s16, 10  ;;  %s14368_s16 = scalar_lea.sflag [#allocation3], %s161_s27 }
  0x19   : > { %s6839_s29 = sshll.u32 %s165_s28, 6  ;;  %v178_v25 = vld [vmem:[%s14410_s1 + $0x8] sm:$0xff]  ;;  %v342_v27 = vld [vmem:[%s14411_s2 + $0x58] sm:$0xff]  ;;  %v179_v28 = vld [vmem:[%s14410_s1 + $0x10] sm:$0xff]  ;;  %s6551_s28 = sshll.u32 %s161_s27, 6 }
  0x1a   : > { %s168_s9 = scalar_lea.vmem %s14409_s0, %s6839_s29  ;;  %v343_v29 = vld [vmem:[%s14411_s2 + $0x60] sm:$0xff]  ;;  %v344_v30 = vld [vmem:[%s14411_s2 + $0x68] sm:$0xff]  ;;  %v180_v31 = vld [vmem:[%s14410_s1 + $0x18] sm:$0xff]  ;;  %s163_s29 = scalar_lea.vmem [#allocation2], %s6551_s28 }
  0x1b   : > { %v170_v6 = vld [vmem:[%s168_s9 + $0x8] sm:$0xff]  ;;  %v172_v7 = vld [vmem:[%s168_s9 + $0x18] sm:$0xff]  ;;  %v169_v8 = vld [vmem:[%s168_s9] sm:$0xff]  ;;  %s6485_s4 = sshll.u32 %s163_s29, 4  ;;  %s14362_s7 = scalar_lea.hbm %s14412_s3, %s6840_s30  ;;  %s14364_s4 = int_to_ptr.vmem [resolvable:$true] %s6485_s4 }
  0x1c   : > { %v7225_v9 = vpack.c.bf16 %v172_v7, %v170_v6  ;;  %v171_v10 = vld [vmem:[%s168_s9 + $0x10] sm:$0xff]  ;;  %v9416_v11 = vld [vmem:[%s168_s9 + $0x28] sm:$0xff]  ;;  %v9418_v12 = vld [vmem:[%s168_s9 + $0x38] sm:$0xff]  ;;  %302 = vperm.xlu0 %7685, %v292_v4   ;;  %312 = vperm.xlu1 %7686, %v294_v5   ;;  %s9259_s8 = scalar_lea.vmem %s14364_s4, 1024 }
  0x1d   : > { %v7227_v13 = vpack.c.bf16 %v171_v10, %v169_v8  ;;  %v7229_v14 = vpack.c.bf16 %v9418_v12, %v9416_v11  ;;  %v9422_v15 = vld [vmem:[%s168_s9 + $0x20] sm:$0xff]  ;;  %v9424_v16 = vld [vmem:[%s168_s9 + $0x30] sm:$0xff]  ;;  %v346_v33 = vld [vmem:[%s14411_s2 + $0x78] sm:$0xff]  ;;  %p9260_p11 = scmp.ne.s32.totalorder %s14364_s4, %s9259_s8  ;;  %s9326_s9 = smov [#allocation2]  }
  0x1e   : > { %7226 = vmatprep.subr.bf16.mxu0 %v7225_v9  ;;  %v7231_v19 = vpack.c.bf16 %v9424_v16, %v9422_v15  ;;  %v345_v32 = vld [vmem:[%s14411_s2 + $0x70] sm:$0xff]  ;;  %v323_v3 = vld [vmem:[%s14410_s1 + $0x20] sm:$0xff]  ;;  %v324_v4 = vld [vmem:[%s14410_s1 + $0x28] sm:$0xff]  ;;  %s9263_s10 = sshll.u32 %s9326_s9, 4  ;;  %s9264_s10 = int_to_ptr.vmem [resolvable:$false] %s9263_s10 }
  0x1f   : > { %7228 = vmatpush1.bf16.msra.mxu0 %v7227_v13  ;;  %v325_v5 = vld [vmem:[%s14410_s1 + $0x30] sm:$0xff]  ;;  %vm9908_vm2 = vmpackc.low %vm1348_vm1, %vm1348_vm1  ;;  %p9261_p12 = pnand %p9260_p11, %p9387_p5  ;;  %s9265_s11 = scalar_lea.vmem %s9264_s10, 2048 }
  0x20   : > { %7230 = vmatprep.subr.bf16.mxu0 %v7229_v14  ;;  %349 = vperm.xlu0 %7685, %v335_v17   ;;  %v329_v9 = vld [vmem:[%s14410_s1 + $0x50] sm:$0xff]  ;;  %v334_v14 = vld [vmem:[%s14410_s1 + $0x78] sm:$0xff]  ;;  %p9266_p0 = scmp.lt.s32.totalorder %s14364_s4, %s9264_s10  ;;  %p9267_p1 = scmp.lt.s32.totalorder %s9265_s11, %s9259_s8 }
  0x21   : > { %354 = vperm.xlu1 %7686, %v336_v18   ;;  %v333_v13 = vld [vmem:[%s14410_s1 + $0x70] sm:$0xff]  ;;  %p9262_p13 = pneg %p9261_p12 }
  0x22   : > { %p9268_p2 = por %p9267_p1, %p9266_p0 }
  0x23   : > { %7232 = vmatpush1.bf16.msra.mxu0 %v7231_v19 }
  0x24   : > { %359 = vperm.xlu0 %7685, %v337_v20   ;;  %p9269_p3 = pnand %p9268_p2, %p9262_p13 }
  0x25   : > { %364 = vperm.xlu1 %7686, %v338_v21  }
  0x26   : > { %6554 = vmatmul.mubr.msk.f32.vlgmr.msra.gmra.mrb[0].mxu0 %vm181_vm0, %v177_v22 }
  0x27   : > { %264 = vmatprep.mubr.f32.mxu0 %v14413_v0 }
  0x28   : > { %369 = vperm.xlu0 %7685, %v339_v23  }
  0x29   : > { %374 = vperm.xlu1 %7686, %v340_v24  }
  0x2a   : > { %6555 = vmatmul.mubr.msk.f32.gmra.mrb[2].mxu0 %vm181_vm0, %v178_v25 }
  0x2b   : > { %270 = vmatprep.mubr.f32.mxu0 %v14413_v0 }
  0x2c   : > { %379 = vperm.xlu0 %7685, %v341_v26  }
  0x2d   : > { %384 = vperm.xlu1 %7686, %v342_v27  }
  0x2e   : > { %6556 = vmatmul.mubr.msk.f32.gmra.mrb[4].mxu0 %vm181_vm0, %v179_v28 }
  0x2f   : > { %276 = vmatprep.mubr.f32.mxu0 %v14413_v0 }
  0x30   : > { %389 = vperm.xlu0 %7685, %v343_v29  }
  0x31   : > { %394 = vperm.xlu1 %7686, %v344_v30  }
  0x32   : > { %6557 = vmatmul.mubr.msk.f32.gmra.mrb[6].mxu0 %vm181_vm0, %v180_v31 }
  0x34   : > { %399 = vperm.xlu0 %7685, %v345_v32  }
  0x35   : > { %404 = vperm.xlu1 %7686, %v346_v33  }
  0x97   : > { %v298_v34 = vpop.permute.xlu0 %297  ;;  %v308_v45 = vpop.permute.xlu1 %307 }
  0x9b   : > { %v303_v42 = vpop.permute.xlu0 %302  ;;  %v313_v58 = vpop.permute.xlu1 %312 }
  0xa0   : > { %v355_v22 = vpop.permute.xlu1 %354 }
  0xa4   : > { %v9574_v28 = vpop.permute.xlu1 %364 }
  0xa8   : > { %v375_v32 = vpop.permute.xlu1 %374 }
  0xf9   : > { %v260_v35 = vpop.f32.mrb[0].mxu0 }
  0xfa   : > { %v262_v36 = vpop.f32.mrb[1].mxu0  ;;  %v283_v39 = vadd.f32 %v260_v35, %v169_v8  ;;  %v328_v8 = vld [vmem:[%s14410_s1 + $0x48] sm:$0xff] }
  0xfb   : > { %v284_v37 = vadd.f32 %v262_v36, %v170_v6  ;;  %v326_v6 = vld [vmem:[%s14410_s1 + $0x38] sm:$0xff] }
  0xfc   : > { %v9489_v50 = vadd.f32 %v298_v34, %v283_v39 }
  0xfd   : > { %v266_v38 = vpop.f32.mrb[2].mxu0  ;;  %v9485_v47 = vadd.f32 %v298_v34, %v284_v37 }
  0xfe   : > { %v285_v40 = vadd.f32 %v266_v38, %v171_v10  ;;  %v268_v41 = vpop.f32.mrb[3].mxu0  ;;  %15277 = vst [vmem:[#allocation8_spill] sm:$0xff] %v9489_v50  ;;  %v330_v10 = vld [vmem:[%s14410_s1 + $0x58] sm:$0xff] }
  0xff   : > { %v286_v43 = vadd.f32 %v268_v41, %v172_v7  ;;  %15275 = vst [vmem:[#allocation6_spill] sm:$0xff] %v9485_v47  ;;  %v327_v7 = vld [vmem:[%s14410_s1 + $0x40] sm:$0xff] }
 0x100   : > { %v9483_v44 = vadd.f32 %v303_v42, %v285_v40 }
 0x101   : > { %v272_v46 = vpop.f32.mrb[4].mxu0  ;;  %v9487_v48 = vadd.f32 %v303_v42, %v286_v43 }
 0x102   : > { %15274 = vst [vmem:[#allocation5_spill] sm:$0xff] %v9483_v44  ;;  %v274_v49 = vpop.f32.mrb[5].mxu0  ;;  %v7235_v52 = vpack.c.bf16 %v9483_v44, %v9489_v50  ;;  %v287_v55 = vadd.f32 %v272_v46, %v9422_v15  ;;  %v350_v15 = vpop.permute.xlu0 %349 }
 0x103   : > { %15276 = vst [vmem:[#allocation7_spill] sm:$0xff] %v9487_v48  ;;  %v7233_v51 = vpack.c.bf16 %v9487_v48, %v9485_v47  ;;  %v288_v53 = vadd.f32 %v274_v49, %v9416_v11  ;;  %v331_v11 = vld [vmem:[%s14410_s1 + $0x60] sm:$0xff] }
 0x104   : > { %v9505_v63 = vadd.f32 %v308_v45, %v287_v55 }
 0x105   : > { %v278_v54 = vpop.f32.mrb[6].mxu0  ;;  %7234 = vmatprep.subr.bf16.mxu1 %v7233_v51  ;;  %v9501_v61 = vadd.f32 %v308_v45, %v288_v53  ;;  %v385_v45 = vpop.permute.xlu1 %384 }
 0x106   : > { %v289_v56 = vadd.f32 %v278_v54, %v9424_v16  ;;  %v280_v57 = vpop.f32.mrb[7].mxu0  ;;  %7236 = vmatpush1.bf16.msra.mxu1 %v7235_v52  ;;  %15281 = vst [vmem:[#allocation12_spill] sm:$0xff] %v9505_v63  ;;  %v360_v26 = vpop.permute.xlu0 %359 }
 0x107   : > { %v290_v59 = vadd.f32 %v280_v57, %v9418_v12  ;;  %15279 = vst [vmem:[#allocation10_spill] sm:$0xff] %v9501_v61  ;;  %v332_v12 = vld [vmem:[%s14410_s1 + $0x68] sm:$0xff] }
 0x108   : > { %v9499_v60 = vadd.f32 %v313_v58, %v289_v56 }
 0x109   : > { %v9503_v62 = vadd.f32 %v313_v58, %v290_v59 }
 0x10a   : > { %15278 = vst [vmem:[#allocation9_spill] sm:$0xff] %v9499_v60  ;;  %v7239_v2 = vpack.c.bf16 %v9499_v60, %v9505_v63  ;;  %v370_v31 = vpop.permute.xlu0 %369 }
 0x10b   : > { %15280 = vst [vmem:[#allocation11_spill] sm:$0xff] %v9503_v62  ;;  %v7237_v1 = vpack.c.bf16 %v9503_v62, %v9501_v61 }
 0x10d   : > { %7238 = vmatprep.subr.bf16.mxu1 %v7237_v1  ;;  %v395_v1 = vpop.permute.xlu1 %394 }
 0x10e   : > { %7240 = vmatpush1.bf16.msra.mxu1 %v7239_v2  ;;  %v380_v43 = vpop.permute.xlu0 %379 }
 0x111   : > { %6558 = vmatmul.mubr.msk.f32.vlgmr.msra.gmra.mrb[0].mxu1 %vm181_vm0, %v323_v3 }
 0x112   : > { %513 = vmatprep.mubr.f32.mxu1 %v14413_v0  ;;  %v390_v59 = vpop.permute.xlu0 %389 }
 0x115   : > { %6559 = vmatmul.mubr.msk.f32.gmra.mrb[2].mxu1 %vm181_vm0, %v324_v4 }
 0x116   : > { %519 = vmatprep.mubr.f32.mxu1 %v14413_v0 }
 0x119   : > { %6560 = vmatmul.mubr.msk.f32.gmra.mrb[4].mxu1 %vm181_vm0, %v325_v5 }
 0x11a   : > { %525 = vmatprep.mubr.f32.mxu1 %v14413_v0 }
 0x11d   : > { %6561 = vmatmul.mubr.msk.f32.gmra.mrb[6].mxu1 %vm181_vm0, %v326_v6 }
 0x11e   : > { %531 = vmatprep.mubr.f32.mxu1 %v14413_v0 }
 0x121   : > { %6562 = vmatmul.mubr.msk.f32.gmra.mrb[8].mxu1 %vm181_vm0, %v327_v7 }
 0x122   : > { %537 = vmatprep.mubr.f32.mxu1 %v14413_v0 }
 0x125   : > { %6563 = vmatmul.mubr.msk.f32.gmra.mrb[10].mxu1 %vm181_vm0, %v328_v8 }
 0x126   : > { %543 = vmatprep.mubr.f32.mxu1 %v14413_v0 }
 0x129   : > { %6564 = vmatmul.mubr.msk.f32.gmra.mrb[12].mxu1 %vm181_vm0, %v329_v9 }
 0x12a   : > { %549 = vmatprep.mubr.f32.mxu1 %v14413_v0 }
 0x12d   : > { %6565 = vmatmul.mubr.msk.f32.gmra.mrb[14].mxu1 %vm181_vm0, %v330_v10 }
 0x12e   : > { %555 = vmatprep.mubr.f32.mxu1 %v14413_v0 }
 0x131   : > { %6566 = vmatmul.mubr.msk.f32.gmra.mrb[16].mxu1 %vm181_vm0, %v331_v11 }
 0x132   : > { %561 = vmatprep.mubr.f32.mxu1 %v14413_v0 }
 0x135   : > { %6567 = vmatmul.mubr.msk.f32.gmra.mrb[18].mxu1 %vm181_vm0, %v332_v12  ;;  %v400_v12 = vpop.permute.xlu0 %399 }
 0x136   : > { %567 = vmatprep.mubr.f32.mxu1 %v14413_v0 }
 0x139   : > { %6568 = vmatmul.mubr.msk.f32.gmra.mrb[20].mxu1 %vm181_vm0, %v333_v13  ;;  %v405_v13 = vpop.permute.xlu1 %404 }
 0x13a   : > { %573 = vmatprep.mubr.f32.mxu1 %v14413_v0 }
 0x13d   : > { %6569 = vmatmul.mubr.msk.f32.gmra.mrb[22].mxu1 %vm181_vm0, %v334_v14 }
 0x1e4   : > { %v509_v16 = vpop.f32.mrb[0].mxu1 }
 0x1e5   : > { %v510_v17 = vadd.f32 %v509_v16, %v350_v15  ;;  %v511_v18 = vpop.f32.mrb[1].mxu1 }
 0x1e6   : > { %v512_v19 = vadd.f32 %v511_v18, %v350_v15 }
 0x1e7   : > { %580 = vxpose.xlu0.b32.start.end [1/1] (short) %v510_v17, 128 }
 0x1e8   : > { %v515_v20 = vpop.f32.mrb[2].mxu1  ;;  %612 = vxpose.xlu1.b32.start.end [1/1] (short) %v512_v19, 128 }
 0x1e9   : > { %v517_v21 = vpop.f32.mrb[3].mxu1 }
 0x1ec   : > { %v521_v23 = vpop.f32.mrb[4].mxu1 }
 0x1ed   : > { %v523_v24 = vpop.f32.mrb[5].mxu1 }
 0x1f0   : > { %v9570_v25 = vpop.f32.mrb[6].mxu1 }
 0x1f1   : > { %v9572_v27 = vpop.f32.mrb[7].mxu1  ;;  %v528_v0 = vadd.f32 %v9570_v25, %v9574_v28 }
 0x1f4   : > { %v533_v29 = vpop.f32.mrb[8].mxu1 }
 0x1f5   : > { %v535_v30 = vpop.f32.mrb[9].mxu1  ;;  %v9576_v34 = vadd.f32 %v533_v29, %v370_v31 }
 0x1f6   : > { %v9580_v37 = vadd.f32 %v535_v30, %v370_v31  ;;  %v516_v31 = vadd.f32 %v515_v20, %v355_v22  ;;  %v530_v30 = vadd.f32 %v9572_v27, %v9574_v28 }
 0x1f8   : > { %v539_v33 = vpop.f32.mrb[10].mxu1 }
 0x1f9   : > { %v9578_v35 = vadd.f32 %v539_v33, %v375_v32  ;;  %v541_v36 = vpop.f32.mrb[11].mxu1  ;;  %v522_v33 = vadd.f32 %v521_v23, %v360_v26 }
 0x1fa   : > { %v9582_v38 = vadd.f32 %v541_v36, %v375_v32  ;;  %v518_v32 = vadd.f32 %v517_v21, %v355_v22  ;;  %v524_v36 = vadd.f32 %v523_v24, %v360_v26 }
 0x1fc   : > { %v545_v41 = vpop.f32.mrb[12].mxu1 }
 0x1fd   : > { %v547_v42 = vpop.f32.mrb[13].mxu1  ;;  %v9588_v49 = vadd.f32 %v545_v41, %v380_v43 }
 0x1fe   : > { %v9592_v53 = vadd.f32 %v547_v42, %v380_v43 }
 0x200   : > { %v551_v46 = vpop.f32.mrb[14].mxu1 }
 0x201   : > { %v9590_v51 = vadd.f32 %v551_v46, %v385_v45  ;;  %v553_v52 = vpop.f32.mrb[15].mxu1 }
 0x202   : > { %v9594_v54 = vadd.f32 %v553_v52, %v385_v45 }
 0x204   : > { %v557_v57 = vpop.f32.mrb[16].mxu1 }
 0x205   : > { %v559_v58 = vpop.f32.mrb[17].mxu1  ;;  %v9600_v3 = vadd.f32 %v557_v57, %v390_v59 }
 0x206   : > { %v9604_v6 = vadd.f32 %v559_v58, %v390_v59 }
 0x208   : > { %v563_v2 = vpop.f32.mrb[18].mxu1 }
 0x209   : > { %v9602_v4 = vadd.f32 %v563_v2, %v395_v1  ;;  %v565_v5 = vpop.f32.mrb[19].mxu1 }
 0x20a   : > { %v9606_v7 = vadd.f32 %v565_v5, %v395_v1 }
 0x20c   : > { %v569_v10 = vpop.f32.mrb[20].mxu1 }
 0x20d   : > { %v571_v11 = vpop.f32.mrb[21].mxu1  ;;  %v9612_v15 = vadd.f32 %v569_v10, %v400_v12 }
 0x20e   : > { %v9616_v18 = vadd.f32 %v571_v11, %v400_v12 }
 0x210   : > { %v575_v14 = vpop.f32.mrb[22].mxu1  ;;  %15282 = vst [vmem:[#allocation13_spill] sm:$0xff] %v9616_v18 }
 0x211   : > { %v9614_v16 = vadd.f32 %v575_v14, %v405_v13  ;;  %v577_v17 = vpop.f32.mrb[23].mxu1 }
 0x212   : > { %v9618_v19 = vadd.f32 %v577_v17, %v405_v13 }
 0x214   : > { %15283 = vst [vmem:[#allocation14_spill] sm:$0xff] %v9618_v19 }
 0x224   : > { %644 = vxpose.xlu0.b32.start.end [1/1] (short) %v516_v31, 128 }
 0x225   : > { %676 = vxpose.xlu1.b32.start.end [1/1] (short) %v518_v32, 128 }
 0x261   : > { %708 = vxpose.xlu0.b32.start.end [1/1] (short) %v522_v33, 128 }
 0x262   : > { %740 = vxpose.xlu1.b32.start.end [1/1] (short) %v524_v36, 128 }
 0x267   : > { %v9624_v41 = vpop.trf.xlu0 }
 0x268   : > { %v9626_v42 = vpop.trf.xlu1  ;;  %6873 = vmatprep.mubr.msk.f32.mxu0 %vm1348_vm1, %v9624_v41 }
 0x26b   : > { %v9630_v43 = vpop.trf.xlu0 }
 0x26c   : > { %v9632_v45 = vpop.trf.xlu1 }
 0x26f   : > { %v9634_v20 = vpop.trf.xlu0 }
 0x270   : > { %v9636_v21 = vpop.trf.xlu1 }
 0x273   : > { %v9638_v22 = vpop.trf.xlu0 }
 0x274   : > { %v9640_v23 = vpop.trf.xlu1 }
 0x277   : > { %v9642_v24 = vpop.trf.xlu0 }
 0x278   : > { %v9644_v26 = vpop.trf.xlu1 }
 0x27b   : > { %v9646_v46 = vpop.trf.xlu0 }
 0x27c   : > { %v9648_v52 = vpop.trf.xlu1 }
 0x27d   : > { %15284 = vst [vmem:[#allocation15_spill] sm:$0xff] %v9648_v52 }
 0x27f   : > { %v9650_v57 = vpop.trf.xlu0 }
 0x280   : > { %v9652_v58 = vpop.trf.xlu1 }
 0x281   : > { %15285 = vst [vmem:[#allocation16_spill] sm:$0xff] %v9652_v58 }
 0x283   : > { %v9654_v59 = vpop.trf.xlu0 }
 0x284   : > { %v9656_v1 = vpop.trf.xlu1 }
 0x285   : > { %15286 = vst [vmem:[#allocation17_spill] sm:$0xff] %v9656_v1 }
 0x287   : > { %v9658_v2 = vpop.trf.xlu0 }
 0x288   : > { %v9660_v5 = vpop.trf.xlu1 }
 0x289   : > { %15287 = vst [vmem:[#allocation18_spill] sm:$0xff] %v9660_v5 }
 0x28b   : > { %v9662_v10 = vpop.trf.xlu0 }
 0x28c   : > { %v9664_v11 = vpop.trf.xlu1 }
 0x28d   : > { %15288 = vst [vmem:[#allocation19_spill] sm:$0xff] %v9664_v11 }
 0x28f   : > { %v9666_v12 = vpop.trf.xlu0 }
 0x290   : > { %v9668_v13 = vpop.trf.xlu1 }
 0x291   : > { %15289 = vst [vmem:[#allocation20_spill] sm:$0xff] %v9668_v13 }
 0x293   : > { %v9670_v14 = vpop.trf.xlu0 }
 0x294   : > { %v9672_v17 = vpop.trf.xlu1 }
 0x295   : > { %15290 = vst [vmem:[#allocation21_spill] sm:$0xff] %v9672_v17 }
 0x297   : > { %v9674_v31 = vpop.trf.xlu0 }
 0x298   : > { %v9676_v32 = vpop.trf.xlu1 }
 0x299   : > { %15291 = vst [vmem:[#allocation22_spill] sm:$0xff] %v9676_v32 }
 0x29b   : > { %v9678_v33 = vpop.trf.xlu0 }
 0x29c   : > { %v9680_v36 = vpop.trf.xlu1 }
 0x29d   : > { %15292 = vst [vmem:[#allocation23_spill] sm:$0xff] %v9680_v36 }
 0x29f   : > { %v9686_v29 = vpop.trf.xlu0  ;;  %772 = vxpose.xlu0.b32.start.end [1/1] (short) %v528_v0, 128 }
 0x2a0   : > { %v9688_v8 = vpop.trf.xlu1  ;;  %804 = vxpose.xlu1.b32.start.end [1/1] (short) %v530_v30, 128 }
 0x2a1   : > { %15293 = vst [vmem:[#allocation24_spill] sm:$0xff] %v9688_v8 }
 0x2a3   : > { %v9690_v9 = vpop.trf.xlu0 }
 0x2a4   : > { %v9692_v55 = vpop.trf.xlu1 }
 0x2a5   : > { %15294 = vst [vmem:[#allocation25_spill] sm:$0xff] %v9692_v55 }
 0x2a7   : > { %v9694_v56 = vpop.trf.xlu0 }
 0x2a8   : > { %v9696_v39 = vpop.trf.xlu1  ;;  %6969 = vmatprep.mubr.msk.f32.mxu1 %vm1348_vm1, %v9694_v56 }
 0x2ab   : > { %v9700_v25 = vpop.trf.xlu0 }
 0x2ac   : > { %v9702_v27 = vpop.trf.xlu1 }
 0x2af   : > { %v9704_v28 = vpop.trf.xlu0 }
 0x2b0   : > { %v9706_v0 = vpop.trf.xlu1 }
 0x2b3   : > { %v9708_v30 = vpop.trf.xlu0 }
 0x2b4   : > { %v9710_v40 = vpop.trf.xlu1 }
 0x2b7   : > { %v9712_v63 = vpop.trf.xlu0 }
 0x2b8   : > { %v9714_v62 = vpop.trf.xlu1 }
 0x2b9   : > { %15295 = vst [vmem:[#allocation26_spill] sm:$0xff] %v9714_v62 }
 0x2bb   : > { %v9716_v61 = vpop.trf.xlu0 }
 0x2bc   : > { %v9718_v60 = vpop.trf.xlu1 }
 0x2bd   : > { %15296 = vst [vmem:[#allocation27_spill] sm:$0xff] %v9718_v60 }
 0x2bf   : > { %v9720_v50 = vpop.trf.xlu0 }
 0x2c0   : > { %v9722_v48 = vpop.trf.xlu1 }
 0x2c1   : > { %15297 = vst [vmem:[#allocation28_spill] sm:$0xff] %v9722_v48 }
 0x2c3   : > { %v9724_v47 = vpop.trf.xlu0 }
 0x2c4   : > { %v9726_v44 = vpop.trf.xlu1 }
 0x2c5   : > { %15298 = vst [vmem:[#allocation29_spill] sm:$0xff] %v9726_v44 }
 0x2c7   : > { %v9728_v18 = vpop.trf.xlu0 }
 0x2c8   : > { %v9730_v19 = vpop.trf.xlu1 }
 0x2c9   : > { %15299 = vst [vmem:[#allocation30_spill] sm:$0xff] %v9730_v19 }
 0x2cb   : > { %v9732_v55 = vpop.trf.xlu0 }
 0x2cc   : > { %v9734_v8 = vpop.trf.xlu1 }
 0x2cd   : > { %15300 = vst [vmem:[#allocation31_spill] sm:$0xff] %v9734_v8  ;;  %v15305_v8 = vpack.i.bf16 %v9582_v38, %v9580_v37 }
 0x2cf   : > { %v9736_v36 = vpop.trf.xlu0 }
 0x2d0   : > { %v9738_v32 = vpop.trf.xlu1 }
 0x2d1   : > { %15301 = vst [vmem:[#allocation32_spill] sm:$0xff] %v9738_v32  ;;  %v15307_v32 = vpack.i.bf16 %v9578_v35, %v9576_v34 }
 0x2d3   : > { %v9740_v17 = vpop.trf.xlu0 }
 0x2d4   : > { %v9742_v13 = vpop.trf.xlu1 }
 0x2d5   : > { %15302 = vst [vmem:[#allocation33_spill] sm:$0xff] %v9742_v13 }
 0x2d7   : > { %v9744_v11 = vpop.trf.xlu0 }
 0x2d8   : > { %v9746_v5 = vpop.trf.xlu1 }
 0x2d9   : > { %15303 = vst [vmem:[#allocation34_spill] sm:$0xff] %v9746_v5 }
 0x2db   : > { %v9748_v44 = vpop.trf.xlu0 }
 0x2dc   : > { %v9750_v1 = vpop.trf.xlu1 }
 0x2dd   : > { %15304 = vst [vmem:[#allocation35_spill] sm:$0xff] %v9750_v1 }
 0x2df   : > { %v9752_v19 = vpop.trf.xlu0  ;;  %7770 = vxpose.xlu0.b32.start.end [1/1] (short) %v15305_v8, 128 }
 0x2e0   : > { %v9757_v48 = vpop.trf.xlu1  ;;  %7688 = vxpose.xlu1.b32.start.end [1/1] (short) %v15307_v32, 128 }
 0x2e1   : > { %15306 = vst [vmem:[#allocation36_spill] sm:$0xff] %v9757_v48 }
 0x2e3   : > { %v9762_v13 = vpop.trf.xlu0 }
 0x2e4   : > { %v9764_v58 = vpop.trf.xlu1 }
 0x2e5   : > { %15308 = vst [vmem:[#allocation37_spill] sm:$0xff] %v9764_v58 }
 0x2e7   : > { %v9766_v5 = vpop.trf.xlu0 }
 0x2e8   : > { %15309 = vst [vmem:[#allocation38_spill] sm:$0xff] %v9766_v5  ;;  %v9768_v60 = vpop.trf.xlu1 }
 0x2e9   : > { %15310 = vst [vmem:[#allocation39_spill] sm:$0xff] %v9768_v60 }
 0x2eb   : > { %v9770_v1 = vpop.trf.xlu0 }
 0x2ec   : > { %15311 = vst [vmem:[#allocation40_spill] sm:$0xff] %v9770_v1  ;;  %v9772_v52 = vpop.trf.xlu1 }
 0x2ed   : > { %15312 = vst [vmem:[#allocation41_spill] sm:$0xff] %v9772_v52 }
 0x2ef   : > { %v9774_v37 = vpop.trf.xlu0 }
 0x2f0   : > { %15313 = vst [vmem:[#allocation42_spill] sm:$0xff] %v9774_v37  ;;  %v9776_v38 = vpop.trf.xlu1 }
 0x2f1   : > { %15314 = vst [vmem:[#allocation43_spill] sm:$0xff] %v9776_v38 }
 0x2f3   : > { %v9778_v8 = vpop.trf.xlu0 }
 0x2f4   : > { %15315 = vst [vmem:[#allocation44_spill] sm:$0xff] %v9778_v8  ;;  %v9780_v34 = vpop.trf.xlu1 }
 0x2f5   : > { %15316 = vst [vmem:[#allocation45_spill] sm:$0xff] %v9780_v34 }
 0x2f7   : > { %v9782_v35 = vpop.trf.xlu0 }
 0x2f8   : > { %15317 = vst [vmem:[#allocation46_spill] sm:$0xff] %v9782_v35  ;;  %v9784_v32 = vpop.trf.xlu1 }
 0x2f9   : > { %15318 = vst [vmem:[#allocation47_spill] sm:$0xff] %v9784_v32 }
 0x2fb   : > { %v9786_v58 = vpop.trf.xlu0 }
 0x2fc   : > { %15319 = vst [vmem:[#allocation48_spill] sm:$0xff] %v9786_v58  ;;  %v9788_v5 = vpop.trf.xlu1 }
 0x2fd   : > { %15320 = vst [vmem:[#allocation49_spill] sm:$0xff] %v9788_v5 }
 0x2ff   : > { %v9790_v60 = vpop.trf.xlu0 }
 0x300   : > { %15321 = vst [vmem:[#allocation50_spill] sm:$0xff] %v9790_v60  ;;  %v9792_v1 = vpop.trf.xlu1 }
 0x301   : > { %15322 = vst [vmem:[#allocation51_spill] sm:$0xff] %v9792_v1 }
 0x303   : > { %v9794_v52 = vpop.trf.xlu0 }
 0x304   : > { %15323 = vst [vmem:[#allocation52_spill] sm:$0xff] %v9794_v52  ;;  %v9796_v37 = vpop.trf.xlu1 }
 0x305   : > { %15324 = vst [vmem:[#allocation53_spill] sm:$0xff] %v9796_v37 }
 0x307   : > { %v9798_v38 = vpop.trf.xlu0 }
 0x308   : > { %15325 = vst [vmem:[#allocation54_spill] sm:$0xff] %v9798_v38  ;;  %v9800_v8 = vpop.trf.xlu1 }
 0x309   : > { %15326 = vst [vmem:[#allocation55_spill] sm:$0xff] %v9800_v8 }
 0x30b   : > { %v9802_v34 = vpop.trf.xlu0 }
 0x30c   : > { %15327 = vst [vmem:[#allocation56_spill] sm:$0xff] %v9802_v34  ;;  %v9804_v35 = vpop.trf.xlu1 }
 0x30d   : > { %15328 = vst [vmem:[#allocation57_spill] sm:$0xff] %v9804_v35  ;;  %v15338_v35 = vpack.i.bf16 %v9594_v54, %v9592_v53 }
 0x30f   : > { %v9806_v32 = vpop.trf.xlu0 }
 0x310   : > { %15329 = vst [vmem:[#allocation58_spill] sm:$0xff] %v9806_v32  ;;  %v9808_v58 = vpop.trf.xlu1 }
 0x311   : > { %15330 = vst [vmem:[#allocation59_spill] sm:$0xff] %v9808_v58  ;;  %v15340_v58 = vpack.i.bf16 %v9590_v51, %v9588_v49 }
 0x313   : > { %v9810_v5 = vpop.trf.xlu0 }
 0x314   : > { %15331 = vst [vmem:[#allocation60_spill] sm:$0xff] %v9810_v5  ;;  %v9812_v60 = vpop.trf.xlu1 }
 0x315   : > { %15332 = vst [vmem:[#allocation61_spill] sm:$0xff] %v9812_v60 }
 0x317   : > { %v9814_v1 = vpop.trf.xlu0 }
 0x318   : > { %15333 = vst [vmem:[#allocation62_spill] sm:$0xff] %v9814_v1  ;;  %v9816_v52 = vpop.trf.xlu1 }
 0x319   : > { %15334 = vst [vmem:[#allocation63_spill] sm:$0xff] %v9816_v52 }
 0x31b   : > { %v9818_v37 = vpop.trf.xlu0 }
 0x31c   : > { %15335 = vst [vmem:[#allocation64_spill] sm:$0xff] %v9818_v37  ;;  %v9820_v38 = vpop.trf.xlu1 }
 0x31d   : > { %15336 = vst [vmem:[#allocation65_spill] sm:$0xff] %v9820_v38 }
 0x31f   : > { %v9822_v8 = vpop.trf.xlu0  ;;  %7934 = vxpose.xlu0.b32.start.end [1/1] (short) %v15338_v35, 128 }
 0x320   : > { %15337 = vst [vmem:[#allocation66_spill] sm:$0xff] %v9822_v8  ;;  %v9827_v32 = vpop.trf.xlu1  ;;  %7852 = vxpose.xlu1.b32.start.end [1/1] (short) %v15340_v58, 128 }
 0x321   : > { %15339 = vst [vmem:[#allocation67_spill] sm:$0xff] %v9827_v32 }
 0x323   : > { %v9832_v60 = vpop.trf.xlu0 }
 0x324   : > { %15341 = vst [vmem:[#allocation68_spill] sm:$0xff] %v9832_v60  ;;  %v9834_v1 = vpop.trf.xlu1 }
 0x325   : > { %15342 = vst [vmem:[#allocation69_spill] sm:$0xff] %v9834_v1 }
 0x327   : > { %v9836_v52 = vpop.trf.xlu0 }
 0x328   : > { %15343 = vst [vmem:[#allocation70_spill] sm:$0xff] %v9836_v52  ;;  %v9838_v37 = vpop.trf.xlu1 }
 0x329   : > { %15344 = vst [vmem:[#allocation71_spill] sm:$0xff] %v9838_v37 }
 0x32b   : > { %v9840_v38 = vpop.trf.xlu0 }
 0x32c   : > { %15345 = vst [vmem:[#allocation72_spill] sm:$0xff] %v9840_v38  ;;  %v9842_v8 = vpop.trf.xlu1 }
 0x32d   : > { %15346 = vst [vmem:[#allocation73_spill] sm:$0xff] %v9842_v8 }
 0x32f   : > { %v9844_v53 = vpop.trf.xlu0 }
 0x330   : > { %15347 = vst [vmem:[#allocation74_spill] sm:$0xff] %v9844_v53  ;;  %v9846_v54 = vpop.trf.xlu1 }
 0x331   : > { %15348 = vst [vmem:[#allocation75_spill] sm:$0xff] %v9846_v54 }
 0x333   : > { %v9848_v35 = vpop.trf.xlu0 }
 0x334   : > { %15349 = vst [vmem:[#allocation76_spill] sm:$0xff] %v9848_v35  ;;  %v9850_v49 = vpop.trf.xlu1 }
 0x335   : > { %15350 = vst [vmem:[#allocation77_spill] sm:$0xff] %v9850_v49 }
 0x337   : > { %v9852_v51 = vpop.trf.xlu0 }
 0x338   : > { %15351 = vst [vmem:[#allocation78_spill] sm:$0xff] %v9852_v51  ;;  %v9854_v58 = vpop.trf.xlu1 }
 0x339   : > { %15352 = vst [vmem:[#allocation79_spill] sm:$0xff] %v9854_v58 }
 0x33b   : > { %v9856_v1 = vpop.trf.xlu0 }
 0x33c   : > { %15353 = vst [vmem:[#allocation80_spill] sm:$0xff] %v9856_v1  ;;  %v9858_v32 = vpop.trf.xlu1 }
 0x33d   : > { %15354 = vst [vmem:[#allocation81_spill] sm:$0xff] %v9858_v32 }
 0x33f   : > { %v9860_v37 = vpop.trf.xlu0 }
 0x340   : > { %15355 = vst [vmem:[#allocation82_spill] sm:$0xff] %v9860_v37  ;;  %v9862_v60 = vpop.trf.xlu1 }
 0x341   : > { %15356 = vst [vmem:[#allocation83_spill] sm:$0xff] %v9862_v60 }
 0x343   : > { %v9864_v8 = vpop.trf.xlu0 }
 0x344   : > { %15357 = vst [vmem:[#allocation84_spill] sm:$0xff] %v9864_v8  ;;  %v9866_v5 = vpop.trf.xlu1 }
 0x345   : > { %15358 = vst [vmem:[#allocation85_spill] sm:$0xff] %v9866_v5 }
 0x347   : > { %v9868_v54 = vpop.trf.xlu0 }
 0x348   : > { %15359 = vst [vmem:[#allocation86_spill] sm:$0xff] %v9868_v54  ;;  %v9870_v34 = vpop.trf.xlu1 }
 0x349   : > { %15360 = vst [vmem:[#allocation87_spill] sm:$0xff] %v9870_v34 }
 0x34b   : > { %v9872_v49 = vpop.trf.xlu0 }
 0x34c   : > { %15361 = vst [vmem:[#allocation88_spill] sm:$0xff] %v9872_v49  ;;  %v9874_v51 = vpop.trf.xlu1 }
 0x34d   : > { %15362 = vst [vmem:[#allocation89_spill] sm:$0xff] %v9874_v51  ;;  %v15372_v51 = vpack.i.bf16 %v9606_v7, %v9604_v6 }
 0x34f   : > { %v9876_v58 = vpop.trf.xlu0 }
 0x350   : > { %15363 = vst [vmem:[#allocation90_spill] sm:$0xff] %v9876_v58  ;;  %v9878_v1 = vpop.trf.xlu1 }
 0x351   : > { %15364 = vst [vmem:[#allocation91_spill] sm:$0xff] %v9878_v1  ;;  %v15374_v1 = vpack.i.bf16 %v9602_v4, %v9600_v3  ;;  %v15393_v3 = vld [vmem:[#allocation21_spill] sm:$0xff] }
 0x353   : > { %v9880_v32 = vpop.trf.xlu0 }
 0x354   : > { %15365 = vst [vmem:[#allocation92_spill] sm:$0xff] %v9880_v32  ;;  %v9882_v37 = vpop.trf.xlu1 }
 0x355   : > { %15366 = vst [vmem:[#allocation93_spill] sm:$0xff] %v9882_v37 }
 0x357   : > { %v9884_v60 = vpop.trf.xlu0 }
 0x358   : > { %15367 = vst [vmem:[#allocation94_spill] sm:$0xff] %v9884_v60  ;;  %v9886_v8 = vpop.trf.xlu1 }
 0x359   : > { %15368 = vst [vmem:[#allocation95_spill] sm:$0xff] %v9886_v8 }
 0x35b   : > { %v9888_v5 = vpop.trf.xlu0 }
 0x35c   : > { %15369 = vst [vmem:[#allocation96_spill] sm:$0xff] %v9888_v5  ;;  %v9890_v54 = vpop.trf.xlu1 }
 0x35d   : > { %15370 = vst [vmem:[#allocation97_spill] sm:$0xff] %v9890_v54 }
 0x35f   : > { %v9892_v34 = vpop.trf.xlu0  ;;  %8098 = vxpose.xlu0.b32.start.end [1/1] (short) %v15372_v51, 128 }
 0x360   : > { %15371 = vst [vmem:[#allocation98_spill] sm:$0xff] %v9892_v34  ;;  %v9897_v58 = vpop.trf.xlu1  ;;  %8016 = vxpose.xlu1.b32.start.end [1/1] (short) %v15374_v1, 128 }
 0x361   : > { %15373 = vst [vmem:[#allocation99_spill] sm:$0xff] %v9897_v58 }
 0x363   : > { %v9902_v37 = vpop.trf.xlu0 }
 0x364   : > { %15375 = vst [vmem:[#allocation100_spill] sm:$0xff] %v9902_v37  ;;  %v9904_v60 = vpop.trf.xlu1 }
 0x365   : > { %15376 = vst [vmem:[#allocation101_spill] sm:$0xff] %v9904_v60 }
 0x367   : > { %v7771_v8 = vpop.trf.xlu0 }
 0x368   : > { %v7689_v5 = vpop.trf.xlu1  ;;  %v7775_v32 = vunpack.i.h.bf16 %v7771_v8  ;;  %v7772_v54 = vunpack.i.l.bf16 %v7771_v8 }
 0x369   : > { %v7693_v49 = vunpack.i.h.bf16 %v7689_v5  ;;  %v7690_v34 = vunpack.i.l.bf16 %v7689_v5 }
 0x36b   : > { %v7776_v35 = vpop.trf.xlu0 }
 0x36c   : > { %v7780_v53 = vunpack.i.h.bf16 %v7776_v35  ;;  %v7777_v6 = vunpack.i.l.bf16 %v7776_v35  ;;  %v7694_v7 = vpop.trf.xlu1 }
 0x36d   : > { %v7698_v51 = vunpack.i.h.bf16 %v7694_v7  ;;  %v7695_v58 = vunpack.i.l.bf16 %v7694_v7 }
 0x36e   : > { %v7241_v4 = vpack.c.bf16 %v7777_v6, %v7772_v54  ;;  %v7289_v1 = vpack.c.bf16 %v7780_v53, %v7775_v32 }
 0x36f   : > { %v7244_v60 = vpack.c.bf16 %v7695_v58, %v7690_v34  ;;  %v7292_v37 = vpack.c.bf16 %v7698_v51, %v7693_v49  ;;  %v7781_v38 = vpop.trf.xlu0 }
 0x370   : > { %v7699_v8 = vpop.trf.xlu1  ;;  %7243 = vmatprep.subr.msk.bf16.mxu0 %vm9908_vm2, %v7241_v4  ;;  %7291 = vmatprep.subr.msk.bf16.mxu1 %vm9908_vm2, %v7289_v1  ;;  %v7785_v5 = vunpack.i.h.bf16 %v7781_v38  ;;  %v7782_v35 = vunpack.i.l.bf16 %v7781_v38 }
 0x371   : > { %7246 = vmatpush3.bf16.xpose.msk.msra.mxu0 %vm9908_vm2, %v7244_v60  ;;  %7294 = vmatpush3.bf16.xpose.msk.msra.mxu1 %vm9908_vm2, %v7292_v37  ;;  %v7703_v54 = vunpack.i.h.bf16 %v7699_v8  ;;  %v7700_v32 = vunpack.i.l.bf16 %v7699_v8 }
 0x373   : > { %v7786_v34 = vpop.trf.xlu0 }
 0x374   : > { %v7790_v53 = vunpack.i.h.bf16 %v7786_v34  ;;  %v7787_v49 = vunpack.i.l.bf16 %v7786_v34  ;;  %v7704_v58 = vpop.trf.xlu1 }
 0x375   : > { %v7708_v6 = vunpack.i.h.bf16 %v7704_v58  ;;  %v7705_v7 = vunpack.i.l.bf16 %v7704_v58 }
 0x376   : > { %v7247_v51 = vpack.c.bf16 %v7787_v49, %v7782_v35  ;;  %v7295_v4 = vpack.c.bf16 %v7790_v53, %v7785_v5 }
 0x377   : > { %v7250_v52 = vpack.c.bf16 %v7705_v7, %v7700_v32  ;;  %v7298_v1 = vpack.c.bf16 %v7708_v6, %v7703_v54  ;;  %v7791_v48 = vpop.trf.xlu0 }
 0x378   : > { %v7709_v62 = vpop.trf.xlu1  ;;  %7249 = vmatprep.subr.msk.bf16.mxu0 %vm9908_vm2, %v7247_v51  ;;  %7297 = vmatprep.subr.msk.bf16.mxu1 %vm9908_vm2, %v7295_v4  ;;  %v7795_v60 = vunpack.i.h.bf16 %v7791_v48  ;;  %v7792_v37 = vunpack.i.l.bf16 %v7791_v48 }
 0x379   : > { %7252 = vmatpush3.bf16.xpose.msk.msra.mxu0 %vm9908_vm2, %v7250_v52  ;;  %7300 = vmatpush3.bf16.xpose.msk.msra.mxu1 %vm9908_vm2, %v7298_v1  ;;  %v7713_v38 = vunpack.i.h.bf16 %v7709_v62  ;;  %v7710_v8 = vunpack.i.l.bf16 %v7709_v62 }
 0x37b   : > { %v7796_v5 = vpop.trf.xlu0 }
 0x37c   : > { %v7800_v35 = vunpack.i.h.bf16 %v7796_v5  ;;  %v7797_v54 = vunpack.i.l.bf16 %v7796_v5  ;;  %v7714_v32 = vpop.trf.xlu1 }
 0x37d   : > { %v7718_v34 = vunpack.i.h.bf16 %v7714_v32  ;;  %v7715_v53 = vunpack.i.l.bf16 %v7714_v32 }
 0x37e   : > { %v7253_v49 = vpack.c.bf16 %v7797_v54, %v7792_v37  ;;  %v7301_v58 = vpack.c.bf16 %v7800_v35, %v7795_v60 }
 0x37f   : > { %v7256_v6 = vpack.c.bf16 %v7715_v53, %v7710_v8  ;;  %v7304_v7 = vpack.c.bf16 %v7718_v34, %v7713_v38  ;;  %v7801_v51 = vpop.trf.xlu0 }
 0x380   : > { %v7719_v4 = vpop.trf.xlu1  ;;  %7255 = vmatprep.subr.msk.bf16.mxu0 %vm9908_vm2, %v7253_v49  ;;  %7303 = vmatprep.subr.msk.bf16.mxu1 %vm9908_vm2, %v7301_v58  ;;  %v7805_v48 = vunpack.i.h.bf16 %v7801_v51  ;;  %v7802_v62 = vunpack.i.l.bf16 %v7801_v51 }
 0x381   : > { %7258 = vmatpush3.bf16.xpose.msk.msra.mxu0 %vm9908_vm2, %v7256_v6  ;;  %7306 = vmatpush3.bf16.xpose.msk.msra.mxu1 %vm9908_vm2, %v7304_v7  ;;  %v7723_v52 = vunpack.i.h.bf16 %v7719_v4  ;;  %v7720_v1 = vunpack.i.l.bf16 %v7719_v4 }
 0x383   : > { %v7806_v60 = vpop.trf.xlu0 }
 0x384   : > { %v7810_v37 = vunpack.i.h.bf16 %v7806_v60  ;;  %v7807_v38 = vunpack.i.l.bf16 %v7806_v60  ;;  %v7724_v8 = vpop.trf.xlu1 }
 0x385   : > { %v7728_v5 = vunpack.i.h.bf16 %v7724_v8  ;;  %v7725_v35 = vunpack.i.l.bf16 %v7724_v8 }
 0x386   : > { %v7259_v54 = vpack.c.bf16 %v7807_v38, %v7802_v62  ;;  %v7307_v32 = vpack.c.bf16 %v7810_v37, %v7805_v48 }
 0x387   : > { %v7262_v34 = vpack.c.bf16 %v7725_v35, %v7720_v1  ;;  %v7310_v53 = vpack.c.bf16 %v7728_v5, %v7723_v52  ;;  %v7811_v49 = vpop.trf.xlu0 }
 0x388   : > { %v7729_v58 = vpop.trf.xlu1  ;;  %7261 = vmatprep.subr.msk.bf16.mxu0 %vm9908_vm2, %v7259_v54  ;;  %7309 = vmatprep.subr.msk.bf16.mxu1 %vm9908_vm2, %v7307_v32  ;;  %v7815_v6 = vunpack.i.h.bf16 %v7811_v49  ;;  %v7812_v7 = vunpack.i.l.bf16 %v7811_v49 }
 0x389   : > { %7264 = vmatpush3.bf16.xpose.msk.msra.mxu0 %vm9908_vm2, %v7262_v34  ;;  %7312 = vmatpush3.bf16.xpose.msk.msra.mxu1 %vm9908_vm2, %v7310_v53  ;;  %v7733_v51 = vunpack.i.h.bf16 %v7729_v58  ;;  %v7730_v4 = vunpack.i.l.bf16 %v7729_v58 }
 0x38b   : > { %v7816_v48 = vpop.trf.xlu0 }
 0x38c   : > { %v7820_v62 = vunpack.i.h.bf16 %v7816_v48  ;;  %v7817_v52 = vunpack.i.l.bf16 %v7816_v48  ;;  %v7734_v1 = vpop.trf.xlu1 }
 0x38d   : > { %v7738_v60 = vunpack.i.h.bf16 %v7734_v1  ;;  %v7735_v37 = vunpack.i.l.bf16 %v7734_v1 }
 0x38e   : > { %v7265_v38 = vpack.c.bf16 %v7817_v52, %v7812_v7  ;;  %v7313_v8 = vpack.c.bf16 %v7820_v62, %v7815_v6 }
 0x38f   : > { %v7268_v5 = vpack.c.bf16 %v7735_v37, %v7730_v4  ;;  %v7316_v35 = vpack.c.bf16 %v7738_v60, %v7733_v51  ;;  %v7821_v54 = vpop.trf.xlu0 }
 0x390   : > { %v7739_v32 = vpop.trf.xlu1  ;;  %7267 = vmatprep.subr.msk.bf16.mxu0 %vm9908_vm2, %v7265_v38  ;;  %7315 = vmatprep.subr.msk.bf16.mxu1 %vm9908_vm2, %v7313_v8  ;;  %v7825_v34 = vunpack.i.h.bf16 %v7821_v54  ;;  %v7822_v53 = vunpack.i.l.bf16 %v7821_v54 }
 0x391   : > { %7270 = vmatpush3.bf16.xpose.msk.msra.mxu0 %vm9908_vm2, %v7268_v5  ;;  %7318 = vmatpush3.bf16.xpose.msk.msra.mxu1 %vm9908_vm2, %v7316_v35  ;;  %v7743_v49 = vunpack.i.h.bf16 %v7739_v32  ;;  %v7740_v58 = vunpack.i.l.bf16 %v7739_v32 }
 0x393   : > { %v7826_v6 = vpop.trf.xlu0 }
 0x394   : > { %v7830_v7 = vunpack.i.h.bf16 %v7826_v6  ;;  %v7827_v51 = vunpack.i.l.bf16 %v7826_v6  ;;  %v7744_v4 = vpop.trf.xlu1 }
 0x395   : > { %v7748_v48 = vunpack.i.h.bf16 %v7744_v4  ;;  %v7745_v62 = vunpack.i.l.bf16 %v7744_v4 }
 0x396   : > { %v7271_v52 = vpack.c.bf16 %v7827_v51, %v7822_v53  ;;  %v7319_v1 = vpack.c.bf16 %v7830_v7, %v7825_v34 }
 0x397   : > { %v7274_v60 = vpack.c.bf16 %v7745_v62, %v7740_v58  ;;  %v7322_v37 = vpack.c.bf16 %v7748_v48, %v7743_v49  ;;  %v7831_v38 = vpop.trf.xlu0 }
 0x398   : > { %v7749_v8 = vpop.trf.xlu1  ;;  %7273 = vmatprep.subr.msk.bf16.mxu0 %vm9908_vm2, %v7271_v52  ;;  %7321 = vmatprep.subr.msk.bf16.mxu1 %vm9908_vm2, %v7319_v1  ;;  %v7835_v5 = vunpack.i.h.bf16 %v7831_v38  ;;  %v7832_v35 = vunpack.i.l.bf16 %v7831_v38 }
 0x399   : > { %7276 = vmatpush3.bf16.xpose.msk.msra.mxu0 %vm9908_vm2, %v7274_v60  ;;  %7324 = vmatpush3.bf16.xpose.msk.msra.mxu1 %vm9908_vm2, %v7322_v37  ;;  %v7753_v54 = vunpack.i.h.bf16 %v7749_v8  ;;  %v7750_v32 = vunpack.i.l.bf16 %v7749_v8  ;;  %v15379_v60 = vpack.i.bf16 %v9614_v16, %v9612_v15 }
 0x39b   : > { %v7836_v34 = vpop.trf.xlu0 }
 0x39c   : > { %v7840_v53 = vunpack.i.h.bf16 %v7836_v34  ;;  %v7837_v49 = vunpack.i.l.bf16 %v7836_v34  ;;  %v7754_v58 = vpop.trf.xlu1 }
 0x39d   : > { %v7758_v6 = vunpack.i.h.bf16 %v7754_v58  ;;  %v7755_v7 = vunpack.i.l.bf16 %v7754_v58 }
 0x39e   : > { %v7277_v51 = vpack.c.bf16 %v7837_v49, %v7832_v35  ;;  %v7325_v4 = vpack.c.bf16 %v7840_v53, %v7835_v5 }
 0x39f   : > { %v7280_v48 = vpack.c.bf16 %v7755_v7, %v7750_v32  ;;  %v7328_v62 = vpack.c.bf16 %v7758_v6, %v7753_v54  ;;  %v7841_v52 = vpop.trf.xlu0 }
 0x3a0   : > { %v7759_v1 = vpop.trf.xlu1  ;;  %8180 = vxpose.xlu1.b32.start.end [1/1] (short) %v15379_v60, 128  ;;  %7279 = vmatprep.subr.msk.bf16.mxu0 %vm9908_vm2, %v7277_v51  ;;  %v7845_v37 = vunpack.i.h.bf16 %v7841_v52  ;;  %v7842_v38 = vunpack.i.l.bf16 %v7841_v52 }
 0x3a1   : > { %7327 = vmatprep.subr.msk.bf16.mxu1 %vm9908_vm2, %v7325_v4  ;;  %7282 = vmatpush3.bf16.xpose.msk.msra.mxu0 %vm9908_vm2, %v7280_v48  ;;  %v7763_v8 = vunpack.i.h.bf16 %v7759_v1  ;;  %v7760_v5 = vunpack.i.l.bf16 %v7759_v1 }
 0x3a2   : > { %7330 = vmatpush3.bf16.xpose.msk.msra.mxu1 %vm9908_vm2, %v7328_v62 }
 0x3a3   : > { %v7846_v35 = vpop.trf.xlu0 }
 0x3a4   : > { %v7850_v54 = vunpack.i.h.bf16 %v7846_v35  ;;  %v7847_v15 = vunpack.i.l.bf16 %v7846_v35  ;;  %v7764_v16 = vpop.trf.xlu1 }
 0x3a5   : > { %v7768_v32 = vunpack.i.h.bf16 %v7764_v16  ;;  %v7765_v34 = vunpack.i.l.bf16 %v7764_v16 }
 0x3a6   : > { %v7283_v53 = vpack.c.bf16 %v7847_v15, %v7842_v38  ;;  %v7331_v49 = vpack.c.bf16 %v7850_v54, %v7845_v37 }
 0x3a7   : > { %v7286_v58 = vpack.c.bf16 %v7765_v34, %v7760_v5  ;;  %v7334_v6 = vpack.c.bf16 %v7768_v32, %v7763_v8  ;;  %v7935_v7 = vpop.trf.xlu0 }
 0x3a8   : > { %7285 = vmatprep.subr.msk.bf16.mxu0 %vm9908_vm2, %v7283_v53  ;;  %7333 = vmatprep.subr.msk.bf16.mxu1 %vm9908_vm2, %v7331_v49  ;;  %v7853_v51 = vpop.trf.xlu1  ;;  %v7939_v4 = vunpack.i.h.bf16 %v7935_v7  ;;  %v7936_v48 = vunpack.i.l.bf16 %v7935_v7 }
 0x3a9   : > { %7288 = vmatpush3.bf16.xpose.msk.msra.mxu0 %vm9908_vm2, %v7286_v58  ;;  %v7857_v62 = vunpack.i.h.bf16 %v7853_v51  ;;  %v7854_v52 = vunpack.i.l.bf16 %v7853_v51 }
 0x3aa   : > { %7336 = vmatpush3.bf16.xpose.msk.msra.mxu1 %vm9908_vm2, %v7334_v6 }
 0x3ab   : > { %v7940_v1 = vpop.trf.xlu0 }
 0x3ac   : > { %v7944_v60 = vunpack.i.h.bf16 %v7940_v1  ;;  %v7941_v37 = vunpack.i.l.bf16 %v7940_v1  ;;  %v7858_v38 = vpop.trf.xlu1 }
 0x3ad   : > { %v7862_v8 = vunpack.i.h.bf16 %v7858_v38  ;;  %v7859_v5 = vunpack.i.l.bf16 %v7858_v38 }
 0x3ae   : > { %v7337_v35 = vpack.c.bf16 %v7941_v37, %v7936_v48  ;;  %v7385_v54 = vpack.c.bf16 %v7944_v60, %v7939_v4 }
 0x3af   : > { %v7340_v15 = vpack.c.bf16 %v7859_v5, %v7854_v52  ;;  %v7388_v16 = vpack.c.bf16 %v7862_v8, %v7857_v62  ;;  %v7945_v32 = vpop.trf.xlu0 }
 0x3b0   : > { %6874 = vmatmul.mubr.msk.f32.vlgmr.msra.gmra.mrb[8].mxu0 %vm1348_vm1, %v9624_v41  ;;  %v7863_v34 = vpop.trf.xlu1  ;;  %7339 = vmatprep.subr.msk.bf16.mxu0 %vm9908_vm2, %v7337_v35  ;;  %v7949_v53 = vunpack.i.h.bf16 %v7945_v32  ;;  %v7946_v49 = vunpack.i.l.bf16 %v7945_v32 }
 0x3b1   : > { %6970 = vmatmul.mubr.msk.f32.vlgmr.msra.gmra.mrb[24].mxu1 %vm1348_vm1, %v9694_v56  ;;  %6875 = vmatprep.mubr.msk.f32.mxu0 %vm1348_vm1, %v9630_v43  ;;  %v7867_v58 = vunpack.i.h.bf16 %v7863_v34  ;;  %v7864_v41 = vunpack.i.l.bf16 %v7863_v34 }
 0x3b2   : > { %6971 = vmatprep.mubr.msk.f32.mxu1 %vm1348_vm1, %v9700_v25  ;;  %7387 = vmatprep.subr.msk.bf16.mxu1 %vm9908_vm2, %v7385_v54 }
 0x3b3   : > { %7342 = vmatpush3.bf16.xpose.msk.msra.mxu0 %vm9908_vm2, %v7340_v15  ;;  %7390 = vmatpush3.bf16.xpose.msk.msra.mxu1 %vm9908_vm2, %v7388_v16  ;;  %v7950_v56 = vpop.trf.xlu0 }
 0x3b4   : > { %6876 = vmatmul.mubr.msk.f32.gmra.mrb[10].mxu0 %vm1348_vm1, %v9630_v43  ;;  %v7954_v6 = vunpack.i.h.bf16 %v7950_v56  ;;  %v7951_v7 = vunpack.i.l.bf16 %v7950_v56  ;;  %v7868_v51 = vpop.trf.xlu1 }
 0x3b5   : > { %6972 = vmatmul.mubr.msk.f32.gmra.mrb[26].mxu1 %vm1348_vm1, %v9700_v25  ;;  %6877 = vmatprep.mubr.msk.f32.mxu0 %vm1348_vm1, %v9634_v20  ;;  %v7872_v4 = vunpack.i.h.bf16 %v7868_v51  ;;  %v7869_v48 = vunpack.i.l.bf16 %v7868_v51 }
 0x3b6   : > { %6973 = vmatprep.mubr.msk.f32.mxu1 %vm1348_vm1, %v9704_v28  ;;  %v7343_v62 = vpack.c.bf16 %v7951_v7, %v7946_v49  ;;  %v7391_v52 = vpack.c.bf16 %v7954_v6, %v7949_v53 }
 0x3b7   : > { %v7346_v1 = vpack.c.bf16 %v7869_v48, %v7864_v41  ;;  %v7394_v60 = vpack.c.bf16 %v7872_v4, %v7867_v58  ;;  %v7955_v37 = vpop.trf.xlu0 }
 0x3b8   : > { %6878 = vmatmul.mubr.msk.f32.gmra.mrb[12].mxu0 %vm1348_vm1, %v9634_v20  ;;  %v7873_v43 = vpop.trf.xlu1  ;;  %7345 = vmatprep.subr.msk.bf16.mxu0 %vm9908_vm2, %v7343_v62  ;;  %v7959_v25 = vunpack.i.h.bf16 %v7955_v37  ;;  %v7956_v38 = vunpack.i.l.bf16 %v7955_v37 }
 0x3b9   : > { %6974 = vmatmul.mubr.msk.f32.gmra.mrb[28].mxu1 %vm1348_vm1, %v9704_v28  ;;  %6879 = vmatprep.mubr.msk.f32.mxu0 %vm1348_vm1, %v9638_v22  ;;  %v7877_v8 = vunpack.i.h.bf16 %v7873_v43  ;;  %v7874_v20 = vunpack.i.l.bf16 %v7873_v43 }
 0x3ba   : > { %6975 = vmatprep.mubr.msk.f32.mxu1 %vm1348_vm1, %v9708_v30  ;;  %7393 = vmatprep.subr.msk.bf16.mxu1 %vm9908_vm2, %v7391_v52 }
 0x3bb   : > { %7348 = vmatpush3.bf16.xpose.msk.msra.mxu0 %vm9908_vm2, %v7346_v1  ;;  %7396 = vmatpush3.bf16.xpose.msk.msra.mxu1 %vm9908_vm2, %v7394_v60  ;;  %v7960_v28 = vpop.trf.xlu0 }
 0x3bc   : > { %6880 = vmatmul.mubr.msk.f32.gmra.mrb[14].mxu0 %vm1348_vm1, %v9638_v22  ;;  %v7964_v5 = vunpack.i.h.bf16 %v7960_v28  ;;  %v7961_v35 = vunpack.i.l.bf16 %v7960_v28  ;;  %v7878_v54 = vpop.trf.xlu1 }
 0x3bd   : > { %6976 = vmatmul.mubr.msk.f32.gmra.mrb[30].mxu1 %vm1348_vm1, %v9708_v30  ;;  %6881 = vmatprep.mubr.msk.f32.mxu0 %vm1348_vm1, %v9642_v24  ;;  %v7882_v15 = vunpack.i.h.bf16 %v7878_v54  ;;  %v7879_v16 = vunpack.i.l.bf16 %v7878_v54 }
 0x3be   : > { %6977 = vmatprep.mubr.msk.f32.mxu1 %vm1348_vm1, %v9712_v63  ;;  %v7349_v32 = vpack.c.bf16 %v7961_v35, %v7956_v38  ;;  %v7397_v34 = vpack.c.bf16 %v7964_v5, %v7959_v25 }
 0x3bf   : > { %v7352_v53 = vpack.c.bf16 %v7879_v16, %v7874_v20  ;;  %v7400_v49 = vpack.c.bf16 %v7882_v15, %v7877_v8  ;;  %v7965_v58 = vpop.trf.xlu0 }
 0x3c0   : > { %6882 = vmatmul.mubr.msk.f32.gmra.mrb[16].mxu0 %vm1348_vm1, %v9642_v24  ;;  %v7883_v22 = vpop.trf.xlu1  ;;  %7351 = vmatprep.subr.msk.bf16.mxu0 %vm9908_vm2, %v7349_v32  ;;  %v7969_v30 = vunpack.i.h.bf16 %v7965_v58  ;;  %v7966_v41 = vunpack.i.l.bf16 %v7965_v58 }
 0x3c1   : > { %6978 = vmatmul.mubr.msk.f32.gmra.mrb[32].mxu1 %vm1348_vm1, %v9712_v63  ;;  %6883 = vmatprep.mubr.msk.f32.mxu0 %vm1348_vm1, %v9646_v46  ;;  %v7887_v56 = vunpack.i.h.bf16 %v7883_v22  ;;  %v7884_v24 = vunpack.i.l.bf16 %v7883_v22 }
 0x3c2   : > { %6979 = vmatprep.mubr.msk.f32.mxu1 %vm1348_vm1, %v9716_v61  ;;  %7399 = vmatprep.subr.msk.bf16.mxu1 %vm9908_vm2, %v7397_v34 }
 0x3c3   : > { %7354 = vmatpush3.bf16.xpose.msk.msra.mxu0 %vm9908_vm2, %v7352_v53  ;;  %7402 = vmatpush3.bf16.xpose.msk.msra.mxu1 %vm9908_vm2, %v7400_v49  ;;  %v7970_v63 = vpop.trf.xlu0 }
 0x3c4   : > { %6884 = vmatmul.mubr.msk.f32.gmra.mrb[18].mxu0 %vm1348_vm1, %v9646_v46  ;;  %v7974_v6 = vunpack.i.h.bf16 %v7970_v63  ;;  %v7971_v7 = vunpack.i.l.bf16 %v7970_v63  ;;  %v7888_v51 = vpop.trf.xlu1 }
 0x3c5   : > { %6980 = vmatmul.mubr.msk.f32.gmra.mrb[34].mxu1 %vm1348_vm1, %v9716_v61  ;;  %6885 = vmatprep.mubr.msk.f32.mxu0 %vm1348_vm1, %v9650_v57  ;;  %v7892_v4 = vunpack.i.h.bf16 %v7888_v51  ;;  %v7889_v48 = vunpack.i.l.bf16 %v7888_v51 }
 0x3c6   : > { %6981 = vmatprep.mubr.msk.f32.mxu1 %vm1348_vm1, %v9720_v50  ;;  %v7355_v62 = vpack.c.bf16 %v7971_v7, %v7966_v41  ;;  %v7403_v52 = vpack.c.bf16 %v7974_v6, %v7969_v30 }
 0x3c7   : > { %v7358_v1 = vpack.c.bf16 %v7889_v48, %v7884_v24  ;;  %v7406_v60 = vpack.c.bf16 %v7892_v4, %v7887_v56  ;;  %v7975_v37 = vpop.trf.xlu0 }
 0x3c8   : > { %6886 = vmatmul.mubr.msk.f32.gmra.mrb[20].mxu0 %vm1348_vm1, %v9650_v57  ;;  %v7893_v46 = vpop.trf.xlu1  ;;  %7357 = vmatprep.subr.msk.bf16.mxu0 %vm9908_vm2, %v7355_v62  ;;  %v7979_v61 = vunpack.i.h.bf16 %v7975_v37  ;;  %v7976_v43 = vunpack.i.l.bf16 %v7975_v37 }
 0x3c9   : > { %6982 = vmatmul.mubr.msk.f32.gmra.mrb[36].mxu1 %vm1348_vm1, %v9720_v50  ;;  %6887 = vmatprep.mubr.msk.f32.mxu0 %vm1348_vm1, %v9654_v59  ;;  %v7897_v25 = vunpack.i.h.bf16 %v7893_v46  ;;  %v7894_v57 = vunpack.i.l.bf16 %v7893_v46 }
 0x3ca   : > { %6983 = vmatprep.mubr.msk.f32.mxu1 %vm1348_vm1, %v9724_v47  ;;  %7405 = vmatprep.subr.msk.bf16.mxu1 %vm9908_vm2, %v7403_v52 }
 0x3cb   : > { %7360 = vmatpush3.bf16.xpose.msk.msra.mxu0 %vm9908_vm2, %v7358_v1  ;;  %7408 = vmatpush3.bf16.xpose.msk.msra.mxu1 %vm9908_vm2, %v7406_v60  ;;  %v7980_v50 = vpop.trf.xlu0 }
 0x3cc   : > { %6888 = vmatmul.mubr.msk.f32.gmra.mrb[22].mxu0 %vm1348_vm1, %v9654_v59  ;;  %v7984_v38 = vunpack.i.h.bf16 %v7980_v50  ;;  %v7981_v8 = vunpack.i.l.bf16 %v7980_v50  ;;  %v7898_v20 = vpop.trf.xlu1 }
 0x3cd   : > { %6984 = vmatmul.mubr.msk.f32.gmra.mrb[38].mxu1 %vm1348_vm1, %v9724_v47  ;;  %6889 = vmatprep.mubr.msk.f32.mxu0 %vm1348_vm1, %v9658_v2  ;;  %v7902_v28 = vunpack.i.h.bf16 %v7898_v20  ;;  %v7899_v5 = vunpack.i.l.bf16 %v7898_v20 }
 0x3ce   : > { %6985 = vmatprep.mubr.msk.f32.mxu1 %vm1348_vm1, %v9728_v18  ;;  %v7361_v35 = vpack.c.bf16 %v7981_v8, %v7976_v43  ;;  %v7409_v54 = vpack.c.bf16 %v7984_v38, %v7979_v61 }
 0x3cf   : > { %v7364_v15 = vpack.c.bf16 %v7899_v5, %v7894_v57  ;;  %v7412_v16 = vpack.c.bf16 %v7902_v28, %v7897_v25  ;;  %v7985_v32 = vpop.trf.xlu0 }
 0x3d0   : > { %6890 = vmatmul.mubr.msk.f32.gmra.mrb[24].mxu0 %vm1348_vm1, %v9658_v2  ;;  %v7903_v59 = vpop.trf.xlu1  ;;  %7363 = vmatprep.subr.msk.bf16.mxu0 %vm9908_vm2, %v7361_v35  ;;  %v7989_v47 = vunpack.i.h.bf16 %v7985_v32  ;;  %v7986_v34 = vunpack.i.l.bf16 %v7985_v32  ;;  %v15394_v32 = vld [vmem:[#allocation33_spill] sm:$0xff] }
 0x3d1   : > { %6986 = vmatmul.mubr.msk.f32.gmra.mrb[40].mxu1 %vm1348_vm1, %v9728_v18  ;;  %6891 = vmatprep.mubr.msk.f32.mxu0 %vm1348_vm1, %v9662_v10  ;;  %v7907_v53 = vunpack.i.h.bf16 %v7903_v59  ;;  %v7904_v2 = vunpack.i.l.bf16 %v7903_v59 }
 0x3d2   : > { %6987 = vmatprep.mubr.msk.f32.mxu1 %vm1348_vm1, %v9732_v55  ;;  %7411 = vmatprep.subr.msk.bf16.mxu1 %vm9908_vm2, %v7409_v54 }
 0x3d3   : > { %7366 = vmatpush3.bf16.xpose.msk.msra.mxu0 %vm9908_vm2, %v7364_v15  ;;  %7414 = vmatpush3.bf16.xpose.msk.msra.mxu1 %vm9908_vm2, %v7412_v16  ;;  %v7990_v18 = vpop.trf.xlu0 }
 0x3d4   : > { %6892 = vmatmul.mubr.msk.f32.gmra.mrb[26].mxu0 %vm1348_vm1, %v9662_v10  ;;  %v7994_v49 = vunpack.i.h.bf16 %v7990_v18  ;;  %v7991_v58 = vunpack.i.l.bf16 %v7990_v18  ;;  %v7908_v22 = vpop.trf.xlu1  ;;  %v15398_v18 = vld [vmem:[#allocation35_spill] sm:$0xff] }
 0x3d5   : > { %6988 = vmatmul.mubr.msk.f32.gmra.mrb[42].mxu1 %vm1348_vm1, %v9732_v55  ;;  %6893 = vmatprep.mubr.msk.f32.mxu0 %vm1348_vm1, %v9666_v12  ;;  %v7912_v30 = vunpack.i.h.bf16 %v7908_v22  ;;  %v7909_v41 = vunpack.i.l.bf16 %v7908_v22  ;;  %v15400_v22 = vld [vmem:[#allocation36_spill] sm:$0xff] }
 0x3d6   : > { %6989 = vmatprep.mubr.msk.f32.mxu1 %vm1348_vm1, %v9736_v36  ;;  %v7367_v56 = vpack.c.bf16 %v7991_v58, %v7986_v34  ;;  %v7415_v24 = vpack.c.bf16 %v7994_v49, %v7989_v47  ;;  %v15395_v47 = vld [vmem:[#allocation22_spill] sm:$0xff]  ;;  %v15399_v58 = vld [vmem:[#allocation24_spill] sm:$0xff] }
 0x3d7   : > { %v7370_v63 = vpack.c.bf16 %v7909_v41, %v7904_v2  ;;  %v7418_v6 = vpack.c.bf16 %v7912_v30, %v7907_v53  ;;  %v7995_v7 = vpop.trf.xlu0  ;;  %v15396_v34 = vld [vmem:[#allocation34_spill] sm:$0xff]  ;;  %v15397_v2 = vld [vmem:[#allocation23_spill] sm:$0xff]  ;;  %v15401_v41 = vld [vmem:[#allocation25_spill] sm:$0xff] }
 0x3d8   : > { %6894 = vmatmul.mubr.msk.f32.gmra.mrb[28].mxu0 %vm1348_vm1, %v9666_v12  ;;  %v7913_v10 = vpop.trf.xlu1  ;;  %7369 = vmatprep.subr.msk.bf16.mxu0 %vm9908_vm2, %v7367_v56  ;;  %v7999_v55 = vunpack.i.h.bf16 %v7995_v7  ;;  %v7996_v51 = vunpack.i.l.bf16 %v7995_v7  ;;  %v15402_v56 = vld [vmem:[#allocation37_spill] sm:$0xff] }
 0x3d9   : > { %6990 = vmatmul.mubr.msk.f32.gmra.mrb[44].mxu1 %vm1348_vm1, %v9736_v36  ;;  %6895 = vmatprep.mubr.msk.f32.mxu0 %vm1348_vm1, %v9670_v14  ;;  %v7917_v4 = vunpack.i.h.bf16 %v7913_v10  ;;  %v7914_v12 = vunpack.i.l.bf16 %v7913_v10  ;;  %v14512_v10 = vmov 0.0|0.0  }
 0x3da   : > { %6991 = vmatprep.mubr.msk.f32.mxu1 %vm1348_vm1, %v9740_v17  ;;  %7417 = vmatprep.subr.msk.bf16.mxu1 %vm9908_vm2, %v7415_v24 }
 0x3db   : > { %7372 = vmatpush3.bf16.xpose.msk.msra.mxu0 %vm9908_vm2, %v7370_v63  ;;  %7420 = vmatpush3.bf16.xpose.msk.msra.mxu1 %vm9908_vm2, %v7418_v6  ;;  %v8000_v36 = vpop.trf.xlu0 }
 0x3dc   : > { %6896 = vmatmul.mubr.msk.f32.gmra.mrb[30].mxu0 %vm1348_vm1, %v9670_v14  ;;  %v8004_v48 = vunpack.i.h.bf16 %v8000_v36  ;;  %v8001_v62 = vunpack.i.l.bf16 %v8000_v36  ;;  %v7918_v52 = vpop.trf.xlu1 }
 0x3dd   : > { %6992 = vmatmul.mubr.msk.f32.gmra.mrb[46].mxu1 %vm1348_vm1, %v9740_v17  ;;  %6897 = vmatprep.mubr.msk.f32.mxu0 %vm1348_vm1, %v9674_v31  ;;  %v7922_v1 = vunpack.i.h.bf16 %v7918_v52  ;;  %v7919_v60 = vunpack.i.l.bf16 %v7918_v52 }
 0x3de   : > { %6993 = vmatprep.mubr.msk.f32.mxu1 %vm1348_vm1, %v9744_v11  ;;  %v7373_v37 = vpack.c.bf16 %v8001_v62, %v7996_v51  ;;  %v7421_v46 = vpack.c.bf16 %v8004_v48, %v7999_v55  ;;  %v15403_v51 = vld [vmem:[#allocation38_spill] sm:$0xff] }
 0x3df   : > { %v7376_v61 = vpack.c.bf16 %v7919_v60, %v7914_v12  ;;  %v7424_v43 = vpack.c.bf16 %v7922_v1, %v7917_v4  ;;  %v8005_v25 = vpop.trf.xlu0  ;;  %v15404_v4 = vld [vmem:[#allocation70_spill] sm:$0xff] }
 0x3e0   : > { %6898 = vmatmul.mubr.msk.f32.gmra.mrb[32].mxu0 %vm1348_vm1, %v9674_v31  ;;  %v7923_v14 = vpop.trf.xlu1  ;;  %7375 = vmatprep.subr.msk.bf16.mxu0 %vm9908_vm2, %v7373_v37  ;;  %v8009_v17 = vunpack.i.h.bf16 %v8005_v25  ;;  %v8006_v57 = vunpack.i.l.bf16 %v8005_v25  ;;  %v15405_v37 = vld [vmem:[#allocation40_spill] sm:$0xff] }
 0x3e1   : > { %6994 = vmatmul.mubr.msk.f32.gmra.mrb[48].mxu1 %vm1348_vm1, %v9744_v11  ;;  %6899 = vmatprep.mubr.msk.f32.mxu0 %vm1348_vm1, %v9678_v33  ;;  %v7927_v50 = vunpack.i.h.bf16 %v7923_v14  ;;  %v7924_v31 = vunpack.i.l.bf16 %v7923_v14  ;;  %v15407_v14 = vld [vmem:[#allocation42_spill] sm:$0xff] }
 0x3e2   : > { %6995 = vmatprep.mubr.msk.f32.mxu1 %vm1348_vm1, %v9748_v44  ;;  %7423 = vmatprep.subr.msk.bf16.mxu1 %vm9908_vm2, %v7421_v46  ;;  %v15406_v46 = vld [vmem:[#allocation72_spill] sm:$0xff] }
 0x3e3   : > { %7378 = vmatpush3.bf16.xpose.msk.msra.mxu0 %vm9908_vm2, %v7376_v61  ;;  %7426 = vmatpush3.bf16.xpose.msk.msra.mxu1 %vm9908_vm2, %v7424_v43  ;;  %v8010_v11 = vpop.trf.xlu0 }
 0x3e4   : > { %6900 = vmatmul.mubr.msk.f32.gmra.mrb[34].mxu0 %vm1348_vm1, %v9678_v33  ;;  %v8014_v38 = vunpack.i.h.bf16 %v8010_v11  ;;  %v8011_v8 = vunpack.i.l.bf16 %v8010_v11  ;;  %v7928_v20 = vpop.trf.xlu1  ;;  %v15391_v33 = vld [vmem:[#allocation20_spill] sm:$0xff] }
 0x3e5   : > { %6996 = vmatmul.mubr.msk.f32.gmra.mrb[50].mxu1 %vm1348_vm1, %v9748_v44  ;;  %6901 = vmatprep.mubr.msk.f32.mxu0 %vm1348_vm1, %v9686_v29  ;;  %v7932_v28 = vunpack.i.h.bf16 %v7928_v20  ;;  %v7929_v5 = vunpack.i.l.bf16 %v7928_v20  ;;  %v15380_v44 = vld [vmem:[#allocation26_spill] sm:$0xff]  ;;  %v15410_v20 = vld [vmem:[#allocation76_spill] sm:$0xff] }
 0x3e6   : > { %6997 = vmatprep.mubr.msk.f32.mxu1 %vm1348_vm1, %v9752_v19  ;;  %v7379_v35 = vpack.c.bf16 %v8011_v8, %v8006_v57  ;;  %v7427_v54 = vpack.c.bf16 %v8014_v38, %v8009_v17  ;;  %v15408_v17 = vld [vmem:[#allocation74_spill] sm:$0xff]  ;;  %v15409_v8 = vld [vmem:[#allocation44_spill] sm:$0xff] }
 0x3e7   : > { %v7382_v15 = vpack.c.bf16 %v7929_v5, %v7924_v31  ;;  %v7430_v16 = vpack.c.bf16 %v7932_v28, %v7927_v50 }
 0x3e8   : > { %6902 = vmatmul.mubr.msk.f32.gmra.mrb[36].mxu0 %vm1348_vm1, %v9686_v29  ;;  %7381 = vmatprep.subr.msk.bf16.mxu0 %vm9908_vm2, %v7379_v35  ;;  %v15385_v29 = vld [vmem:[#allocation17_spill] sm:$0xff] }
 0x3e9   : > { %6998 = vmatmul.mubr.msk.f32.gmra.mrb[52].mxu1 %vm1348_vm1, %v9752_v19  ;;  %6903 = vmatprep.mubr.msk.f32.mxu0 %vm1348_vm1, %v9690_v9  ;;  %v15384_v19 = vld [vmem:[#allocation28_spill] sm:$0xff] }
 0x3ea   : > { %6999 = vmatprep.mubr.msk.f32.mxu1 %vm1348_vm1, %v9762_v13  ;;  %7429 = vmatprep.subr.msk.bf16.mxu1 %vm9908_vm2, %v7427_v54  ;;  %v15411_v54 = vld [vmem:[#allocation46_spill] sm:$0xff] }
 0x3eb   : > { %7384 = vmatpush3.bf16.xpose.msk.msra.mxu0 %vm9908_vm2, %v7382_v15  ;;  %7432 = vmatpush3.bf16.xpose.msk.msra.mxu1 %vm9908_vm2, %v7430_v16  ;;  %v15412_v15 = vld [vmem:[#allocation78_spill] sm:$0xff] }
 0x3ec   : > { %6904 = vmatmul.mubr.msk.f32.gmra.mrb[38].mxu0 %vm1348_vm1, %v9690_v9  ;;  %v15382_v9 = vld [vmem:[#allocation27_spill] sm:$0xff]  ;;  %7433 = vmatprep.subr.bf16.mxu0 %v14512_v10 }
 0x3ed   : > { %7000 = vmatmul.mubr.msk.f32.gmra.mrb[54].mxu1 %vm1348_vm1, %v9762_v13  ;;  %6905 = vmatprep.mubr.msk.f32.mxu0 %vm1348_vm1, %v9626_v42  ;;  %v8017_v13 = vpop.trf.xlu1 }
 0x3ee   : > { %7001 = vmatprep.mubr.msk.f32.mxu1 %vm1348_vm1, %v9696_v39  ;;  %v8018_v24 = vunpack.i.l.bf16 %v8017_v13  ;;  %v8021_v6 = vunpack.i.h.bf16 %v8017_v13  ;;  %7481 = vmatprep.subr.bf16.mxu1 %v14512_v10 }
 0x3f0   : > { %6906 = vmatmul.mubr.msk.f32.gmra.mrb[40].mxu0 %vm1348_vm1, %v9626_v42  ;;  %v15386_v42 = vld [vmem:[#allocation29_spill] sm:$0xff] }
 0x3f1   : > { %7002 = vmatmul.mubr.msk.f32.gmra.mrb[56].mxu1 %vm1348_vm1, %v9696_v39  ;;  %6907 = vmatprep.mubr.msk.f32.mxu0 %vm1348_vm1, %v9632_v45  ;;  %v15381_v39 = vld [vmem:[#allocation15_spill] sm:$0xff] }
 0x3f2   : > { %7003 = vmatprep.mubr.msk.f32.mxu1 %vm1348_vm1, %v9702_v27 }
 0x3f4   : > { %6908 = vmatmul.mubr.msk.f32.gmra.mrb[42].mxu0 %vm1348_vm1, %v9632_v45  ;;  %v15387_v45 = vld [vmem:[#allocation18_spill] sm:$0xff] }
 0x3f5   : > { %7004 = vmatmul.mubr.msk.f32.gmra.mrb[58].mxu1 %vm1348_vm1, %v9702_v27  ;;  %6909 = vmatprep.mubr.msk.f32.mxu0 %vm1348_vm1, %v9636_v21  ;;  %v15392_v27 = vld [vmem:[#allocation32_spill] sm:$0xff] }
 0x3f6   : > { %7005 = vmatprep.mubr.msk.f32.mxu1 %vm1348_vm1, %v9706_v0 }
 0x3f8   : > { %6910 = vmatmul.mubr.msk.f32.gmra.mrb[44].mxu0 %vm1348_vm1, %v9636_v21  ;;  %v15388_v21 = vld [vmem:[#allocation30_spill] sm:$0xff] }
 0x3f9   : > { %7006 = vmatmul.mubr.msk.f32.gmra.mrb[60].mxu1 %vm1348_vm1, %v9706_v0  ;;  %6911 = vmatprep.mubr.msk.f32.mxu0 %vm1348_vm1, %v9640_v23  ;;  %v8022_v0 = vpop.trf.xlu1 }
 0x3fa   : > { %7007 = vmatprep.mubr.msk.f32.mxu1 %vm1348_vm1, %v9710_v40  ;;  %v8023_v63 = vunpack.i.l.bf16 %v8022_v0  ;;  %v8026_v7 = vunpack.i.h.bf16 %v8022_v0 }
 0x3fc   : > { %6912 = vmatmul.mubr.msk.f32.gmra.mrb[46].mxu0 %vm1348_vm1, %v9640_v23  ;;  %v15389_v23 = vld [vmem:[#allocation19_spill] sm:$0xff]  ;;  %v7434_v48 = vpack.c.bf16 %v8023_v63, %v8018_v24  ;;  %v7482_v1 = vpack.c.bf16 %v8026_v7, %v8021_v6  ;;  %v15422_v24 = vld [vmem:[#allocation88_spill] sm:$0xff] }
 0x3fd   : > { %7008 = vmatmul.mubr.msk.f32.gmra.mrb[62].mxu1 %vm1348_vm1, %v9710_v40  ;;  %6913 = vmatprep.mubr.msk.f32.mxu0 %vm1348_vm1, %v9644_v26  ;;  %v15383_v40 = vld [vmem:[#allocation16_spill] sm:$0xff]  ;;  %v8027_v59 = vpop.trf.xlu1 }
 0x3fe   : > { %7009 = vmatprep.mubr.msk.f32.mxu1 %vm1348_vm1, %v15380_v44  ;;  %v8028_v12 = vunpack.i.l.bf16 %v8027_v59  ;;  %v8031_v62 = vunpack.i.h.bf16 %v8027_v59  ;;  %v15418_v59 = vld [vmem:[#allocation84_spill] sm:$0xff] }
 0x400   : > { %6914 = vmatmul.mubr.msk.f32.gmra.mrb[48].mxu0 %vm1348_vm1, %v9644_v26  ;;  %v15390_v26 = vld [vmem:[#allocation31_spill] sm:$0xff] }
 0x401   : > { %7010 = vmatmul.mubr.msk.f32.gmra.mrb[64].mxu1 %vm1348_vm1, %v15380_v44  ;;  %6915 = vmatprep.mubr.msk.f32.mxu0 %vm1348_vm1, %v15381_v39  ;;  %v8032_v53 = vpop.trf.xlu1 }
 0x402   : > { %7011 = vmatprep.mubr.msk.f32.mxu1 %vm1348_vm1, %v15382_v9  ;;  %v8033_v36 = vunpack.i.l.bf16 %v8032_v53  ;;  %v8036_v52 = vunpack.i.h.bf16 %v8032_v53 }
 0x404   : > { %6916 = vmatmul.mubr.msk.f32.gmra.mrb[50].mxu0 %vm1348_vm1, %v15381_v39  ;;  %v7437_v61 = vpack.c.bf16 %v8033_v36, %v8028_v12  ;;  %v7485_v43 = vpack.c.bf16 %v8036_v52, %v8031_v62 }
 0x405   : > { %7012 = vmatmul.mubr.msk.f32.gmra.mrb[66].mxu1 %vm1348_vm1, %v15382_v9  ;;  %6917 = vmatprep.mubr.msk.f32.mxu0 %vm1348_vm1, %v15383_v40  ;;  %v8037_v49 = vpop.trf.xlu1 }
 0x406   : > { %7013 = vmatprep.mubr.msk.f32.mxu1 %vm1348_vm1, %v15384_v19  ;;  %v8041_v57 = vunpack.i.h.bf16 %v8037_v49  ;;  %v8038_v50 = vunpack.i.l.bf16 %v8037_v49 }
 0x408   : > { %6918 = vmatmul.mubr.msk.f32.gmra.mrb[52].mxu0 %vm1348_vm1, %v15383_v40 }
 0x409   : > { %7014 = vmatmul.mubr.msk.f32.gmra.mrb[68].mxu1 %vm1348_vm1, %v15384_v19  ;;  %6919 = vmatprep.mubr.msk.f32.mxu0 %vm1348_vm1, %v15385_v29  ;;  %v8042_v30 = vpop.trf.xlu1  ;;  %v15413_v19 = vld [vmem:[#allocation48_spill] sm:$0xff] }
 0x40a   : > { %7015 = vmatprep.mubr.msk.f32.mxu1 %vm1348_vm1, %v15386_v42  ;;  %v8046_v31 = vunpack.i.h.bf16 %v8042_v30  ;;  %v8043_v11 = vunpack.i.l.bf16 %v8042_v30 }
 0x40c   : > { %6920 = vmatmul.mubr.msk.f32.gmra.mrb[54].mxu0 %vm1348_vm1, %v15385_v29  ;;  %v7440_v28 = vpack.c.bf16 %v8043_v11, %v8038_v50  ;;  %v7488_v5 = vpack.c.bf16 %v8046_v31, %v8041_v57  ;;  %v15414_v29 = vld [vmem:[#allocation80_spill] sm:$0xff]  ;;  %v15430_v31 = vld [vmem:[#allocation62_spill] sm:$0xff] }
 0x40d   : > { %7016 = vmatmul.mubr.msk.f32.gmra.mrb[70].mxu1 %vm1348_vm1, %v15386_v42  ;;  %6921 = vmatprep.mubr.msk.f32.mxu0 %vm1348_vm1, %v15387_v45  ;;  %v8047_v55 = vpop.trf.xlu1  ;;  %v15431_v11 = vld [vmem:[#allocation94_spill] sm:$0xff] }
 0x40e   : > { %7017 = vmatprep.mubr.msk.f32.mxu1 %vm1348_vm1, %v15388_v21  ;;  %v8051_v16 = vunpack.i.h.bf16 %v8047_v55  ;;  %v8048_v44 = vunpack.i.l.bf16 %v8047_v55  ;;  %v8099_v55 = vpop.trf.xlu0 }
 0x410   : > { %6922 = vmatmul.mubr.msk.f32.gmra.mrb[56].mxu0 %vm1348_vm1, %v15387_v45 }
 0x411   : > { %7018 = vmatmul.mubr.msk.f32.gmra.mrb[72].mxu1 %vm1348_vm1, %v15388_v21  ;;  %6923 = vmatprep.mubr.msk.f32.mxu0 %vm1348_vm1, %v15389_v23  ;;  %v8052_v60 = vpop.trf.xlu1 }
 0x412   : > { %7019 = vmatprep.mubr.msk.f32.mxu1 %vm1348_vm1, %v15390_v26  ;;  %v8056_v39 = vunpack.i.h.bf16 %v8052_v60  ;;  %v8053_v9 = vunpack.i.l.bf16 %v8052_v60  ;;  %v15427_v60 = vld [vmem:[#allocation60_spill] sm:$0xff] }
 0x414   : > { %6924 = vmatmul.mubr.msk.f32.gmra.mrb[58].mxu0 %vm1348_vm1, %v15389_v23  ;;  %v7443_v42 = vpack.c.bf16 %v8053_v9, %v8048_v44  ;;  %v7491_v45 = vpack.c.bf16 %v8056_v39, %v8051_v16  ;;  %v15415_v23 = vld [vmem:[#allocation50_spill] sm:$0xff]  ;;  %v15433_v16 = vld [vmem:[#allocation64_spill] sm:$0xff] }
 0x415   : > { %7020 = vmatmul.mubr.msk.f32.gmra.mrb[74].mxu1 %vm1348_vm1, %v15390_v26  ;;  %6925 = vmatprep.mubr.msk.f32.mxu0 %vm1348_vm1, %v15391_v33  ;;  %v8057_v25 = vpop.trf.xlu1  ;;  %v15416_v26 = vld [vmem:[#allocation82_spill] sm:$0xff]  ;;  %v15434_v44 = vld [vmem:[#allocation96_spill] sm:$0xff] }
 0x416   : > { %7021 = vmatprep.mubr.msk.f32.mxu1 %vm1348_vm1, %v15392_v27  ;;  %v8061_v13 = vunpack.i.h.bf16 %v8057_v25 }
 0x418   : > { %6926 = vmatmul.mubr.msk.f32.gmra.mrb[60].mxu0 %vm1348_vm1, %v15391_v33  ;;  %v8058_v33 = vunpack.i.l.bf16 %v8057_v25 }
 0x419   : > { %7022 = vmatmul.mubr.msk.f32.gmra.mrb[76].mxu1 %vm1348_vm1, %v15392_v27  ;;  %6927 = vmatprep.mubr.msk.f32.mxu0 %vm1348_vm1, %v15393_v3  ;;  %v8062_v38 = vpop.trf.xlu1 }
 0x41a   : > { %7023 = vmatprep.mubr.msk.f32.mxu1 %vm1348_vm1, %v15394_v32  ;;  %v8066_v27 = vunpack.i.h.bf16 %v8062_v38  ;;  %v8063_v0 = vunpack.i.l.bf16 %v8062_v38  ;;  %v8103_v38 = vunpack.i.h.bf16 %v8099_v55 }
 0x41c   : > { %6928 = vmatmul.mubr.msk.f32.gmra.mrb[62].mxu0 %vm1348_vm1, %v15393_v3 }
 0x41d   : > { %7024 = vmatmul.mubr.msk.f32.gmra.mrb[78].mxu1 %vm1348_vm1, %v15394_v32  ;;  %6929 = vmatprep.mubr.msk.f32.mxu0 %vm1348_vm1, %v15395_v47  ;;  %v8067_v35 = vpop.trf.xlu1  ;;  %v15417_v32 = vld [vmem:[#allocation52_spill] sm:$0xff] }
 0x41e   : > { %7025 = vmatprep.mubr.msk.f32.mxu1 %vm1348_vm1, %v15396_v34  ;;  %v8071_v49 = vunpack.i.h.bf16 %v8067_v35 }
 0x420   : > { %6930 = vmatmul.mubr.msk.f32.gmra.mrb[64].mxu0 %vm1348_vm1, %v15395_v47  ;;  %v7446_v47 = vpack.c.bf16 %v8063_v0, %v8058_v33  ;;  %v15440_v0 = vld [vmem:[#allocation100_spill] sm:$0xff] }
 0x421   : > { %7026 = vmatmul.mubr.msk.f32.gmra.mrb[80].mxu1 %vm1348_vm1, %v15396_v34  ;;  %6931 = vmatprep.mubr.msk.f32.mxu0 %vm1348_vm1, %v15397_v2  ;;  %v8072_v40 = vpop.trf.xlu1  ;;  %v7494_v34 = vpack.c.bf16 %v8066_v27, %v8061_v13  ;;  %v15439_v27 = vld [vmem:[#allocation68_spill] sm:$0xff] }
 0x422   : > { %7027 = vmatprep.mubr.msk.f32.mxu1 %vm1348_vm1, %v15398_v18  ;;  %v8073_v30 = vunpack.i.l.bf16 %v8072_v40 }
 0x424   : > { %6932 = vmatmul.mubr.msk.f32.gmra.mrb[66].mxu0 %vm1348_vm1, %v15397_v2  ;;  %v15419_v2 = vld [vmem:[#allocation54_spill] sm:$0xff] }
 0x425   : > { %7028 = vmatmul.mubr.msk.f32.gmra.mrb[82].mxu1 %vm1348_vm1, %v15398_v18  ;;  %6933 = vmatprep.mubr.msk.f32.mxu0 %vm1348_vm1, %v15399_v58  ;;  %v10349_v21 = vpop.trf.xlu1  ;;  %v15420_v18 = vld [vmem:[#allocation86_spill] sm:$0xff] }
 0x426   : > { %7029 = vmatprep.mubr.msk.f32.mxu1 %vm1348_vm1, %v15400_v22  ;;  %v8081_v12 = vunpack.i.h.bf16 %v10349_v21  ;;  %v8078_v36 = vunpack.i.l.bf16 %v10349_v21 }
 0x428   : > { %6934 = vmatmul.mubr.msk.f32.gmra.mrb[68].mxu0 %vm1348_vm1, %v15399_v58  ;;  %v8068_v58 = vunpack.i.l.bf16 %v8067_v35 }
 0x429   : > { %7030 = vmatmul.mubr.msk.f32.gmra.mrb[84].mxu1 %vm1348_vm1, %v15400_v22  ;;  %6935 = vmatprep.mubr.msk.f32.mxu0 %vm1348_vm1, %v15401_v41  ;;  %v8082_v3 = vpop.trf.xlu1  ;;  %v8076_v22 = vunpack.i.h.bf16 %v8072_v40 }
 0x42a   : > { %7031 = vmatprep.mubr.msk.f32.mxu1 %vm1348_vm1, %v15402_v56  ;;  %v7449_v63 = vpack.c.bf16 %v8073_v30, %v8068_v58  ;;  %v8083_v62 = vunpack.i.l.bf16 %v8082_v3 }
 0x42b   : > { %v7497_v6 = vpack.c.bf16 %v8076_v22, %v8071_v49 }
 0x42c   : > { %6936 = vmatmul.mubr.msk.f32.gmra.mrb[70].mxu0 %vm1348_vm1, %v15401_v41 }
 0x42d   : > { %7032 = vmatmul.mubr.msk.f32.gmra.mrb[86].mxu1 %vm1348_vm1, %v15402_v56  ;;  %7065 = vmatprep.mubr.msk.f32.mxu0 %vm1348_vm1, %v15403_v51  ;;  %v8087_v53 = vpop.trf.xlu1  ;;  %v15421_v56 = vld [vmem:[#allocation56_spill] sm:$0xff] }
 0x42e   : > { %7161 = vmatprep.mubr.msk.f32.mxu1 %vm1348_vm1, %v15404_v4 }
 0x430   : > { %7066 = vmatmul.mubr.msk.f32.vlgmr.msra.gmra.mrb[72].mxu0 %vm1348_vm1, %v15403_v51  ;;  %v15424_v51 = vld [vmem:[#allocation58_spill] sm:$0xff] }
 0x431   : > { %7162 = vmatmul.mubr.msk.f32.vlgmr.msra.gmra.mrb[88].mxu1 %vm1348_vm1, %v15404_v4  ;;  %7067 = vmatprep.mubr.msk.f32.mxu0 %vm1348_vm1, %v15405_v37  ;;  %v8092_v41 = vpop.trf.xlu1  ;;  %v15425_v4 = vld [vmem:[#allocation90_spill] sm:$0xff] }
 0x432   : > { %7163 = vmatprep.mubr.msk.f32.mxu1 %vm1348_vm1, %v15406_v46  ;;  %7435 = vmatpush1.bf16.msra.mxu0 %v7434_v48  ;;  %v8086_v48 = vunpack.i.h.bf16 %v8082_v3  ;;  %v8093_v25 = vunpack.i.l.bf16 %v8092_v41 }
 0x433   : > { %7483 = vmatpush1.bf16.msra.mxu1 %v7482_v1  ;;  %7436 = vmatprep.subr.bf16.mxu0 %v14512_v10  ;;  %v8104_v1 = vpop.trf.xlu0 }
 0x434   : > { %7068 = vmatmul.mubr.msk.f32.gmra.mrb[74].mxu0 %vm1348_vm1, %v15405_v37  ;;  %7484 = vmatprep.subr.bf16.mxu1 %v14512_v10  ;;  %v15428_v37 = vld [vmem:[#allocation92_spill] sm:$0xff] }
 0x435   : > { %7164 = vmatmul.mubr.msk.f32.gmra.mrb[90].mxu1 %vm1348_vm1, %v15406_v46  ;;  %7069 = vmatprep.mubr.msk.f32.mxu0 %vm1348_vm1, %v15407_v14  ;;  %v10387_v7 = vpop.trf.xlu1  ;;  %v8091_v46 = vunpack.i.h.bf16 %v8087_v53 }
 0x436   : > { %7165 = vmatprep.mubr.msk.f32.mxu1 %vm1348_vm1, %v15408_v17  ;;  %7438 = vmatpush1.bf16.msra.mxu0 %v7437_v61  ;;  %15423 = vst [vmem:[#allocation26_spill] sm:$0xff] %v10387_v7  ;;  %v8088_v61 = vunpack.i.l.bf16 %v8087_v53  ;;  %v15443_v53 = vld [vmem:[#allocation71_spill] sm:$0xff] }
 0x437   : > { %7486 = vmatpush1.bf16.msra.mxu1 %v7485_v43  ;;  %7439 = vmatprep.subr.bf16.mxu0 %v14512_v10  ;;  %v8096_v43 = vunpack.i.h.bf16 %v8092_v41  ;;  %v8109_v50 = vpop.trf.xlu0  ;;  %v15445_v41 = vld [vmem:[#allocation41_spill] sm:$0xff] }
 0x438   : > { %7070 = vmatmul.mubr.msk.f32.gmra.mrb[76].mxu0 %vm1348_vm1, %v15407_v14  ;;  %7487 = vmatprep.subr.bf16.mxu1 %v14512_v10  ;;  %v7452_v14 = vpack.c.bf16 %v8083_v62, %v8078_v36  ;;  %v8110_v21 = vunpack.i.l.bf16 %v8109_v50 }
 0x439   : > { %7166 = vmatmul.mubr.msk.f32.gmra.mrb[92].mxu1 %vm1348_vm1, %v15408_v17  ;;  %7071 = vmatprep.mubr.msk.f32.mxu0 %vm1348_vm1, %v15409_v8  ;;  %v10401_v52 = vpop.trf.xlu1  ;;  %v7500_v17 = vpack.c.bf16 %v8086_v48, %v8081_v12  ;;  %v7503_v35 = vpack.c.bf16 %v8096_v43, %v8091_v46  ;;  %v15452_v46 = vld [vmem:[#allocation77_spill] sm:$0xff] }
 0x43a   : > { %7167 = vmatprep.mubr.msk.f32.mxu1 %vm1348_vm1, %v15410_v20  ;;  %7441 = vmatpush1.bf16.msra.mxu0 %v7440_v28  ;;  %15426 = vst [vmem:[#allocation15_spill] sm:$0xff] %v10401_v52  ;;  %v8105_v28 = vunpack.i.l.bf16 %v8104_v1 }
 0x43b   : > { %7489 = vmatpush1.bf16.msra.mxu1 %v7488_v5  ;;  %7442 = vmatprep.subr.bf16.mxu0 %v14512_v10  ;;  %v7455_v5 = vpack.c.bf16 %v8093_v25, %v8088_v61 }
 0x43c   : > { %7072 = vmatmul.mubr.msk.f32.gmra.mrb[78].mxu0 %vm1348_vm1, %v15409_v8  ;;  %7490 = vmatprep.subr.bf16.mxu1 %v14512_v10  ;;  %v8100_v8 = vunpack.i.l.bf16 %v8099_v55 }
 0x43d   : > { %7168 = vmatmul.mubr.msk.f32.gmra.mrb[94].mxu1 %vm1348_vm1, %v15410_v20  ;;  %7073 = vmatprep.mubr.msk.f32.mxu0 %vm1348_vm1, %v15411_v54  ;;  %v10411_v57 = vpop.trf.xlu1  ;;  %v8108_v20 = vunpack.i.h.bf16 %v8104_v1 }
 0x43e   : > { %7169 = vmatprep.mubr.msk.f32.mxu1 %vm1348_vm1, %v15412_v15  ;;  %7444 = vmatpush1.bf16.msra.mxu0 %v7443_v42  ;;  %15429 = vst [vmem:[#allocation27_spill] sm:$0xff] %v10411_v57  ;;  %v7458_v39 = vpack.c.bf16 %v8105_v28, %v8100_v8  ;;  %v15437_v42 = vld [vmem:[#allocation98_spill] sm:$0xff] }
 0x43f   : > { %7492 = vmatpush1.bf16.msra.mxu1 %v7491_v45  ;;  %7445 = vmatprep.subr.bf16.mxu0 %v14512_v10  ;;  %v7506_v9 = vpack.c.bf16 %v8108_v20, %v8103_v38  ;;  %v8113_v45 = vunpack.i.h.bf16 %v8109_v50  ;;  %v15455_v50 = vld [vmem:[#allocation79_spill] sm:$0xff] }
 0x440   : > { %7074 = vmatmul.mubr.msk.f32.gmra.mrb[80].mxu0 %vm1348_vm1, %v15411_v54  ;;  %7493 = vmatprep.subr.bf16.mxu1 %v14512_v10 }
 0x441   : > { %7170 = vmatmul.mubr.msk.f32.gmra.mrb[96].mxu1 %vm1348_vm1, %v15412_v15  ;;  %7075 = vmatprep.mubr.msk.f32.mxu0 %vm1348_vm1, %v15413_v19  ;;  %v10423_v54 = vpop.trf.xlu1  ;;  %v8114_v15 = vpop.trf.xlu0 }
 0x442   : > { %7171 = vmatprep.mubr.msk.f32.mxu1 %vm1348_vm1, %v15414_v29  ;;  %7447 = vmatpush1.bf16.msra.mxu0 %v7446_v47  ;;  %15432 = vst [vmem:[#allocation16_spill] sm:$0xff] %v10423_v54 }
 0x443   : > { %7495 = vmatpush1.bf16.msra.mxu1 %v7494_v34  ;;  %7448 = vmatprep.subr.bf16.mxu0 %v14512_v10  ;;  %v15442_v34 = vld [vmem:[#allocation39_spill] sm:$0xff] }
 0x444   : > { %7076 = vmatmul.mubr.msk.f32.gmra.mrb[82].mxu0 %vm1348_vm1, %v15413_v19  ;;  %7496 = vmatprep.subr.bf16.mxu1 %v14512_v10 }
 0x445   : > { %7172 = vmatmul.mubr.msk.f32.gmra.mrb[98].mxu1 %vm1348_vm1, %v15414_v29  ;;  %7077 = vmatprep.mubr.msk.f32.mxu0 %vm1348_vm1, %v15415_v23  ;;  %v10435_v40 = vpop.trf.xlu1  ;;  %v8119_v19 = vpop.trf.xlu0  ;;  %v15436_v29 = vld [vmem:[#allocation66_spill] sm:$0xff] }
 0x446   : > { %7173 = vmatprep.mubr.msk.f32.mxu1 %vm1348_vm1, %v15416_v26  ;;  %7450 = vmatpush1.bf16.msra.mxu0 %v7449_v63  ;;  %15435 = vst [vmem:[#allocation28_spill] sm:$0xff] %v10435_v40 }
 0x447   : > { %7498 = vmatpush1.bf16.msra.mxu1 %v7497_v6  ;;  %7451 = vmatprep.subr.bf16.mxu0 %v14512_v10 }
 0x448   : > { %7078 = vmatmul.mubr.msk.f32.gmra.mrb[84].mxu0 %vm1348_vm1, %v15415_v23  ;;  %7499 = vmatprep.subr.bf16.mxu1 %v14512_v10  ;;  %v8118_v23 = vunpack.i.h.bf16 %v8114_v15 }
 0x449   : > { %7174 = vmatmul.mubr.msk.f32.gmra.mrb[100].mxu1 %vm1348_vm1, %v15416_v26  ;;  %7079 = vmatprep.mubr.msk.f32.mxu0 %vm1348_vm1, %v15417_v32  ;;  %v8115_v26 = vunpack.i.l.bf16 %v8114_v15  ;;  %v10446_v13 = vpop.trf.xlu1  ;;  %v8124_v33 = vpop.trf.xlu0 }
 0x44a   : > { %7175 = vmatprep.mubr.msk.f32.mxu1 %vm1348_vm1, %v15418_v59  ;;  %7453 = vmatpush1.bf16.msra.mxu0 %v7452_v14  ;;  %15438 = vst [vmem:[#allocation17_spill] sm:$0xff] %v10446_v13  ;;  %v8128_v49 = vunpack.i.h.bf16 %v8124_v33  ;;  %v8125_v58 = vunpack.i.l.bf16 %v8124_v33  ;;  %v15461_v33 = vld [vmem:[#allocation83_spill] sm:$0xff] }
 0x44b   : > { %7501 = vmatpush1.bf16.msra.mxu1 %v7500_v17  ;;  %7454 = vmatprep.subr.bf16.mxu0 %v14512_v10  ;;  %v7461_v3 = vpack.c.bf16 %v8115_v26, %v8110_v21  ;;  %v15454_v17 = vld [vmem:[#allocation47_spill] sm:$0xff] }
 0x44c   : > { %7080 = vmatmul.mubr.msk.f32.gmra.mrb[86].mxu0 %vm1348_vm1, %v15417_v32  ;;  %7502 = vmatprep.subr.bf16.mxu1 %v14512_v10  ;;  %v7509_v32 = vpack.c.bf16 %v8118_v23, %v8113_v45 }
 0x44d   : > { %7176 = vmatmul.mubr.msk.f32.gmra.mrb[102].mxu1 %vm1348_vm1, %v15418_v59  ;;  %7081 = vmatprep.mubr.msk.f32.mxu0 %vm1348_vm1, %v15419_v2  ;;  %v10457_v59 = vpop.trf.xlu1  ;;  %v8129_v47 = vpop.trf.xlu0 }
 0x44e   : > { %7177 = vmatprep.mubr.msk.f32.mxu1 %vm1348_vm1, %v15420_v18  ;;  %7456 = vmatpush1.bf16.msra.mxu0 %v7455_v5  ;;  %15441 = vst [vmem:[#allocation29_spill] sm:$0xff] %v10457_v59  ;;  %v8133_v12 = vunpack.i.h.bf16 %v8129_v47  ;;  %v8130_v36 = vunpack.i.l.bf16 %v8129_v47  ;;  %v15457_v5 = vld [vmem:[#allocation49_spill] sm:$0xff] }
 0x44f   : > { %7504 = vmatpush1.bf16.msra.mxu1 %v7503_v35  ;;  %7457 = vmatprep.subr.bf16.mxu0 %v14512_v10  ;;  %v15458_v35 = vld [vmem:[#allocation81_spill] sm:$0xff] }
 0x450   : > { %7082 = vmatmul.mubr.msk.f32.gmra.mrb[88].mxu0 %vm1348_vm1, %v15419_v2  ;;  %7505 = vmatprep.subr.bf16.mxu1 %v14512_v10  ;;  %v8123_v2 = vunpack.i.h.bf16 %v8119_v19 }
 0x451   : > { %7178 = vmatmul.mubr.msk.f32.gmra.mrb[104].mxu1 %vm1348_vm1, %v15420_v18  ;;  %7083 = vmatprep.mubr.msk.f32.mxu0 %vm1348_vm1, %v15421_v56  ;;  %v8120_v18 = vunpack.i.l.bf16 %v8119_v19  ;;  %v10468_v22 = vpop.trf.xlu1  ;;  %v8134_v30 = vpop.trf.xlu0 }
 0x452   : > { %7179 = vmatprep.mubr.msk.f32.mxu1 %vm1348_vm1, %v15422_v24  ;;  %7459 = vmatpush1.bf16.msra.mxu0 %v7458_v39  ;;  %15444 = vst [vmem:[#allocation18_spill] sm:$0xff] %v10468_v22  ;;  %v7512_v63 = vpack.c.bf16 %v8128_v49, %v8123_v2  ;;  %v8138_v48 = vunpack.i.h.bf16 %v8134_v30  ;;  %v8135_v62 = vunpack.i.l.bf16 %v8134_v30  ;;  %v15462_v2 = vld [vmem:[#allocation53_spill] sm:$0xff] }
 0x453   : > { %7507 = vmatpush1.bf16.msra.mxu1 %v7506_v9  ;;  %7460 = vmatprep.subr.bf16.mxu0 %v14512_v10  ;;  %v15464_v30 = vld [vmem:[#allocation85_spill] sm:$0xff] }
 0x454   : > { %7084 = vmatmul.mubr.msk.f32.gmra.mrb[90].mxu0 %vm1348_vm1, %v15421_v56  ;;  %7508 = vmatprep.subr.bf16.mxu1 %v14512_v10  ;;  %v15446_v56 = vld [vmem:[#allocation73_spill] sm:$0xff]  ;;  %v7467_v61 = vpack.c.bf16 %v8135_v62, %v8130_v36  ;;  %v7515_v43 = vpack.c.bf16 %v8138_v48, %v8133_v12  ;;  %v15465_v12 = vld [vmem:[#allocation55_spill] sm:$0xff] }
 0x455   : > { %7180 = vmatmul.mubr.msk.f32.gmra.mrb[106].mxu1 %vm1348_vm1, %v15422_v24  ;;  %7085 = vmatprep.mubr.msk.f32.mxu0 %vm1348_vm1, %v15424_v51  ;;  %v7464_v24 = vpack.c.bf16 %v8125_v58, %v8120_v18  ;;  %v10479_v6 = vpop.trf.xlu1  ;;  %v8139_v55 = vpop.trf.xlu0 }
 0x456   : > { %7181 = vmatprep.mubr.msk.f32.mxu1 %vm1348_vm1, %v15425_v4  ;;  %7462 = vmatpush1.bf16.msra.mxu0 %v7461_v3  ;;  %15447 = vst [vmem:[#allocation30_spill] sm:$0xff] %v10479_v6 }
 0x457   : > { %7510 = vmatpush1.bf16.msra.mxu1 %v7509_v32  ;;  %7463 = vmatprep.subr.bf16.mxu0 %v14512_v10 }
 0x458   : > { %7086 = vmatmul.mubr.msk.f32.gmra.mrb[92].mxu0 %vm1348_vm1, %v15424_v51  ;;  %7511 = vmatprep.subr.bf16.mxu1 %v14512_v10  ;;  %v15448_v51 = vld [vmem:[#allocation43_spill] sm:$0xff] }
 0x459   : > { %7182 = vmatmul.mubr.msk.f32.gmra.mrb[108].mxu1 %vm1348_vm1, %v15425_v4  ;;  %7087 = vmatprep.mubr.msk.f32.mxu0 %vm1348_vm1, %v15427_v60  ;;  %v15449_v4 = vld [vmem:[#allocation75_spill] sm:$0xff]  ;;  %v10490_v1 = vpop.trf.xlu1 }
 0x45a   : > { %7183 = vmatprep.mubr.msk.f32.mxu1 %vm1348_vm1, %v15428_v37  ;;  %7465 = vmatpush1.bf16.msra.mxu0 %v7464_v24  ;;  %15450 = vst [vmem:[#allocation19_spill] sm:$0xff] %v10490_v1 }
 0x45b   : > { %7513 = vmatpush1.bf16.msra.mxu1 %v7512_v63  ;;  %7466 = vmatprep.subr.bf16.mxu0 %v14512_v10 }
 0x45c   : > { %7088 = vmatmul.mubr.msk.f32.gmra.mrb[94].mxu0 %vm1348_vm1, %v15427_v60  ;;  %v8144_v60 = vpop.trf.xlu0  ;;  %7514 = vmatprep.subr.bf16.mxu1 %v14512_v10 }
 0x45d   : > { %7184 = vmatmul.mubr.msk.f32.gmra.mrb[110].mxu1 %vm1348_vm1, %v15428_v37  ;;  %7089 = vmatprep.mubr.msk.f32.mxu0 %vm1348_vm1, %v15430_v31  ;;  %v15451_v37 = vld [vmem:[#allocation45_spill] sm:$0xff]  ;;  %v10501_v25 = vpop.trf.xlu1  ;;  %v8148_v38 = vunpack.i.h.bf16 %v8144_v60  ;;  %v8145_v8 = vunpack.i.l.bf16 %v8144_v60 }
 0x45e   : > { %7185 = vmatprep.mubr.msk.f32.mxu1 %vm1348_vm1, %v15431_v11  ;;  %15453 = vst [vmem:[#allocation31_spill] sm:$0xff] %v10501_v25  ;;  %7468 = vmatpush1.bf16.msra.mxu0 %v7467_v61 }
 0x45f   : > { %7516 = vmatpush1.bf16.msra.mxu1 %v7515_v43  ;;  %7469 = vmatprep.subr.bf16.mxu0 %v14512_v10 }
 0x460   : > { %7090 = vmatmul.mubr.msk.f32.gmra.mrb[96].mxu0 %vm1348_vm1, %v15430_v31  ;;  %v8149_v14 = vpop.trf.xlu0  ;;  %v8143_v31 = vunpack.i.h.bf16 %v8139_v55  ;;  %7517 = vmatprep.subr.bf16.mxu1 %v14512_v10 }
 0x461   : > { %7186 = vmatmul.mubr.msk.f32.gmra.mrb[112].mxu1 %vm1348_vm1, %v15431_v11  ;;  %7091 = vmatprep.mubr.msk.f32.mxu0 %vm1348_vm1, %v15433_v16  ;;  %v8140_v11 = vunpack.i.l.bf16 %v8139_v55  ;;  %v10512_v20 = vpop.trf.xlu1  ;;  %v8153_v45 = vunpack.i.h.bf16 %v8149_v14  ;;  %v8150_v21 = vunpack.i.l.bf16 %v8149_v14 }
 0x462   : > { %7187 = vmatprep.mubr.msk.f32.mxu1 %vm1348_vm1, %v15434_v44  ;;  %15456 = vst [vmem:[#allocation20_spill] sm:$0xff] %v10512_v20 }
 0x464   : > { %7092 = vmatmul.mubr.msk.f32.gmra.mrb[98].mxu0 %vm1348_vm1, %v15433_v16  ;;  %v8154_v28 = vpop.trf.xlu0  ;;  %v7470_v16 = vpack.c.bf16 %v8145_v8, %v8140_v11 }
 0x465   : > { %7188 = vmatmul.mubr.msk.f32.gmra.mrb[114].mxu1 %vm1348_vm1, %v15434_v44  ;;  %7093 = vmatprep.mubr.msk.f32.mxu0 %vm1348_vm1, %v15436_v29  ;;  %v7518_v44 = vpack.c.bf16 %v8148_v38, %v8143_v31  ;;  %v8158_v23 = vunpack.i.h.bf16 %v8154_v28  ;;  %v10537_v26 = vpop.trf.xlu1  ;;  %v15468_v38 = vld [vmem:[#allocation57_spill] sm:$0xff] }
 0x466   : > { %7189 = vmatprep.mubr.msk.f32.mxu1 %vm1348_vm1, %v15437_v42  ;;  %15460 = vst [vmem:[#allocation32_spill] sm:$0xff] %v10537_v26  ;;  %7471 = vmatpush1.bf16.msra.mxu0 %v7470_v16 }
 0x467   : > { %7519 = vmatpush1.bf16.msra.mxu1 %v7518_v44  ;;  %v7521_v58 = vpack.c.bf16 %v8158_v23, %v8153_v45  ;;  %7472 = vmatprep.subr.bf16.mxu0 %v14512_v10 }
 0x468   : > { %7094 = vmatmul.mubr.msk.f32.gmra.mrb[100].mxu0 %vm1348_vm1, %v15436_v29  ;;  %v15459_v29 = vld [vmem:[#allocation51_spill] sm:$0xff]  ;;  %v8159_v3 = vpop.trf.xlu0  ;;  %7520 = vmatprep.subr.bf16.mxu1 %v14512_v10 }
 0x469   : > { %7190 = vmatmul.mubr.msk.f32.gmra.mrb[116].mxu1 %vm1348_vm1, %v15437_v42  ;;  %7095 = vmatprep.mubr.msk.f32.mxu0 %vm1348_vm1, %v15439_v27  ;;  %v10559_v49 = vpop.trf.xlu1  ;;  %v8163_v48 = vunpack.i.h.bf16 %v8159_v3  ;;  %v8160_v62 = vunpack.i.l.bf16 %v8159_v3  ;;  %v15472_v3 = vld [vmem:[#allocation91_spill] sm:$0xff] }
 0x46a   : > { %7191 = vmatprep.mubr.msk.f32.mxu1 %vm1348_vm1, %v15440_v0  ;;  %15463 = vst [vmem:[#allocation21_spill] sm:$0xff] %v10559_v49 }
 0x46b   : > { %7522 = vmatpush1.bf16.msra.mxu1 %v7521_v58 }
 0x46c   : > { %7096 = vmatmul.mubr.msk.f32.gmra.mrb[102].mxu0 %vm1348_vm1, %v15439_v27  ;;  %7523 = vmatprep.subr.bf16.mxu1 %v14512_v10 }
 0x46d   : > { %7192 = vmatmul.mubr.msk.f32.gmra.mrb[118].mxu1 %vm1348_vm1, %v15440_v0  ;;  %7097 = vmatprep.mubr.msk.f32.mxu0 %vm1348_vm1, %v15442_v34  ;;  %v8155_v0 = vunpack.i.l.bf16 %v8154_v28 }
 0x46e   : > { %7193 = vmatprep.mubr.msk.f32.mxu1 %vm1348_vm1, %v15443_v53 }
 0x46f   : > { %v7473_v24 = vpack.c.bf16 %v8155_v0, %v8150_v21 }
 0x470   : > { %7098 = vmatmul.mubr.msk.f32.gmra.mrb[104].mxu0 %vm1348_vm1, %v15442_v34 }
 0x471   : > { %7194 = vmatmul.mubr.msk.f32.gmra.mrb[120].mxu1 %vm1348_vm1, %v15443_v53  ;;  %7099 = vmatprep.mubr.msk.f32.mxu0 %vm1348_vm1, %v15445_v41 }
 0x472   : > { %7195 = vmatprep.mubr.msk.f32.mxu1 %vm1348_vm1, %v15446_v56  ;;  %7474 = vmatpush1.bf16.msra.mxu0 %v7473_v24 }
 0x473   : > { %7475 = vmatprep.subr.bf16.mxu0 %v14512_v10 }
 0x474   : > { %7100 = vmatmul.mubr.msk.f32.gmra.mrb[106].mxu0 %vm1348_vm1, %v15445_v41 }
 0x475   : > { %7196 = vmatmul.mubr.msk.f32.gmra.mrb[122].mxu1 %vm1348_vm1, %v15446_v56  ;;  %7101 = vmatprep.mubr.msk.f32.mxu0 %vm1348_vm1, %v15448_v51  ;;  %v8164_v56 = vpop.trf.xlu0 }
 0x476   : > { %7197 = vmatprep.mubr.msk.f32.mxu1 %vm1348_vm1, %v15449_v4  ;;  %v8168_v60 = vunpack.i.h.bf16 %v8164_v56  ;;  %v8165_v43 = vunpack.i.l.bf16 %v8164_v56 }
 0x478   : > { %7102 = vmatmul.mubr.msk.f32.gmra.mrb[108].mxu0 %vm1348_vm1, %v15448_v51 }
 0x479   : > { %7198 = vmatmul.mubr.msk.f32.gmra.mrb[124].mxu1 %vm1348_vm1, %v15449_v4  ;;  %7103 = vmatprep.mubr.msk.f32.mxu0 %vm1348_vm1, %v15451_v37  ;;  %v8169_v14 = vpop.trf.xlu0 }
 0x47a   : > { %7199 = vmatprep.mubr.msk.f32.mxu1 %vm1348_vm1, %v15452_v46  ;;  %v8173_v56 = vunpack.i.h.bf16 %v8169_v14 }
 0x47c   : > { %7104 = vmatmul.mubr.msk.f32.gmra.mrb[110].mxu0 %vm1348_vm1, %v15451_v37  ;;  %v10583_v37 = vpop.trf.xlu1 }
 0x47d   : > { %7200 = vmatmul.mubr.msk.f32.gmra.mrb[126].mxu1 %vm1348_vm1, %v15452_v46  ;;  %7105 = vmatprep.mubr.msk.f32.mxu0 %vm1348_vm1, %v15454_v17  ;;  %15466 = vst [vmem:[#allocation33_spill] sm:$0xff] %v10583_v37  ;;  %v15467_v46 = vld [vmem:[#allocation87_spill] sm:$0xff]  ;;  %v8174_v44 = vpop.trf.xlu0 }
 0x47e   : > { %7201 = vmatprep.mubr.msk.f32.mxu1 %vm1348_vm1, %v15455_v50  ;;  %v8175_v58 = vunpack.i.l.bf16 %v8174_v44  ;;  %v8178_v24 = vunpack.i.h.bf16 %v8174_v44  ;;  %v15478_v44 = vld [vmem:[#allocation95_spill] sm:$0xff] }
 0x480   : > { %7106 = vmatmul.mubr.msk.f32.gmra.mrb[112].mxu0 %vm1348_vm1, %v15454_v17  ;;  %v10606_v28 = vpop.trf.xlu1 }
 0x481   : > { %7202 = vmatmul.mubr.msk.f32.gmra.mrb[128].mxu1 %vm1348_vm1, %v15455_v50  ;;  %7107 = vmatprep.mubr.msk.f32.mxu0 %vm1348_vm1, %v15457_v5  ;;  %15469 = vst [vmem:[#allocation22_spill] sm:$0xff] %v10606_v28 }
 0x482   : > { %7203 = vmatprep.mubr.msk.f32.mxu1 %vm1348_vm1, %v15458_v35 }
 0x483   : > { %v10521_v15 = vpop.f32.mrb[8].mxu0 }
 0x484   : > { %v10523_v39 = vpop.f32.mrb[24].mxu1  ;;  %v10525_v9 = vpop.f32.mrb[9].mxu0  ;;  %7108 = vmatmul.mubr.msk.f32.gmra.mrb[114].mxu0 %vm1348_vm1, %v15457_v5  ;;  %v7524_v5 = vpack.c.bf16 %v8168_v60, %v8163_v48  ;;  %v15473_v48 = vld [vmem:[#allocation61_spill] sm:$0xff] }
 0x485   : > { %v10529_v19 = vpop.f32.mrb[25].mxu1  ;;  %7204 = vmatmul.mubr.msk.f32.gmra.mrb[130].mxu1 %vm1348_vm1, %v15458_v35  ;;  %7109 = vmatprep.mubr.msk.f32.mxu0 %vm1348_vm1, %v15459_v29  ;;  %v3145_v42 = vmax.f32 %v10521_v15, %v10525_v9  ;;  %v15470_v35 = vld [vmem:[#allocation89_spill] sm:$0xff] }
 0x486   : > { %7205 = vmatprep.mubr.msk.f32.mxu1 %vm1348_vm1, %v15461_v33  ;;  %v3241_v27 = vmax.f32 %v10523_v39, %v10529_v19  ;;  %7525 = vmatpush1.bf16.msra.mxu1 %v7524_v5  ;;  %v15474_v60 = vld [vmem:[#allocation93_spill] sm:$0xff] }
 0x487   : > { %3146 = vmax.xlane.f32.xlu0 %v3145_v42  ;;  %v10543_v32 = vpop.f32.mrb[10].mxu0  ;;  %7526 = vmatprep.subr.bf16.mxu1 %v14512_v10 }
 0x488   : > { %3242 = vmax.xlane.f32.xlu1 %v3241_v27  ;;  %v10545_v47 = vpop.f32.mrb[26].mxu1  ;;  %v10547_v34 = vpop.f32.mrb[11].mxu0  ;;  %7110 = vmatmul.mubr.msk.f32.gmra.mrb[116].mxu0 %vm1348_vm1, %v15459_v29  ;;  %v7476_v29 = vpack.c.bf16 %v8165_v43, %v8160_v62  ;;  %v15471_v27 = vld [vmem:[#allocation59_spill] sm:$0xff] }
 0x489   : > { %v10551_v53 = vpop.f32.mrb[27].mxu1  ;;  %7206 = vmatmul.mubr.msk.f32.gmra.mrb[132].mxu1 %vm1348_vm1, %v15461_v33  ;;  %7111 = vmatprep.mubr.msk.f32.mxu0 %vm1348_vm1, %v15462_v2  ;;  %v3148_v18 = vmax.f32 %v10543_v32, %v10547_v34 }
 0x48a   : > { %7207 = vmatprep.mubr.msk.f32.mxu1 %vm1348_vm1, %v15464_v30  ;;  %v3244_v41 = vmax.f32 %v10545_v47, %v10551_v53  ;;  %7477 = vmatpush1.bf16.msra.mxu0 %v7476_v29 }
 0x48b   : > { %3149 = vmax.xlane.f32.xlu0 %v3148_v18  ;;  %v10566_v63 = vpop.f32.mrb[12].mxu0  ;;  %v8170_v18 = vunpack.i.l.bf16 %v8169_v14  ;;  %7478 = vmatprep.subr.bf16.mxu0 %v14512_v10 }
 0x48c   : > { %v10569_v55 = vpop.f32.mrb[28].mxu1  ;;  %v10571_v51 = vpop.f32.mrb[13].mxu0  ;;  %7112 = vmatmul.mubr.msk.f32.gmra.mrb[118].mxu0 %vm1348_vm1, %v15462_v2 }
 0x48d   : > { %v10575_v4 = vpop.f32.mrb[29].mxu1  ;;  %7208 = vmatmul.mubr.msk.f32.gmra.mrb[134].mxu1 %vm1348_vm1, %v15464_v30  ;;  %7113 = vmatprep.mubr.msk.f32.mxu0 %vm1348_vm1, %v15465_v12  ;;  %v3151_v36 = vmax.f32 %v10566_v63, %v10571_v51 }
 0x48e   : > { %7209 = vmatprep.mubr.msk.f32.mxu1 %vm1348_vm1, %v15467_v46  ;;  %v3247_v61 = vmax.f32 %v10569_v55, %v10575_v4 }
 0x48f   : > { %3245 = vmax.xlane.f32.xlu0 %v3244_v41  ;;  %3152 = vmax.xlane.f32.xlu1 %v3151_v36  ;;  %v10589_v17 = vpop.f32.mrb[14].mxu0 }
 0x490   : > { %v10591_v50 = vpop.f32.mrb[30].mxu1  ;;  %v10593_v31 = vpop.f32.mrb[15].mxu0  ;;  %7114 = vmatmul.mubr.msk.f32.gmra.mrb[120].mxu0 %vm1348_vm1, %v15465_v12 }
 0x491   : > { %v10598_v11 = vpop.f32.mrb[31].mxu1  ;;  %7210 = vmatmul.mubr.msk.f32.gmra.mrb[136].mxu1 %vm1348_vm1, %v15467_v46  ;;  %7115 = vmatprep.mubr.msk.f32.mxu0 %vm1348_vm1, %v15468_v38  ;;  %v3154_v8 = vmax.f32 %v10589_v17, %v10593_v31 }
 0x492   : > { %7211 = vmatprep.mubr.msk.f32.mxu1 %vm1348_vm1, %v15470_v35  ;;  %v3250_v16 = vmax.f32 %v10591_v50, %v10598_v11 }
 0x493   : > { %3248 = vmax.xlane.f32.xlu0 %v3247_v61  ;;  %3155 = vmax.xlane.f32.xlu1 %v3154_v8  ;;  %v10613_v42 = vpop.f32.mrb[16].mxu0  ;;  %v7479_v61 = vpack.c.bf16 %v8175_v58, %v8170_v18  ;;  %v15483_v18 = vld [vmem:[#allocation65_spill] sm:$0xff] }
 0x494   : > { %v10615_v45 = vpop.f32.mrb[32].mxu1  ;;  %v10617_v21 = vpop.f32.mrb[17].mxu0  ;;  %7116 = vmatmul.mubr.msk.f32.gmra.mrb[122].mxu0 %vm1348_vm1, %v15468_v38  ;;  %v7527_v38 = vpack.c.bf16 %v8178_v24, %v8173_v56  ;;  %v15484_v56 = vld [vmem:[#allocation97_spill] sm:$0xff] }
 0x495   : > { %v3157_v23 = vmax.f32 %v10613_v42, %v10617_v21  ;;  %v10623_v33 = vpop.f32.mrb[33].mxu1  ;;  %7212 = vmatmul.mubr.msk.f32.gmra.mrb[138].mxu1 %vm1348_vm1, %v15470_v35  ;;  %7117 = vmatprep.mubr.msk.f32.mxu0 %vm1348_vm1, %v15471_v27  ;;  %v15477_v35 = vld [vmem:[#allocation63_spill] sm:$0xff] }
 0x496   : > { %v3253_v0 = vmax.f32 %v10615_v45, %v10623_v33  ;;  %7213 = vmatprep.mubr.msk.f32.mxu1 %vm1348_vm1, %v15472_v3  ;;  %7480 = vmatpush1.bf16.msra.mxu0 %v7479_v61  ;;  %v15489_v61 = vld [vmem:[#allocation67_spill] sm:$0xff] }
 0x497   : > { %3251 = vmax.xlane.f32.xlu0 %v3250_v16  ;;  %3158 = vmax.xlane.f32.xlu1 %v3157_v23  ;;  %v10633_v2 = vpop.f32.mrb[18].mxu0 }
 0x498   : > { %v10635_v30 = vpop.f32.mrb[34].mxu1  ;;  %v10637_v41 = vpop.f32.mrb[19].mxu0  ;;  %7118 = vmatmul.mubr.msk.f32.gmra.mrb[124].mxu0 %vm1348_vm1, %v15471_v27  ;;  %7528 = vmatpush1.bf16.msra.mxu1 %v7527_v38 }
 0x499   : > { %v3160_v12 = vmax.f32 %v10633_v2, %v10637_v41  ;;  %v10644_v36 = vpop.f32.mrb[35].mxu1  ;;  %7214 = vmatmul.mubr.msk.f32.gmra.mrb[140].mxu1 %vm1348_vm1, %v15472_v3  ;;  %7119 = vmatprep.mubr.msk.f32.mxu0 %vm1348_vm1, %v15473_v48 }
 0x49a   : > { %v3256_v62 = vmax.f32 %v10635_v30, %v10644_v36  ;;  %7215 = vmatprep.mubr.msk.f32.mxu1 %vm1348_vm1, %v15474_v60  ;;  %7529 = vmatprep.subr.bf16.mxu0 %v14512_v10 }
 0x49b   : > { %3254 = vmax.xlane.f32.xlu0 %v3253_v0  ;;  %3161 = vmax.xlane.f32.xlu1 %v3160_v12  ;;  %v10655_v46 = vpop.f32.mrb[20].mxu0 }
 0x49c   : > { %v10657_v43 = vpop.f32.mrb[36].mxu1  ;;  %v10659_v14 = vpop.f32.mrb[21].mxu0  ;;  %7120 = vmatmul.mubr.msk.f32.gmra.mrb[126].mxu0 %vm1348_vm1, %v15473_v48  ;;  %7577 = vmatprep.subr.bf16.mxu1 %v14512_v10 }
 0x49d   : > { %15475 = vst [vmem:[#allocation34_spill] sm:$0xff] %v10657_v43  ;;  %v3163_v8 = vmax.f32 %v10655_v46, %v10659_v14  ;;  %v10665_v5 = vpop.f32.mrb[37].mxu1  ;;  %7216 = vmatmul.mubr.msk.f32.gmra.mrb[142].mxu1 %vm1348_vm1, %v15474_v60  ;;  %7121 = vmatprep.mubr.msk.f32.mxu0 %vm1348_vm1, %v15477_v35 }
 0x49e   : > { %15476 = vst [vmem:[#allocation23_spill] sm:$0xff] %v10665_v5  ;;  %v3259_v16 = vmax.f32 %v10657_v43, %v10665_v5  ;;  %7217 = vmatprep.mubr.msk.f32.mxu1 %vm1348_vm1, %v15478_v44 }
 0x49f   : > { %3257 = vmax.xlane.f32.xlu0 %v3256_v62  ;;  %3164 = vmax.xlane.f32.xlu1 %v3163_v8  ;;  %v10675_v29 = vpop.f32.mrb[22].mxu0  ;;  %v15490_v8 = vld [vmem:[#allocation99_spill] sm:$0xff] }
 0x4a0   : > { %15479 = vst [vmem:[#allocation35_spill] sm:$0xff] %v10675_v29  ;;  %v10677_v23 = vpop.f32.mrb[38].mxu1  ;;  %v10679_v27 = vpop.f32.mrb[23].mxu0  ;;  %7122 = vmatmul.mubr.msk.f32.gmra.mrb[128].mxu0 %vm1348_vm1, %v15477_v35 }
 0x4a1   : > { %15480 = vst [vmem:[#allocation24_spill] sm:$0xff] %v10677_v23  ;;  %15481 = vst [vmem:[#allocation36_spill] sm:$0xff] %v10679_v27  ;;  %v3166_v0 = vmax.f32 %v10675_v29, %v10679_v27  ;;  %v10685_v3 = vpop.f32.mrb[39].mxu1  ;;  %7218 = vmatmul.mubr.msk.f32.gmra.mrb[144].mxu1 %vm1348_vm1, %v15478_v44  ;;  %7123 = vmatprep.mubr.msk.f32.mxu0 %vm1348_vm1, %v15483_v18 }
 0x4a2   : > { %15482 = vst [vmem:[#allocation25_spill] sm:$0xff] %v10685_v3  ;;  %v3262_v58 = vmax.f32 %v10677_v23, %v10685_v3  ;;  %7219 = vmatprep.mubr.msk.f32.mxu1 %vm1348_vm1, %v15484_v56 }
 0x4a3   : > { %3260 = vmax.xlane.f32.xlu0 %v3259_v16  ;;  %3167 = vmax.xlane.f32.xlu1 %v3166_v0  ;;  %v10696_v24 = vpop.f32.mrb[24].mxu0 }
 0x4a4   : > { %15485 = vst [vmem:[#allocation37_spill] sm:$0xff] %v10696_v24  ;;  %v10698_v12 = vpop.f32.mrb[40].mxu1  ;;  %v10700_v48 = vpop.f32.mrb[25].mxu0  ;;  %7124 = vmatmul.mubr.msk.f32.gmra.mrb[130].mxu0 %vm1348_vm1, %v15483_v18 }
 0x4a5   : > { %15486 = vst [vmem:[#allocation38_spill] sm:$0xff] %v10698_v12  ;;  %15487 = vst [vmem:[#allocation70_spill] sm:$0xff] %v10700_v48  ;;  %v3169_v62 = vmax.f32 %v10696_v24, %v10700_v48  ;;  %v10707_v60 = vpop.f32.mrb[41].mxu1  ;;  %7220 = vmatmul.mubr.msk.f32.gmra.mrb[146].mxu1 %vm1348_vm1, %v15484_v56  ;;  %7125 = vmatprep.mubr.msk.f32.mxu0 %vm1348_vm1, %v15489_v61  ;;  %v15493_v56 = vld [vmem:[#allocation69_spill] sm:$0xff] }
 0x4a6   : > { %15488 = vst [vmem:[#allocation40_spill] sm:$0xff] %v10707_v60  ;;  %v3265_v38 = vmax.f32 %v10698_v12, %v10707_v60  ;;  %7221 = vmatprep.mubr.msk.f32.mxu1 %vm1348_vm1, %v15490_v8 }
 0x4a7   : > { %3263 = vmax.xlane.f32.xlu0 %v3262_v58  ;;  %3170 = vmax.xlane.f32.xlu1 %v3169_v62  ;;  %v10717_v35 = vpop.f32.mrb[26].mxu0  ;;  %v15494_v62 = vld [vmem:[#allocation101_spill] sm:$0xff] }
 0x4a8   : > { %15491 = vst [vmem:[#allocation72_spill] sm:$0xff] %v10717_v35  ;;  %v10719_v16 = vpop.f32.mrb[42].mxu1  ;;  %v10721_v44 = vpop.f32.mrb[27].mxu0  ;;  %7126 = vmatmul.mubr.msk.f32.gmra.mrb[132].mxu0 %vm1348_vm1, %v15489_v61 }
 0x4a9   : > { %15492 = vst [vmem:[#allocation42_spill] sm:$0xff] %v10721_v44  ;;  %v3172_v0 = vmax.f32 %v10717_v35, %v10721_v44  ;;  %v10727_v18 = vpop.f32.mrb[43].mxu1  ;;  %7222 = vmatmul.mubr.msk.f32.gmra.mrb[148].mxu1 %vm1348_vm1, %v15490_v8  ;;  %7127 = vmatprep.mubr.msk.f32.mxu0 %vm1348_vm1, %v15493_v56 }
 0x4aa   : > { %v3268_v58 = vmax.f32 %v10719_v16, %v10727_v18  ;;  %7223 = vmatprep.mubr.msk.f32.mxu1 %vm1348_vm1, %v15494_v62 }
 0x4ab   : > { %3266 = vmax.xlane.f32.xlu0 %v3265_v38  ;;  %3173 = vmax.xlane.f32.xlu1 %v3172_v0  ;;  %v10737_v61 = vpop.f32.mrb[28].mxu0 }
 0x4ac   : > { %15495 = vst [vmem:[#allocation74_spill] sm:$0xff] %v10737_v61  ;;  %v10739_v10 = vpop.f32.mrb[44].mxu1  ;;  %v10741_v28 = vpop.f32.mrb[29].mxu0  ;;  %7128 = vmatmul.mubr.msk.f32.gmra.mrb[134].mxu0 %vm1348_vm1, %v15493_v56 }
 0x4ad   : > { %15496 = vst [vmem:[#allocation44_spill] sm:$0xff] %v10739_v10  ;;  %15497 = vst [vmem:[#allocation76_spill] sm:$0xff] %v10741_v28  ;;  %v3175_v8 = vmax.f32 %v10737_v61, %v10741_v28  ;;  %v10747_v37 = vpop.f32.mrb[45].mxu1  ;;  %7224 = vmatmul.mubr.msk.f32.gmra.mrb[150].mxu1 %vm1348_vm1, %v15494_v62 }
 0x4ae   : > { %15498 = vst [vmem:[#allocation46_spill] sm:$0xff] %v10747_v37  ;;  %v3271_v38 = vmax.f32 %v10739_v10, %v10747_v37 }
 0x4af   : > { %3269 = vmax.xlane.f32.xlu0 %v3268_v58  ;;  %3176 = vmax.xlane.f32.xlu1 %v3175_v8  ;;  %v10753_v0 = vpop.f32.mrb[30].mxu0 }
 0x4b0   : > { %15499 = vst [vmem:[#allocation78_spill] sm:$0xff] %v10753_v0  ;;  %v10755_v49 = vpop.f32.mrb[46].mxu1  ;;  %v10757_v26 = vpop.f32.mrb[31].mxu0 }
 0x4b1   : > { %15500 = vst [vmem:[#allocation48_spill] sm:$0xff] %v10755_v49  ;;  %15501 = vst [vmem:[#allocation80_spill] sm:$0xff] %v10757_v26  ;;  %v3178_v56 = vmax.f32 %v10753_v0, %v10757_v26  ;;  %v10761_v20 = vpop.f32.mrb[47].mxu1 }
 0x4b2   : > { %15502 = vst [vmem:[#allocation50_spill] sm:$0xff] %v10761_v20  ;;  %v3274_v25 = vmax.f32 %v10755_v49, %v10761_v20 }
 0x4b3   : > { %3272 = vmax.xlane.f32.xlu0 %v3271_v38  ;;  %3179 = vmax.xlane.f32.xlu1 %v3178_v56  ;;  %v10765_v62 = vpop.f32.mrb[32].mxu0 }
 0x4b4   : > { %15503 = vst [vmem:[#allocation82_spill] sm:$0xff] %v10765_v62  ;;  %v10767_v58 = vpop.f32.mrb[48].mxu1  ;;  %v10769_v8 = vpop.f32.mrb[33].mxu0 }
 0x4b5   : > { %15504 = vst [vmem:[#allocation52_spill] sm:$0xff] %v10767_v58  ;;  %15505 = vst [vmem:[#allocation84_spill] sm:$0xff] %v10769_v8  ;;  %v3181_v1 = vmax.f32 %v10765_v62, %v10769_v8  ;;  %v10773_v6 = vpop.f32.mrb[49].mxu1 }
 0x4b6   : > { %15506 = vst [vmem:[#allocation54_spill] sm:$0xff] %v10773_v6  ;;  %v3277_v22 = vmax.f32 %v10767_v58, %v10773_v6 }
 0x4b7   : > { %3275 = vmax.xlane.f32.xlu0 %v3274_v25  ;;  %3182 = vmax.xlane.f32.xlu1 %v3181_v1  ;;  %v10777_v59 = vpop.f32.mrb[34].mxu0 }
 0x4b8   : > { %15507 = vst [vmem:[#allocation86_spill] sm:$0xff] %v10777_v59  ;;  %v10779_v38 = vpop.f32.mrb[50].mxu1  ;;  %v10781_v56 = vpop.f32.mrb[35].mxu0 }
 0x4b9   : > { %15508 = vst [vmem:[#allocation56_spill] sm:$0xff] %v10779_v38  ;;  %15509 = vst [vmem:[#allocation88_spill] sm:$0xff] %v10781_v56  ;;  %v3184_v13 = vmax.f32 %v10777_v59, %v10781_v56  ;;  %v10785_v40 = vpop.f32.mrb[51].mxu1 }
 0x4ba   : > { %15510 = vst [vmem:[#allocation58_spill] sm:$0xff] %v10785_v40  ;;  %v3280_v54 = vmax.f32 %v10779_v38, %v10785_v40 }
 0x4bb   : > { %3278 = vmax.xlane.f32.xlu0 %v3277_v22  ;;  %3185 = vmax.xlane.f32.xlu1 %v3184_v13  ;;  %v10789_v57 = vpop.f32.mrb[36].mxu0 }
 0x4bc   : > { %15511 = vst [vmem:[#allocation90_spill] sm:$0xff] %v10789_v57  ;;  %v10791_v25 = vpop.f32.mrb[52].mxu1  ;;  %v10793_v1 = vpop.f32.mrb[37].mxu0 }
 0x4bd   : > { %15512 = vst [vmem:[#allocation60_spill] sm:$0xff] %v10791_v25  ;;  %15513 = vst [vmem:[#allocation92_spill] sm:$0xff] %v10793_v1  ;;  %v3187_v52 = vmax.f32 %v10789_v57, %v10793_v1  ;;  %v10797_v7 = vpop.f32.mrb[53].mxu1 }
 0x4be   : > { %15514 = vst [vmem:[#allocation62_spill] sm:$0xff] %v10797_v7  ;;  %v3283_v56 = vmax.f32 %v10791_v25, %v10797_v7 }
 0x4bf   : > { %3281 = vmax.xlane.f32.xlu0 %v3280_v54  ;;  %3188 = vmax.xlane.f32.xlu1 %v3187_v52  ;;  %v10801_v59 = vpop.f32.mrb[38].mxu0 }
 0x4c0   : > { %15515 = vst [vmem:[#allocation94_spill] sm:$0xff] %v10801_v59  ;;  %v10803_v22 = vpop.f32.mrb[54].mxu1  ;;  %v10805_v13 = vpop.f32.mrb[39].mxu0 }
 0x4c1   : > { %15516 = vst [vmem:[#allocation64_spill] sm:$0xff] %v10803_v22  ;;  %15517 = vst [vmem:[#allocation96_spill] sm:$0xff] %v10805_v13  ;;  %v3190_v8 = vmax.f32 %v10801_v59, %v10805_v13  ;;  %v10809_v62 = vpop.f32.mrb[55].mxu1 }
 0x4c2   : > { %15518 = vst [vmem:[#allocation66_spill] sm:$0xff] %v10809_v62  ;;  %v3286_v1 = vmax.f32 %v10803_v22, %v10809_v62 }
 0x4c3   : > { %3284 = vmax.xlane.f32.xlu0 %v3283_v56  ;;  %3191 = vmax.xlane.f32.xlu1 %v3190_v8  ;;  %v10813_v57 = vpop.f32.mrb[40].mxu0 }
 0x4c4   : > { %15519 = vst [vmem:[#allocation98_spill] sm:$0xff] %v10813_v57  ;;  %v10815_v54 = vpop.f32.mrb[56].mxu1  ;;  %v10817_v52 = vpop.f32.mrb[41].mxu0 }
 0x4c5   : > { %15520 = vst [vmem:[#allocation68_spill] sm:$0xff] %v10815_v54  ;;  %15521 = vst [vmem:[#allocation100_spill] sm:$0xff] %v10817_v52  ;;  %v3193_v40 = vmax.f32 %v10813_v57, %v10817_v52  ;;  %v10821_v38 = vpop.f32.mrb[57].mxu1 }
 0x4c6   : > { %15522 = vst [vmem:[#allocation39_spill] sm:$0xff] %v10821_v38  ;;  %v3289_v13 = vmax.f32 %v10815_v54, %v10821_v38 }
 0x4c7   : > { %3287 = vmax.xlane.f32.xlu0 %v3286_v1  ;;  %3194 = vmax.xlane.f32.xlu1 %v3193_v40  ;;  %v10825_v59 = vpop.f32.mrb[42].mxu0 }
 0x4c8   : > { %15523 = vst [vmem:[#allocation71_spill] sm:$0xff] %v10825_v59  ;;  %v10827_v56 = vpop.f32.mrb[58].mxu1  ;;  %v10829_v8 = vpop.f32.mrb[43].mxu0 }
 0x4c9   : > { %15524 = vst [vmem:[#allocation41_spill] sm:$0xff] %v10827_v56  ;;  %15525 = vst [vmem:[#allocation73_spill] sm:$0xff] %v10829_v8  ;;  %v3196_v26 = vmax.f32 %v10825_v59, %v10829_v8  ;;  %v10833_v0 = vpop.f32.mrb[59].mxu1 }
 0x4ca   : > { %15526 = vst [vmem:[#allocation43_spill] sm:$0xff] %v10833_v0  ;;  %v3292_v52 = vmax.f32 %v10827_v56, %v10833_v0 }
 0x4cb   : > { %3290 = vmax.xlane.f32.xlu0 %v3289_v13  ;;  %3197 = vmax.xlane.f32.xlu1 %v3196_v26  ;;  %v10837_v57 = vpop.f32.mrb[44].mxu0 }
 0x4cc   : > { %15527 = vst [vmem:[#allocation75_spill] sm:$0xff] %v10837_v57  ;;  %v10839_v1 = vpop.f32.mrb[60].mxu1  ;;  %v10841_v40 = vpop.f32.mrb[45].mxu0 }
 0x4cd   : > { %15528 = vst [vmem:[#allocation45_spill] sm:$0xff] %v10839_v1  ;;  %15529 = vst [vmem:[#allocation77_spill] sm:$0xff] %v10841_v40  ;;  %v3199_v28 = vmax.f32 %v10837_v57, %v10841_v40  ;;  %v10845_v61 = vpop.f32.mrb[61].mxu1 }
 0x4ce   : > { %15530 = vst [vmem:[#allocation47_spill] sm:$0xff] %v10845_v61  ;;  %v3295_v8 = vmax.f32 %v10839_v1, %v10845_v61 }
 0x4cf   : > { %3293 = vmax.xlane.f32.xlu0 %v3292_v52  ;;  %3200 = vmax.xlane.f32.xlu1 %v3199_v28  ;;  %v10849_v59 = vpop.f32.mrb[46].mxu0 }
 0x4d0   : > { %15531 = vst [vmem:[#allocation79_spill] sm:$0xff] %v10849_v59  ;;  %v10851_v13 = vpop.f32.mrb[62].mxu1  ;;  %v10853_v26 = vpop.f32.mrb[47].mxu0 }
 0x4d1   : > { %15532 = vst [vmem:[#allocation49_spill] sm:$0xff] %v10851_v13  ;;  %15533 = vst [vmem:[#allocation81_spill] sm:$0xff] %v10853_v26  ;;  %v3202_v6 = vmax.f32 %v10849_v59, %v10853_v26  ;;  %v10857_v58 = vpop.f32.mrb[63].mxu1 }
 0x4d2   : > { %15534 = vst [vmem:[#allocation51_spill] sm:$0xff] %v10857_v58  ;;  %v3298_v40 = vmax.f32 %v10851_v13, %v10857_v58 }
 0x4d3   : > { %3296 = vmax.xlane.f32.xlu0 %v3295_v8  ;;  %v10861_v57 = vpop.f32.mrb[48].mxu0 }
 0x4d4   : > { %15535 = vst [vmem:[#allocation83_spill] sm:$0xff] %v10861_v57  ;;  %v10863_v44 = vpop.f32.mrb[64].mxu1  ;;  %v10865_v28 = vpop.f32.mrb[49].mxu0 }
 0x4d5   : > { %15536 = vst [vmem:[#allocation53_spill] sm:$0xff] %v10863_v44  ;;  %15537 = vst [vmem:[#allocation85_spill] sm:$0xff] %v10865_v28  ;;  %v3205_v52 = vmax.f32 %v10861_v57, %v10865_v28  ;;  %v10869_v35 = vpop.f32.mrb[65].mxu1 }
 0x4d6   : > { %15538 = vst [vmem:[#allocation55_spill] sm:$0xff] %v10869_v35  ;;  %v3301_v20 = vmax.f32 %v10863_v44, %v10869_v35 }
 0x4d7   : > { %3203 = vmax.xlane.f32.xlu0 %v3202_v6  ;;  %v10873_v49 = vpop.f32.mrb[50].mxu0 }
 0x4d8   : > { %15539 = vst [vmem:[#allocation87_spill] sm:$0xff] %v10873_v49  ;;  %v10875_v60 = vpop.f32.mrb[66].mxu1  ;;  %v10877_v8 = vpop.f32.mrb[51].mxu0 }
 0x4d9   : > { %15540 = vst [vmem:[#allocation57_spill] sm:$0xff] %v10875_v60  ;;  %15541 = vst [vmem:[#allocation89_spill] sm:$0xff] %v10877_v8  ;;  %v3208_v12 = vmax.f32 %v10873_v49, %v10877_v8  ;;  %v10881_v58 = vpop.f32.mrb[67].mxu1 }
 0x4da   : > { %15542 = vst [vmem:[#allocation59_spill] sm:$0xff] %v10881_v58  ;;  %v3304_v28 = vmax.f32 %v10875_v60, %v10881_v58 }
 0x4db   : > { %3299 = vmax.xlane.f32.xlu0 %v3298_v40  ;;  %v10885_v57 = vpop.f32.mrb[52].mxu0 }
 0x4dc   : > { %15543 = vst [vmem:[#allocation91_spill] sm:$0xff] %v10885_v57  ;;  %v10887_v13 = vpop.f32.mrb[68].mxu1  ;;  %v10889_v6 = vpop.f32.mrb[53].mxu0 }
 0x4dd   : > { %15544 = vst [vmem:[#allocation61_spill] sm:$0xff] %v10887_v13  ;;  %15545 = vst [vmem:[#allocation93_spill] sm:$0xff] %v10889_v6  ;;  %v3211_v35 = vmax.f32 %v10885_v57, %v10889_v6  ;;  %v10893_v44 = vpop.f32.mrb[69].mxu1 }
 0x4de   : > { %15546 = vst [vmem:[#allocation63_spill] sm:$0xff] %v10893_v44  ;;  %v3307_v8 = vmax.f32 %v10887_v13, %v10893_v44 }
 0x4df   : > { %3206 = vmax.xlane.f32.xlu0 %v3205_v52  ;;  %v10897_v49 = vpop.f32.mrb[54].mxu0 }
 0x4e0   : > { %15547 = vst [vmem:[#allocation95_spill] sm:$0xff] %v10897_v49  ;;  %v10899_v48 = vpop.f32.mrb[70].mxu1  ;;  %v10901_v40 = vpop.f32.mrb[55].mxu0 }
 0x4e1   : > { %15548 = vst [vmem:[#allocation65_spill] sm:$0xff] %v10899_v48  ;;  %15549 = vst [vmem:[#allocation97_spill] sm:$0xff] %v10901_v40  ;;  %v3214_v58 = vmax.f32 %v10897_v49, %v10901_v40  ;;  %v10905_v60 = vpop.f32.mrb[71].mxu1 }
 0x4e2   : > { %15550 = vst [vmem:[#allocation67_spill] sm:$0xff] %v10905_v60  ;;  %v3310_v6 = vmax.f32 %v10899_v48, %v10905_v60 }
 0x4e3   : > { %3302 = vmax.xlane.f32.xlu0 %v3301_v20  ;;  %v10909_v57 = vpop.f32.mrb[56].mxu0 }
 0x4e4   : > { %15551 = vst [vmem:[#allocation99_spill] sm:$0xff] %v10909_v57  ;;  %v10911_v24 = vpop.f32.mrb[72].mxu1  ;;  %v10913_v52 = vpop.f32.mrb[57].mxu0 }
 0x4e5   : > { %15552 = vst [vmem:[#allocation69_spill] sm:$0xff] %v10911_v24  ;;  %15553 = vst [vmem:[#allocation101_spill] sm:$0xff] %v10913_v52  ;;  %v3217_v44 = vmax.f32 %v10909_v57, %v10913_v52  ;;  %v10917_v13 = vpop.f32.mrb[73].mxu1 }
 0x4e6   : > { %15554 = vst [vmem:[#allocation102_spill] sm:$0xff] %v10917_v13  ;;  %v3313_v40 = vmax.f32 %v10911_v24, %v10917_v13 }
 0x4e7   : > { %3209 = vmax.xlane.f32.xlu0 %v3208_v12  ;;  %v10921_v49 = vpop.f32.mrb[58].mxu0 }
 0x4e8   : > { %15555 = vst [vmem:[#allocation103_spill] sm:$0xff] %v10921_v49  ;;  %v10923_v26 = vpop.f32.mrb[74].mxu1  ;;  %v10925_v20 = vpop.f32.mrb[59].mxu0 }
 0x4e9   : > { %15556 = vst [vmem:[#allocation104_spill] sm:$0xff] %v10923_v26  ;;  %15557 = vst [vmem:[#allocation105_spill] sm:$0xff] %v10925_v20  ;;  %v3220_v60 = vmax.f32 %v10921_v49, %v10925_v20  ;;  %v10929_v48 = vpop.f32.mrb[75].mxu1 }
 0x4ea   : > { %15558 = vst [vmem:[#allocation106_spill] sm:$0xff] %v10929_v48 }
 0x4eb   : > { %3305 = vmax.xlane.f32.xlu0 %v3304_v28  ;;  %v10933_v57 = vpop.f32.mrb[60].mxu0 }
 0x4ec   : > { %15559 = vst [vmem:[#allocation107_spill] sm:$0xff] %v10933_v57  ;;  %v10935_v59 = vpop.f32.mrb[76].mxu1  ;;  %v10937_v12 = vpop.f32.mrb[61].mxu0 }
 0x4ed   : > { %15560 = vst [vmem:[#allocation108_spill] sm:$0xff] %v10935_v59  ;;  %15561 = vst [vmem:[#allocation109_spill] sm:$0xff] %v10937_v12  ;;  %v10941_v24 = vpop.f32.mrb[77].mxu1 }
 0x4ee   : > { %15562 = vst [vmem:[#allocation110_spill] sm:$0xff] %v10941_v24 }
 0x4ef   : > { %3212 = vmax.xlane.f32.xlu0 %v3211_v35  ;;  %v10945_v49 = vpop.f32.mrb[62].mxu0 }
 0x4f0   : > { %15563 = vst [vmem:[#allocation111_spill] sm:$0xff] %v10945_v49  ;;  %v10947_v37 = vpop.f32.mrb[78].mxu1  ;;  %v10949_v28 = vpop.f32.mrb[63].mxu0 }
 0x4f1   : > { %15564 = vst [vmem:[#allocation112_spill] sm:$0xff] %v10947_v37  ;;  %15565 = vst [vmem:[#allocation113_spill] sm:$0xff] %v10949_v28  ;;  %v3226_v52 = vmax.f32 %v10945_v49, %v10949_v28  ;;  %v10953_v10 = vpop.f32.mrb[79].mxu1 }
 0x4f2   : > { %15566 = vst [vmem:[#allocation114_spill] sm:$0xff] %v10953_v10  ;;  %v3322_v13 = vmax.f32 %v10947_v37, %v10953_v10 }
 0x4f3   : > { %3308 = vmax.xlane.f32.xlu0 %v3307_v8  ;;  %3227 = vmax.xlane.f32.xlu1 %v3226_v52  ;;  %v10957_v3 = vpop.f32.mrb[64].mxu0 }
 0x4f4   : > { %15567 = vst [vmem:[#allocation115_spill] sm:$0xff] %v10957_v3  ;;  %v10959_v20 = vpop.f32.mrb[80].mxu1  ;;  %v10961_v35 = vpop.f32.mrb[65].mxu0 }
 0x4f5   : > { %15568 = vst [vmem:[#allocation116_spill] sm:$0xff] %v10959_v20  ;;  %15569 = vst [vmem:[#allocation117_spill] sm:$0xff] %v10961_v35  ;;  %v3229_v61 = vmax.f32 %v10957_v3, %v10961_v35  ;;  %v10965_v1 = vpop.f32.mrb[81].mxu1 }
 0x4f6   : > { %15570 = vst [vmem:[#allocation118_spill] sm:$0xff] %v10965_v1  ;;  %v3325_v28 = vmax.f32 %v10959_v20, %v10965_v1 }
 0x4f7   : > { %3215 = vmax.xlane.f32.xlu0 %v3214_v58  ;;  %3323 = vmax.xlane.f32.xlu1 %v3322_v13  ;;  %v10969_v49 = vpop.f32.mrb[66].mxu0 }
 0x4f8   : > { %15571 = vst [vmem:[#allocation119_spill] sm:$0xff] %v10969_v49  ;;  %v10971_v8 = vpop.f32.mrb[82].mxu1  ;;  %v10973_v52 = vpop.f32.mrb[67].mxu0 }
 0x4f9   : > { %15572 = vst [vmem:[#allocation120_spill] sm:$0xff] %v10971_v8  ;;  %15573 = vst [vmem:[#allocation121_spill] sm:$0xff] %v10973_v52  ;;  %v3232_v10 = vmax.f32 %v10969_v49, %v10973_v52  ;;  %v10977_v37 = vpop.f32.mrb[83].mxu1 }
 0x4fa   : > { %15574 = vst [vmem:[#allocation122_spill] sm:$0xff] %v10977_v37  ;;  %v3328_v35 = vmax.f32 %v10971_v8, %v10977_v37 }
 0x4fb   : > { %3311 = vmax.xlane.f32.xlu0 %v3310_v6  ;;  %3230 = vmax.xlane.f32.xlu1 %v3229_v61  ;;  %v10981_v3 = vpop.f32.mrb[68].mxu0 }
 0x4fc   : > { %15575 = vst [vmem:[#allocation123_spill] sm:$0xff] %v10981_v3  ;;  %v10983_v58 = vpop.f32.mrb[84].mxu1  ;;  %v10985_v13 = vpop.f32.mrb[69].mxu0 }
 0x4fd   : > { %15576 = vst [vmem:[#allocation124_spill] sm:$0xff] %v10983_v58  ;;  %15577 = vst [vmem:[#allocation125_spill] sm:$0xff] %v10985_v13  ;;  %v3235_v1 = vmax.f32 %v10981_v3, %v10985_v13  ;;  %v10989_v20 = vpop.f32.mrb[85].mxu1 }
 0x4fe   : > { %15578 = vst [vmem:[#allocation126_spill] sm:$0xff] %v10989_v20  ;;  %v3331_v52 = vmax.f32 %v10983_v58, %v10989_v20 }
 0x4ff   : > { %3218 = vmax.xlane.f32.xlu0 %v3217_v44  ;;  %3326 = vmax.xlane.f32.xlu1 %v3325_v28  ;;  %v10993_v49 = vpop.f32.mrb[70].mxu0 }
 0x500   : > { %15579 = vst [vmem:[#allocation127_spill] sm:$0xff] %v10993_v49  ;;  %v10995_v6 = vpop.f32.mrb[86].mxu1  ;;  %v10997_v61 = vpop.f32.mrb[71].mxu0 }
 0x501   : > { %15580 = vst [vmem:[#allocation128_spill] sm:$0xff] %v10995_v6  ;;  %15581 = vst [vmem:[#allocation129_spill] sm:$0xff] %v10997_v61  ;;  %v3238_v37 = vmax.f32 %v10993_v49, %v10997_v61  ;;  %v11001_v8 = vpop.f32.mrb[87].mxu1 }
 0x502   : > { %15582 = vst [vmem:[#allocation130_spill] sm:$0xff] %v11001_v8  ;;  %v3334_v13 = vmax.f32 %v10995_v6, %v11001_v8 }
 0x503   : > { %3314 = vmax.xlane.f32.xlu0 %v3313_v40  ;;  %3233 = vmax.xlane.f32.xlu1 %v3232_v10  ;;  %v11005_v3 = vpop.f32.mrb[72].mxu0 }
 0x504   : > { %15583 = vst [vmem:[#allocation131_spill] sm:$0xff] %v11005_v3  ;;  %v11007_v44 = vpop.f32.mrb[88].mxu1  ;;  %v11009_v28 = vpop.f32.mrb[73].mxu0 }
 0x505   : > { %15584 = vst [vmem:[#allocation132_spill] sm:$0xff] %v11007_v44  ;;  %15585 = vst [vmem:[#allocation133_spill] sm:$0xff] %v11009_v28  ;;  %v3337_v20 = vmax.f32 %v11005_v3, %v11009_v28  ;;  %v11013_v58 = vpop.f32.mrb[89].mxu1  ;;  %v15591_v3 = vmax.f32 %v10923_v26, %v10929_v48 }
 0x506   : > { %15586 = vst [vmem:[#allocation134_spill] sm:$0xff] %v11013_v58  ;;  %v3433_v61 = vmax.f32 %v11007_v44, %v11013_v58 }
 0x507   : > { %3221 = vmax.xlane.f32.xlu0 %v3220_v60  ;;  %3329 = vmax.xlane.f32.xlu1 %v3328_v35  ;;  %v11017_v49 = vpop.f32.mrb[74].mxu0 }
 0x508   : > { %15587 = vst [vmem:[#allocation135_spill] sm:$0xff] %v11017_v49  ;;  %v11019_v40 = vpop.f32.mrb[90].mxu1  ;;  %v11021_v10 = vpop.f32.mrb[75].mxu0 }
 0x509   : > { %15588 = vst [vmem:[#allocation136_spill] sm:$0xff] %v11019_v40  ;;  %15589 = vst [vmem:[#allocation137_spill] sm:$0xff] %v11021_v10  ;;  %v11025_v6 = vpop.f32.mrb[91].mxu1 }
 0x50a   : > { %15590 = vst [vmem:[#allocation138_spill] sm:$0xff] %v11025_v6  ;;  %v3436_v28 = vmax.f32 %v11019_v40, %v11025_v6  ;;  %v15596_v6 = vmax.f32 %v10933_v57, %v10937_v12 }
 0x50b   : > { %3317 = vmax.xlane.f32.xlu0 %v15591_v3  ;;  %3236 = vmax.xlane.f32.xlu1 %v3235_v1  ;;  %v11032_v60 = vpop.f32.mrb[76].mxu0 }
 0x50c   : > { %15592 = vst [vmem:[#allocation139_spill] sm:$0xff] %v11032_v60  ;;  %v11034_v35 = vpop.f32.mrb[92].mxu1  ;;  %v11036_v58 = vpop.f32.mrb[77].mxu0 }
 0x50d   : > { %15593 = vst [vmem:[#allocation140_spill] sm:$0xff] %v11034_v35  ;;  %15594 = vst [vmem:[#allocation141_spill] sm:$0xff] %v11036_v58  ;;  %v11040_v8 = vpop.f32.mrb[93].mxu1 }
 0x50e   : > { %15595 = vst [vmem:[#allocation142_spill] sm:$0xff] %v11040_v8  ;;  %v3439_v23 = vmax.f32 %v11034_v35, %v11040_v8  ;;  %v15601_v8 = vmax.f32 %v10935_v59, %v10941_v24 }
 0x50f   : > { %3224 = vmax.xlane.f32.xlu0 %v15596_v6  ;;  %3332 = vmax.xlane.f32.xlu1 %v3331_v52  ;;  %v11047_v3 = vpop.f32.mrb[78].mxu0 }
 0x510   : > { %15597 = vst [vmem:[#allocation143_spill] sm:$0xff] %v11047_v3  ;;  %v11049_v1 = vpop.f32.mrb[94].mxu1  ;;  %v11051_v40 = vpop.f32.mrb[79].mxu0 }
 0x511   : > { %15598 = vst [vmem:[#allocation144_spill] sm:$0xff] %v11049_v1  ;;  %15599 = vst [vmem:[#allocation145_spill] sm:$0xff] %v11051_v40  ;;  %v11055_v44 = vpop.f32.mrb[95].mxu1 }
 0x512   : > { %15600 = vst [vmem:[#allocation146_spill] sm:$0xff] %v11055_v44  ;;  %v3442_v26 = vmax.f32 %v11049_v1, %v11055_v44 }
 0x513   : > { %3320 = vmax.xlane.f32.xlu0 %v15601_v8  ;;  %3239 = vmax.xlane.f32.xlu1 %v3238_v37  ;;  %v11062_v52 = vpop.f32.mrb[80].mxu0 }
 0x514   : > { %15602 = vst [vmem:[#allocation147_spill] sm:$0xff] %v11062_v52  ;;  %v11064_v6 = vpop.f32.mrb[96].mxu1  ;;  %v3147_v12 = vpop.xlane.xlu0 %3146 }
 0x515   : > { %15603 = vst [vmem:[#allocation148_spill] sm:$0xff] %v11064_v6  ;;  %v11066_v57 = vpop.f32.mrb[97].mxu1  ;;  %v11070_v35 = vpop.f32.mrb[81].mxu0  ;;  %v3529_v44 = vsub.f32 %v10521_v15, %v3147_v12  ;;  %v3530_v8 = vsub.f32 %v10525_v9, %v3147_v12 }
 0x516   : > { %15604 = vst [vmem:[#allocation149_spill] sm:$0xff] %v11066_v57  ;;  %v3445_v48 = vmax.f32 %v11064_v6, %v11066_v57  ;;  %15605 = vst [vmem:[#allocation150_spill] sm:$0xff] %v11070_v35  ;;  %v3243_v0 = vpop.xlane.xlu1 %3242 }
 0x517   : > { %3437 = vmax.xlane.f32.xlu0 %v3436_v28  ;;  %3335 = vmax.xlane.f32.xlu1 %v3334_v13  ;;  %v11075_v37 = vpop.f32.mrb[82].mxu0  ;;  %v3785_v1 = vmul.f32 1.442695, %v3529_v44  ;;  %v3787_v28 = vmul.f32 1.442695, %v3530_v8  ;;  %v3593_v44 = vsub.f32 %v10523_v39, %v3243_v0  ;;  %v3594_v8 = vsub.f32 %v10529_v19, %v3243_v0 }
 0x518   : > { %15606 = vst [vmem:[#allocation151_spill] sm:$0xff] %v11075_v37  ;;  %v11078_v24 = vpop.f32.mrb[98].mxu1  ;;  %v3150_v59 = vpop.xlane.xlu0 %3149  ;;  %v15618_v0 = vmax.f32 %v11017_v49, %v11021_v10 }
 0x519   : > { %15607 = vst [vmem:[#allocation152_spill] sm:$0xff] %v11078_v24  ;;  %v11080_v56 = vpop.f32.mrb[99].mxu1  ;;  %v11082_v57 = vpop.f32.mrb[83].mxu0  ;;  %8491 = vpow2.f32 %v3785_v1  ;;  %v3532_v54 = vsub.f32 %v10547_v34, %v3150_v59 }
 0x51a   : > { %15608 = vst [vmem:[#allocation153_spill] sm:$0xff] %v11080_v56  ;;  %15609 = vst [vmem:[#allocation154_spill] sm:$0xff] %v11082_v57  ;;  %v3448_v6 = vmax.f32 %v11078_v24, %v11080_v56  ;;  %8493 = vpow2.f32 %v3787_v28 }
 0x51b   : > { %3440 = vmax.xlane.f32.xlu0 %v3439_v23  ;;  %3338 = vmax.xlane.f32.xlu1 %v3337_v20  ;;  %v11088_v13 = vpop.f32.mrb[84].mxu0  ;;  %v3915_v23 = vmul.f32 1.442695, %v3594_v8  ;;  %v3791_v10 = vmul.f32 1.442695, %v3532_v54 }
 0x51c   : > { %15610 = vst [vmem:[#allocation155_spill] sm:$0xff] %v11088_v13  ;;  %v11090_v9 = vpop.f32.mrb[100].mxu1  ;;  %v11092_v12 = vpop.xlane.xlu0 %3245 }
 0x51d   : > { %15611 = vst [vmem:[#allocation156_spill] sm:$0xff] %v11090_v9  ;;  %v11094_v27 = vpop.f32.mrb[101].mxu1  ;;  %v11096_v29 = vpop.xlane.xlu1 %3152 }
 0x51e   : > { %15612 = vst [vmem:[#allocation157_spill] sm:$0xff] %v11094_v27  ;;  %v3451_v56 = vmax.f32 %v11090_v9, %v11094_v27  ;;  %v11100_v24 = vpop.f32.mrb[85].mxu0  ;;  %v3533_v54 = vsub.f32 %v10566_v63, %v11096_v29 }
 0x51f   : > { %15613 = vst [vmem:[#allocation158_spill] sm:$0xff] %v11100_v24  ;;  %3443 = vmax.xlane.f32.xlu0 %v3442_v26  ;;  %3434 = vmax.xlane.f32.xlu1 %v3433_v61  ;;  %v11105_v20 = vpop.f32.mrb[86].mxu0  ;;  %v3913_v26 = vmul.f32 1.442695, %v3593_v44  ;;  %v3531_v61 = vsub.f32 %v10543_v32, %v3150_v59  ;;  %v15623_v59 = vmax.f32 %v11032_v60, %v11036_v58 }
 0x520   : > { %15614 = vst [vmem:[#allocation159_spill] sm:$0xff] %v11105_v20  ;;  %v11108_v15 = vpop.f32.mrb[102].mxu1  ;;  %v11110_v38 = vpop.xlane.xlu0 %3248  ;;  %v15630_v58 = vmax.f32 %v11047_v3, %v11051_v40  ;;  %v15635_v40 = vmax.f32 %v11062_v52, %v11070_v35 }
 0x521   : > { %15615 = vst [vmem:[#allocation160_spill] sm:$0xff] %v11108_v15  ;;  %v11112_v27 = vpop.f32.mrb[103].mxu1  ;;  %v11114_v9 = vpop.xlane.xlu1 %3155  ;;  %8495 = vpow2.f32 %v3913_v26 }
 0x522   : > { %15616 = vst [vmem:[#allocation161_spill] sm:$0xff] %v11112_v27  ;;  %v11118_v1 = vpop.f32.mrb[87].mxu0  ;;  %8497 = vpow2.f32 %v3915_v23  ;;  %v15643_v52 = vmax.f32 %v11108_v15, %v11112_v27 }
 0x523   : > { %15617 = vst [vmem:[#allocation162_spill] sm:$0xff] %v11118_v1  ;;  %3446 = vmax.xlane.f32.xlu0 %v3445_v48  ;;  %3341 = vmax.xlane.f32.xlu1 %v15618_v0  ;;  %v11126_v28 = vpop.f32.mrb[88].mxu0  ;;  %v3789_v0 = vmul.f32 1.442695, %v3531_v61  ;;  %v11152_v48 = vpop.eup %8491 }
 0x524   : > { %15619 = vst [vmem:[#allocation163_spill] sm:$0xff] %v11126_v28  ;;  %v11129_v5 = vpop.f32.mrb[104].mxu1  ;;  %v11131_v39 = vpop.xlane.xlu0 %3251  ;;  %15626 = vst [vmem:[#allocation169_spill] sm:$0xff] %v11152_v48 }
 0x525   : > { %15620 = vst [vmem:[#allocation164_spill] sm:$0xff] %v11129_v5  ;;  %v11133_v44 = vpop.f32.mrb[105].mxu1  ;;  %v11135_v32 = vpop.xlane.xlu1 %3158  ;;  %8499 = vpow2.f32 %v3789_v0 }
 0x526   : > { %15621 = vst [vmem:[#allocation165_spill] sm:$0xff] %v11133_v44  ;;  %v11139_v19 = vpop.f32.mrb[89].mxu0  ;;  %v11158_v8 = vpop.eup %8493  ;;  %8501 = vpow2.f32 %v3791_v10  ;;  %v3595_v10 = vsub.f32 %v10545_v47, %v11092_v12 }
 0x527   : > { %15622 = vst [vmem:[#allocation166_spill] sm:$0xff] %v11139_v19  ;;  %3449 = vmax.xlane.f32.xlu0 %v3448_v6  ;;  %3344 = vmax.xlane.f32.xlu1 %v15623_v59  ;;  %v11146_v34 = vpop.f32.mrb[90].mxu0  ;;  %15628 = vst [vmem:[#allocation171_spill] sm:$0xff] %v11158_v8  ;;  %v3534_v6 = vsub.f32 %v10571_v51, %v11096_v29  ;;  %v3793_v51 = vmul.f32 1.442695, %v3533_v54 }
 0x528   : > { %15624 = vst [vmem:[#allocation167_spill] sm:$0xff] %v11146_v34  ;;  %v11148_v49 = vpop.f32.mrb[106].mxu1  ;;  %v11150_v43 = vpop.xlane.xlu0 %3254  ;;  %v3917_v35 = vmul.f32 1.442695, %v3595_v10 }
 0x529   : > { %15625 = vst [vmem:[#allocation168_spill] sm:$0xff] %v11148_v49  ;;  %v11154_v26 = vpop.f32.mrb[107].mxu1  ;;  %v11156_v61 = vpop.xlane.xlu1 %3161  ;;  %8503 = vpow2.f32 %v3793_v51 }
 0x52a   : > { %15627 = vst [vmem:[#allocation170_spill] sm:$0xff] %v11154_v26  ;;  %v11162_v59 = vpop.f32.mrb[91].mxu0 }
 0x52b   : > { %15629 = vst [vmem:[#allocation172_spill] sm:$0xff] %v11162_v59  ;;  %3452 = vmax.xlane.f32.xlu0 %v3451_v56  ;;  %3347 = vmax.xlane.f32.xlu1 %v15630_v58  ;;  %v11171_v60 = vpop.f32.mrb[92].mxu0  ;;  %v4297_v56 = vadd.f32 %v11158_v8, %v11152_v48  ;;  %v3596_v48 = vsub.f32 %v10551_v53, %v11092_v12  ;;  %v3795_v58 = vmul.f32 1.442695, %v3534_v6  ;;  %v11204_v47 = vpop.eup %8495 }
 0x52c   : > { %15631 = vst [vmem:[#allocation173_spill] sm:$0xff] %v11171_v60  ;;  %v11175_v62 = vpop.f32.mrb[108].mxu1  ;;  %v11177_v0 = vpop.xlane.xlu0 %3257  ;;  %15639 = vst [vmem:[#allocation180_spill] sm:$0xff] %v11204_v47  ;;  %v3597_v53 = vsub.f32 %v10569_v55, %v11110_v38  ;;  %v3598_v55 = vsub.f32 %v10575_v4, %v11110_v38  ;;  %v3535_v38 = vsub.f32 %v10589_v17, %v11114_v9 }
 0x52d   : > { %15632 = vst [vmem:[#allocation174_spill] sm:$0xff] %v11175_v62  ;;  %v11179_v22 = vpop.f32.mrb[109].mxu1  ;;  %v11181_v63 = vpop.xlane.xlu1 %3164  ;;  %v3919_v10 = vmul.f32 1.442695, %v3596_v48  ;;  %8505 = vpow2.f32 %v3795_v58 }
 0x52e   : > { %15633 = vst [vmem:[#allocation175_spill] sm:$0xff] %v11179_v22  ;;  %v11187_v23 = vpop.f32.mrb[93].mxu0  ;;  %v11208_v29 = vpop.eup %8497  ;;  %8507 = vpow2.f32 %v3917_v35  ;;  %v3921_v4 = vmul.f32 1.442695, %v3597_v53 }
 0x52f   : > { %15634 = vst [vmem:[#allocation176_spill] sm:$0xff] %v11187_v23  ;;  %4298 = vadd.xlane.f32.xlu0 %v4297_v56  ;;  %3350 = vmax.xlane.f32.xlu1 %v15635_v40  ;;  %v11196_v3 = vpop.f32.mrb[94].mxu0  ;;  %15641 = vst [vmem:[#allocation182_spill] sm:$0xff] %v11208_v29  ;;  %v11234_v6 = vpop.eup %8499  ;;  %8509 = vpow2.f32 %v3919_v10  ;;  %v3797_v10 = vmul.f32 1.442695, %v3535_v38 }
 0x530   : > { %15636 = vst [vmem:[#allocation177_spill] sm:$0xff] %v11196_v3  ;;  %v11200_v8 = vpop.f32.mrb[110].mxu1  ;;  %v11202_v22 = vpop.xlane.xlu0 %3260  ;;  %15647 = vst [vmem:[#allocation186_spill] sm:$0xff] %v11234_v6  ;;  %8511 = vpow2.f32 %v3921_v4  ;;  %v3599_v4 = vsub.f32 %v10591_v50, %v11131_v39  ;;  %v3601_v50 = vsub.f32 %v10615_v45, %v11150_v43 }
 0x531   : > { %15637 = vst [vmem:[#allocation178_spill] sm:$0xff] %v11200_v8  ;;  %15638 = vst [vmem:[#allocation179_spill] sm:$0xff] %v11202_v22  ;;  %v11206_v54 = vpop.f32.mrb[111].mxu1  ;;  %v11212_v40 = vpop.f32.mrb[95].mxu0  ;;  %v15644_v22 = vmax.f32 %v11075_v37, %v11082_v57  ;;  %v15651_v37 = vmax.f32 %v11088_v13, %v11100_v24 }
 0x532   : > { %15640 = vst [vmem:[#allocation181_spill] sm:$0xff] %v11206_v54  ;;  %15642 = vst [vmem:[#allocation183_spill] sm:$0xff] %v11212_v40  ;;  %v11216_v12 = vpop.xlane.xlu1 %3167  ;;  %v11240_v57 = vpop.eup %8501 }
 0x533   : > { %3455 = vmax.xlane.f32.xlu0 %v15643_v52  ;;  %3353 = vmax.xlane.f32.xlu1 %v15644_v22  ;;  %v11226_v56 = vpop.f32.mrb[96].mxu0  ;;  %v4393_v52 = vadd.f32 %v11208_v29, %v11204_v47  ;;  %15649 = vst [vmem:[#allocation188_spill] sm:$0xff] %v11240_v57  ;;  %v3923_v29 = vmul.f32 1.442695, %v3598_v55  ;;  %v3536_v22 = vsub.f32 %v10593_v31, %v11114_v9 }
 0x534   : > { %15645 = vst [vmem:[#allocation184_spill] sm:$0xff] %v11226_v56  ;;  %v11230_v51 = vpop.f32.mrb[112].mxu1  ;;  %v11232_v54 = vpop.xlane.xlu0 %3263  ;;  %v15656_v9 = vmax.f32 %v11105_v20, %v11118_v1 }
 0x535   : > { %15646 = vst [vmem:[#allocation185_spill] sm:$0xff] %v11230_v51  ;;  %v11236_v8 = vpop.f32.mrb[113].mxu1  ;;  %v11244_v48 = vpop.f32.mrb[97].mxu0  ;;  %8513 = vpow2.f32 %v3923_v29  ;;  %v3799_v24 = vmul.f32 1.442695, %v3536_v22  ;;  %v3600_v29 = vsub.f32 %v10598_v11, %v11131_v39  ;;  %v15664_v11 = vmax.f32 %v11126_v28, %v11139_v19 }
 0x536   : > { %15648 = vst [vmem:[#allocation187_spill] sm:$0xff] %v11236_v8  ;;  %15650 = vst [vmem:[#allocation189_spill] sm:$0xff] %v11244_v48  ;;  %v11261_v17 = vpop.xlane.xlu1 %3170  ;;  %8515 = vpow2.f32 %v3797_v10  ;;  %v3602_v10 = vsub.f32 %v10623_v33, %v11150_v43  ;;  %v3538_v33 = vsub.f32 %v10617_v21, %v11135_v32 }
 0x537   : > { %4394 = vadd.xlane.f32.xlu0 %v4393_v52  ;;  %3356 = vmax.xlane.f32.xlu1 %v15651_v37  ;;  %v11253_v47 = vpop.f32.mrb[98].mxu0  ;;  %v4300_v52 = vadd.f32 %v11240_v57, %v11234_v6  ;;  %v11282_v37 = vpop.eup %8503  ;;  %8517 = vpow2.f32 %v3799_v24  ;;  %v3927_v24 = vmul.f32 1.442695, %v3600_v29 }
 0x538   : > { %15652 = vst [vmem:[#allocation190_spill] sm:$0xff] %v11253_v47  ;;  %v11257_v35 = vpop.f32.mrb[114].mxu1  ;;  %v11259_v53 = vpop.xlane.xlu0 %3266  ;;  %15659 = vst [vmem:[#allocation196_spill] sm:$0xff] %v11282_v37  ;;  %v3931_v21 = vmul.f32 1.442695, %v3602_v10 }
 0x539   : > { %15653 = vst [vmem:[#allocation191_spill] sm:$0xff] %v11257_v35  ;;  %v11263_v27 = vpop.f32.mrb[115].mxu1  ;;  %v11269_v58 = vpop.f32.mrb[99].mxu0  ;;  %v3803_v10 = vmul.f32 1.442695, %v3538_v33 }
 0x53a   : > { %15654 = vst [vmem:[#allocation192_spill] sm:$0xff] %v11263_v27  ;;  %15655 = vst [vmem:[#allocation193_spill] sm:$0xff] %v11269_v58  ;;  %v11292_v31 = vpop.eup %8505  ;;  %v11302_v20 = vpop.xlane.xlu1 %3173 }
 0x53b   : > { %4301 = vadd.xlane.f32.xlu0 %v4300_v52  ;;  %3359 = vmax.xlane.f32.xlu1 %v15656_v9  ;;  %v11276_v55 = vpop.f32.mrb[100].mxu0  ;;  %15661 = vst [vmem:[#allocation198_spill] sm:$0xff] %v11292_v31  ;;  %v15663_v9 = vmax.f32 %v11129_v5, %v11133_v44  ;;  %v11320_v13 = vpop.eup %8507  ;;  %v3925_v52 = vmul.f32 1.442695, %v3599_v4  ;;  %v3929_v4 = vmul.f32 1.442695, %v3601_v50 }
 0x53c   : > { %15657 = vst [vmem:[#allocation194_spill] sm:$0xff] %v11276_v55  ;;  %v11278_v6 = vpop.f32.mrb[116].mxu1  ;;  %v11280_v57 = vpop.xlane.xlu0 %3269  ;;  %15667 = vst [vmem:[#allocation202_spill] sm:$0xff] %v11320_v13 }
 0x53d   : > { %15658 = vst [vmem:[#allocation195_spill] sm:$0xff] %v11278_v6  ;;  %v11286_v38 = vpop.f32.mrb[117].mxu1  ;;  %v11298_v1 = vpop.f32.mrb[101].mxu0  ;;  %8519 = vpow2.f32 %v3925_v52 }
 0x53e   : > { %15660 = vst [vmem:[#allocation197_spill] sm:$0xff] %v11286_v38  ;;  %15662 = vst [vmem:[#allocation199_spill] sm:$0xff] %v11298_v1  ;;  %v11328_v19 = vpop.eup %8509  ;;  %v11353_v5 = vpop.xlane.xlu1 %3176  ;;  %8521 = vpow2.f32 %v3927_v24 }
 0x53f   : > { %3458 = vmax.xlane.f32.xlu0 %v15663_v9  ;;  %3362 = vmax.xlane.f32.xlu1 %v15664_v11  ;;  %v11312_v39 = vpop.f32.mrb[102].mxu0  ;;  %v3537_v9 = vsub.f32 %v10613_v42, %v11135_v32  ;;  %v4303_v11 = vadd.f32 %v11292_v31, %v11282_v37  ;;  %15669 = vst [vmem:[#allocation204_spill] sm:$0xff] %v11328_v19  ;;  %v11351_v31 = vpop.eup %8511  ;;  %8523 = vpow2.f32 %v3929_v4 }
 0x540   : > { %15665 = vst [vmem:[#allocation200_spill] sm:$0xff] %v11312_v39  ;;  %v11316_v45 = vpop.f32.mrb[118].mxu1  ;;  %v11318_v22 = vpop.xlane.xlu0 %3272  ;;  %v3539_v42 = vsub.f32 %v10633_v2, %v11156_v61  ;;  %v15671_v37 = vmax.f32 %v11146_v34, %v11162_v59  ;;  %v3540_v32 = vsub.f32 %v10637_v41, %v11156_v61  ;;  %15674 = vst [vmem:[#allocation208_spill] sm:$0xff] %v11351_v31  ;;  %8525 = vpow2.f32 %v3931_v21 }
 0x541   : > { %15666 = vst [vmem:[#allocation201_spill] sm:$0xff] %v11316_v45  ;;  %v11324_v44 = vpop.f32.mrb[119].mxu1  ;;  %v11334_v28 = vpop.f32.mrb[103].mxu0  ;;  %v3801_v2 = vmul.f32 1.442695, %v3537_v9  ;;  %v15678_v9 = vmax.f32 %v11148_v49, %v11154_v26  ;;  %v3542_v26 = vsub.f32 %v10659_v14, %v11181_v63 }
 0x542   : > { %15668 = vst [vmem:[#allocation203_spill] sm:$0xff] %v11324_v44  ;;  %15670 = vst [vmem:[#allocation205_spill] sm:$0xff] %v11334_v28  ;;  %v11359_v59 = vpop.eup %8513  ;;  %v3805_v34 = vmul.f32 1.442695, %v3539_v42  ;;  %v3807_v24 = vmul.f32 1.442695, %v3540_v32  ;;  %v3603_v32 = vsub.f32 %v10635_v30, %v11177_v0 }
 0x543   : > { %4304 = vadd.xlane.f32.xlu0 %v4303_v11  ;;  %3365 = vmax.xlane.f32.xlu1 %v15671_v37  ;;  %v11343_v29 = vpop.f32.mrb[104].mxu0  ;;  %v4396_v37 = vadd.f32 %v11328_v19, %v11320_v13  ;;  %15676 = vst [vmem:[#allocation210_spill] sm:$0xff] %v11359_v59  ;;  %v11376_v41 = vpop.eup %8515  ;;  %8527 = vpow2.f32 %v3801_v2  ;;  %v4399_v42 = vadd.f32 %v11359_v59, %v11351_v31 }
 0x544   : > { %15672 = vst [vmem:[#allocation206_spill] sm:$0xff] %v11343_v29  ;;  %v11347_v43 = vpop.f32.mrb[120].mxu1  ;;  %v11349_v50 = vpop.xlane.xlu0 %3275  ;;  %15681 = vst [vmem:[#allocation214_spill] sm:$0xff] %v11376_v41  ;;  %8529 = vpow2.f32 %v3803_v10  ;;  %v15685_v31 = vmax.f32 %v11171_v60, %v11187_v23  ;;  %v15691_v60 = vmax.f32 %v11196_v3, %v11212_v40  ;;  %v15703_v40 = vmax.f32 %v11226_v56, %v11244_v48 }
 0x545   : > { %15673 = vst [vmem:[#allocation207_spill] sm:$0xff] %v11347_v43  ;;  %v11355_v11 = vpop.f32.mrb[121].mxu1  ;;  %v11363_v61 = vpop.f32.mrb[105].mxu0  ;;  %8531 = vpow2.f32 %v3805_v34 }
 0x546   : > { %15675 = vst [vmem:[#allocation209_spill] sm:$0xff] %v11355_v11  ;;  %15677 = vst [vmem:[#allocation211_spill] sm:$0xff] %v11363_v61  ;;  %v11382_v52 = vpop.eup %8517  ;;  %8533 = vpow2.f32 %v3807_v24  ;;  %v3933_v24 = vmul.f32 1.442695, %v3603_v32 }
 0x547   : > { %3461 = vmax.xlane.f32.xlu0 %v15678_v9  ;;  %4397 = vadd.xlane.f32.xlu1 %v4396_v37  ;;  %v11370_v13 = vpop.f32.mrb[106].mxu0  ;;  %15683 = vst [vmem:[#allocation216_spill] sm:$0xff] %v11382_v52  ;;  %v11390_v9 = vpop.xlane.xlu1 %3179  ;;  %v3604_v37 = vsub.f32 %v10644_v36, %v11177_v0  ;;  %v4306_v2 = vadd.f32 %v11382_v52, %v11376_v41 }
 0x548   : > { %15679 = vst [vmem:[#allocation212_spill] sm:$0xff] %v11370_v13  ;;  %v11372_v33 = vpop.f32.mrb[122].mxu1  ;;  %v11374_v19 = vpop.xlane.xlu0 %3278  ;;  %v3541_v36 = vsub.f32 %v10655_v46, %v11181_v63  ;;  %8535 = vpow2.f32 %v3933_v24  ;;  %v15714_v13 = vld [vmem:[#allocation179_spill] sm:$0xff] }
 0x549   : > { %15680 = vst [vmem:[#allocation213_spill] sm:$0xff] %v11372_v33  ;;  %v11378_v4 = vpop.f32.mrb[123].mxu1  ;;  %v11386_v21 = vpop.f32.mrb[107].mxu0 }
 0x54a   : > { %15682 = vst [vmem:[#allocation215_spill] sm:$0xff] %v11378_v4  ;;  %15684 = vst [vmem:[#allocation217_spill] sm:$0xff] %v11386_v21  ;;  %v3809_v15 = vmul.f32 1.442695, %v3541_v36 }
 0x54b   : > { %4400 = vadd.xlane.f32.xlu0 %v4399_v42  ;;  %3368 = vmax.xlane.f32.xlu1 %v15685_v31  ;;  %v11397_v10 = vpop.f32.mrb[108].mxu0  ;;  %v11413_v31 = vpop.eup %8519  ;;  %v3935_v42 = vmul.f32 1.442695, %v3604_v37 }
 0x54c   : > { %15686 = vst [vmem:[#allocation218_spill] sm:$0xff] %v11397_v10  ;;  %v11401_v34 = vpop.f32.mrb[124].mxu1  ;;  %v11403_v59 = vpop.xlane.xlu0 %3281  ;;  %15690 = vst [vmem:[#allocation222_spill] sm:$0xff] %v11413_v31  ;;  %v15701_v10 = vld [vmem:[#allocation175_spill] sm:$0xff] }
 0x54d   : > { %15687 = vst [vmem:[#allocation219_spill] sm:$0xff] %v11401_v34  ;;  %v11405_v30 = vpop.f32.mrb[125].mxu1  ;;  %v11411_v23 = vpop.f32.mrb[109].mxu0  ;;  %8537 = vpow2.f32 %v3935_v42 }
 0x54e   : > { %15688 = vst [vmem:[#allocation220_spill] sm:$0xff] %v11405_v30  ;;  %15689 = vst [vmem:[#allocation221_spill] sm:$0xff] %v11411_v23  ;;  %v11424_v52 = vpop.eup %8521  ;;  %v11434_v0 = vpop.xlane.xlu1 %3182  ;;  %8539 = vpow2.f32 %v3809_v15 }
 0x54f   : > { %4307 = vadd.xlane.f32.xlu0 %v4306_v2  ;;  %3371 = vmax.xlane.f32.xlu1 %v15691_v60  ;;  %v11422_v41 = vpop.f32.mrb[110].mxu0  ;;  %15693 = vst [vmem:[#allocation224_spill] sm:$0xff] %v11424_v52  ;;  %v11432_v46 = vpop.eup %8523  ;;  %v15702_v60 = vmax.f32 %v11175_v62, %v15701_v10  ;;  %v4402_v56 = vadd.f32 %v11424_v52, %v11413_v31 }
 0x550   : > { %15692 = vst [vmem:[#allocation223_spill] sm:$0xff] %v11422_v41  ;;  %v11428_v32 = vpop.f32.mrb[126].mxu1  ;;  %v11430_v49 = vpop.xlane.xlu0 %3284  ;;  %15696 = vst [vmem:[#allocation227_spill] sm:$0xff] %v11432_v46 }
 0x551   : > { %15694 = vst [vmem:[#allocation225_spill] sm:$0xff] %v11428_v32  ;;  %15695 = vst [vmem:[#allocation226_spill] sm:$0xff] %v11430_v49  ;;  %v11436_v2 = vpop.f32.mrb[127].mxu1  ;;  %v11442_v37 = vpop.eup %8525  ;;  %v3811_v49 = vmul.f32 1.442695, %v3542_v26 }
 0x552   : > { %15697 = vst [vmem:[#allocation228_spill] sm:$0xff] %v11436_v2  ;;  %15698 = vst [vmem:[#allocation229_spill] sm:$0xff] %v11442_v37  ;;  %v11446_v63 = vpop.f32.mrb[111].mxu0  ;;  %v11448_v3 = vpop.eup %8527  ;;  %v4405_v26 = vadd.f32 %v11442_v37, %v11432_v46  ;;  %v15715_v2 = vld [vmem:[#allocation34_spill] sm:$0xff]  ;;  %v15717_v46 = vld [vmem:[#allocation23_spill] sm:$0xff] }
 0x553   : > { %15699 = vst [vmem:[#allocation230_spill] sm:$0xff] %v11446_v63  ;;  %15700 = vst [vmem:[#allocation231_spill] sm:$0xff] %v11448_v3  ;;  %3464 = vmax.xlane.f32.xlu0 %v15702_v60  ;;  %3374 = vmax.xlane.f32.xlu1 %v15703_v40  ;;  %v11458_v7 = vpop.f32.mrb[112].mxu0  ;;  %v11460_v14 = vpop.eup %8529  ;;  %v3605_v10 = vsub.f32 %v15715_v2, %v15714_v13  ;;  %8541 = vpow2.f32 %v3811_v49  ;;  %v3606_v37 = vsub.f32 %v15717_v46, %v15714_v13  ;;  %v15735_v2 = vld [vmem:[#allocation178_spill] sm:$0xff] }
 0x554   : > { %15704 = vst [vmem:[#allocation232_spill] sm:$0xff] %v11458_v7  ;;  %15705 = vst [vmem:[#allocation233_spill] sm:$0xff] %v11460_v14  ;;  %v11462_v25 = vpop.f32.mrb[128].mxu1  ;;  %v11464_v24 = vpop.xlane.xlu0 %3287 }
 0x555   : > { %15706 = vst [vmem:[#allocation234_spill] sm:$0xff] %v11462_v25  ;;  %15707 = vst [vmem:[#allocation235_spill] sm:$0xff] %v11464_v24  ;;  %v11466_v36 = vpop.eup %8531  ;;  %v11468_v23 = vpop.f32.mrb[129].mxu1 }
 0x556   : > { %15708 = vst [vmem:[#allocation236_spill] sm:$0xff] %v11466_v36  ;;  %15709 = vst [vmem:[#allocation237_spill] sm:$0xff] %v11468_v23  ;;  %v11478_v42 = vpop.eup %8533  ;;  %v11482_v21 = vpop.f32.mrb[113].mxu0  ;;  %v15724_v23 = vld [vmem:[#allocation35_spill] sm:$0xff] }
 0x557   : > { %15712 = vst [vmem:[#allocation238_spill] sm:$0xff] %v11478_v42  ;;  %15713 = vst [vmem:[#allocation239_spill] sm:$0xff] %v11482_v21  ;;  %v11486_v60 = vpop.xlane.xlu1 %3185  ;;  %4403 = vadd.xlane.f32.xlu0 %v4402_v56  ;;  %4406 = vadd.xlane.f32.xlu1 %v4405_v26  ;;  %v11490_v31 = vpop.f32.mrb[114].mxu0  ;;  %v4309_v56 = vadd.f32 %v11460_v14, %v11448_v3  ;;  %v4312_v49 = vadd.f32 %v11478_v42, %v11466_v36  ;;  %v3937_v26 = vmul.f32 1.442695, %v3605_v10  ;;  %v15726_v14 = vld [vmem:[#allocation36_spill] sm:$0xff] }
 0x558   : > { %15716 = vst [vmem:[#allocation179_spill] sm:$0xff] %v11490_v31  ;;  %v11494_v62 = vpop.f32.mrb[130].mxu1  ;;  %v11496_v52 = vpop.xlane.xlu0 %3290  ;;  %v3543_v25 = vsub.f32 %v15724_v23, %v11216_v12  ;;  %v3939_v3 = vmul.f32 1.442695, %v3606_v37  ;;  %v3544_v36 = vsub.f32 %v15726_v14, %v11216_v12 }
 0x559   : > { %15718 = vst [vmem:[#allocation34_spill] sm:$0xff] %v11494_v62  ;;  %15719 = vst [vmem:[#allocation23_spill] sm:$0xff] %v11496_v52  ;;  %v11498_v15 = vpop.f32.mrb[131].mxu1  ;;  %v11510_v46 = vpop.f32.mrb[115].mxu0  ;;  %8543 = vpow2.f32 %v3937_v26  ;;  %v15743_v26 = vld [vmem:[#allocation24_spill] sm:$0xff] }
 0x55a   : > { %15720 = vst [vmem:[#allocation240_spill] sm:$0xff] %v11498_v15  ;;  %15723 = vst [vmem:[#allocation241_spill] sm:$0xff] %v11510_v46  ;;  %v11524_v24 = vpop.eup %8535  ;;  %v3813_v62 = vmul.f32 1.442695, %v3543_v25  ;;  %v15736_v46 = vld [vmem:[#allocation181_spill] sm:$0xff]  ;;  %8545 = vpow2.f32 %v3939_v3  ;;  %v3607_v52 = vsub.f32 %v15743_v26, %v11232_v54 }
 0x55b   : > { %4310 = vadd.xlane.f32.xlu0 %v4309_v56  ;;  %4313 = vadd.xlane.f32.xlu1 %v4312_v49  ;;  %v11516_v40 = vpop.f32.mrb[116].mxu0  ;;  %15729 = vst [vmem:[#allocation243_spill] sm:$0xff] %v11524_v24  ;;  %v11526_v10 = vpop.xlane.xlu1 %3188  ;;  %v15737_v31 = vmax.f32 %v15735_v2, %v15736_v46  ;;  %v15738_v56 = vmax.f32 %v11253_v47, %v11269_v58  ;;  %v3815_v49 = vmul.f32 1.442695, %v3544_v36  ;;  %v15749_v2 = vld [vmem:[#allocation25_spill] sm:$0xff]  ;;  %v15750_v46 = vld [vmem:[#allocation44_spill] sm:$0xff] }
 0x55c   : > { %15725 = vst [vmem:[#allocation35_spill] sm:$0xff] %v11516_v40  ;;  %v11520_v42 = vpop.f32.mrb[132].mxu1  ;;  %v11522_v13 = vpop.xlane.xlu0 %3293  ;;  %8547 = vpow2.f32 %v3813_v62  ;;  %v3613_v58 = vsub.f32 %v15750_v46, %v11318_v22  ;;  %v3941_v62 = vmul.f32 1.442695, %v3607_v52  ;;  %v15756_v46 = vld [vmem:[#allocation79_spill] sm:$0xff] }
 0x55d   : > { %15727 = vst [vmem:[#allocation36_spill] sm:$0xff] %v11520_v42  ;;  %15728 = vst [vmem:[#allocation242_spill] sm:$0xff] %v11522_v13  ;;  %v11528_v23 = vpop.f32.mrb[133].mxu1  ;;  %v11534_v37 = vpop.eup %8537  ;;  %v3608_v13 = vsub.f32 %v15749_v2, %v11232_v54  ;;  %8549 = vpow2.f32 %v3815_v49  ;;  %v15753_v54 = vld [vmem:[#allocation46_spill] sm:$0xff] }
 0x55e   : > { %15730 = vst [vmem:[#allocation244_spill] sm:$0xff] %v11528_v23  ;;  %15733 = vst [vmem:[#allocation245_spill] sm:$0xff] %v11534_v37  ;;  %v11538_v14 = vpop.f32.mrb[117].mxu0  ;;  %v11554_v25 = vpop.eup %8539  ;;  %v4408_v3 = vadd.f32 %v11534_v37, %v11524_v24  ;;  %v15751_v24 = vmax.f32 %v11230_v51, %v11236_v8  ;;  %v3614_v2 = vsub.f32 %v15753_v54, %v11318_v22  ;;  %v15757_v8 = vld [vmem:[#allocation81_spill] sm:$0xff]  ;;  %8551 = vpow2.f32 %v3941_v62 }
 0x55f   : > { %15734 = vst [vmem:[#allocation246_spill] sm:$0xff] %v11538_v14  ;;  %3467 = vmax.xlane.f32.xlu0 %v15737_v31  ;;  %3377 = vmax.xlane.f32.xlu1 %v15738_v56  ;;  %v11548_v15 = vpop.f32.mrb[118].mxu0  ;;  %15742 = vst [vmem:[#allocation250_spill] sm:$0xff] %v11554_v25  ;;  %v15745_v31 = vld [vmem:[#allocation45_spill] sm:$0xff]  ;;  %v11568_v36 = vpop.eup %8541  ;;  %v3943_v51 = vmul.f32 1.442695, %v3608_v13 }
 0x560   : > { %15739 = vst [vmem:[#allocation247_spill] sm:$0xff] %v11548_v15  ;;  %v11550_v12 = vpop.f32.mrb[134].mxu1  ;;  %v11552_v23 = vpop.xlane.xlu0 %3296  ;;  %15748 = vst [vmem:[#allocation251_spill] sm:$0xff] %v11568_v36  ;;  %v4315_v49 = vadd.f32 %v11568_v36, %v11554_v25  ;;  %v15759_v54 = vld [vmem:[#allocation37_spill] sm:$0xff]  ;;  %v3953_v15 = vmul.f32 1.442695, %v3613_v58 }
 0x561   : > { %15740 = vst [vmem:[#allocation248_spill] sm:$0xff] %v11550_v12  ;;  %15741 = vst [vmem:[#allocation249_spill] sm:$0xff] %v11552_v23  ;;  %v11558_v42 = vpop.f32.mrb[135].mxu1  ;;  %v11564_v47 = vpop.f32.mrb[119].mxu0  ;;  %v15760_v12 = vmax.f32 %v11257_v35, %v11263_v27  ;;  %v15762_v25 = vld [vmem:[#allocation70_spill] sm:$0xff]  ;;  %v15766_v58 = vld [vmem:[#allocation49_spill] sm:$0xff]  ;;  %8553 = vpow2.f32 %v3943_v51  ;;  %v15770_v27 = vmax.f32 %v11278_v6, %v11286_v38 }
 0x562   : > { %15744 = vst [vmem:[#allocation24_spill] sm:$0xff] %v11558_v42  ;;  %15747 = vst [vmem:[#allocation45_spill] sm:$0xff] %v11564_v47  ;;  %v11578_v56 = vpop.xlane.xlu1 %3191  ;;  %v3545_v47 = vsub.f32 %v15759_v54, %v11261_v17  ;;  %v3546_v13 = vsub.f32 %v15762_v25, %v11261_v17  ;;  %v3955_v36 = vmul.f32 1.442695, %v3614_v2  ;;  %8555 = vpow2.f32 %v3953_v15  ;;  %v15775_v15 = vld [vmem:[#allocation38_spill] sm:$0xff]  ;;  %v15781_v6 = vld [vmem:[#allocation40_spill] sm:$0xff] }
 0x563   : > { %3470 = vmax.xlane.f32.xlu0 %v15751_v24  ;;  %4409 = vadd.xlane.f32.xlu1 %v4408_v3  ;;  %v11583_v37 = vpop.f32.mrb[120].mxu0  ;;  %v11618_v52 = vpop.eup %8543  ;;  %v3609_v25 = vsub.f32 %v15775_v15, %v11259_v53  ;;  %v15782_v38 = vld [vmem:[#allocation48_spill] sm:$0xff] }
 0x564   : > { %15752 = vst [vmem:[#allocation25_spill] sm:$0xff] %v11583_v37  ;;  %v11587_v26 = vpop.f32.mrb[136].mxu1  ;;  %v11589_v48 = vpop.xlane.xlu0 %3203  ;;  %15764 = vst [vmem:[#allocation70_spill] sm:$0xff] %v11618_v52  ;;  %v3817_v2 = vmul.f32 1.442695, %v3545_v47  ;;  %8557 = vpow2.f32 %v3955_v36 }
 0x565   : > { %15754 = vst [vmem:[#allocation44_spill] sm:$0xff] %v11587_v26  ;;  %v11591_v42 = vpop.f32.mrb[137].mxu1  ;;  %v11597_v3 = vpop.f32.mrb[121].mxu0  ;;  %v3819_v51 = vmul.f32 1.442695, %v3546_v13 }
 0x566   : > { %15755 = vst [vmem:[#allocation46_spill] sm:$0xff] %v11591_v42  ;;  %15758 = vst [vmem:[#allocation79_spill] sm:$0xff] %v11597_v3  ;;  %v11628_v42 = vpop.eup %8545  ;;  %v11634_v62 = vpop.xlane.xlu1 %3194  ;;  %8559 = vpow2.f32 %v3817_v2  ;;  %v15783_v3 = vmax.f32 %v11316_v45, %v11324_v44  ;;  %v15789_v44 = vld [vmem:[#allocation55_spill] sm:$0xff] }
 0x567   : > { %3473 = vmax.xlane.f32.xlu0 %v15760_v12  ;;  %4316 = vadd.xlane.f32.xlu1 %v4315_v49  ;;  %v11610_v24 = vpop.f32.mrb[122].mxu0  ;;  %v15767_v12 = vld [vmem:[#allocation51_spill] sm:$0xff]  ;;  %v15771_v49 = vmax.f32 %v11276_v55, %v11298_v1  ;;  %v11648_v47 = vpop.eup %8547  ;;  %v4411_v36 = vadd.f32 %v11628_v42, %v11618_v52  ;;  %v3615_v1 = vsub.f32 %v15782_v38, %v11349_v50  ;;  %8561 = vpow2.f32 %v3819_v51  ;;  %v15788_v38 = vld [vmem:[#allocation53_spill] sm:$0xff] }
 0x568   : > { %15761 = vst [vmem:[#allocation81_spill] sm:$0xff] %v11610_v24  ;;  %v11614_v23 = vpop.f32.mrb[138].mxu1  ;;  %v11616_v22 = vpop.xlane.xlu0 %3299  ;;  %15769 = vst [vmem:[#allocation51_spill] sm:$0xff] %v11628_v42  ;;  %v3945_v24 = vmul.f32 1.442695, %v3609_v25 }
 0x569   : > { %15763 = vst [vmem:[#allocation37_spill] sm:$0xff] %v11614_v23  ;;  %v11620_v54 = vpop.f32.mrb[139].mxu1  ;;  %v11626_v35 = vpop.f32.mrb[123].mxu0  ;;  %15774 = vst [vmem:[#allocation255_spill] sm:$0xff] %v11648_v47 }
 0x56a   : > { %15765 = vst [vmem:[#allocation252_spill] sm:$0xff] %v11620_v54  ;;  %15768 = vst [vmem:[#allocation49_spill] sm:$0xff] %v11626_v35  ;;  %v11662_v13 = vpop.eup %8549  ;;  %v3610_v35 = vsub.f32 %v15781_v6, %v11259_v53  ;;  %v15785_v6 = vld [vmem:[#allocation50_spill] sm:$0xff]  ;;  %8563 = vpow2.f32 %v3945_v24  ;;  %v15803_v24 = vmax.f32 %v11312_v39, %v11334_v28 }
 0x56b   : > { %3476 = vmax.xlane.f32.xlu0 %v15770_v27  ;;  %3380 = vmax.xlane.f32.xlu1 %v15771_v49  ;;  %v11642_v26 = vpop.f32.mrb[124].mxu0  ;;  %v15777_v27 = vld [vmem:[#allocation83_spill] sm:$0xff]  ;;  %v15778_v49 = vld [vmem:[#allocation85_spill] sm:$0xff]  ;;  %v3616_v53 = vsub.f32 %v15785_v6, %v11349_v50  ;;  %v4318_v51 = vadd.f32 %v11662_v13, %v11648_v47  ;;  %v11697_v6 = vpop.eup %8551  ;;  %v15796_v50 = vld [vmem:[#allocation42_spill] sm:$0xff] }
 0x56c   : > { %15772 = vst [vmem:[#allocation253_spill] sm:$0xff] %v11642_v26  ;;  %v11644_v17 = vpop.f32.mrb[140].mxu1  ;;  %v11646_v54 = vpop.xlane.xlu0 %3206  ;;  %15780 = vst [vmem:[#allocation85_spill] sm:$0xff] %v11662_v13  ;;  %v3947_v45 = vmul.f32 1.442695, %v3610_v35  ;;  %v3548_v25 = vsub.f32 %v15796_v50, %v11302_v20  ;;  %v15802_v50 = vmax.f32 %v11372_v33, %v11378_v4 }
 0x56d   : > { %15773 = vst [vmem:[#allocation254_spill] sm:$0xff] %v11644_v17  ;;  %v11652_v23 = vpop.f32.mrb[141].mxu1  ;;  %v11658_v55 = vpop.f32.mrb[125].mxu0  ;;  %15791 = vst [vmem:[#allocation55_spill] sm:$0xff] %v11697_v6  ;;  %v15792_v17 = vld [vmem:[#allocation72_spill] sm:$0xff] }
 0x56e   : > { %15776 = vst [vmem:[#allocation38_spill] sm:$0xff] %v11652_v23  ;;  %15779 = vst [vmem:[#allocation83_spill] sm:$0xff] %v11658_v55  ;;  %v3547_v23 = vsub.f32 %v15792_v17, %v11302_v20  ;;  %v3957_v55 = vmul.f32 1.442695, %v3615_v1  ;;  %v11701_v26 = vpop.xlane.xlu1 %3197  ;;  %v11708_v47 = vpop.eup %8553  ;;  %v3959_v13 = vmul.f32 1.442695, %v3616_v53  ;;  %8565 = vpow2.f32 %v3947_v45 }
 0x56f   : > { %3479 = vmax.xlane.f32.xlu0 %v15783_v3  ;;  %4412 = vadd.xlane.f32.xlu1 %v4411_v36  ;;  %v11675_v52 = vpop.f32.mrb[126].mxu0  ;;  %v15793_v3 = vmax.f32 %v11347_v43, %v11355_v11  ;;  %15795 = vst [vmem:[#allocation256_spill] sm:$0xff] %v11708_v47  ;;  %v11716_v1 = vpop.eup %8555  ;;  %v15812_v20 = vld [vmem:[#allocation52_spill] sm:$0xff] }
 0x570   : > { %15784 = vst [vmem:[#allocation40_spill] sm:$0xff] %v11675_v52  ;;  %v11679_v42 = vpop.f32.mrb[142].mxu1  ;;  %v11681_v15 = vpop.xlane.xlu0 %3302  ;;  %15798 = vst [vmem:[#allocation257_spill] sm:$0xff] %v11716_v1  ;;  %v3821_v53 = vmul.f32 1.442695, %v3547_v23  ;;  %8567 = vpow2.f32 %v3957_v55  ;;  %v15808_v55 = vld [vmem:[#allocation57_spill] sm:$0xff] }
 0x571   : > { %15786 = vst [vmem:[#allocation48_spill] sm:$0xff] %v11679_v42  ;;  %v11683_v2 = vpop.f32.mrb[143].mxu1  ;;  %v11689_v36 = vpop.f32.mrb[127].mxu0  ;;  %8569 = vpow2.f32 %v3959_v13  ;;  %v4414_v13 = vadd.f32 %v11708_v47, %v11697_v6 }
 0x572   : > { %15787 = vst [vmem:[#allocation50_spill] sm:$0xff] %v11683_v2  ;;  %15790 = vst [vmem:[#allocation53_spill] sm:$0xff] %v11689_v36  ;;  %v3823_v36 = vmul.f32 1.442695, %v3548_v25  ;;  %8571 = vpow2.f32 %v3821_v53  ;;  %v11762_v4 = vpop.xlane.xlu1 %3200  ;;  %v15816_v53 = vsub.f32 %v10719_v16, %v11280_v57  ;;  %v15821_v16 = vld [vmem:[#allocation74_spill] sm:$0xff] }
 0x573   : > { %3482 = vmax.xlane.f32.xlu0 %v15793_v3  ;;  %4319 = vadd.xlane.f32.xlu1 %v4318_v51  ;;  %v11706_v35 = vpop.f32.mrb[128].mxu0  ;;  %v11722_v3 = vpop.eup %8557 }
 0x574   : > { %15794 = vst [vmem:[#allocation72_spill] sm:$0xff] %v11706_v35  ;;  %v11712_v2 = vpop.f32.mrb[144].mxu1  ;;  %v11714_v42 = vpop.xlane.xlu0 %3209  ;;  %15801 = vst [vmem:[#allocation260_spill] sm:$0xff] %v11722_v3  ;;  %v4423_v25 = vadd.f32 %v11722_v3, %v11716_v1  ;;  %8573 = vpow2.f32 %v3823_v36  ;;  %v15814_v3 = vld [vmem:[#allocation54_spill] sm:$0xff]  ;;  %v3949_v39 = vmul.f32 1.442695, %v15816_v53  ;;  %v15819_v36 = vsub.f32 %v10727_v18, %v11280_v57 }
 0x575   : > { %15797 = vst [vmem:[#allocation42_spill] sm:$0xff] %v11712_v2  ;;  %v11718_v17 = vpop.f32.mrb[145].mxu1  ;;  %v11720_v11 = vpop.f32.mrb[129].mxu0  ;;  %v3618_v6 = vsub.f32 %v15814_v3, %v11374_v19  ;;  %v3549_v53 = vsub.f32 %v15821_v16, %v11353_v5  ;;  %v15825_v18 = vld [vmem:[#allocation76_spill] sm:$0xff]  ;;  %v15830_v16 = vld [vmem:[#allocation63_spill] sm:$0xff] }
 0x576   : > { %15799 = vst [vmem:[#allocation258_spill] sm:$0xff] %v11718_v17  ;;  %15800 = vst [vmem:[#allocation259_spill] sm:$0xff] %v11720_v11  ;;  %v11740_v17 = vpop.eup %8559  ;;  %v3617_v11 = vsub.f32 %v15812_v20, %v11374_v19  ;;  %8575 = vpow2.f32 %v3949_v39  ;;  %v15833_v39 = vld [vmem:[#allocation113_spill] sm:$0xff] }
 0x577   : > { %3485 = vmax.xlane.f32.xlu0 %v15802_v50  ;;  %3383 = vmax.xlane.f32.xlu1 %v15803_v24  ;;  %v11734_v43 = vpop.f32.mrb[130].mxu0  ;;  %15806 = vst [vmem:[#allocation263_spill] sm:$0xff] %v11740_v17  ;;  %v15809_v50 = vld [vmem:[#allocation59_spill] sm:$0xff]  ;;  %v11754_v24 = vpop.eup %8561  ;;  %v3963_v19 = vmul.f32 1.442695, %v3618_v6 }
 0x578   : > { %15804 = vst [vmem:[#allocation261_spill] sm:$0xff] %v11734_v43  ;;  %v11736_v45 = vpop.f32.mrb[146].mxu1  ;;  %v11738_v51 = vpop.xlane.xlu0 %3305  ;;  %15811 = vst [vmem:[#allocation59_spill] sm:$0xff] %v11754_v24  ;;  %v15832_v6 = vld [vmem:[#allocation111_spill] sm:$0xff]  ;;  %v15835_v43 = vmax.f32 %v11343_v29, %v11363_v61  ;;  %v15865_v29 = vld [vmem:[#allocation88_spill] sm:$0xff] }
 0x579   : > { %15805 = vst [vmem:[#allocation262_spill] sm:$0xff] %v11736_v45  ;;  %v11742_v23 = vpop.f32.mrb[147].mxu1  ;;  %v11748_v35 = vpop.f32.mrb[131].mxu0  ;;  %v3961_v45 = vmul.f32 1.442695, %v3617_v11 }
 0x57a   : > { %15807 = vst [vmem:[#allocation264_spill] sm:$0xff] %v11742_v23  ;;  %15810 = vst [vmem:[#allocation57_spill] sm:$0xff] %v11748_v35  ;;  %v11788_v23 = vpop.eup %8563  ;;  %v15822_v35 = vmax.f32 %v11401_v34, %v11405_v30 }
 0x57b   : > { %4424 = vadd.xlane.f32.xlu0 %v4423_v25  ;;  %4415 = vadd.xlane.f32.xlu1 %v4414_v13  ;;  %v11764_v1 = vpop.f32.mrb[132].mxu0  ;;  %v4321_v25 = vadd.f32 %v11754_v24, %v11740_v17  ;;  %v3951_v13 = vmul.f32 1.442695, %v15819_v36  ;;  %15820 = vst [vmem:[#allocation267_spill] sm:$0xff] %v11788_v23  ;;  %v11797_v57 = vpop.eup %8565  ;;  %v3550_v36 = vsub.f32 %v15825_v18, %v11353_v5 }
 0x57c   : > { %15813 = vst [vmem:[#allocation52_spill] sm:$0xff] %v11764_v1  ;;  %v11768_v47 = vpop.f32.mrb[148].mxu1  ;;  %v11770_v28 = vpop.xlane.xlu0 %3212  ;;  %15824 = vst [vmem:[#allocation268_spill] sm:$0xff] %v11797_v57  ;;  %v4417_v30 = vadd.f32 %v11797_v57, %v11788_v23 }
 0x57d   : > { %15815 = vst [vmem:[#allocation54_spill] sm:$0xff] %v11768_v47  ;;  %v11775_v33 = vpop.f32.mrb[149].mxu1  ;;  %v11777_v20 = vpop.f32.mrb[133].mxu0  ;;  %8577 = vpow2.f32 %v3951_v13  ;;  %v15836_v13 = vmax.f32 %v11422_v41, %v11446_v63  ;;  %v3827_v5 = vmul.f32 1.442695, %v3550_v36  ;;  %v15840_v36 = vld [vmem:[#allocation80_spill] sm:$0xff] }
 0x57e   : > { %15817 = vst [vmem:[#allocation265_spill] sm:$0xff] %v11775_v33  ;;  %15818 = vst [vmem:[#allocation266_spill] sm:$0xff] %v11777_v20  ;;  %v11805_v33 = vpop.eup %8567  ;;  %8579 = vpow2.f32 %v3961_v45  ;;  %v15842_v63 = vld [vmem:[#allocation114_spill] sm:$0xff] }
 0x57f   : > { %3488 = vmax.xlane.f32.xlu0 %v15822_v35  ;;  %4322 = vadd.xlane.f32.xlu1 %v4321_v25  ;;  %v11795_v17 = vpop.f32.mrb[134].mxu0  ;;  %15827 = vst [vmem:[#allocation269_spill] sm:$0xff] %v11805_v33  ;;  %v15829_v35 = vld [vmem:[#allocation61_spill] sm:$0xff]  ;;  %v11815_v47 = vpop.eup %8569  ;;  %v3825_v25 = vmul.f32 1.442695, %v3549_v53  ;;  %8581 = vpow2.f32 %v3963_v19  ;;  %v15838_v53 = vld [vmem:[#allocation78_spill] sm:$0xff]  ;;  %v3552_v19 = vsub.f32 %v15840_v36, %v11390_v9 }
 0x580   : > { %15823 = vst [vmem:[#allocation74_spill] sm:$0xff] %v11795_v17  ;;  %v11801_v3 = vpop.f32.mrb[150].mxu1  ;;  %v11803_v24 = vpop.xlane.xlu0 %3308  ;;  %15831 = vst [vmem:[#allocation61_spill] sm:$0xff] %v11815_v47  ;;  %v3551_v45 = vsub.f32 %v15838_v53, %v11390_v9  ;;  %v15843_v53 = vld [vmem:[#allocation56_spill] sm:$0xff]  ;;  %v15845_v9 = vld [vmem:[#allocation65_spill] sm:$0xff] }
 0x581   : > { %15826 = vst [vmem:[#allocation76_spill] sm:$0xff] %v11801_v3  ;;  %v11807_v11 = vpop.f32.mrb[151].mxu1  ;;  %v11813_v34 = vpop.xlane.xlu1 %3227  ;;  %8583 = vpow2.f32 %v3825_v25  ;;  %v3619_v3 = vsub.f32 %v15843_v53, %v11403_v59 }
 0x582   : > { %15828 = vst [vmem:[#allocation270_spill] sm:$0xff] %v11807_v11  ;;  %v11823_v1 = vpop.f32.mrb[135].mxu0  ;;  %v11835_v20 = vpop.eup %8571  ;;  %8585 = vpow2.f32 %v3827_v5  ;;  %v3829_v57 = vmul.f32 1.442695, %v3551_v45  ;;  %v15851_v45 = vld [vmem:[#allocation82_spill] sm:$0xff] }
 0x583   : > { %15834 = vst [vmem:[#allocation63_spill] sm:$0xff] %v11823_v1  ;;  %3386 = vmax.xlane.f32.xlu1 %v15835_v43  ;;  %3395 = vmax.xlane.f32.xlu0 %v15836_v13  ;;  %15837 = vst [vmem:[#allocation111_spill] sm:$0xff] %v11835_v20  ;;  %v4426_v43 = vadd.f32 %v11815_v47, %v11805_v33  ;;  %v11845_v61 = vpop.eup %8573  ;;  %v15841_v13 = vld [vmem:[#allocation112_spill] sm:$0xff]  ;;  %v15844_v33 = vld [vmem:[#allocation58_spill] sm:$0xff]  ;;  %v3553_v36 = vsub.f32 %v15851_v45, %v11434_v0  ;;  %v3965_v17 = vmul.f32 1.442695, %v3619_v3 }
 0x584   : > { %v11833_v18 = vpop.xlane.xlu0 %3215  ;;  %15839 = vst [vmem:[#allocation113_spill] sm:$0xff] %v11845_v61  ;;  %v3620_v47 = vsub.f32 %v15844_v33, %v11403_v59  ;;  %v4324_v25 = vadd.f32 %v11845_v61, %v11835_v20  ;;  %v11871_v53 = vpop.eup %8575  ;;  %v15852_v1 = vld [vmem:[#allocation228_spill] sm:$0xff]  ;;  %8587 = vpow2.f32 %v3829_v57  ;;  %v15864_v57 = vmax.f32 %v11458_v7, %v11482_v21 }
 0x585   : > { %v11839_v11 = vpop.xlane.xlu1 %3323  ;;  %15850 = vst [vmem:[#allocation80_spill] sm:$0xff] %v11871_v53  ;;  %v15853_v2 = vmax.f32 %v11428_v32, %v15852_v1  ;;  %v3833_v32 = vmul.f32 1.442695, %v3553_v36 }
 0x587   : > { %4418 = vadd.xlane.f32.xlu1 %v4417_v30  ;;  %4427 = vadd.xlane.f32.xlu0 %v4426_v43  ;;  %v3831_v30 = vmul.f32 1.442695, %v3552_v19  ;;  %v11878_v52 = vpop.eup %8577  ;;  %v15855_v19 = vld [vmem:[#allocation84_spill] sm:$0xff]  ;;  %v3967_v43 = vmul.f32 1.442695, %v3620_v47 }
 0x588   : > { %v11857_v23 = vpop.xlane.xlu0 %3311  ;;  %15854 = vst [vmem:[#allocation112_spill] sm:$0xff] %v11878_v52  ;;  %v3554_v20 = vsub.f32 %v15855_v19, %v11434_v0  ;;  %v11884_v33 = vpop.eup %8579  ;;  %v15860_v0 = vld [vmem:[#allocation86_spill] sm:$0xff]  ;;  %v15861_v19 = vld [vmem:[#allocation212_spill] sm:$0xff]  ;;  %v4420_v36 = vadd.f32 %v11878_v52, %v11871_v53 }
 0x589   : > { %v11863_v41 = vpop.xlane.xlu1 %3230  ;;  %15856 = vst [vmem:[#allocation114_spill] sm:$0xff] %v11884_v33  ;;  %v11888_v45 = vpop.eup %8581  ;;  %8589 = vpow2.f32 %v3831_v30  ;;  %v3555_v47 = vsub.f32 %v15860_v0, %v11486_v60  ;;  %v15888_v52 = vld [vmem:[#allocation62_spill] sm:$0xff] }
 0x58a   : > { %15847 = vst [vmem:[#allocation78_spill] sm:$0xff] %v11863_v41  ;;  %15857 = vst [vmem:[#allocation56_spill] sm:$0xff] %v11888_v45  ;;  %8591 = vpow2.f32 %v3965_v17  ;;  %v15862_v41 = vld [vmem:[#allocation217_spill] sm:$0xff]  ;;  %v3835_v30 = vmul.f32 1.442695, %v3554_v20  ;;  %v15868_v17 = vld [vmem:[#allocation90_spill] sm:$0xff] }
 0x58b   : > { %4325 = vadd.xlane.f32.xlu1 %v4324_v25  ;;  %3491 = vmax.xlane.f32.xlu0 %v15853_v2  ;;  %v15859_v2 = vld [vmem:[#allocation118_spill] sm:$0xff]  ;;  %v15863_v5 = vmax.f32 %v15861_v19, %v15862_v41  ;;  %v3556_v25 = vsub.f32 %v15865_v29, %v11486_v60  ;;  %8593 = vpow2.f32 %v3967_v43  ;;  %v11908_v0 = vpop.eup %8583  ;;  %v3557_v1 = vsub.f32 %v15868_v17, %v11526_v10  ;;  %v15873_v43 = vld [vmem:[#allocation92_spill] sm:$0xff] }
 0x58c   : > { %v11882_v61 = vpop.xlane.xlu0 %3218  ;;  %15867 = vst [vmem:[#allocation65_spill] sm:$0xff] %v11908_v0  ;;  %v4429_v29 = vadd.f32 %v11888_v45, %v11884_v33  ;;  %v11920_v60 = vpop.eup %8585  ;;  %v3558_v53 = vsub.f32 %v15873_v43, %v11526_v10  ;;  %8595 = vpow2.f32 %v3833_v32  ;;  %v3837_v41 = vmul.f32 1.442695, %v3555_v47 }
 0x58d   : > { %v11886_v59 = vpop.xlane.xlu1 %3326  ;;  %15872 = vst [vmem:[#allocation84_spill] sm:$0xff] %v11920_v60  ;;  %8597 = vpow2.f32 %v3835_v30  ;;  %v3839_v20 = vmul.f32 1.442695, %v3556_v25  ;;  %v3841_v33 = vmul.f32 1.442695, %v3557_v1  ;;  %v4327_v10 = vadd.f32 %v11920_v60, %v11908_v0  ;;  %v15880_v30 = vld [vmem:[#allocation60_spill] sm:$0xff] }
 0x58e   : > { %v3843_v43 = vmul.f32 1.442695, %v3558_v53  ;;  %v11938_v47 = vpop.eup %8587  ;;  %8599 = vpow2.f32 %v3837_v41  ;;  %v15881_v25 = vld [vmem:[#allocation226_spill] sm:$0xff]  ;;  %v15885_v0 = vld [vmem:[#allocation237_spill] sm:$0xff]  ;;  %v15890_v41 = vld [vmem:[#allocation96_spill] sm:$0xff] }
 0x58f   : > { %3389 = vmax.xlane.f32.xlu1 %v15863_v5  ;;  %3398 = vmax.xlane.f32.xlu0 %v15864_v57  ;;  %15879 = vst [vmem:[#allocation86_spill] sm:$0xff] %v11938_v47  ;;  %v15883_v1 = vld [vmem:[#allocation94_spill] sm:$0xff]  ;;  %8601 = vpow2.f32 %v3839_v20  ;;  %v15889_v32 = vsub.f32 %v15888_v52, %v15881_v25 }
 0x590   : > { %v11904_v3 = vpop.xlane.xlu0 %3314  ;;  %v3559_v17 = vsub.f32 %v15883_v1, %v11578_v56  ;;  %8603 = vpow2.f32 %v3841_v33  ;;  %v15898_v33 = vld [vmem:[#allocation98_spill] sm:$0xff] }
 0x591   : > { %15866 = vst [vmem:[#allocation58_spill] sm:$0xff] %v11904_v3  ;;  %v11916_v19 = vpop.xlane.xlu1 %3233  ;;  %v3971_v7 = vmul.f32 1.442695, %v15889_v32  ;;  %8605 = vpow2.f32 %v3843_v43  ;;  %v3561_v21 = vsub.f32 %v15898_v33, %v11634_v62  ;;  %v15899_v1 = vld [vmem:[#allocation218_spill] sm:$0xff]  ;;  %v15905_v32 = vld [vmem:[#allocation100_spill] sm:$0xff] }
 0x592   : > { %15871 = vst [vmem:[#allocation82_spill] sm:$0xff] %v11916_v19  ;;  %v15884_v19 = vld [vmem:[#allocation234_spill] sm:$0xff]  ;;  %v3562_v52 = vsub.f32 %v15905_v32, %v11634_v62 }
 0x593   : > { %4421 = vadd.xlane.f32.xlu1 %v4420_v36  ;;  %4430 = vadd.xlane.f32.xlu0 %v4429_v29  ;;  %v15882_v36 = vsub.f32 %v15880_v30, %v15881_v25  ;;  %v15886_v53 = vmax.f32 %v15884_v19, %v15885_v0  ;;  %v11948_v60 = vpop.eup %8589  ;;  %v15902_v0 = vld [vmem:[#allocation179_spill] sm:$0xff]  ;;  %v15918_v32 = vld [vmem:[#allocation66_spill] sm:$0xff] }
 0x594   : > { %v11928_v57 = vpop.xlane.xlu0 %3221  ;;  %15887 = vst [vmem:[#allocation88_spill] sm:$0xff] %v11948_v60  ;;  %v4330_v33 = vadd.f32 %v11948_v60, %v11938_v47 }
 0x595   : > { %v11930_v45 = vpop.xlane.xlu1 %3329  ;;  %v3969_v29 = vmul.f32 1.442695, %v15882_v36  ;;  %v11957_v36 = vpop.eup %8591 }
 0x596   : > { %15876 = vst [vmem:[#allocation118_spill] sm:$0xff] %v11930_v45  ;;  %v3560_v45 = vsub.f32 %v15890_v41, %v11578_v56  ;;  %15892 = vst [vmem:[#allocation92_spill] sm:$0xff] %v11957_v36  ;;  %v11965_v20 = vpop.eup %8593  ;;  %v3845_v41 = vmul.f32 1.442695, %v3559_v17  ;;  %v15914_v56 = vld [vmem:[#allocation71_spill] sm:$0xff] }
 0x597   : > { %4328 = vadd.xlane.f32.xlu1 %v4327_v10  ;;  %3494 = vmax.xlane.f32.xlu0 %v15886_v53  ;;  %15895 = vst [vmem:[#allocation60_spill] sm:$0xff] %v11965_v20  ;;  %8607 = vpow2.f32 %v3969_v29  ;;  %v15900_v10 = vld [vmem:[#allocation221_spill] sm:$0xff]  ;;  %v11983_v29 = vpop.eup %8595  ;;  %v3563_v47 = vsub.f32 %v15914_v56, %v11701_v26  ;;  %v15929_v56 = vld [vmem:[#allocation75_spill] sm:$0xff] }
 0x598   : > { %v11955_v30 = vpop.xlane.xlu0 %3317  ;;  %v15901_v3 = vmax.f32 %v15899_v1, %v15900_v10  ;;  %v15903_v53 = vld [vmem:[#allocation241_spill] sm:$0xff]  ;;  %8609 = vpow2.f32 %v3971_v7  ;;  %v3847_v43 = vmul.f32 1.442695, %v3560_v45  ;;  %15906 = vst [vmem:[#allocation226_spill] sm:$0xff] %v11983_v29  ;;  %v11991_v25 = vpop.eup %8597  ;;  %v15910_v7 = vld [vmem:[#allocation235_spill] sm:$0xff] }
 0x599   : > { %15891 = vst [vmem:[#allocation90_spill] sm:$0xff] %v11955_v30  ;;  %v11963_v19 = vpop.xlane.xlu1 %3236  ;;  %v15904_v30 = vmax.f32 %v15902_v0, %v15903_v53  ;;  %15908 = vst [vmem:[#allocation62_spill] sm:$0xff] %v11991_v25  ;;  %8611 = vpow2.f32 %v3845_v41  ;;  %v3849_v0 = vmul.f32 1.442695, %v3561_v21  ;;  %v15919_v62 = vsub.f32 %v15918_v32, %v15910_v7 }
 0x59a   : > { %8613 = vpow2.f32 %v3847_v43  ;;  %v15924_v43 = vld [vmem:[#allocation23_spill] sm:$0xff] }
 0x59b   : > { %3392 = vmax.xlane.f32.xlu1 %v15901_v3  ;;  %3401 = vmax.xlane.f32.xlu0 %v15904_v30  ;;  %v4432_v3 = vadd.f32 %v11965_v20, %v11957_v36  ;;  %v15909_v30 = vld [vmem:[#allocation64_spill] sm:$0xff]  ;;  %v3851_v36 = vmul.f32 1.442695, %v3562_v52  ;;  %v15915_v20 = vld [vmem:[#allocation73_spill] sm:$0xff]  ;;  %v3975_v53 = vmul.f32 1.442695, %v15919_v62  ;;  %v4333_v52 = vadd.f32 %v11991_v25, %v11983_v29 }
 0x59c   : > { %v11981_v5 = vpop.xlane.xlu0 %3224  ;;  %v15911_v45 = vsub.f32 %v15909_v30, %v15910_v7  ;;  %v3564_v60 = vsub.f32 %v15915_v20, %v11701_v26  ;;  %v15923_v20 = vld [vmem:[#allocation68_spill] sm:$0xff]  ;;  %v3565_v29 = vsub.f32 %v15929_v56, %v11762_v4  ;;  %v15930_v25 = vld [vmem:[#allocation34_spill] sm:$0xff]  ;;  %v15934_v62 = vld [vmem:[#allocation77_spill] sm:$0xff] }
 0x59d   : > { %v11985_v17 = vpop.xlane.xlu1 %3332  ;;  %v15925_v1 = vsub.f32 %v15923_v20, %v15924_v43  ;;  %v3566_v7 = vsub.f32 %v15934_v62, %v11762_v4  ;;  %v15940_v4 = vld [vmem:[#allocation39_spill] sm:$0xff] }
 0x59e   : > { %15907 = vst [vmem:[#allocation94_spill] sm:$0xff] %v11985_v17  ;;  %v3973_v10 = vmul.f32 1.442695, %v15911_v45  ;;  %v12006_v45 = vpop.eup %8599 }
 0x59f   : > { %4331 = vadd.xlane.f32.xlu1 %v4330_v33  ;;  %4433 = vadd.xlane.f32.xlu0 %v4432_v3  ;;  %15917 = vst [vmem:[#allocation98_spill] sm:$0xff] %v12006_v45  ;;  %v12019_v26 = vpop.eup %8601  ;;  %v3977_v17 = vmul.f32 1.442695, %v15925_v1  ;;  %v3853_v33 = vmul.f32 1.442695, %v3563_v47  ;;  %v15942_v47 = vmax.f32 %v11516_v40, %v11538_v14 }
 0x5a0   : > { %v12004_v30 = vpop.xlane.xlu0 %3320  ;;  %15922 = vst [vmem:[#allocation100_spill] sm:$0xff] %v12019_v26  ;;  %8615 = vpow2.f32 %v3973_v10  ;;  %v12028_v21 = vpop.eup %8603  ;;  %v15931_v10 = vld [vmem:[#allocation240_spill] sm:$0xff]  ;;  %v3855_v1 = vmul.f32 1.442695, %v3564_v60 }
 0x5a1   : > { %15916 = vst [vmem:[#allocation96_spill] sm:$0xff] %v12004_v30  ;;  %v12015_v3 = vpop.xlane.xlu1 %3239  ;;  %15928 = vst [vmem:[#allocation64_spill] sm:$0xff] %v12028_v21  ;;  %8617 = vpow2.f32 %v3849_v0  ;;  %v15932_v30 = vmax.f32 %v15930_v25, %v15931_v10  ;;  %v12035_v20 = vpop.eup %8605  ;;  %v15937_v0 = vld [vmem:[#allocation136_spill] sm:$0xff]  ;;  %v15944_v25 = vld [vmem:[#allocation242_spill] sm:$0xff] }
 0x5a2   : > { %15933 = vst [vmem:[#allocation235_spill] sm:$0xff] %v12035_v20  ;;  %8619 = vpow2.f32 %v3851_v36  ;;  %v12041_v32 = vpop.eup %8607  ;;  %v4336_v36 = vadd.f32 %v12019_v26, %v12006_v45  ;;  %v3859_v45 = vmul.f32 1.442695, %v3566_v7  ;;  %v15950_v7 = vld [vmem:[#allocation43_spill] sm:$0xff] }
 0x5a3   : > { %4334 = vadd.xlane.f32.xlu1 %v4333_v52  ;;  %3497 = vmax.xlane.f32.xlu0 %v15932_v30  ;;  %15936 = vst [vmem:[#allocation73_spill] sm:$0xff] %v12041_v32  ;;  %8621 = vpow2.f32 %v3975_v53  ;;  %v12051_v60 = vpop.eup %8609  ;;  %v15941_v30 = vsub.f32 %v15940_v4, %v15924_v43  ;;  %v3857_v53 = vmul.f32 1.442695, %v3565_v29  ;;  %v15943_v52 = vld [vmem:[#allocation41_spill] sm:$0xff]  ;;  %v15947_v43 = vld [vmem:[#allocation140_spill] sm:$0xff]  ;;  %v15948_v29 = vld [vmem:[#allocation142_spill] sm:$0xff] }
 0x5a4   : > { %v12039_v41 = vpop.xlane.xlu0 %3437  ;;  %15939 = vst [vmem:[#allocation66_spill] sm:$0xff] %v12051_v60  ;;  %8623 = vpow2.f32 %v3977_v17  ;;  %v15945_v56 = vsub.f32 %v15943_v52, %v15944_v25  ;;  %v12064_v17 = vpop.eup %8611  ;;  %v15951_v52 = vsub.f32 %v15950_v7, %v15944_v25  ;;  %v15952_v4 = vld [vmem:[#allocation131_spill] sm:$0xff]  ;;  %v15956_v25 = vsub.f32 %v15757_v8, %v11589_v48  ;;  %v15963_v8 = vld [vmem:[#allocation249_spill] sm:$0xff] }
 0x5a5   : > { %15935 = vst [vmem:[#allocation71_spill] sm:$0xff] %v12039_v41  ;;  %v12047_v10 = vpop.xlane.xlu1 %3335  ;;  %v3979_v62 = vmul.f32 1.442695, %v15941_v30  ;;  %8625 = vpow2.f32 %v3853_v33  ;;  %15946 = vst [vmem:[#allocation68_spill] sm:$0xff] %v12064_v17  ;;  %v15953_v33 = vld [vmem:[#allocation133_spill] sm:$0xff] }
 0x5a6   : > { %8627 = vpow2.f32 %v3855_v1  ;;  %v3981_v41 = vmul.f32 1.442695, %v15945_v56  ;;  %v4339_v1 = vadd.f32 %v12035_v20, %v12028_v21  ;;  %v12076_v56 = vpop.eup %8613  ;;  %v3983_v30 = vmul.f32 1.442695, %v15951_v52 }
 0x5a7   : > { %4337 = vadd.xlane.f32.xlu1 %v4336_v36  ;;  %3404 = vmax.xlane.f32.xlu0 %v15942_v47  ;;  %v4435_v47 = vadd.f32 %v12051_v60, %v12041_v32  ;;  %15949 = vst [vmem:[#allocation23_spill] sm:$0xff] %v12076_v56  ;;  %8629 = vpow2.f32 %v3979_v62  ;;  %v15954_v21 = vsub.f32 %v15756_v46, %v11589_v48  ;;  %v3863_v62 = vmul.f32 1.442695, %v15956_v25  ;;  %v15970_v46 = vld [vmem:[#allocation36_spill] sm:$0xff] }
 0x5a8   : > { %v12062_v26 = vpop.xlane.xlu0 %3440  ;;  %8631 = vpow2.f32 %v3857_v53  ;;  %v15964_v48 = vsub.f32 %v15745_v31, %v15963_v8  ;;  %v15971_v31 = vld [vmem:[#allocation244_spill] sm:$0xff]  ;;  %v15974_v60 = vsub.f32 %v15778_v49, %v11646_v54  ;;  %v15984_v49 = vsub.f32 %v15766_v58, %v11616_v22 }
 0x5a9   : > { %v12070_v36 = vpop.xlane.xlu1 %3338  ;;  %v3861_v20 = vmul.f32 1.442695, %v15954_v21  ;;  %8633 = vpow2.f32 %v3859_v45  ;;  %v4342_v45 = vadd.f32 %v12076_v56, %v12064_v17  ;;  %v15968_v21 = vsub.f32 %v15777_v27, %v11646_v54  ;;  %v15969_v56 = vld [vmem:[#allocation87_spill] sm:$0xff] }
 0x5aa   : > { %v12088_v32 = vpop.eup %8615  ;;  %8635 = vpow2.f32 %v3981_v41  ;;  %v3985_v25 = vmul.f32 1.442695, %v15964_v48  ;;  %v15972_v48 = vmax.f32 %v15970_v46, %v15971_v31  ;;  %v3867_v14 = vmul.f32 1.442695, %v15974_v60  ;;  %v15987_v31 = vld [vmem:[#allocation91_spill] sm:$0xff] }
 0x5ab   : > { %4340 = vadd.xlane.f32.xlu1 %v4339_v1  ;;  %4436 = vadd.xlane.f32.xlu0 %v4435_v47  ;;  %15955 = vst [vmem:[#allocation75_spill] sm:$0xff] %v12088_v32  ;;  %v12095_v52 = vpop.eup %8617  ;;  %8637 = vpow2.f32 %v3983_v30  ;;  %v3865_v17 = vmul.f32 1.442695, %v15968_v21  ;;  %v3571_v30 = vsub.f32 %v15969_v56, %v11714_v42  ;;  %v15978_v56 = vld [vmem:[#allocation47_spill] sm:$0xff]  ;;  %v3989_v60 = vmul.f32 1.442695, %v15984_v49 }
 0x5ac   : > { %v12093_v7 = vpop.xlane.xlu0 %3443  ;;  %15958 = vst [vmem:[#allocation136_spill] sm:$0xff] %v12095_v52  ;;  %v12105_v47 = vpop.eup %8619  ;;  %8639 = vpow2.f32 %v3861_v20  ;;  %v15975_v20 = vld [vmem:[#allocation89_spill] sm:$0xff] }
 0x5ad   : > { %15957 = vst [vmem:[#allocation77_spill] sm:$0xff] %v12093_v7  ;;  %v12101_v1 = vpop.xlane.xlu1 %3434  ;;  %15962 = vst [vmem:[#allocation41_spill] sm:$0xff] %v12105_v47  ;;  %v12114_v53 = vpop.eup %8621  ;;  %8641 = vpow2.f32 %v3863_v62  ;;  %v3572_v40 = vsub.f32 %v15975_v20, %v11714_v42  ;;  %v4345_v54 = vadd.f32 %v12105_v47, %v12095_v52  ;;  %v3869_v46 = vmul.f32 1.442695, %v3571_v30  ;;  %v15988_v52 = vld [vmem:[#allocation247_spill] sm:$0xff]  ;;  %v15989_v47 = vld [vmem:[#allocation45_spill] sm:$0xff] }
 0x5ae   : > { %15961 = vst [vmem:[#allocation39_spill] sm:$0xff] %v12101_v1  ;;  %15967 = vst [vmem:[#allocation242_spill] sm:$0xff] %v12114_v53  ;;  %v12124_v7 = vpop.eup %8623  ;;  %8643 = vpow2.f32 %v3985_v25  ;;  %v3573_v62 = vsub.f32 %v15987_v31, %v11770_v28  ;;  %v15992_v49 = vld [vmem:[#allocation93_spill] sm:$0xff] }
 0x5af   : > { %4343 = vadd.xlane.f32.xlu1 %v4342_v45  ;;  %3500 = vmax.xlane.f32.xlu0 %v15972_v48  ;;  %15973 = vst [vmem:[#allocation140_spill] sm:$0xff] %v12124_v7  ;;  %v12133_v21 = vpop.eup %8625  ;;  %v15979_v45 = vsub.f32 %v15978_v56, %v15963_v8  ;;  %v15980_v48 = vld [vmem:[#allocation148_spill] sm:$0xff]  ;;  %8645 = vpow2.f32 %v3865_v17  ;;  %v3871_v58 = vmul.f32 1.442695, %v3572_v40  ;;  %v3574_v20 = vsub.f32 %v15992_v49, %v11770_v28  ;;  %v16003_v56 = vld [vmem:[#allocation95_spill] sm:$0xff] }
 0x5b0   : > { %v12131_v27 = vpop.xlane.xlu0 %3446  ;;  %15977 = vst [vmem:[#allocation43_spill] sm:$0xff] %v12133_v21  ;;  %v12146_v42 = vpop.eup %8627  ;;  %8647 = vpow2.f32 %v3867_v14  ;;  %v4438_v17 = vadd.f32 %v12114_v53, %v12088_v32  ;;  %v15999_v14 = vsub.f32 %v15767_v12, %v11616_v22  ;;  %v16005_v12 = vld [vmem:[#allocation97_spill] sm:$0xff] }
 0x5b1   : > { %15976 = vst [vmem:[#allocation142_spill] sm:$0xff] %v12131_v27  ;;  %v3987_v1 = vmul.f32 1.442695, %v15979_v45  ;;  %v12142_v41 = vpop.xlane.xlu1 %3341  ;;  %15983 = vst [vmem:[#allocation133_spill] sm:$0xff] %v12146_v42  ;;  %v15990_v27 = vmax.f32 %v15988_v52, %v15989_v47  ;;  %v12160_v25 = vpop.eup %8629  ;;  %v4348_v40 = vadd.f32 %v12146_v42, %v12133_v21  ;;  %v3873_v45 = vmul.f32 1.442695, %v3573_v62 }
 0x5b2   : > { %15982 = vst [vmem:[#allocation131_spill] sm:$0xff] %v12142_v41  ;;  %15991 = vst [vmem:[#allocation249_spill] sm:$0xff] %v12160_v25  ;;  %v12168_v30 = vpop.eup %8631  ;;  %v3991_v49 = vmul.f32 1.442695, %v15999_v14  ;;  %v3575_v21 = vsub.f32 %v16003_v56, %v11833_v18  ;;  %v3875_v22 = vmul.f32 1.442695, %v3574_v20  ;;  %v3576_v14 = vsub.f32 %v16005_v12, %v11833_v18 }
 0x5b3   : > { %4346 = vadd.xlane.f32.xlu1 %v4345_v54  ;;  %3407 = vmax.xlane.f32.xlu0 %v15990_v27  ;;  %15994 = vst [vmem:[#allocation89_spill] sm:$0xff] %v12168_v30  ;;  %8649 = vpow2.f32 %v3987_v1  ;;  %v12178_v28 = vpop.eup %8633  ;;  %v16016_v1 = vld [vmem:[#allocation99_spill] sm:$0xff] }
 0x5b4   : > { %v12164_v8 = vpop.xlane.xlu0 %3449  ;;  %15998 = vst [vmem:[#allocation148_spill] sm:$0xff] %v12178_v28  ;;  %8651 = vpow2.f32 %v3989_v60  ;;  %v12187_v53 = vpop.eup %8635  ;;  %v4351_v20 = vadd.f32 %v12178_v28, %v12168_v30  ;;  %v16017_v30 = vld [vmem:[#allocation248_spill] sm:$0xff] }
 0x5b5   : > { %15993 = vst [vmem:[#allocation87_spill] sm:$0xff] %v12164_v8  ;;  %v12174_v47 = vpop.xlane.xlu1 %3344  ;;  %16002 = vst [vmem:[#allocation91_spill] sm:$0xff] %v12187_v53  ;;  %8653 = vpow2.f32 %v3869_v46  ;;  %v12191_v60 = vpop.eup %8637  ;;  %v16008_v46 = vsub.f32 %v15788_v38, %v11681_v15  ;;  %v16018_v28 = vld [vmem:[#allocation24_spill] sm:$0xff] }
 0x5b6   : > { %15997 = vst [vmem:[#allocation47_spill] sm:$0xff] %v12174_v47  ;;  %16004 = vst [vmem:[#allocation93_spill] sm:$0xff] %v12191_v60  ;;  %8655 = vpow2.f32 %v3871_v58  ;;  %v12197_v42 = vpop.eup %8639  ;;  %v16013_v58 = vsub.f32 %v15789_v44, %v11681_v15  ;;  %v3879_v44 = vmul.f32 1.442695, %v3576_v14  ;;  %v16021_v15 = vld [vmem:[#allocation101_spill] sm:$0xff]  ;;  %v16026_v14 = vld [vmem:[#allocation147_spill] sm:$0xff] }
 0x5b7   : > { %4349 = vadd.xlane.f32.xlu1 %v4348_v40  ;;  %4439 = vadd.xlane.f32.xlu0 %v4438_v17  ;;  %16007 = vst [vmem:[#allocation97_spill] sm:$0xff] %v12197_v42  ;;  %v3993_v62 = vmul.f32 1.442695, %v16008_v46  ;;  %v12210_v18 = vpop.eup %8641  ;;  %8657 = vpow2.f32 %v3991_v49  ;;  %v3877_v40 = vmul.f32 1.442695, %v3575_v21  ;;  %v3577_v17 = vsub.f32 %v16016_v1, %v11882_v61 }
 0x5b8   : > { %v12195_v52 = vpop.xlane.xlu0 %3452  ;;  %16012 = vst [vmem:[#allocation272_spill] sm:$0xff] %v12210_v18  ;;  %v3995_v12 = vmul.f32 1.442695, %v16013_v58  ;;  %8659 = vpow2.f32 %v3873_v45  ;;  %v12224_v49 = vpop.eup %8643  ;;  %v3578_v58 = vsub.f32 %v16021_v15, %v11882_v61  ;;  %v16023_v45 = vld [vmem:[#allocation26_spill] sm:$0xff]  ;;  %v4354_v1 = vadd.f32 %v12210_v18, %v12197_v42  ;;  %v16029_v42 = vld [vmem:[#allocation105_spill] sm:$0xff] }
 0x5b9   : > { %16006 = vst [vmem:[#allocation95_spill] sm:$0xff] %v12195_v52  ;;  %v12206_v54 = vpop.xlane.xlu1 %3347  ;;  %v16019_v52 = vmax.f32 %v16017_v30, %v16018_v28  ;;  %16020 = vst [vmem:[#allocation99_spill] sm:$0xff] %v12224_v49  ;;  %8661 = vpow2.f32 %v3875_v22  ;;  %v12228_v38 = vpop.eup %8645  ;;  %v16027_v15 = vld [vmem:[#allocation150_spill] sm:$0xff]  ;;  %v3881_v21 = vmul.f32 1.442695, %v3577_v17  ;;  %v3580_v18 = vsub.f32 %v16029_v42, %v11928_v57 }
 0x5ba   : > { %16011 = vst [vmem:[#allocation271_spill] sm:$0xff] %v12206_v54  ;;  %16022 = vst [vmem:[#allocation101_spill] sm:$0xff] %v12228_v38  ;;  %8663 = vpow2.f32 %v3993_v62  ;;  %v16033_v61 = vsub.f32 %v15808_v55, %v11738_v51  ;;  %v3883_v54 = vmul.f32 1.442695, %v3578_v58  ;;  %v4441_v17 = vadd.f32 %v12160_v25, %v12124_v7  ;;  %v16042_v25 = vld [vmem:[#allocation15_spill] sm:$0xff] }
 0x5bb   : > { %4352 = vadd.xlane.f32.xlu1 %v4351_v20  ;;  %3503 = vmax.xlane.f32.xlu0 %v16019_v52  ;;  %v12235_v20 = vpop.eup %8647  ;;  %8665 = vpow2.f32 %v3995_v12  ;;  %v16025_v52 = vld [vmem:[#allocation103_spill] sm:$0xff] }
 0x5bc   : > { %v4299_v46 = vpop.xlane.xlu0 %4298  ;;  %16024 = vst [vmem:[#allocation26_spill] sm:$0xff] %v12235_v20  ;;  %v3579_v22 = vsub.f32 %v16025_v52, %v11928_v57  ;;  %8667 = vpow2.f32 %v3877_v40  ;;  %v16030_v12 = vld [vmem:[#allocation79_spill] sm:$0xff]  ;;  %v3997_v28 = vmul.f32 1.442695, %v16033_v61  ;;  %v4357_v55 = vadd.f32 %v12235_v20, %v12228_v38 }
 0x5bd   : > { %v12231_v47 = vpop.xlane.xlu1 %3350  ;;  %v12243_v30 = vpop.eup %8649  ;;  %v16031_v56 = vmax.f32 %v11583_v37, %v16030_v12  ;;  %8669 = vpow2.f32 %v3879_v44  ;;  %v16039_v61 = vld [vmem:[#allocation107_spill] sm:$0xff]  ;;  %v8190_v57 = vunpack.i.h.bf16 %v16042_v25 }
 0x5be   : > { %16028 = vst [vmem:[#allocation103_spill] sm:$0xff] %v12243_v30  ;;  %v12251_v52 = vpop.eup %8651  ;;  %8671 = vrcp.f32 %v4299_v46  ;;  %v3885_v58 = vmul.f32 1.442695, %v3579_v22  ;;  %v3581_v12 = vsub.f32 %v16039_v61, %v11981_v5  ;;  %v16040_v37 = vld [vmem:[#allocation151_spill] sm:$0xff]  ;;  %v8187_v22 = vunpack.i.l.bf16 %v16042_v25 }
 0x5bf   : > { %4355 = vadd.xlane.f32.xlu1 %v4354_v1  ;;  %3410 = vmax.xlane.f32.xlu0 %v16031_v56  ;;  %16032 = vst [vmem:[#allocation147_spill] sm:$0xff] %v12251_v52  ;;  %v12260_v40 = vpop.eup %8653  ;;  %8673 = vpow2.f32 %v3881_v21  ;;  %v3887_v1 = vmul.f32 1.442695, %v3580_v18  ;;  %v16043_v56 = vld [vmem:[#allocation109_spill] sm:$0xff]  ;;  %v16045_v61 = vld [vmem:[#allocation27_spill] sm:$0xff]  ;;  %v16046_v46 = vsub.f32 %v15809_v50, %v11738_v51  ;;  %v16048_v21 = vld [vmem:[#allocation16_spill] sm:$0xff] }
 0x5c0   : > { %v12256_v32 = vpop.xlane.xlu0 %3455  ;;  %16035 = vst [vmem:[#allocation105_spill] sm:$0xff] %v12260_v40  ;;  %v12270_v44 = vpop.eup %8655  ;;  %8675 = vpow2.f32 %v3883_v54  ;;  %v16059_v50 = vld [vmem:[#allocation17_spill] sm:$0xff]  ;;  %v16063_v51 = vld [vmem:[#allocation159_spill] sm:$0xff] }
 0x5c1   : > { %16034 = vst [vmem:[#allocation150_spill] sm:$0xff] %v12256_v32  ;;  %v12266_v62 = vpop.xlane.xlu1 %3353  ;;  %16038 = vst [vmem:[#allocation273_spill] sm:$0xff] %v12270_v44  ;;  %v3582_v32 = vsub.f32 %v16043_v56, %v11981_v5  ;;  %v12281_v38 = vpop.eup %8657  ;;  %v3999_v27 = vmul.f32 1.442695, %v16046_v46  ;;  %8677 = vpow2.f32 %v3997_v28  ;;  %v4360_v25 = vadd.f32 %v12270_v44, %v12260_v40  ;;  %v16054_v28 = vld [vmem:[#allocation28_spill] sm:$0xff]  ;;  %v16056_v44 = vld [vmem:[#allocation46_spill] sm:$0xff] }
 0x5c2   : > { %16044 = vst [vmem:[#allocation107_spill] sm:$0xff] %v12281_v38  ;;  %v12288_v8 = vpop.eup %8659  ;;  %8679 = vpow2.f32 %v3885_v58  ;;  %v16055_v40 = vld [vmem:[#allocation44_spill] sm:$0xff]  ;;  %v16061_v18 = vld [vmem:[#allocation29_spill] sm:$0xff]  ;;  %v16070_v46 = vunpack.i.h.bf16 %v16023_v45 }
 0x5c3   : > { %4358 = vadd.xlane.f32.xlu1 %v4357_v55  ;;  %4442 = vadd.xlane.f32.xlu0 %v4441_v17  ;;  %16047 = vst [vmem:[#allocation151_spill] sm:$0xff] %v12288_v8  ;;  %v12296_v56 = vpop.eup %8661  ;;  %v3889_v55 = vmul.f32 1.442695, %v3581_v12  ;;  %8681 = vpow2.f32 %v3887_v1  ;;  %v3891_v31 = vmul.f32 1.442695, %v3582_v32  ;;  %v16057_v41 = vmax.f32 %v16055_v40, %v16056_v44 }
 0x5c4   : > { %v4395_v42 = vpop.xlane.xlu0 %4394  ;;  %16050 = vst [vmem:[#allocation109_spill] sm:$0xff] %v12296_v56  ;;  %v12302_v20 = vpop.eup %8663  ;;  %8683 = vpow2.f32 %v3999_v27  ;;  %v16064_v27 = vld [vmem:[#allocation162_spill] sm:$0xff]  ;;  %v16065_v40 = vunpack.i.l.bf16 %v16023_v45  ;;  %v12340_v58 = vpack.c.bf16 %v8190_v57, %v16070_v46  ;;  %v16077_v45 = vld [vmem:[#allocation164_spill] sm:$0xff] }
 0x5c5   : > { %v12292_v17 = vpop.xlane.xlu1 %3356  ;;  %16053 = vst [vmem:[#allocation27_spill] sm:$0xff] %v12302_v20  ;;  %v12309_v12 = vpop.eup %8665  ;;  %8685 = vrcp.f32 %v4395_v42  ;;  %v16066_v42 = vsub.f32 %v15832_v6, %v11813_v34  ;;  %v16072_v6 = vsub.f32 %v15833_v39, %v11813_v34  ;;  %v16090_v57 = vld [vmem:[#allocation30_spill] sm:$0xff] }
 0x5c6   : > { %16049 = vst [vmem:[#allocation15_spill] sm:$0xff] %v12292_v17  ;;  %16058 = vst [vmem:[#allocation16_spill] sm:$0xff] %v12309_v12  ;;  %v12314_v5 = vpop.eup %8667  ;;  %8687 = vpow2.f32 %v3889_v55  ;;  %v7530_v1 = vpack.c.bf16 %v8187_v22, %v16065_v40  ;;  %v4444_v55 = vadd.f32 %v12191_v60, %v12187_v53  ;;  %v16071_v40 = vsub.f32 %v15829_v35, %v11803_v24  ;;  %v16100_v35 = vld [vmem:[#allocation19_spill] sm:$0xff] }
 0x5c7   : > { %4361 = vadd.xlane.f32.xlu1 %v4360_v25  ;;  %3506 = vmax.xlane.f32.xlu0 %v16057_v41  ;;  %16060 = vst [vmem:[#allocation28_spill] sm:$0xff] %v12314_v5  ;;  %v4363_v41 = vadd.f32 %v12296_v56, %v12288_v8  ;;  %v12322_v44 = vpop.eup %8669  ;;  %v3893_v32 = vmul.f32 1.442695, %v16066_v42  ;;  %8689 = vpow2.f32 %v3891_v31  ;;  %v16067_v8 = vld [vmem:[#allocation81_spill] sm:$0xff]  ;;  %v3895_v31 = vmul.f32 1.442695, %v16072_v6 }
 0x5c8   : > { %v4302_v54 = vpop.xlane.xlu0 %4301  ;;  %16062 = vst [vmem:[#allocation17_spill] sm:$0xff] %v12322_v44  ;;  %v8672_v17 = vpop.eup %8671  ;;  %v16068_v56 = vld [vmem:[#allocation49_spill] sm:$0xff]  ;;  %v4001_v22 = vmul.f32 1.442695, %v16071_v40  ;;  %v4366_v34 = vadd.f32 %v12322_v44, %v12314_v5  ;;  %v16087_v44 = vsub.f32 %v15841_v13, %v11839_v11  ;;  %v16091_v5 = vsub.f32 %v15842_v63, %v11839_v11 }
 0x5c9   : > { %v12318_v25 = vpop.xlane.xlu1 %3359  ;;  %v16069_v7 = vmax.f32 %v16067_v8, %v16068_v56  ;;  %8691 = vrcp.f32 %v4302_v54  ;;  %v16076_v8 = vld [vmem:[#allocation169_spill] sm:$0xff]  ;;  %v16081_v54 = vsub.f32 %v15830_v16, %v11803_v24  ;;  %v16088_v16 = vld [vmem:[#allocation130_spill] sm:$0xff] }
 0x5ca   : > { %v4682_v53 = vmul.f32 %v8672_v17, %v16076_v8  ;;  %8693 = vpow2.f32 %v3893_v32  ;;  %v4021_v24 = vmul.f32 1.442695, %v16087_v44  ;;  %v4023_v32 = vmul.f32 1.442695, %v16091_v5 }
 0x5cb   : > { %4364 = vadd.xlane.f32.xlu1 %v4363_v41  ;;  %3413 = vmax.xlane.f32.xlu0 %v16069_v7  ;;  %v16073_v41 = vld [vmem:[#allocation171_spill] sm:$0xff]  ;;  %v12351_v7 = vpop.eup %8673  ;;  %v4003_v6 = vmul.f32 1.442695, %v16081_v54  ;;  %v3656_v54 = vsub.f32 %v16088_v16, %v12047_v10  ;;  %8695 = vpow2.f32 %v3895_v31  ;;  %v16095_v16 = vunpack.i.l.bf16 %v16048_v21 }
 0x5cc   : > { %v4683_v42 = vmul.f32 %v8672_v17, %v16073_v41  ;;  %v12349_v56 = vpop.xlane.xlu0 %3458  ;;  %16075 = vst [vmem:[#allocation159_spill] sm:$0xff] %v12351_v7  ;;  %v12362_v39 = vpop.eup %8675  ;;  %v16082_v41 = vld [vmem:[#allocation128_spill] sm:$0xff]  ;;  %8697 = vpow2.f32 %v4001_v22  ;;  %v16106_v22 = vld [vmem:[#allocation37_spill] sm:$0xff] }
 0x5cd   : > { %16074 = vst [vmem:[#allocation29_spill] sm:$0xff] %v12349_v56  ;;  %v12358_v40 = vpop.xlane.xlu1 %3362  ;;  %16080 = vst [vmem:[#allocation171_spill] sm:$0xff] %v12362_v39  ;;  %v3655_v8 = vsub.f32 %v16082_v41, %v12047_v10  ;;  %v12373_v46 = vpop.eup %8677  ;;  %v16086_v56 = vld [vmem:[#allocation18_spill] sm:$0xff]  ;;  %v4369_v63 = vadd.f32 %v12362_v39, %v12351_v7  ;;  %8699 = vpow2.f32 %v4003_v6  ;;  %v16102_v7 = vunpack.i.h.bf16 %v16048_v21 }
 0x5ce   : > { %16079 = vst [vmem:[#allocation162_spill] sm:$0xff] %v12358_v40  ;;  %5129 = vmatprep.mubr.f32.mxu0 %v4683_v42  ;;  %16085 = vst [vmem:[#allocation169_spill] sm:$0xff] %v12373_v46  ;;  %v12381_v42 = vpop.eup %8679  ;;  %8701 = vpow2.f32 %v4021_v24  ;;  %v16104_v6 = vsub.f32 %v15845_v9, %v11857_v23  ;;  %v16105_v10 = vld [vmem:[#allocation182_spill] sm:$0xff]  ;;  %v16107_v40 = vld [vmem:[#allocation252_spill] sm:$0xff] }
 0x5cf   : > { %5130 = vmatmul.mubr.f32.vlgmr.msra.gmra.mrb[136].mxu0 %v4682_v53  ;;  %4367 = vadd.xlane.f32.xlu1 %v4366_v34  ;;  %16089 = vst [vmem:[#allocation164_spill] sm:$0xff] %v12381_v42  ;;  %v12388_v44 = vpop.eup %8681  ;;  %v16093_v53 = vmov 0.0|0.0   ;;  %v16094_v34 = vunpack.i.l.bf16 %v16045_v61  ;;  %v4037_v5 = vmul.f32 1.442695, %v3655_v8  ;;  %8703 = vpow2.f32 %v4023_v32 }
 0x5d0   : > { %7531 = vmatpush1.bf16.msra.mxu0 %v7530_v1  ;;  %4445 = vadd.xlane.f32.xlu0 %v4444_v55  ;;  %v4305_v13 = vpop.xlane.xlu0 %4304  ;;  %16092 = vst [vmem:[#allocation128_spill] sm:$0xff] %v12388_v44  ;;  %v12400_v11 = vpop.eup %8683  ;;  %v4005_v8 = vmul.f32 1.442695, %v16104_v6  ;;  %v16108_v24 = vmax.f32 %v16106_v22, %v16107_v40  ;;  %v16114_v40 = vld [vmem:[#allocation67_spill] sm:$0xff] }
 0x5d1   : > { %7532 = vmatprep.subr.bf16.mxu0 %v16093_v53  ;;  %v7533_v60 = vpack.c.bf16 %v16095_v16, %v16094_v34  ;;  %v12396_v31 = vpop.xlane.xlu1 %3365  ;;  %16097 = vst [vmem:[#allocation130_spill] sm:$0xff] %v12400_v11  ;;  %v8686_v41 = vpop.eup %8685  ;;  %v4039_v34 = vmul.f32 1.442695, %v3656_v54  ;;  %v16101_v16 = vunpack.i.h.bf16 %v16045_v61  ;;  %v4372_v61 = vadd.f32 %v12388_v44, %v12381_v42  ;;  %v16118_v44 = vld [vmem:[#allocation31_spill] sm:$0xff] }
 0x5d2   : > { %16096 = vst [vmem:[#allocation18_spill] sm:$0xff] %v12396_v31  ;;  %v12411_v17 = vpop.eup %8687  ;;  %v4779_v55 = vmul.f32 %v8686_v41, %v16105_v10  ;;  %8705 = vrcp.f32 %v4305_v13  ;;  %v16115_v22 = vsub.f32 %v16114_v40, %v11857_v23  ;;  %v16116_v13 = vunpack.i.l.bf16 %v16054_v28  ;;  %v16121_v31 = vld [vmem:[#allocation78_spill] sm:$0xff] }
 0x5d3   : > { %4370 = vadd.xlane.f32.xlu1 %v4369_v63  ;;  %v7581_v39 = vpack.c.bf16 %v16102_v7, %v16101_v16  ;;  %16103 = vst [vmem:[#allocation30_spill] sm:$0xff] %v12411_v17  ;;  %v12424_v21 = vpop.eup %8689  ;;  %v16111_v7 = vld [vmem:[#allocation180_spill] sm:$0xff]  ;;  %8707 = vpow2.f32 %v4037_v5  ;;  %v16123_v5 = vld [vmem:[#allocation186_spill] sm:$0xff] }
 0x5d4   : > { %7534 = vmatpush1.bf16.msra.mxu0 %v7533_v60  ;;  %3509 = vmax.xlane.f32.xlu0 %v16108_v24  ;;  %v12420_v54 = vpop.xlane.xlu0 %3461  ;;  %16110 = vst [vmem:[#allocation182_spill] sm:$0xff] %v12424_v21  ;;  %v4778_v9 = vmul.f32 %v8686_v41, %v16111_v7  ;;  %v8692_v6 = vpop.eup %8691  ;;  %v8227_v24 = vunpack.i.l.bf16 %v16100_v35  ;;  %v4007_v42 = vmul.f32 1.442695, %v16115_v22  ;;  %v16117_v41 = vunpack.i.l.bf16 %v16059_v50  ;;  %v16119_v63 = vld [vmem:[#allocation188_spill] sm:$0xff] }
 0x5d5   : > { %16109 = vst [vmem:[#allocation19_spill] sm:$0xff] %v12420_v54  ;;  %7535 = vmatprep.subr.bf16.mxu0 %v16093_v53  ;;  %v4398_v16 = vpop.xlane.xlu1 %4397  ;;  %5354 = vmatprep.mubr.f32.mxu1 %v4779_v55  ;;  %v8232_v60 = vunpack.i.l.bf16 %v16118_v44  ;;  %8709 = vpow2.f32 %v4039_v34  ;;  %v4686_v10 = vmul.f32 %v8692_v6, %v16119_v63  ;;  %v16120_v54 = vld [vmem:[#allocation115_spill] sm:$0xff]  ;;  %v4685_v55 = vmul.f32 %v8692_v6, %v16123_v5  ;;  %v16127_v63 = vld [vmem:[#allocation20_spill] sm:$0xff] }
 0x5d6   : > { %v7536_v7 = vpack.c.bf16 %v16117_v41, %v16116_v13  ;;  %5355 = vmatmul.mubr.f32.vlgmr.msra.gmra.mrb[152].mxu1 %v4778_v9  ;;  %v16122_v23 = vsub.f32 %v16120_v54, %v16121_v31  ;;  %8711 = vrcp.f32 %v4398_v16  ;;  %v16124_v13 = vunpack.i.h.bf16 %v16054_v28  ;;  %v12452_v9 = vpop.eup %8693 }
 0x5d7   : > { %4373 = vadd.xlane.f32.xlu1 %v4372_v61  ;;  %7579 = vmatpush1.bf16.msra.mxu1 %v12340_v58  ;;  %v16125_v41 = vunpack.i.h.bf16 %v16059_v50  ;;  %16126 = vst [vmem:[#allocation180_spill] sm:$0xff] %v12452_v9  ;;  %8713 = vpow2.f32 %v4005_v8  ;;  %v16128_v54 = vunpack.i.l.bf16 %v16061_v18  ;;  %v16129_v58 = vunpack.i.l.bf16 %v16086_v56  ;;  %v12464_v50 = vpop.eup %8695  ;;  %v16137_v61 = vld [vmem:[#allocation116_spill] sm:$0xff] }
 0x5d8   : > { %v3897_v40 = vmul.f32 1.442695, %v16122_v23  ;;  %7537 = vmatpush1.bf16.msra.mxu0 %v7536_v7  ;;  %v4401_v22 = vpop.xlane.xlu0 %4400  ;;  %5134 = vmatprep.mubr.f32.mxu0 %v4686_v10  ;;  %v4375_v28 = vadd.f32 %v12424_v21, %v12411_v17  ;;  %16131 = vst [vmem:[#allocation31_spill] sm:$0xff] %v12464_v50  ;;  %8715 = vpow2.f32 %v4007_v42  ;;  %v16132_v7 = vld [vmem:[#allocation117_spill] sm:$0xff]  ;;  %v16138_v42 = vsub.f32 %v16137_v61, %v11886_v59  ;;  %v16145_v21 = vld [vmem:[#allocation32_spill] sm:$0xff] }
 0x5d9   : > { %v7584_v34 = vpack.c.bf16 %v16125_v41, %v16124_v13  ;;  %7538 = vmatprep.subr.bf16.mxu0 %v16093_v53  ;;  %v7539_v16 = vpack.c.bf16 %v16129_v58, %v16128_v54  ;;  %v12460_v6 = vpop.xlane.xlu1 %3368  ;;  %v16133_v23 = vsub.f32 %v16132_v7, %v16121_v31  ;;  %7580 = vmatprep.subr.bf16.mxu1 %v16093_v53  ;;  %v12474_v54 = vpop.eup %8697  ;;  %v8237_v58 = vunpack.i.l.bf16 %v16127_v63  ;;  %v16139_v17 = vld [vmem:[#allocation253_spill] sm:$0xff]  ;;  %v16140_v31 = vld [vmem:[#allocation83_spill] sm:$0xff]  ;;  %v16165_v13 = vld [vmem:[#allocation198_spill] sm:$0xff] }
 0x5da   : > { %16130 = vst [vmem:[#allocation67_spill] sm:$0xff] %v12460_v6  ;;  %5135 = vmatmul.mubr.f32.gmra.mrb[138].mxu0 %v4685_v55  ;;  %16136 = vst [vmem:[#allocation188_spill] sm:$0xff] %v12474_v54  ;;  %v4025_v32 = vmul.f32 1.442695, %v16138_v42  ;;  %v16141_v7 = vmax.f32 %v16139_v17, %v16140_v31  ;;  %8717 = vrcp.f32 %v4401_v22  ;;  %v16142_v55 = vunpack.i.h.bf16 %v16061_v18  ;;  %v12487_v41 = vpop.eup %8699  ;;  %v16149_v18 = vld [vmem:[#allocation69_spill] sm:$0xff]  ;;  %v16160_v6 = vld [vmem:[#allocation82_spill] sm:$0xff] }
 0x5db   : > { %v3899_v8 = vmul.f32 1.442695, %v16133_v23  ;;  %4376 = vadd.xlane.f32.xlu1 %v4375_v28  ;;  %v16143_v23 = vunpack.i.h.bf16 %v16086_v56  ;;  %16144 = vst [vmem:[#allocation115_spill] sm:$0xff] %v12487_v41  ;;  %8719 = vpow2.f32 %v3897_v40  ;;  %v16146_v61 = vsub.f32 %v15859_v2, %v11886_v59  ;;  %7582 = vmatpush1.bf16.msra.mxu1 %v7581_v39  ;;  %v12495_v31 = vpop.eup %8701  ;;  %v16150_v56 = vld [vmem:[#allocation58_spill] sm:$0xff] }
 0x5dc   : > { %3416 = vmax.xlane.f32.xlu0 %v16141_v7  ;;  %7540 = vmatpush1.bf16.msra.mxu0 %v7539_v16  ;;  %v16147_v7 = vunpack.i.l.bf16 %v16090_v57  ;;  %v4308_v28 = vpop.xlane.xlu0 %4307  ;;  %16148 = vst [vmem:[#allocation78_spill] sm:$0xff] %v12495_v31  ;;  %v4447_v59 = vadd.f32 %v12243_v30, %v12224_v49  ;;  %v4378_v39 = vadd.f32 %v12464_v50, %v12452_v9  ;;  %v16154_v40 = vld [vmem:[#allocation102_spill] sm:$0xff]  ;;  %v16159_v30 = vld [vmem:[#allocation119_spill] sm:$0xff] }
 0x5dd   : > { %v7587_v5 = vpack.c.bf16 %v16143_v23, %v16142_v55  ;;  %v4027_v42 = vmul.f32 1.442695, %v16146_v61  ;;  %v16151_v55 = vsub.f32 %v16149_v18, %v16150_v56  ;;  %7541 = vmatprep.subr.bf16.mxu0 %v16093_v53  ;;  %7583 = vmatprep.subr.bf16.mxu1 %v16093_v53  ;;  %8721 = vrcp.f32 %v4308_v28  ;;  %v12504_v2 = vpop.xlane.xlu1 %3371  ;;  %v16158_v28 = vld [vmem:[#allocation21_spill] sm:$0xff] }
 0x5de   : > { %v7542_v22 = vpack.c.bf16 %v8227_v24, %v16147_v7  ;;  %16152 = vst [vmem:[#allocation186_spill] sm:$0xff] %v12504_v2  ;;  %v12508_v24 = vpop.eup %8703  ;;  %8723 = vpow2.f32 %v3899_v8  ;;  %v16155_v16 = vsub.f32 %v16154_v40, %v16150_v56  ;;  %v8247_v49 = vunpack.i.l.bf16 %v16158_v28  ;;  %v16163_v56 = vld [vmem:[#allocation121_spill] sm:$0xff] }
 0x5df   : > { %v4009_v23 = vmul.f32 1.442695, %v16151_v55  ;;  %16153 = vst [vmem:[#allocation20_spill] sm:$0xff] %v12508_v24  ;;  %v8706_v17 = vpop.eup %8705  ;;  %8725 = vpow2.f32 %v4025_v32  ;;  %v16161_v9 = vsub.f32 %v16159_v30, %v16160_v6  ;;  %v7545_v8 = vpack.c.bf16 %v8237_v58, %v8232_v60  ;;  %4379 = vadd.xlane.f32.xlu1 %v4378_v39  ;;  %7585 = vmatpush1.bf16.msra.mxu1 %v7584_v34  ;;  %v16166_v55 = vld [vmem:[#allocation196_spill] sm:$0xff]  ;;  %v16175_v39 = vld [vmem:[#allocation122_spill] sm:$0xff] }
 0x5e0   : > { %v4011_v61 = vmul.f32 1.442695, %v16155_v16  ;;  %4448 = vadd.xlane.f32.xlu0 %v4447_v59  ;;  %v12521_v10 = vpop.eup %8707  ;;  %8727 = vpow2.f32 %v4027_v42  ;;  %v16164_v40 = vsub.f32 %v16163_v56, %v16160_v6  ;;  %7543 = vmatpush1.bf16.msra.mxu0 %v7542_v22  ;;  %v4689_v18 = vmul.f32 %v8706_v17, %v16165_v13  ;;  %v12528_v2 = vpop.xlane.xlu0 %3464  ;;  %v16169_v60 = vld [vmem:[#allocation120_spill] sm:$0xff]  ;;  %v16181_v42 = vld [vmem:[#allocation90_spill] sm:$0xff] }
 0x5e1   : > { %v3901_v50 = vmul.f32 1.442695, %v16161_v9  ;;  %16162 = vst [vmem:[#allocation117_spill] sm:$0xff] %v12521_v10  ;;  %v4688_v32 = vmul.f32 %v8706_v17, %v16166_v55  ;;  %16167 = vst [vmem:[#allocation116_spill] sm:$0xff] %v12528_v2  ;;  %v12530_v30 = vpop.eup %8709  ;;  %8729 = vpow2.f32 %v4009_v23  ;;  %v16170_v9 = vld [vmem:[#allocation118_spill] sm:$0xff]  ;;  %7544 = vmatprep.subr.bf16.mxu0 %v16093_v53  ;;  %7586 = vmatprep.subr.bf16.mxu1 %v16093_v53  ;;  %v12541_v17 = vpop.xlane.xlu1 %3374  ;;  %v16177_v56 = vld [vmem:[#allocation184_spill] sm:$0xff] }
 0x5e2   : > { %v3903_v16 = vmul.f32 1.442695, %v16164_v40  ;;  %16168 = vst [vmem:[#allocation32_spill] sm:$0xff] %v12530_v30  ;;  %v16171_v58 = vsub.f32 %v16169_v60, %v16170_v9  ;;  %16174 = vst [vmem:[#allocation69_spill] sm:$0xff] %v12541_v17  ;;  %v8712_v22 = vpop.eup %8711  ;;  %8731 = vpow2.f32 %v4011_v61  ;;  %v16176_v23 = vsub.f32 %v16175_v39, %v16170_v9  ;;  %5139 = vmatprep.mubr.f32.mxu0 %v4689_v18  ;;  %v16180_v34 = vld [vmem:[#allocation104_spill] sm:$0xff]  ;;  %v16183_v61 = vld [vmem:[#allocation254_spill] sm:$0xff] }
 0x5e3   : > { %v12550_v7 = vpop.eup %8713  ;;  %8733 = vpow2.f32 %v3901_v50  ;;  %v16182_v13 = vsub.f32 %v16180_v34, %v16181_v42  ;;  %5140 = vmatmul.mubr.f32.gmra.mrb[140].mxu0 %v4688_v32  ;;  %v16184_v6 = vld [vmem:[#allocation38_spill] sm:$0xff]  ;;  %v16186_v9 = vld [vmem:[#allocation204_spill] sm:$0xff]  ;;  %v16187_v39 = vunpack.i.h.bf16 %v16090_v57  ;;  %v16190_v60 = vld [vmem:[#allocation33_spill] sm:$0xff]  ;;  %7588 = vmatpush1.bf16.msra.mxu1 %v7587_v5  ;;  %v16196_v5 = vunpack.i.l.bf16 %v16145_v21 }
 0x5e4   : > { %v4029_v59 = vmul.f32 1.442695, %v16171_v58  ;;  %v4031_v55 = vmul.f32 1.442695, %v16176_v23  ;;  %16179 = vst [vmem:[#allocation58_spill] sm:$0xff] %v12550_v7  ;;  %v16185_v1 = vmax.f32 %v16183_v61, %v16184_v6  ;;  %v4782_v18 = vmul.f32 %v8712_v22, %v16186_v9  ;;  %v12563_v58 = vpop.eup %8715  ;;  %v16191_v17 = vld [vmem:[#allocation106_spill] sm:$0xff]  ;;  %7546 = vmatpush1.bf16.msra.mxu0 %v7545_v8  ;;  %v4404_v6 = vpop.xlane.xlu0 %4403  ;;  %7589 = vmatprep.subr.bf16.mxu1 %v16093_v53 }
 0x5e5   : > { %v4013_v2 = vmul.f32 1.442695, %v16182_v13  ;;  %v16188_v23 = vunpack.i.h.bf16 %v16100_v35  ;;  %16189 = vst [vmem:[#allocation102_spill] sm:$0xff] %v12563_v58  ;;  %v8252_v50 = vunpack.i.l.bf16 %v16190_v60  ;;  %8735 = vpow2.f32 %v3903_v16  ;;  %v16193_v13 = vld [vmem:[#allocation202_spill] sm:$0xff]  ;;  %v8718_v9 = vpop.eup %8717  ;;  %7547 = vmatprep.subr.bf16.mxu0 %v16093_v53 }
 0x5e6   : > { %3512 = vmax.xlane.f32.xlu0 %v16185_v1  ;;  %v16192_v34 = vsub.f32 %v16191_v17, %v16181_v42  ;;  %v4781_v1 = vmul.f32 %v8712_v22, %v16193_v13  ;;  %v16194_v61 = vld [vmem:[#allocation22_spill] sm:$0xff]  ;;  %8737 = vpow2.f32 %v4029_v59  ;;  %5359 = vmatprep.mubr.f32.mxu1 %v4782_v18  ;;  %v4486_v35 = vadd.f32 %v12530_v30, %v12521_v10  ;;  %v4407_v42 = vpop.xlane.xlu1 %4406  ;;  %v12576_v17 = vpop.eup %8719  ;;  %v16198_v18 = vld [vmem:[#allocation208_spill] sm:$0xff]  ;;  %v16200_v10 = vld [vmem:[#allocation123_spill] sm:$0xff] }
 0x5e7   : > { %v7590_v40 = vpack.c.bf16 %v16188_v23, %v16187_v39  ;;  %v8257_v57 = vunpack.i.l.bf16 %v16194_v61  ;;  %v4450_v16 = vadd.f32 %v12281_v38, %v12251_v52  ;;  %16195 = vst [vmem:[#allocation21_spill] sm:$0xff] %v12576_v17  ;;  %8739 = vpow2.f32 %v4031_v55  ;;  %v16197_v59 = vld [vmem:[#allocation210_spill] sm:$0xff]  ;;  %v8722_v23 = vpop.eup %8721 }
 0x5e8   : > { %v4015_v32 = vmul.f32 1.442695, %v16192_v34  ;;  %5360 = vmatmul.mubr.f32.gmra.mrb[154].mxu1 %v4781_v1  ;;  %v7548_v8 = vpack.c.bf16 %v8247_v49, %v16196_v5  ;;  %v4785_v22 = vmul.f32 %v8718_v9, %v16197_v59  ;;  %v4784_v39 = vmul.f32 %v8718_v9, %v16198_v18  ;;  %4487 = vadd.xlane.f32.xlu1 %v4486_v35  ;;  %v12583_v34 = vpop.eup %8723  ;;  %v4311_v49 = vpop.xlane.xlu0 %4310  ;;  %v16209_v59 = vld [vmem:[#allocation214_spill] sm:$0xff] }
 0x5e9   : > { %8741 = vpow2.f32 %v4013_v2  ;;  %16199 = vst [vmem:[#allocation119_spill] sm:$0xff] %v12583_v34  ;;  %v8245_v13 = vunpack.i.h.bf16 %v16145_v21  ;;  %v8250_v55 = vunpack.i.h.bf16 %v16158_v28  ;;  %v16201_v1 = vsub.f32 %v16200_v10, %v11963_v19  ;;  %7591 = vmatpush1.bf16.msra.mxu1 %v7590_v40  ;;  %v12590_v5 = vpop.eup %8725  ;;  %v16205_v10 = vld [vmem:[#allocation216_spill] sm:$0xff]  ;;  %v16207_v40 = vld [vmem:[#allocation125_spill] sm:$0xff] }
 0x5ea   : > { %4451 = vadd.xlane.f32.xlu0 %v4450_v16  ;;  %8743 = vpow2.f32 %v4015_v32  ;;  %7549 = vmatpush1.bf16.msra.mxu0 %v7548_v8  ;;  %16202 = vst [vmem:[#allocation82_spill] sm:$0xff] %v12590_v5  ;;  %v16203_v2 = vunpack.i.h.bf16 %v16118_v44  ;;  %v16204_v21 = vunpack.i.h.bf16 %v16127_v63  ;;  %v4453_v28 = vadd.f32 %v12309_v12, %v12302_v20  ;;  %v4314_v32 = vpop.xlane.xlu1 %4313  ;;  %v12600_v16 = vpop.eup %8727 }
 0x5eb   : > { %v3905_v30 = vmul.f32 1.442695, %v16201_v1  ;;  %8745 = vrcp.f32 %v4404_v6  ;;  %5364 = vmatprep.mubr.f32.mxu1 %v4785_v22  ;;  %7550 = vmatprep.subr.bf16.mxu0 %v16093_v53  ;;  %v4692_v35 = vmul.f32 %v8722_v23, %v16205_v10  ;;  %16206 = vst [vmem:[#allocation121_spill] sm:$0xff] %v12600_v16  ;;  %v16208_v8 = vsub.f32 %v16207_v40, %v11963_v19  ;;  %v12607_v22 = vpop.eup %8729  ;;  %v16214_v19 = vld [vmem:[#allocation40_spill] sm:$0xff]  ;;  %v16215_v40 = vld [vmem:[#allocation53_spill] sm:$0xff] }
 0x5ec   : > { %v7593_v9 = vpack.c.bf16 %v16204_v21, %v16203_v2  ;;  %8747 = vrcp.f32 %v4407_v42  ;;  %7592 = vmatprep.subr.bf16.mxu1 %v16093_v53  ;;  %5365 = vmatmul.mubr.f32.gmra.mrb[156].mxu1 %v4784_v39  ;;  %v7551_v44 = vpack.c.bf16 %v8257_v57, %v8252_v50  ;;  %v4691_v63 = vmul.f32 %v8722_v23, %v16209_v59  ;;  %v16211_v2 = vld [vmem:[#allocation124_spill] sm:$0xff]  ;;  %v16212_v21 = vld [vmem:[#allocation94_spill] sm:$0xff]  ;;  %v12617_v39 = vpop.eup %8731 }
 0x5ed   : > { %v3907_v6 = vmul.f32 1.442695, %v16208_v8  ;;  %16210 = vst [vmem:[#allocation198_spill] sm:$0xff] %v12607_v22  ;;  %v8255_v18 = vunpack.i.h.bf16 %v16190_v60  ;;  %v8260_v1 = vunpack.i.h.bf16 %v16194_v61  ;;  %v16213_v10 = vsub.f32 %v16211_v2, %v16212_v21  ;;  %16217 = vst [vmem:[#allocation196_spill] sm:$0xff] %v12617_v39  ;;  %v16218_v50 = vld [vmem:[#allocation126_spill] sm:$0xff]  ;;  %v12624_v8 = vpop.xlane.xlu0 %3467  ;;  %v16221_v59 = vld [vmem:[#allocation108_spill] sm:$0xff]  ;;  %5144 = vmatprep.mubr.f32.mxu0 %v4692_v35 }
 0x5ee   : > { %4454 = vadd.xlane.f32.xlu0 %v4453_v28  ;;  %v16216_v42 = vmax.f32 %v16214_v19, %v16215_v40  ;;  %8749 = vrcp.f32 %v4311_v49  ;;  %v16219_v57 = vsub.f32 %v16218_v50, %v16212_v21  ;;  %7552 = vmatpush1.bf16.msra.mxu0 %v7551_v44  ;;  %v7596_v60 = vpack.c.bf16 %v8250_v55, %v8245_v13  ;;  %v12626_v28 = vpop.eup %8733  ;;  %v16222_v2 = vld [vmem:[#allocation96_spill] sm:$0xff]  ;;  %v16225_v13 = vld [vmem:[#allocation181_spill] sm:$0xff]  ;;  %v16232_v55 = vld [vmem:[#allocation127_spill] sm:$0xff] }
 0x5ef   : > { %v4033_v20 = vmul.f32 1.442695, %v16213_v10  ;;  %8751 = vpow2.f32 %v3905_v30  ;;  %7594 = vmatpush1.bf16.msra.mxu1 %v7593_v9  ;;  %v4456_v61 = vadd.f32 %v12400_v11, %v12373_v46  ;;  %16220 = vst [vmem:[#allocation120_spill] sm:$0xff] %v12626_v28  ;;  %v16223_v49 = vsub.f32 %v16221_v59, %v16222_v2  ;;  %v16224_v30 = vld [vmem:[#allocation178_spill] sm:$0xff]  ;;  %v12636_v9 = vpop.xlane.xlu1 %3377  ;;  %v12638_v21 = vpop.eup %8735  ;;  %5145 = vmatmul.mubr.f32.gmra.mrb[142].mxu0 %v4691_v63  ;;  %v16234_v11 = vld [vmem:[#allocation48_spill] sm:$0xff] }
 0x5f0   : > { %3419 = vmax.xlane.f32.xlu1 %v16216_v42  ;;  %v4035_v23 = vmul.f32 1.442695, %v16219_v57  ;;  %8753 = vrcp.f32 %v4314_v32  ;;  %7595 = vmatprep.subr.bf16.mxu1 %v16093_v53  ;;  %16226 = vst [vmem:[#allocation118_spill] sm:$0xff] %v12638_v21  ;;  %v16227_v42 = vld [vmem:[#allocation110_spill] sm:$0xff]  ;;  %v12648_v44 = vpop.eup %8737  ;;  %v16233_v46 = vsub.f32 %v16232_v55, %v12015_v3 }
 0x5f1   : > { %v4017_v10 = vmul.f32 1.442695, %v16223_v49  ;;  %8755 = vpow2.f32 %v3907_v6  ;;  %v16228_v50 = vsub.f32 %v16227_v42, %v16222_v2  ;;  %v16229_v32 = vld [vmem:[#allocation190_spill] sm:$0xff]  ;;  %7553 = vmatprep.subr.bf16.mxu0 %v16093_v53  ;;  %16231 = vst [vmem:[#allocation122_spill] sm:$0xff] %v12648_v44  ;;  %v12656_v63 = vpop.eup %8739  ;;  %v12663_v12 = vpop.xlane.xlu0 %3470 }
 0x5f2   : > { %8757 = vpow2.f32 %v4033_v20  ;;  %v3909_v6 = vmul.f32 1.442695, %v16233_v46  ;;  %4457 = vadd.xlane.f32.xlu0 %v4456_v61  ;;  %v16235_v2 = vld [vmem:[#allocation50_spill] sm:$0xff]  ;;  %16237 = vst [vmem:[#allocation184_spill] sm:$0xff] %v12656_v63  ;;  %v4459_v20 = vadd.f32 %v12487_v41, %v12474_v54  ;;  %v16241_v46 = vld [vmem:[#allocation71_spill] sm:$0xff]  ;;  %v7599_v41 = vpack.c.bf16 %v8260_v1, %v8255_v18  ;;  %v16254_v1 = vld [vmem:[#allocation192_spill] sm:$0xff] }
 0x5f3   : > { %v4019_v57 = vmul.f32 1.442695, %v16228_v50  ;;  %v16236_v42 = vmax.f32 %v16234_v11, %v16235_v2  ;;  %8759 = vpow2.f32 %v4035_v23  ;;  %v16238_v50 = vld [vmem:[#allocation129_spill] sm:$0xff]  ;;  %7597 = vmatpush1.bf16.msra.mxu1 %v7596_v60  ;;  %v12665_v55 = vpop.eup %8741  ;;  %v16242_v61 = vsub.f32 %v15937_v0, %v16241_v46  ;;  %v16246_v11 = vld [vmem:[#allocation138_spill] sm:$0xff]  ;;  %v16251_v60 = vld [vmem:[#allocation224_spill] sm:$0xff] }
 0x5f4   : > { %v16239_v49 = vsub.f32 %v16238_v50, %v12015_v3  ;;  %16240 = vst [vmem:[#allocation104_spill] sm:$0xff] %v12665_v55  ;;  %8761 = vpow2.f32 %v4017_v10  ;;  %7598 = vmatprep.subr.bf16.mxu1 %v16093_v53  ;;  %v16243_v23 = vld [vmem:[#allocation185_spill] sm:$0xff]  ;;  %v12675_v50 = vpop.eup %8743  ;;  %v16247_v54 = vsub.f32 %v16246_v11, %v16241_v46  ;;  %v16248_v0 = vld [vmem:[#allocation42_spill] sm:$0xff]  ;;  %v4462_v11 = vadd.f32 %v12563_v58, %v12550_v7  ;;  %v16258_v46 = vld [vmem:[#allocation231_spill] sm:$0xff] }
 0x5f5   : > { %3515 = vmax.xlane.f32.xlu1 %v16236_v42  ;;  %v4173_v42 = vmul.f32 1.442695, %v16242_v61  ;;  %16245 = vst [vmem:[#allocation90_spill] sm:$0xff] %v12675_v50  ;;  %8763 = vpow2.f32 %v4019_v57  ;;  %v8746_v52 = vpop.eup %8745  ;;  %v16249_v61 = vld [vmem:[#allocation258_spill] sm:$0xff]  ;;  %v12685_v57 = vpop.xlane.xlu0 %3473  ;;  %v16259_v18 = vsub.f32 %v15947_v43, %v12062_v26 }
 0x5f6   : > { %v3911_v35 = vmul.f32 1.442695, %v16239_v49  ;;  %v4410_v49 = vpop.xlane.xlu1 %4409  ;;  %v4175_v10 = vmul.f32 1.442695, %v16247_v54  ;;  %8765 = vpow2.f32 %v3909_v6  ;;  %4460 = vadd.xlane.f32.xlu0 %v4459_v20  ;;  %v16250_v38 = vmax.f32 %v16248_v0, %v16249_v61  ;;  %v8748_v2 = vpop.eup %8747  ;;  %v16252_v19 = vld [vmem:[#allocation222_spill] sm:$0xff]  ;;  %v16253_v54 = vld [vmem:[#allocation191_spill] sm:$0xff] }
 0x5f7   : > { %7600 = vmatpush1.bf16.msra.mxu1 %v7599_v41  ;;  %v4788_v40 = vmul.f32 %v8746_v52, %v16251_v60  ;;  %v4787_v59 = vmul.f32 %v8746_v52, %v16252_v19  ;;  %v16256_v52 = vld [vmem:[#allocation229_spill] sm:$0xff]  ;;  %v4177_v61 = vmul.f32 1.442695, %v16259_v18  ;;  %v16268_v18 = vld [vmem:[#allocation195_spill] sm:$0xff] }
 0x5f8   : > { %8767 = vpow2.f32 %v3911_v35  ;;  %v8750_v3 = vpop.eup %8749  ;;  %7601 = vmatprep.subr.bf16.mxu1 %v16093_v53  ;;  %v4791_v19 = vmul.f32 %v8748_v2, %v16256_v52  ;;  %v16257_v35 = vld [vmem:[#allocation233_spill] sm:$0xff] }
 0x5f9   : > { %3518 = vmax.xlane.f32.xlu1 %v16250_v38  ;;  %8769 = vpow2.f32 %v4173_v42  ;;  %v12694_v41 = vpop.eup %8751  ;;  %5369 = vmatprep.mubr.f32.mxu1 %v4788_v40  ;;  %v4695_v20 = vmul.f32 %v8750_v3, %v16257_v35  ;;  %v4694_v42 = vmul.f32 %v8750_v3, %v16258_v46  ;;  %v16262_v53 = vld [vmem:[#allocation261_spill] sm:$0xff]  ;;  %v4465_v3 = vadd.f32 %v12617_v39, %v12607_v22  ;;  %v12712_v43 = vpop.xlane.xlu0 %3476  ;;  %v16284_v35 = vld [vmem:[#allocation236_spill] sm:$0xff] }
 0x5fa   : > { %v4317_v6 = vpop.xlane.xlu1 %4316  ;;  %16255 = vst [vmem:[#allocation204_spill] sm:$0xff] %v12694_v41  ;;  %8771 = vpow2.f32 %v4175_v10  ;;  %v8754_v60 = vpop.eup %8753  ;;  %5370 = vmatmul.mubr.f32.gmra.mrb[158].mxu1 %v4787_v59  ;;  %4463 = vadd.xlane.f32.xlu0 %v4462_v11  ;;  %v16261_v10 = vsub.f32 %v15948_v29, %v12062_v26  ;;  %v16263_v52 = vld [vmem:[#allocation57_spill] sm:$0xff]  ;;  %v16266_v59 = vsub.f32 %v15952_v4, %v12070_v36  ;;  %v16267_v26 = vld [vmem:[#allocation227_spill] sm:$0xff]  ;;  %v16272_v4 = vld [vmem:[#allocation238_spill] sm:$0xff] }
 0x5fb   : > { %8773 = vrcp.f32 %v4410_v49  ;;  %v12702_v38 = vpop.eup %8755  ;;  %v16264_v0 = vmax.f32 %v16262_v53, %v16263_v52  ;;  %5374 = vmatprep.mubr.f32.mxu1 %v4791_v19  ;;  %5149 = vmatprep.mubr.f32.mxu0 %v4695_v20  ;;  %v4790_v29 = vmul.f32 %v8748_v2, %v16267_v26  ;;  %v16273_v20 = vld [vmem:[#allocation194_spill] sm:$0xff]  ;;  %v16274_v26 = vld [vmem:[#allocation199_spill] sm:$0xff]  ;;  %v16277_v22 = vld [vmem:[#allocation77_spill] sm:$0xff] }
 0x5fc   : > { %16260 = vst [vmem:[#allocation33_spill] sm:$0xff] %v12702_v38  ;;  %v4179_v40 = vmul.f32 1.442695, %v16261_v10  ;;  %8775 = vrcp.f32 %v4317_v6  ;;  %v12714_v49 = vpop.eup %8757  ;;  %v4041_v11 = vmul.f32 1.442695, %v16266_v59  ;;  %v16271_v10 = vsub.f32 %v15953_v33, %v12070_v36  ;;  %5150 = vmatmul.mubr.f32.gmra.mrb[144].mxu0 %v4694_v42  ;;  %v16276_v6 = vld [vmem:[#allocation144_spill] sm:$0xff] }
 0x5fd   : > { %3425 = vmax.xlane.f32.xlu1 %v16264_v0  ;;  %16265 = vst [vmem:[#allocation106_spill] sm:$0xff] %v12714_v49  ;;  %v12726_v46 = vpop.eup %8759  ;;  %v4698_v59 = vmul.f32 %v8754_v60, %v16272_v4  ;;  %8777 = vpow2.f32 %v4177_v61  ;;  %v16278_v39 = vsub.f32 %v16276_v6, %v16277_v22  ;;  %v16280_v36 = vsub.f32 %v16026_v14, %v12231_v47  ;;  %v16282_v4 = vld [vmem:[#allocation264_spill] sm:$0xff] }
 0x5fe   : > { %v12724_v19 = vpop.xlane.xlu1 %3380  ;;  %16270 = vst [vmem:[#allocation202_spill] sm:$0xff] %v12726_v46  ;;  %v4043_v52 = vmul.f32 1.442695, %v16271_v10  ;;  %v12736_v53 = vpop.eup %8761  ;;  %5375 = vmatmul.mubr.f32.gmra.mrb[160].mxu1 %v4790_v29  ;;  %4466 = vadd.xlane.f32.xlu0 %v4465_v3  ;;  %8779 = vpow2.f32 %v4179_v40  ;;  %v16281_v10 = vld [vmem:[#allocation262_spill] sm:$0xff]  ;;  %v4697_v61 = vmul.f32 %v8754_v60, %v16284_v35  ;;  %v4468_v6 = vadd.f32 %v12675_v50, %v12665_v55 }
 0x5ff   : > { %16275 = vst [vmem:[#allocation22_spill] sm:$0xff] %v12736_v53  ;;  %v4181_v7 = vmul.f32 1.442695, %v16278_v39  ;;  %v12741_v33 = vpop.eup %8763  ;;  %v4057_v42 = vmul.f32 1.442695, %v16280_v36  ;;  %v16283_v2 = vmax.f32 %v16281_v10, %v16282_v4  ;;  %5154 = vmatprep.mubr.f32.mxu0 %v4698_v59  ;;  %v12752_v39 = vpop.xlane.xlu0 %3479  ;;  %8781 = vpow2.f32 %v4041_v11  ;;  %v16291_v35 = vld [vmem:[#allocation142_spill] sm:$0xff] }
 0x600   : > { %16279 = vst [vmem:[#allocation210_spill] sm:$0xff] %v12741_v33  ;;  %16285 = vst [vmem:[#allocation208_spill] sm:$0xff] %v12752_v39  ;;  %v12754_v3 = vpop.eup %8765  ;;  %v16287_v40 = vsub.f32 %v16027_v15, %v12231_v47  ;;  %8783 = vpow2.f32 %v4043_v52  ;;  %v16292_v10 = vsub.f32 %v15980_v48, %v16291_v35  ;;  %5155 = vmatmul.mubr.f32.gmra.mrb[146].mxu0 %v4697_v61  ;;  %v16295_v15 = vld [vmem:[#allocation52_spill] sm:$0xff]  ;;  %v16299_v48 = vld [vmem:[#allocation149_spill] sm:$0xff] }
 0x601   : > { %3521 = vmax.xlane.f32.xlu1 %v16283_v2  ;;  %16286 = vst [vmem:[#allocation123_spill] sm:$0xff] %v12754_v3  ;;  %8785 = vpow2.f32 %v4181_v7  ;;  %v4471_v59 = vadd.f32 %v12741_v33, %v12736_v53  ;;  %v16305_v33 = vld [vmem:[#allocation245_spill] sm:$0xff]  ;;  %v16311_v39 = vsub.f32 %v16040_v37, %v12266_v62 }
 0x602   : > { %v4059_v14 = vmul.f32 1.442695, %v16287_v40  ;;  %v4413_v4 = vpop.xlane.xlu1 %4412  ;;  %v12763_v60 = vpop.eup %8767  ;;  %v4185_v55 = vmul.f32 1.442695, %v16292_v10  ;;  %4469 = vadd.xlane.f32.xlu0 %v4468_v6  ;;  %8787 = vpow2.f32 %v4057_v42  ;;  %v16296_v40 = vld [vmem:[#allocation266_spill] sm:$0xff]  ;;  %v16300_v10 = vsub.f32 %v16299_v48, %v16291_v35  ;;  %v16307_v35 = vld [vmem:[#allocation132_spill] sm:$0xff] }
 0x603   : > { %16290 = vst [vmem:[#allocation216_spill] sm:$0xff] %v12763_v60  ;;  %v12768_v11 = vpop.eup %8769  ;;  %v16297_v36 = vmax.f32 %v16295_v15, %v16296_v40  ;;  %v12777_v52 = vpop.xlane.xlu0 %3482  ;;  %v16306_v15 = vld [vmem:[#allocation243_spill] sm:$0xff]  ;;  %v4061_v42 = vmul.f32 1.442695, %v16311_v39 }
 0x604   : > { %16293 = vst [vmem:[#allocation125_spill] sm:$0xff] %v12768_v11  ;;  %v12770_v47 = vpop.eup %8771  ;;  %16298 = vst [vmem:[#allocation124_spill] sm:$0xff] %v12777_v52  ;;  %v4187_v61 = vmul.f32 1.442695, %v16300_v10  ;;  %8789 = vpow2.f32 %v4059_v14  ;;  %v16308_v48 = vld [vmem:[#allocation39_spill] sm:$0xff] }
 0x605   : > { %16294 = vst [vmem:[#allocation214_spill] sm:$0xff] %v12770_v47  ;;  %3428 = vmax.xlane.f32.xlu1 %v16297_v36  ;;  %v8774_v2 = vpop.eup %8773  ;;  %v16303_v36 = vld [vmem:[#allocation146_spill] sm:$0xff]  ;;  %8791 = vpow2.f32 %v4185_v55  ;;  %v16309_v14 = vsub.f32 %v16307_v35, %v16308_v48  ;;  %v16310_v6 = vld [vmem:[#allocation251_spill] sm:$0xff] }
 0x606   : > { %v4320_v29 = vpop.xlane.xlu1 %4319  ;;  %v8776_v50 = vpop.eup %8775  ;;  %v16304_v58 = vsub.f32 %v16303_v36, %v16277_v22  ;;  %v4794_v40 = vmul.f32 %v8774_v2, %v16305_v33  ;;  %v4793_v0 = vmul.f32 %v8774_v2, %v16306_v15  ;;  %8793 = vrcp.f32 %v4413_v4  ;;  %4472 = vadd.xlane.f32.xlu0 %v4471_v59  ;;  %v16312_v22 = vld [vmem:[#allocation54_spill] sm:$0xff] }
 0x607   : > { %v4169_v10 = vmul.f32 1.442695, %v16309_v14  ;;  %v4701_v7 = vmul.f32 %v8776_v50, %v16310_v6  ;;  %8795 = vrcp.f32 %v4320_v29  ;;  %v16315_v33 = vld [vmem:[#allocation250_spill] sm:$0xff]  ;;  %v4474_v15 = vadd.f32 %v12508_v24, %v12495_v31  ;;  %v12804_v36 = vpop.xlane.xlu0 %3485  ;;  %v12806_v4 = vpop.eup %8777  ;;  %v16328_v6 = vld [vmem:[#allocation131_spill] sm:$0xff]  ;;  %v16331_v29 = vld [vmem:[#allocation152_spill] sm:$0xff] }
 0x608   : > { %v4183_v53 = vmul.f32 1.442695, %v16304_v58  ;;  %5379 = vmatprep.mubr.f32.mxu1 %v4794_v40  ;;  %v16313_v58 = vld [vmem:[#allocation265_spill] sm:$0xff]  ;;  %v4700_v2 = vmul.f32 %v8776_v50, %v16315_v33  ;;  %16316 = vst [vmem:[#allocation94_spill] sm:$0xff] %v12804_v36  ;;  %8797 = vpow2.f32 %v4187_v61  ;;  %v16317_v59 = vld [vmem:[#allocation154_spill] sm:$0xff]  ;;  %v12817_v14 = vpop.eup %8779  ;;  %v16327_v50 = vld [vmem:[#allocation135_spill] sm:$0xff] }
 0x609   : > { %v16314_v55 = vmax.f32 %v16312_v22, %v16313_v58  ;;  %v16318_v37 = vsub.f32 %v16317_v59, %v12266_v62  ;;  %5380 = vmatmul.mubr.f32.gmra.mrb[162].mxu1 %v4793_v0  ;;  %5159 = vmatprep.mubr.f32.mxu0 %v4701_v7  ;;  %v16324_v62 = vld [vmem:[#allocation200_spill] sm:$0xff]  ;;  %v16329_v58 = vsub.f32 %v16327_v50, %v16328_v6  ;;  %v16335_v0 = vld [vmem:[#allocation63_spill] sm:$0xff] }
 0x60a   : > { %v12815_v35 = vpop.xlane.xlu1 %3383  ;;  %8799 = vpow2.f32 %v4183_v53  ;;  %5160 = vmatmul.mubr.f32.gmra.mrb[148].mxu0 %v4700_v2  ;;  %4475 = vadd.xlane.f32.xlu0 %v4474_v15  ;;  %v4381_v15 = vadd.f32 %v12583_v34, %v12576_v17  ;;  %v16343_v31 = vld [vmem:[#allocation15_spill] sm:$0xff]  ;;  %v4477_v17 = vadd.f32 %v12600_v16, %v12590_v5  ;;  %v16354_v5 = vld [vmem:[#allocation70_spill] sm:$0xff] }
 0x60b   : > { %3524 = vmax.xlane.f32.xlu1 %v16314_v55  ;;  %v4063_v39 = vmul.f32 1.442695, %v16318_v37  ;;  %16321 = vst [vmem:[#allocation126_spill] sm:$0xff] %v12815_v35  ;;  %v16322_v55 = vld [vmem:[#allocation134_spill] sm:$0xff]  ;;  %v12826_v37 = vpop.eup %8781  ;;  %8801 = vpow2.f32 %v4169_v10  ;;  %v4045_v22 = vmul.f32 1.442695, %v16329_v58  ;;  %v12839_v59 = vpop.xlane.xlu0 %4424 }
 0x60c   : > { %v16323_v61 = vsub.f32 %v16322_v55, %v16308_v48  ;;  %16326 = vst [vmem:[#allocation108_spill] sm:$0xff] %v12826_v37  ;;  %v12831_v53 = vpop.eup %8783  ;;  %v16332_v48 = vld [vmem:[#allocation87_spill] sm:$0xff]  ;;  %8803 = vpow2.f32 %v4061_v42  ;;  %v16337_v10 = vld [vmem:[#allocation153_spill] sm:$0xff] }
 0x60d   : > { %16330 = vst [vmem:[#allocation96_spill] sm:$0xff] %v12831_v53  ;;  %v16333_v55 = vsub.f32 %v16331_v29, %v16332_v48  ;;  %v12841_v40 = vpop.eup %8785  ;;  %v16338_v50 = vsub.f32 %v16337_v10, %v16332_v48  ;;  %8805 = vpow2.f32 %v4063_v39  ;;  %v16345_v10 = vld [vmem:[#allocation76_spill] sm:$0xff]  ;;  %v16346_v39 = vld [vmem:[#allocation270_spill] sm:$0xff] }
 0x60e   : > { %v4171_v33 = vmul.f32 1.442695, %v16323_v61  ;;  %v16334_v61 = vld [vmem:[#allocation74_spill] sm:$0xff]  ;;  %v4416_v52 = vpop.xlane.xlu1 %4415  ;;  %v12848_v29 = vpop.eup %8787  ;;  %4382 = vadd.xlane.f32.xlu0 %v4381_v15 }
 0x60f   : > { %v4189_v2 = vmul.f32 1.442695, %v16333_v55  ;;  %v16336_v36 = vmax.f32 %v16334_v61, %v16335_v0  ;;  %v4191_v58 = vmul.f32 1.442695, %v16338_v50  ;;  %16339 = vst [vmem:[#allocation178_spill] sm:$0xff] %v12848_v29  ;;  %v12850_v42 = vpop.eup %8789  ;;  %v16342_v55 = vld [vmem:[#allocation155_spill] sm:$0xff]  ;;  %v16347_v50 = vmax.f32 %v16345_v10, %v16346_v39  ;;  %v12862_v34 = vpop.xlane.xlu0 %3488 }
 0x610   : > { %8807 = vpow2.f32 %v4171_v33  ;;  %16340 = vst [vmem:[#allocation181_spill] sm:$0xff] %v12850_v42  ;;  %v16344_v24 = vsub.f32 %v16342_v55, %v16343_v31  ;;  %16348 = vst [vmem:[#allocation190_spill] sm:$0xff] %v12862_v34  ;;  %v16358_v61 = vld [vmem:[#allocation85_spill] sm:$0xff]  ;;  %v16360_v34 = vld [vmem:[#allocation95_spill] sm:$0xff] }
 0x611   : > { %3431 = vmax.xlane.f32.xlu1 %v16336_v36  ;;  %8809 = vpow2.f32 %v4045_v22  ;;  %v12852_v36 = vpop.eup %8791  ;;  %v16349_v22 = vld [vmem:[#allocation158_spill] sm:$0xff] }
 0x612   : > { %16341 = vst [vmem:[#allocation110_spill] sm:$0xff] %v12852_v36  ;;  %8811 = vpow2.f32 %v4189_v2  ;;  %v4065_v48 = vmul.f32 1.442695, %v16344_v24  ;;  %v8794_v33 = vpop.eup %8793  ;;  %v16350_v15 = vsub.f32 %v16349_v22, %v16343_v31  ;;  %v4323_v7 = vpop.xlane.xlu1 %4322  ;;  %v16356_v31 = vld [vmem:[#allocation137_spill] sm:$0xff]  ;;  %4478 = vadd.xlane.f32.xlu0 %v4477_v17 }
 0x613   : > { %8813 = vpow2.f32 %v4191_v58  ;;  %v8796_v39 = vpop.eup %8795  ;;  %v4796_v16 = vmul.f32 %v8794_v33, %v16354_v5  ;;  %v4501_v58 = vadd.f32 %v12850_v42, %v12848_v29  ;;  %v16357_v22 = vsub.f32 %v16356_v31, %v16328_v6  ;;  %v16362_v5 = vld [vmem:[#allocation255_spill] sm:$0xff]  ;;  %v12889_v6 = vpop.xlane.xlu0 %3395 }
 0x614   : > { %v4067_v0 = vmul.f32 1.442695, %v16350_v15  ;;  %8815 = vrcp.f32 %v4416_v52  ;;  %v12875_v35 = vpop.eup %8797  ;;  %v4704_v55 = vmul.f32 %v8796_v39, %v16358_v61  ;;  %v16359_v52 = vld [vmem:[#allocation156_spill] sm:$0xff]  ;;  %v4384_v29 = vadd.f32 %v12638_v21, %v12626_v28  ;;  %16363 = vst [vmem:[#allocation129_spill] sm:$0xff] %v12889_v6 }
 0x615   : > { %3527 = vmax.xlane.f32.xlu1 %v16347_v50  ;;  %v16353_v50 = vld [vmem:[#allocation51_spill] sm:$0xff]  ;;  %16355 = vst [vmem:[#allocation127_spill] sm:$0xff] %v12875_v35  ;;  %v4047_v15 = vmul.f32 1.442695, %v16357_v22  ;;  %8817 = vrcp.f32 %v4323_v7  ;;  %v12881_v24 = vpop.eup %8799  ;;  %v16365_v7 = vld [vmem:[#allocation157_spill] sm:$0xff] }
 0x616   : > { %v4797_v10 = vmul.f32 %v8794_v33, %v16353_v50  ;;  %v16361_v50 = vsub.f32 %v16359_v52, %v16360_v34  ;;  %8819 = vpow2.f32 %v4065_v48  ;;  %v4703_v33 = vmul.f32 %v8796_v39, %v16362_v5  ;;  %v12891_v17 = vpop.eup %8801  ;;  %5164 = vmatprep.mubr.f32.mxu0 %v4704_v55  ;;  %v12896_v22 = vpop.xlane.xlu1 %3386  ;;  %v16367_v48 = vld [vmem:[#allocation223_spill] sm:$0xff]  ;;  %4385 = vadd.xlane.f32.xlu0 %v4384_v29 }
 0x617   : > { %16364 = vst [vmem:[#allocation71_spill] sm:$0xff] %v12891_v17  ;;  %v16366_v61 = vsub.f32 %v16365_v7, %v16360_v34  ;;  %8821 = vpow2.f32 %v4067_v0  ;;  %v12902_v52 = vpop.eup %8803  ;;  %v16371_v5 = vld [vmem:[#allocation47_spill] sm:$0xff]  ;;  %v4597_v34 = vadd.f32 %v12875_v35, %v12852_v36  ;;  %v12923_v0 = vpop.xlane.xlu0 %4427 }
 0x618   : > { %v4193_v2 = vmul.f32 1.442695, %v16361_v50  ;;  %5384 = vmatprep.mubr.f32.mxu1 %v4797_v10  ;;  %16369 = vst [vmem:[#allocation185_spill] sm:$0xff] %v12902_v52  ;;  %v16370_v50 = vld [vmem:[#allocation139_spill] sm:$0xff]  ;;  %5165 = vmatmul.mubr.f32.gmra.mrb[150].mxu0 %v4703_v33  ;;  %8823 = vpow2.f32 %v4047_v15  ;;  %v4480_v15 = vadd.f32 %v12656_v63, %v12648_v44 }
 0x619   : > { %4502 = vadd.xlane.f32.xlu1 %v4501_v58  ;;  %v4195_v31 = vmul.f32 1.442695, %v16366_v61  ;;  %5385 = vmatmul.mubr.f32.gmra.mrb[164].mxu1 %v4796_v16  ;;  %v16372_v42 = vsub.f32 %v16370_v50, %v16371_v5  ;;  %v16373_v16 = vld [vmem:[#allocation206_spill] sm:$0xff]  ;;  %v16374_v55 = vld [vmem:[#allocation211_spill] sm:$0xff]  ;;  %v12913_v61 = vpop.eup %8805  ;;  %v16376_v58 = vsub.f32 %v16063_v51, %v12318_v25 }
 0x61a   : > { %16375 = vst [vmem:[#allocation138_spill] sm:$0xff] %v12913_v61  ;;  %v12918_v50 = vpop.eup %8807  ;;  %8825 = vpow2.f32 %v4193_v2  ;;  %v4419_v7 = vpop.xlane.xlu1 %4418  ;;  %v4504_v29 = vadd.f32 %v12913_v61, %v12902_v52  ;;  %4481 = vadd.xlane.f32.xlu0 %v4480_v15  ;;  %v16388_v61 = vld [vmem:[#allocation55_spill] sm:$0xff] }
 0x61b   : > { %v4049_v28 = vmul.f32 1.442695, %v16372_v42  ;;  %v4069_v10 = vmul.f32 1.442695, %v16376_v58  ;;  %v16377_v42 = vsub.f32 %v16064_v27, %v12318_v25  ;;  %v12925_v36 = vpop.eup %8809  ;;  %8827 = vpow2.f32 %v4195_v31  ;;  %v16381_v27 = vld [vmem:[#allocation160_spill] sm:$0xff]  ;;  %v16382_v58 = vld [vmem:[#allocation150_spill] sm:$0xff]  ;;  %v12943_v63 = vpop.xlane.xlu0 %3491 }
 0x61c   : > { %16378 = vst [vmem:[#allocation224_spill] sm:$0xff] %v12925_v36  ;;  %v12929_v51 = vpop.eup %8811  ;;  %v16384_v31 = vld [vmem:[#allocation161_spill] sm:$0xff]  ;;  %16386 = vst [vmem:[#allocation192_spill] sm:$0xff] %v12943_v63 }
 0x61d   : > { %v4071_v33 = vmul.f32 1.442695, %v16377_v42  ;;  %4598 = vadd.xlane.f32.xlu1 %v4597_v34  ;;  %16379 = vst [vmem:[#allocation222_spill] sm:$0xff] %v12929_v51  ;;  %8829 = vpow2.f32 %v4049_v28  ;;  %v12933_v2 = vpop.eup %8813  ;;  %v16383_v34 = vsub.f32 %v16381_v27, %v16382_v58  ;;  %v16385_v35 = vsub.f32 %v16384_v31, %v16382_v58  ;;  %v16392_v58 = vld [vmem:[#allocation59_spill] sm:$0xff]  ;;  %v16398_v27 = vld [vmem:[#allocation162_spill] sm:$0xff]  ;;  %v16412_v63 = vld [vmem:[#allocation141_spill] sm:$0xff] }
 0x61e   : > { %16380 = vst [vmem:[#allocation191_spill] sm:$0xff] %v12933_v2  ;;  %8831 = vpow2.f32 %v4069_v10  ;;  %v8816_v25 = vpop.eup %8815  ;;  %v4387_v28 = vadd.f32 %v12702_v38, %v12694_v41  ;;  %v16387_v10 = vld [vmem:[#allocation256_spill] sm:$0xff]  ;;  %v4326_v39 = vpop.xlane.xlu1 %4325  ;;  %v16393_v41 = vld [vmem:[#allocation263_spill] sm:$0xff] }
 0x61f   : > { %v4197_v42 = vmul.f32 1.442695, %v16383_v34  ;;  %v4199_v44 = vmul.f32 1.442695, %v16385_v35  ;;  %8833 = vpow2.f32 %v4071_v33  ;;  %v8818_v52 = vpop.eup %8817  ;;  %v4800_v15 = vmul.f32 %v8816_v25, %v16387_v10  ;;  %v16397_v34 = vld [vmem:[#allocation163_spill] sm:$0xff] }
 0x620   : > { %8835 = vrcp.f32 %v4419_v7  ;;  %v4799_v21 = vmul.f32 %v8816_v25, %v16388_v61  ;;  %v12949_v6 = vpop.eup %8819  ;;  %v4600_v35 = vadd.f32 %v12933_v2, %v12929_v51  ;;  %v4707_v31 = vmul.f32 %v8818_v52, %v16392_v58  ;;  %v16395_v61 = vld [vmem:[#allocation29_spill] sm:$0xff]  ;;  %4388 = vadd.xlane.f32.xlu0 %v4387_v28 }
 0x621   : > { %4505 = vadd.xlane.f32.xlu1 %v4504_v29  ;;  %16390 = vst [vmem:[#allocation229_spill] sm:$0xff] %v12949_v6  ;;  %v4706_v7 = vmul.f32 %v8818_v52, %v16393_v41  ;;  %v12957_v38 = vpop.eup %8821  ;;  %v16396_v25 = vsub.f32 %v16077_v45, %v16395_v61  ;;  %5389 = vmatprep.mubr.f32.mxu1 %v4800_v15  ;;  %8837 = vrcp.f32 %v4326_v39  ;;  %v12967_v41 = vpop.xlane.xlu0 %3398  ;;  %v16402_v45 = vld [vmem:[#allocation166_spill] sm:$0xff] }
 0x622   : > { %16394 = vst [vmem:[#allocation233_spill] sm:$0xff] %v12957_v38  ;;  %8839 = vpow2.f32 %v4197_v42  ;;  %v16399_v51 = vsub.f32 %v16397_v34, %v16398_v27  ;;  %5390 = vmatmul.mubr.f32.gmra.mrb[166].mxu1 %v4799_v21  ;;  %v4483_v58 = vadd.f32 %v12726_v46, %v12714_v49  ;;  %16400 = vst [vmem:[#allocation231_spill] sm:$0xff] %v12967_v41  ;;  %v12969_v52 = vpop.eup %8823  ;;  %5169 = vmatprep.mubr.f32.mxu0 %v4707_v31  ;;  %v12974_v39 = vpop.xlane.xlu1 %3389  ;;  %v16404_v42 = vld [vmem:[#allocation232_spill] sm:$0xff]  ;;  %v16434_v21 = vld [vmem:[#allocation19_spill] sm:$0xff] }
 0x623   : > { %v4201_v10 = vmul.f32 1.442695, %v16396_v25  ;;  %16401 = vst [vmem:[#allocation227_spill] sm:$0xff] %v12969_v52  ;;  %8841 = vpow2.f32 %v4199_v44  ;;  %v16403_v15 = vsub.f32 %v16402_v45, %v16398_v27  ;;  %v16407_v25 = vld [vmem:[#allocation165_spill] sm:$0xff]  ;;  %5170 = vmatmul.mubr.f32.gmra.mrb[152].mxu0 %v4706_v7  ;;  %v4507_v44 = vadd.f32 %v12957_v38, %v12949_v6  ;;  %v16409_v27 = vld [vmem:[#allocation212_spill] sm:$0xff]  ;;  %v16416_v6 = vld [vmem:[#allocation167_spill] sm:$0xff] }
 0x624   : > { %v4073_v2 = vmul.f32 1.442695, %v16399_v51  ;;  %v16408_v29 = vsub.f32 %v16407_v25, %v16395_v61  ;;  %v16410_v45 = vld [vmem:[#allocation217_spill] sm:$0xff]  ;;  %v16413_v34 = vsub.f32 %v16412_v63, %v16371_v5  ;;  %4484 = vadd.xlane.f32.xlu0 %v4483_v58  ;;  %v4390_v25 = vadd.f32 %v12763_v60, %v12754_v3  ;;  %v16417_v63 = vld [vmem:[#allocation18_spill] sm:$0xff] }
 0x625   : > { %4601 = vadd.xlane.f32.xlu1 %v4600_v35  ;;  %v4075_v28 = vmul.f32 1.442695, %v16403_v15  ;;  %v12980_v35 = vpop.eup %8825  ;;  %8843 = vpow2.f32 %v4201_v10  ;;  %v16418_v5 = vsub.f32 %v16416_v6, %v16417_v63  ;;  %v16422_v6 = vld [vmem:[#allocation267_spill] sm:$0xff] }
 0x626   : > { %16406 = vst [vmem:[#allocation195_spill] sm:$0xff] %v12980_v35  ;;  %v4203_v33 = vmul.f32 1.442695, %v16408_v29  ;;  %v12991_v51 = vpop.eup %8827  ;;  %v4051_v49 = vmul.f32 1.442695, %v16413_v34  ;;  %8845 = vpow2.f32 %v4073_v2  ;;  %v4431_v29 = vpop.xlane.xlu0 %4430  ;;  %v16419_v34 = vld [vmem:[#allocation172_spill] sm:$0xff] }
 0x627   : > { %16411 = vst [vmem:[#allocation238_spill] sm:$0xff] %v12991_v51  ;;  %v12996_v61 = vpop.eup %8829  ;;  %8847 = vpow2.f32 %v4075_v28  ;;  %v4422_v15 = vpop.xlane.xlu1 %4421  ;;  %v4077_v10 = vmul.f32 1.442695, %v16418_v5  ;;  %v4603_v58 = vadd.f32 %v12991_v51, %v12980_v35  ;;  %v4489_v28 = vadd.f32 %v12831_v53, %v12826_v37  ;;  %v16424_v51 = vld [vmem:[#allocation143_spill] sm:$0xff]  ;;  %v16427_v53 = vld [vmem:[#allocation234_spill] sm:$0xff] }
 0x628   : > { %v12998_v7 = vpop.eup %8831  ;;  %8849 = vpow2.f32 %v4203_v33  ;;  %4391 = vadd.xlane.f32.xlu0 %v4390_v25  ;;  %v16421_v33 = vld [vmem:[#allocation268_spill] sm:$0xff] }
 0x629   : > { %4508 = vadd.xlane.f32.xlu1 %v4507_v44  ;;  %16414 = vst [vmem:[#allocation194_spill] sm:$0xff] %v12998_v7  ;;  %v13002_v31 = vpop.eup %8833  ;;  %8851 = vpow2.f32 %v4051_v49  ;;  %v16420_v44 = vsub.f32 %v16419_v34, %v16417_v63  ;;  %v16425_v49 = vld [vmem:[#allocation271_spill] sm:$0xff]  ;;  %v16464_v34 = vld [vmem:[#allocation65_spill] sm:$0xff] }
 0x62a   : > { %16415 = vst [vmem:[#allocation199_spill] sm:$0xff] %v13002_v31  ;;  %v8836_v2 = vpop.eup %8835  ;;  %8853 = vrcp.f32 %v12839_v59  ;;  %v13017_v60 = vpop.xlane.xlu0 %3494  ;;  %v16426_v25 = vsub.f32 %v16424_v51, %v16425_v49  ;;  %v16436_v59 = vld [vmem:[#allocation170_spill] sm:$0xff] }
 0x62b   : > { %v4079_v38 = vmul.f32 1.442695, %v16420_v44  ;;  %v4803_v3 = vmul.f32 %v8836_v2, %v16421_v33  ;;  %v4802_v5 = vmul.f32 %v8836_v2, %v16422_v6  ;;  %16423 = vst [vmem:[#allocation144_spill] sm:$0xff] %v13017_v60  ;;  %v8838_v35 = vpop.eup %8837  ;;  %8855 = vrcp.f32 %v4422_v15  ;;  %v4329_v37 = vpop.xlane.xlu1 %4328  ;;  %v16430_v44 = vld [vmem:[#allocation113_spill] sm:$0xff]  ;;  %v16431_v6 = vld [vmem:[#allocation111_spill] sm:$0xff]  ;;  %v16433_v15 = vld [vmem:[#allocation168_spill] sm:$0xff] }
 0x62c   : > { %v4053_v46 = vmul.f32 1.442695, %v16426_v25  ;;  %8857 = vpow2.f32 %v4077_v10  ;;  %v4510_v2 = vadd.f32 %v13002_v31, %v12998_v7  ;;  %v4710_v33 = vmul.f32 %v8838_v35, %v16430_v44  ;;  %4490 = vadd.xlane.f32.xlu0 %v4489_v28  ;;  %v16449_v28 = vld [vmem:[#allocation176_spill] sm:$0xff] }
 0x62d   : > { %4604 = vadd.xlane.f32.xlu1 %v4603_v58  ;;  %v13026_v58 = vpop.eup %8839  ;;  %5394 = vmatprep.mubr.f32.mxu1 %v4803_v3  ;;  %v4709_v51 = vmul.f32 %v8838_v35, %v16431_v6  ;;  %v16435_v41 = vsub.f32 %v16433_v15, %v16434_v21  ;;  %8859 = vrcp.f32 %v4329_v37  ;;  %v16437_v3 = vsub.f32 %v16436_v59, %v16434_v21  ;;  %v16440_v21 = vld [vmem:[#allocation241_spill] sm:$0xff]  ;;  %v16446_v15 = vld [vmem:[#allocation67_spill] sm:$0xff] }
 0x62e   : > { %16429 = vst [vmem:[#allocation77_spill] sm:$0xff] %v13026_v58  ;;  %v13032_v25 = vpop.eup %8841  ;;  %5395 = vmatmul.mubr.f32.gmra.mrb[168].mxu1 %v4802_v5  ;;  %8861 = vpow2.f32 %v4079_v38  ;;  %5174 = vmatprep.mubr.f32.mxu0 %v4710_v33  ;;  %v13040_v7 = vpop.xlane.xlu0 %3401  ;;  %v16439_v38 = vld [vmem:[#allocation179_spill] sm:$0xff]  ;;  %v16442_v59 = vld [vmem:[#allocation145_spill] sm:$0xff] }
 0x62f   : > { %16432 = vst [vmem:[#allocation236_spill] sm:$0xff] %v13032_v25  ;;  %v4205_v63 = vmul.f32 1.442695, %v16435_v41  ;;  %v4207_v10 = vmul.f32 1.442695, %v16437_v3  ;;  %v13042_v44 = vpop.eup %8843  ;;  %8863 = vrcp.f32 %v12923_v0  ;;  %5175 = vmatmul.mubr.f32.gmra.mrb[154].mxu0 %v4709_v51  ;;  %v4585_v41 = vadd.f32 %v12918_v50, %v12891_v17  ;;  %v13047_v35 = vpop.xlane.xlu1 %3392  ;;  %v16445_v51 = vld [vmem:[#allocation173_spill] sm:$0xff] }
 0x630   : > { %16438 = vst [vmem:[#allocation142_spill] sm:$0xff] %v13042_v44  ;;  %v13053_v5 = vpop.eup %8845  ;;  %8865 = vpow2.f32 %v4053_v46  ;;  %v4606_v0 = vadd.f32 %v13032_v25, %v13026_v58  ;;  %v16447_v3 = vsub.f32 %v16445_v51, %v16446_v15  ;;  %v16450_v46 = vsub.f32 %v16449_v28, %v16446_v15  ;;  %v16453_v15 = vld [vmem:[#allocation116_spill] sm:$0xff] }
 0x631   : > { %4511 = vadd.xlane.f32.xlu1 %v4510_v2  ;;  %16441 = vst [vmem:[#allocation149_spill] sm:$0xff] %v13053_v5  ;;  %v16443_v2 = vsub.f32 %v16442_v59, %v16425_v49  ;;  %v13060_v6 = vpop.eup %8847  ;;  %8867 = vpow2.f32 %v4205_v63  ;;  %4586 = vadd.xlane.f32.xlu0 %v4585_v41  ;;  %v4492_v63 = vadd.f32 %v12969_v52, %v12925_v36  ;;  %v16457_v36 = vld [vmem:[#allocation175_spill] sm:$0xff] }
 0x632   : > { %16444 = vst [vmem:[#allocation146_spill] sm:$0xff] %v13060_v6  ;;  %v4081_v37 = vmul.f32 1.442695, %v16447_v3  ;;  %v13065_v31 = vpop.eup %8849  ;;  %8869 = vpow2.f32 %v4207_v10  ;;  %v4083_v17 = vmul.f32 1.442695, %v16450_v46  ;;  %v4434_v49 = vpop.xlane.xlu0 %4433  ;;  %v4513_v41 = vadd.f32 %v13060_v6, %v13053_v5  ;;  %v16456_v5 = vld [vmem:[#allocation80_spill] sm:$0xff] }
 0x633   : > { %v4055_v33 = vmul.f32 1.442695, %v16443_v2  ;;  %16448 = vst [vmem:[#allocation245_spill] sm:$0xff] %v13065_v31  ;;  %v13070_v59 = vpop.eup %8851  ;;  %8871 = vrcp.f32 %v4431_v29  ;;  %v4332_v2 = vpop.xlane.xlu1 %4331  ;;  %v4588_v10 = vadd.f32 %v12770_v47, %v12768_v11  ;;  %v4609_v28 = vadd.f32 %v13065_v31, %v13042_v44  ;;  %v16452_v29 = vld [vmem:[#allocation174_spill] sm:$0xff] }
 0x634   : > { %v8854_v58 = vpop.eup %8853  ;;  %v16454_v3 = vsub.f32 %v16452_v29, %v16453_v15  ;;  %v16458_v11 = vsub.f32 %v16457_v36, %v16453_v15  ;;  %v16460_v29 = vld [vmem:[#allocation240_spill] sm:$0xff]  ;;  %v16467_v15 = vld [vmem:[#allocation186_spill] sm:$0xff] }
 0x635   : > { %4607 = vadd.xlane.f32.xlu1 %v4606_v0  ;;  %8873 = vpow2.f32 %v4055_v33  ;;  %v8856_v51 = vpop.eup %8855  ;;  %4493 = vadd.xlane.f32.xlu0 %v4492_v63  ;;  %v16455_v33 = vld [vmem:[#allocation112_spill] sm:$0xff] }
 0x636   : > { %8875 = vpow2.f32 %v4081_v37  ;;  %v13080_v0 = vpop.eup %8857  ;;  %v4209_v46 = vmul.f32 1.442695, %v16454_v3  ;;  %v4806_v25 = vmul.f32 %v8856_v51, %v16455_v33  ;;  %v4805_v6 = vmul.f32 %v8856_v51, %v16456_v5  ;;  %v13087_v37 = vpop.xlane.xlu0 %3497  ;;  %v16462_v5 = vld [vmem:[#allocation260_spill] sm:$0xff] }
 0x637   : > { %16451 = vst [vmem:[#allocation243_spill] sm:$0xff] %v13080_v0  ;;  %8877 = vpow2.f32 %v4083_v17  ;;  %v8860_v63 = vpop.eup %8859  ;;  %v4211_v47 = vmul.f32 1.442695, %v16458_v11  ;;  %v4335_v44 = vpop.xlane.xlu1 %4334  ;;  %v16459_v17 = vld [vmem:[#allocation34_spill] sm:$0xff]  ;;  %v4809_v51 = vmul.f32 %v8854_v58, %v16462_v5  ;;  %v16463_v33 = vld [vmem:[#allocation84_spill] sm:$0xff]  ;;  %v16470_v5 = vld [vmem:[#allocation183_spill] sm:$0xff] }
 0x638   : > { %8879 = vrcp.f32 %v4332_v2  ;;  %5399 = vmatprep.mubr.f32.mxu1 %v4806_v25  ;;  %v4713_v52 = vmul.f32 %v8860_v63, %v16463_v33  ;;  %v4712_v60 = vmul.f32 %v8860_v63, %v16464_v34  ;;  %v16466_v2 = vld [vmem:[#allocation177_spill] sm:$0xff]  ;;  %v16471_v34 = vsub.f32 %v16470_v5, %v16467_v15 }
 0x639   : > { %4514 = vadd.xlane.f32.xlu1 %v4513_v41  ;;  %v13096_v41 = vpop.eup %8861  ;;  %8881 = vrcp.f32 %v4434_v49  ;;  %5400 = vmatmul.mubr.f32.gmra.mrb[170].mxu1 %v4805_v6  ;;  %v16468_v31 = vsub.f32 %v16466_v2, %v16467_v15  ;;  %v16475_v2 = vld [vmem:[#allocation61_spill] sm:$0xff] }
 0x63a   : > { %16461 = vst [vmem:[#allocation132_spill] sm:$0xff] %v13096_v41  ;;  %v8864_v36 = vpop.eup %8863  ;;  %4589 = vadd.xlane.f32.xlu0 %v4588_v10  ;;  %8883 = vrcp.f32 %v4335_v44  ;;  %5404 = vmatprep.mubr.f32.mxu1 %v4809_v51  ;;  %v13106_v25 = vpop.xlane.xlu0 %3404  ;;  %v4087_v63 = vmul.f32 1.442695, %v16471_v34  ;;  %v16472_v44 = vld [vmem:[#allocation257_spill] sm:$0xff]  ;;  %v4495_v10 = vadd.f32 %v13070_v59, %v12996_v61  ;;  %v4516_v51 = vadd.f32 %v13096_v41, %v13080_v0  ;;  %v16485_v0 = vld [vmem:[#allocation86_spill] sm:$0xff]  ;;  %v16487_v41 = vld [vmem:[#allocation36_spill] sm:$0xff] }
 0x63b   : > { %v13101_v11 = vpop.eup %8865  ;;  %v4085_v3 = vmul.f32 1.442695, %v16468_v31  ;;  %8885 = vpow2.f32 %v4209_v46  ;;  %5179 = vmatprep.mubr.f32.mxu0 %v4713_v52  ;;  %v4808_v6 = vmul.f32 %v8854_v58, %v16472_v44  ;;  %v4338_v33 = vpop.xlane.xlu1 %4337  ;;  %v4812_v15 = vmul.f32 %v8864_v36, %v16475_v2  ;;  %v16478_v34 = vld [vmem:[#allocation269_spill] sm:$0xff] }
 0x63c   : > { %16465 = vst [vmem:[#allocation39_spill] sm:$0xff] %v13101_v11  ;;  %v13108_v49 = vpop.eup %8867  ;;  %8887 = vpow2.f32 %v4211_v47  ;;  %5180 = vmatmul.mubr.f32.gmra.mrb[156].mxu0 %v4712_v60  ;;  %v4811_v44 = vmul.f32 %v8864_v36, %v16478_v34 }
 0x63d   : > { %4610 = vadd.xlane.f32.xlu1 %v4609_v28  ;;  %16469 = vst [vmem:[#allocation251_spill] sm:$0xff] %v13108_v49  ;;  %v13116_v31 = vpop.eup %8869  ;;  %v16474_v28 = vsub.f32 %v16224_v30, %v12624_v8  ;;  %5405 = vmatmul.mubr.f32.gmra.mrb[172].mxu1 %v4808_v6  ;;  %8889 = vrcp.f32 %v4338_v33  ;;  %v16477_v30 = vsub.f32 %v16225_v13, %v12624_v8 }
 0x63e   : > { %16473 = vst [vmem:[#allocation250_spill] sm:$0xff] %v13116_v31  ;;  %v8872_v47 = vpop.eup %8871  ;;  %4496 = vadd.xlane.f32.xlu0 %v4495_v10  ;;  %8891 = vpow2.f32 %v4085_v3  ;;  %5409 = vmatprep.mubr.f32.mxu1 %v4812_v15  ;;  %v4437_v58 = vpop.xlane.xlu0 %4436  ;;  %v4591_v6 = vadd.f32 %v12817_v14, %v12806_v4  ;;  %v4612_v3 = vadd.f32 %v13116_v31, %v13108_v49 }
 0x63f   : > { %v4213_v46 = vmul.f32 1.442695, %v16474_v28  ;;  %v13124_v52 = vpop.eup %8873  ;;  %8893 = vpow2.f32 %v4087_v63  ;;  %v4215_v60 = vmul.f32 1.442695, %v16477_v30  ;;  %v4341_v10 = vpop.xlane.xlu1 %4340  ;;  %v16479_v28 = vld [vmem:[#allocation56_spill] sm:$0xff]  ;;  %v16480_v63 = vld [vmem:[#allocation69_spill] sm:$0xff] }
 0x640   : > { %v13126_v5 = vpop.eup %8875  ;;  %v16481_v15 = vsub.f32 %v16177_v56, %v16480_v63  ;;  %v4498_v13 = vadd.f32 %v13124_v52, %v13101_v11  ;;  %v16482_v30 = vld [vmem:[#allocation189_spill] sm:$0xff] }
 0x641   : > { %4517 = vadd.xlane.f32.xlu1 %v4516_v51  ;;  %16476 = vst [vmem:[#allocation154_spill] sm:$0xff] %v13126_v5  ;;  %v13134_v33 = vpop.eup %8877  ;;  %8895 = vpow2.f32 %v4213_v46  ;;  %v4815_v51 = vmul.f32 %v8872_v47, %v16479_v28  ;;  %5410 = vmatmul.mubr.f32.gmra.mrb[174].mxu1 %v4811_v44  ;;  %v16483_v46 = vsub.f32 %v16482_v30, %v16480_v63  ;;  %v16484_v28 = vld [vmem:[#allocation88_spill] sm:$0xff] }
 0x642   : > { %v8880_v2 = vpop.eup %8879  ;;  %v4089_v8 = vmul.f32 1.442695, %v16481_v15  ;;  %4592 = vadd.xlane.f32.xlu0 %v4591_v6  ;;  %8897 = vrcp.f32 %v4341_v10  ;;  %v13149_v56 = vpop.xlane.xlu0 %3500  ;;  %v16486_v6 = vld [vmem:[#allocation114_spill] sm:$0xff]  ;;  %v16488_v63 = vld [vmem:[#allocation244_spill] sm:$0xff] }
 0x643   : > { %v8882_v36 = vpop.eup %8881  ;;  %v4091_v34 = vmul.f32 1.442695, %v16483_v46  ;;  %5414 = vmatprep.mubr.f32.mxu1 %v4815_v51  ;;  %8899 = vrcp.f32 %v4437_v58  ;;  %v4716_v49 = vmul.f32 %v8880_v2, %v16484_v28  ;;  %v4715_v31 = vmul.f32 %v8880_v2, %v16485_v0  ;;  %v4344_v15 = vpop.xlane.xlu1 %4343  ;;  %v16493_v46 = vld [vmem:[#allocation60_spill] sm:$0xff] }
 0x644   : > { %v8884_v44 = vpop.eup %8883  ;;  %8901 = vpow2.f32 %v4215_v60  ;;  %v4814_v10 = vmul.f32 %v8872_v47, %v16486_v6  ;;  %v16490_v58 = vsub.f32 %v16229_v32, %v12636_v9  ;;  %v4519_v0 = vadd.f32 %v13134_v33, %v13126_v5  ;;  %v16491_v60 = vld [vmem:[#allocation62_spill] sm:$0xff]  ;;  %v16702_v5 = vld [vmem:[#allocation228_spill] sm:$0xff] }
 0x645   : > { %4613 = vadd.xlane.f32.xlu1 %v4612_v3  ;;  %v13156_v3 = vpop.eup %8885  ;;  %5184 = vmatprep.mubr.f32.mxu0 %v4716_v49  ;;  %8903 = vrcp.f32 %v4344_v15  ;;  %v4719_v47 = vmul.f32 %v8884_v44, %v16491_v60  ;;  %v4818_v28 = vmul.f32 %v8882_v36, %v16493_v46  ;;  %v16494_v6 = vld [vmem:[#allocation226_spill] sm:$0xff]  ;;  %v16495_v32 = vsub.f32 %v16243_v23, %v12663_v12  ;;  %v16496_v60 = vld [vmem:[#allocation187_spill] sm:$0xff] }
 0x646   : > { %16489 = vst [vmem:[#allocation134_spill] sm:$0xff] %v13156_v3  ;;  %v4093_v51 = vmul.f32 1.442695, %v16490_v58  ;;  %v13164_v2 = vpop.eup %8887  ;;  %5185 = vmatmul.mubr.f32.gmra.mrb[158].mxu0 %v4715_v31  ;;  %5415 = vmatmul.mubr.f32.gmra.mrb[176].mxu1 %v4814_v10  ;;  %v4718_v30 = vmul.f32 %v8884_v44, %v16494_v6  ;;  %8905 = vpow2.f32 %v4089_v8  ;;  %v13171_v49 = vpop.xlane.xlu0 %3407  ;;  %v16497_v11 = vsub.f32 %v16496_v60, %v12663_v12  ;;  %v16498_v10 = vld [vmem:[#allocation92_spill] sm:$0xff] }
 0x647   : > { %16492 = vst [vmem:[#allocation200_spill] sm:$0xff] %v13164_v2  ;;  %v4217_v58 = vmul.f32 1.442695, %v16495_v32  ;;  %4499 = vadd.xlane.f32.xlu0 %v4498_v13  ;;  %v8890_v15 = vpop.eup %8889  ;;  %8907 = vpow2.f32 %v4091_v34  ;;  %5419 = vmatprep.mubr.f32.mxu1 %v4818_v28  ;;  %v4817_v46 = vmul.f32 %v8882_v36, %v16498_v10  ;;  %v4594_v8 = vadd.f32 %v12881_v24, %v12841_v40  ;;  %v4347_v44 = vpop.xlane.xlu1 %4346  ;;  %v16500_v13 = vld [vmem:[#allocation193_spill] sm:$0xff]  ;;  %v16502_v12 = vld [vmem:[#allocation100_spill] sm:$0xff]  ;;  %v16504_v36 = vld [vmem:[#allocation98_spill] sm:$0xff] }
 0x648   : > { %v4219_v31 = vmul.f32 1.442695, %v16497_v11  ;;  %5189 = vmatprep.mubr.f32.mxu0 %v4719_v47  ;;  %v13179_v23 = vpop.eup %8891  ;;  %8909 = vpow2.f32 %v4093_v51  ;;  %v4615_v34 = vadd.f32 %v13164_v2, %v13156_v3  ;;  %v4722_v11 = vmul.f32 %v8890_v15, %v16502_v12  ;;  %v16698_v3 = vld [vmem:[#allocation72_spill] sm:$0xff] }
 0x649   : > { %4520 = vadd.xlane.f32.xlu1 %v4519_v0  ;;  %16499 = vst [vmem:[#allocation135_spill] sm:$0xff] %v13179_v23  ;;  %v16501_v0 = vsub.f32 %v16500_v13, %v12636_v9  ;;  %v13187_v28 = vpop.eup %8893  ;;  %8911 = vrcp.f32 %v4347_v44  ;;  %v4721_v47 = vmul.f32 %v8890_v15, %v16504_v36  ;;  %v16508_v15 = vld [vmem:[#allocation66_spill] sm:$0xff] }
 0x64a   : > { %16503 = vst [vmem:[#allocation131_spill] sm:$0xff] %v13187_v28  ;;  %5190 = vmatmul.mubr.f32.gmra.mrb[160].mxu0 %v4718_v30  ;;  %5420 = vmatmul.mubr.f32.gmra.mrb[178].mxu1 %v4817_v46  ;;  %8913 = vpow2.f32 %v4217_v58  ;;  %v4440_v51 = vpop.xlane.xlu0 %4439  ;;  %v4522_v13 = vadd.f32 %v13187_v28, %v13179_v23  ;;  %v16506_v30 = vld [vmem:[#allocation235_spill] sm:$0xff] }
 0x64b   : > { %v4095_v6 = vmul.f32 1.442695, %v16501_v0  ;;  %v13190_v32 = vpop.eup %8895  ;;  %4595 = vadd.xlane.f32.xlu0 %v4594_v8  ;;  %8915 = vpow2.f32 %v4219_v31  ;;  %5194 = vmatprep.mubr.f32.mxu0 %v4722_v11  ;;  %v4350_v60 = vpop.xlane.xlu1 %4349  ;;  %v16509_v8 = vld [vmem:[#allocation64_spill] sm:$0xff]  ;;  %v16511_v11 = vsub.f32 %v16253_v54, %v12685_v57 }
 0x64c   : > { %16505 = vst [vmem:[#allocation152_spill] sm:$0xff] %v13190_v32  ;;  %v8898_v9 = vpop.eup %8897 }
 0x64d   : > { %4616 = vadd.xlane.f32.xlu1 %v4615_v34  ;;  %v8900_v10 = vpop.eup %8899  ;;  %8917 = vpow2.f32 %v4095_v6  ;;  %v4725_v46 = vmul.f32 %v8898_v9, %v16506_v30  ;;  %v4724_v0 = vmul.f32 %v8898_v9, %v16509_v8  ;;  %v16510_v34 = vld [vmem:[#allocation73_spill] sm:$0xff]  ;;  %v4221_v6 = vmul.f32 1.442695, %v16511_v11  ;;  %v16513_v9 = vld [vmem:[#allocation248_spill] sm:$0xff] }
 0x64e   : > { %v13195_v44 = vpop.eup %8901  ;;  %5195 = vmatmul.mubr.f32.gmra.mrb[162].mxu0 %v4721_v47  ;;  %8919 = vrcp.f32 %v4350_v60  ;;  %v4821_v58 = vmul.f32 %v8900_v10, %v16508_v15  ;;  %v4820_v12 = vmul.f32 %v8900_v10, %v16510_v34  ;;  %v13203_v36 = vpop.xlane.xlu0 %3503  ;;  %v16512_v47 = vsub.f32 %v16254_v1, %v12685_v57  ;;  %v16514_v10 = vld [vmem:[#allocation24_spill] sm:$0xff]  ;;  %v16515_v34 = vld [vmem:[#allocation23_spill] sm:$0xff] }
 0x64f   : > { %16507 = vst [vmem:[#allocation87_spill] sm:$0xff] %v13195_v44  ;;  %v8904_v31 = vpop.eup %8903  ;;  %8921 = vrcp.f32 %v4440_v51  ;;  %5199 = vmatprep.mubr.f32.mxu0 %v4725_v46  ;;  %v4353_v30 = vpop.xlane.xlu1 %4352  ;;  %v4618_v51 = vadd.f32 %v13195_v44, %v13190_v32  ;;  %v16518_v57 = vld [vmem:[#allocation68_spill] sm:$0xff] }
 0x650   : > { %v4223_v60 = vmul.f32 1.442695, %v16512_v47  ;;  %5424 = vmatprep.mubr.f32.mxu1 %v4821_v58  ;;  %v4728_v54 = vmul.f32 %v8904_v31, %v16515_v34  ;;  %v13213_v11 = vpop.eup %8905  ;;  %8923 = vrcp.f32 %v4353_v30  ;;  %v4727_v1 = vmul.f32 %v8904_v31, %v16518_v57 }
 0x651   : > { %4523 = vadd.xlane.f32.xlu1 %v4522_v13  ;;  %16516 = vst [vmem:[#allocation153_spill] sm:$0xff] %v13213_v11  ;;  %5425 = vmatmul.mubr.f32.gmra.mrb[180].mxu1 %v4820_v12  ;;  %v13217_v13 = vpop.eup %8907  ;;  %8925 = vpow2.f32 %v4221_v6  ;;  %v16520_v58 = vsub.f32 %v16273_v20, %v12724_v19  ;;  %v16521_v30 = vsub.f32 %v16274_v26, %v12724_v19 }
 0x652   : > { %16517 = vst [vmem:[#allocation155_spill] sm:$0xff] %v13217_v13  ;;  %5200 = vmatmul.mubr.f32.gmra.mrb[164].mxu0 %v4724_v0  ;;  %v13220_v46 = vpop.eup %8909  ;;  %v13225_v34 = vpop.xlane.xlu0 %3410  ;;  %8927 = vpow2.f32 %v4223_v60  ;;  %v16523_v31 = vsub.f32 %v16268_v18, %v12712_v43  ;;  %v4525_v20 = vadd.f32 %v13217_v13, %v13213_v11  ;;  %v16526_v60 = vld [vmem:[#allocation136_spill] sm:$0xff]  ;;  %v16528_v18 = vld [vmem:[#allocation197_spill] sm:$0xff]  ;;  %v16533_v13 = vld [vmem:[#allocation75_spill] sm:$0xff] }
 0x653   : > { %16519 = vst [vmem:[#allocation15_spill] sm:$0xff] %v13220_v46  ;;  %v4097_v47 = vmul.f32 1.442695, %v16520_v58  ;;  %5204 = vmatprep.mubr.f32.mxu0 %v4728_v54  ;;  %v8912_v12 = vpop.eup %8911  ;;  %v4099_v8 = vmul.f32 1.442695, %v16521_v30  ;;  %v4356_v0 = vpop.xlane.xlu1 %4355 }
 0x654   : > { %v13230_v15 = vpop.eup %8913  ;;  %v4225_v6 = vmul.f32 1.442695, %v16523_v31  ;;  %8929 = vrcp.f32 %v4356_v0  ;;  %v4730_v58 = vmul.f32 %v8912_v12, %v16526_v60  ;;  %v16529_v31 = vsub.f32 %v16528_v18, %v12712_v43  ;;  %v16530_v0 = vld [vmem:[#allocation133_spill] sm:$0xff]  ;;  %v16534_v43 = vld [vmem:[#allocation126_spill] sm:$0xff] }
 0x655   : > { %4619 = vadd.xlane.f32.xlu1 %v4618_v51  ;;  %16522 = vst [vmem:[#allocation158_spill] sm:$0xff] %v13230_v15  ;;  %v16524_v51 = vld [vmem:[#allocation41_spill] sm:$0xff]  ;;  %v13238_v57 = vpop.eup %8915  ;;  %8931 = vpow2.f32 %v4097_v47  ;;  %v16531_v47 = vld [vmem:[#allocation242_spill] sm:$0xff] }
 0x656   : > { %v4731_v54 = vmul.f32 %v8912_v12, %v16524_v51  ;;  %16525 = vst [vmem:[#allocation51_spill] sm:$0xff] %v13238_v57  ;;  %5205 = vmatmul.mubr.f32.gmra.mrb[166].mxu0 %v4727_v1  ;;  %v4443_v26 = vpop.xlane.xlu0 %4442  ;;  %v4227_v32 = vmul.f32 1.442695, %v16529_v31  ;;  %8933 = vpow2.f32 %v4099_v8  ;;  %v4621_v1 = vadd.f32 %v13238_v57, %v13230_v15  ;;  %v16536_v31 = vld [vmem:[#allocation205_spill] sm:$0xff]  ;;  %v16685_v15 = vld [vmem:[#allocation215_spill] sm:$0xff] }
 0x657   : > { %v13241_v19 = vpop.eup %8917  ;;  %v4359_v11 = vpop.xlane.xlu1 %4358  ;;  %8935 = vpow2.f32 %v4225_v6  ;;  %v16535_v8 = vsub.f32 %v16324_v62, %v16534_v43 }
 0x658   : > { %16527 = vst [vmem:[#allocation70_spill] sm:$0xff] %v13241_v19  ;;  %5209 = vmatprep.mubr.f32.mxu0 %v4731_v54  ;;  %v8920_v30 = vpop.eup %8919  ;;  %8937 = vrcp.f32 %v4359_v11  ;;  %v16532_v54 = vld [vmem:[#allocation43_spill] sm:$0xff]  ;;  %v16537_v11 = vsub.f32 %v16536_v31, %v16534_v43  ;;  %v4528_v62 = vadd.f32 %v13241_v19, %v13220_v46 }
 0x659   : > { %4526 = vadd.xlane.f32.xlu1 %v4525_v20  ;;  %v8922_v51 = vpop.eup %8921  ;;  %v4734_v12 = vmul.f32 %v8920_v30, %v16530_v0  ;;  %v4733_v60 = vmul.f32 %v8920_v30, %v16532_v54  ;;  %v4101_v18 = vmul.f32 1.442695, %v16535_v8  ;;  %8939 = vrcp.f32 %v4443_v26  ;;  %v16538_v30 = vld [vmem:[#allocation148_spill] sm:$0xff] }
 0x65a   : > { %5210 = vmatmul.mubr.f32.gmra.mrb[168].mxu0 %v4730_v58  ;;  %v4824_v20 = vmul.f32 %v8922_v51, %v16531_v47  ;;  %v4823_v23 = vmul.f32 %v8922_v51, %v16533_v13  ;;  %v8924_v44 = vpop.eup %8923  ;;  %v13255_v6 = vpop.xlane.xlu0 %3506  ;;  %8941 = vpow2.f32 %v4227_v32  ;;  %v4103_v58 = vmul.f32 1.442695, %v16537_v11  ;;  %v16541_v51 = vld [vmem:[#allocation89_spill] sm:$0xff] }
 0x65b   : > { %5214 = vmatprep.mubr.f32.mxu0 %v4734_v12  ;;  %v4362_v0 = vpop.xlane.xlu1 %4361  ;;  %v4737_v47 = vmul.f32 %v8924_v44, %v16538_v30  ;;  %v13261_v13 = vpop.eup %8925  ;;  %v4736_v32 = vmul.f32 %v8924_v44, %v16541_v51  ;;  %v16545_v44 = vsub.f32 %v16409_v27, %v12974_v39 }
 0x65c   : > { %5429 = vmatprep.mubr.f32.mxu1 %v4824_v20  ;;  %16539 = vst [vmem:[#allocation137_spill] sm:$0xff] %v13261_v13  ;;  %8943 = vrcp.f32 %v4362_v0  ;;  %v13265_v26 = vpop.eup %8927 }
 0x65d   : > { %4622 = vadd.xlane.f32.xlu1 %v4621_v1  ;;  %5430 = vmatmul.mubr.f32.gmra.mrb[182].mxu1 %v4823_v23  ;;  %16540 = vst [vmem:[#allocation85_spill] sm:$0xff] %v13265_v26  ;;  %8945 = vpow2.f32 %v4101_v18  ;;  %v16542_v1 = vsub.f32 %v16373_v16, %v12896_v22  ;;  %v16543_v23 = vsub.f32 %v16374_v55, %v12896_v22  ;;  %v16546_v18 = vld [vmem:[#allocation272_spill] sm:$0xff]  ;;  %v16550_v55 = vld [vmem:[#allocation218_spill] sm:$0xff] }
 0x65e   : > { %5215 = vmatmul.mubr.f32.gmra.mrb[170].mxu0 %v4733_v60  ;;  %v13271_v20 = vpop.xlane.xlu0 %3413  ;;  %v8930_v54 = vpop.eup %8929  ;;  %8947 = vpow2.f32 %v4103_v58  ;;  %v4109_v60 = vmul.f32 1.442695, %v16545_v44  ;;  %v4624_v16 = vadd.f32 %v13265_v26, %v13261_v13  ;;  %v16548_v58 = vld [vmem:[#allocation97_spill] sm:$0xff]  ;;  %v16553_v44 = vld [vmem:[#allocation26_spill] sm:$0xff] }
 0x65f   : > { %v4105_v12 = vmul.f32 1.442695, %v16542_v1  ;;  %5219 = vmatprep.mubr.f32.mxu0 %v4737_v47  ;;  %v4107_v43 = vmul.f32 1.442695, %v16543_v23  ;;  %v4365_v8 = vpop.xlane.xlu1 %4364  ;;  %v13276_v31 = vpop.eup %8931  ;;  %v4740_v11 = vmul.f32 %v8930_v54, %v16546_v18  ;;  %v4739_v30 = vmul.f32 %v8930_v54, %v16548_v58  ;;  %v16552_v1 = vld [vmem:[#allocation221_spill] sm:$0xff]  ;;  %v16557_v58 = vld [vmem:[#allocation140_spill] sm:$0xff] }
 0x660   : > { %16544 = vst [vmem:[#allocation156_spill] sm:$0xff] %v13276_v31  ;;  %v13284_v0 = vpop.eup %8933  ;;  %8949 = vrcp.f32 %v4365_v8  ;;  %v3693_v47 = vsub.f32 %v16550_v55, %v13047_v35  ;;  %v16682_v26 = vld [vmem:[#allocation94_spill] sm:$0xff] }
 0x661   : > { %4529 = vadd.xlane.f32.xlu1 %v4528_v62  ;;  %16547 = vst [vmem:[#allocation95_spill] sm:$0xff] %v13284_v0  ;;  %v13287_v22 = vpop.eup %8935  ;;  %8951 = vpow2.f32 %v4105_v12  ;;  %v16551_v62 = vsub.f32 %v16410_v45, %v12974_v39  ;;  %v4531_v12 = vadd.f32 %v13284_v0, %v13276_v31  ;;  %v16556_v39 = vld [vmem:[#allocation101_spill] sm:$0xff] }
 0x662   : > { %5220 = vmatmul.mubr.f32.gmra.mrb[172].mxu0 %v4736_v32  ;;  %16549 = vst [vmem:[#allocation255_spill] sm:$0xff] %v13287_v22  ;;  %v8938_v27 = vpop.eup %8937  ;;  %8953 = vpow2.f32 %v4107_v43  ;;  %v3694_v32 = vsub.f32 %v16552_v1, %v13047_v35  ;;  %v4446_v8 = vpop.xlane.xlu0 %4445  ;;  %v16555_v43 = vld [vmem:[#allocation249_spill] sm:$0xff] }
 0x663   : > { %5224 = vmatprep.mubr.f32.mxu0 %v4740_v11  ;;  %v4111_v51 = vmul.f32 1.442695, %v16551_v62  ;;  %v4368_v23 = vpop.xlane.xlu1 %4367  ;;  %v8940_v54 = vpop.eup %8939  ;;  %8955 = vpow2.f32 %v4109_v60  ;;  %v4743_v18 = vmul.f32 %v8938_v27, %v16553_v44  ;;  %v4742_v45 = vmul.f32 %v8938_v27, %v16556_v39  ;;  %v16558_v44 = vld [vmem:[#allocation273_spill] sm:$0xff] }
 0x664   : > { %8957 = vrcp.f32 %v4368_v23  ;;  %v4827_v11 = vmul.f32 %v8940_v54, %v16555_v43  ;;  %v4826_v55 = vmul.f32 %v8940_v54, %v16557_v58  ;;  %v4113_v62 = vmul.f32 1.442695, %v3693_v47  ;;  %v16561_v47 = vld [vmem:[#allocation129_spill] sm:$0xff] }
 0x665   : > { %4625 = vadd.xlane.f32.xlu1 %v4624_v16  ;;  %v13299_v16 = vpop.eup %8941  ;;  %8959 = vrcp.f32 %v4446_v8  ;;  %v4115_v60 = vmul.f32 1.442695, %v3694_v32  ;;  %v16562_v8 = vsub.f32 %v16367_v48, %v16561_v47  ;;  %v16563_v32 = vld [vmem:[#allocation105_spill] sm:$0xff] }
 0x666   : > { %16554 = vst [vmem:[#allocation157_spill] sm:$0xff] %v13299_v16  ;;  %5225 = vmatmul.mubr.f32.gmra.mrb[174].mxu0 %v4739_v30  ;;  %v8944_v35 = vpop.eup %8943  ;;  %8961 = vpow2.f32 %v4111_v51  ;;  %5434 = vmatprep.mubr.f32.mxu1 %v4827_v11  ;;  %v4627_v30 = vadd.f32 %v13299_v16, %v13287_v22  ;;  %v13309_v27 = vpop.xlane.xlu0 %3509  ;;  %v16567_v48 = vld [vmem:[#allocation109_spill] sm:$0xff]  ;;  %v16675_v22 = vld [vmem:[#allocation124_spill] sm:$0xff] }
 0x667   : > { %5229 = vmatprep.mubr.f32.mxu0 %v4743_v18  ;;  %v4371_v1 = vpop.xlane.xlu1 %4370  ;;  %v4746_v31 = vmul.f32 %v8944_v35, %v16558_v44  ;;  %v13305_v0 = vpop.eup %8945  ;;  %5435 = vmatmul.mubr.f32.gmra.mrb[184].mxu1 %v4826_v55  ;;  %v4117_v51 = vmul.f32 1.442695, %v16562_v8  ;;  %v4745_v54 = vmul.f32 %v8944_v35, %v16563_v32  ;;  %v16564_v18 = vld [vmem:[#allocation230_spill] sm:$0xff]  ;;  %v16569_v35 = vld [vmem:[#allocation151_spill] sm:$0xff] }
 0x668   : > { %16559 = vst [vmem:[#allocation223_spill] sm:$0xff] %v13305_v0  ;;  %8963 = vrcp.f32 %v4371_v1  ;;  %v13311_v23 = vpop.eup %8947  ;;  %v16565_v43 = vsub.f32 %v16564_v18, %v16561_v47  ;;  %v16571_v44 = vld [vmem:[#allocation231_spill] sm:$0xff] }
 0x669   : > { %4532 = vadd.xlane.f32.xlu1 %v4531_v12  ;;  %16560 = vst [vmem:[#allocation139_spill] sm:$0xff] %v13311_v23  ;;  %8965 = vpow2.f32 %v4113_v62  ;;  %v4534_v55 = vadd.f32 %v13311_v23, %v13305_v0  ;;  %v16573_v32 = vld [vmem:[#allocation239_spill] sm:$0xff] }
 0x66a   : > { %5230 = vmatmul.mubr.f32.gmra.mrb[176].mxu0 %v4742_v45  ;;  %v8950_v12 = vpop.eup %8949  ;;  %v4119_v11 = vmul.f32 1.442695, %v16565_v43  ;;  %8967 = vpow2.f32 %v4115_v60  ;;  %v13333_v47 = vpop.xlane.xlu0 %3416  ;;  %v16574_v18 = vsub.f32 %v16573_v32, %v16571_v44  ;;  %v16580_v32 = vld [vmem:[#allocation91_spill] sm:$0xff] }
 0x66b   : > { %5234 = vmatprep.mubr.f32.mxu0 %v4746_v31  ;;  %v4374_v39 = vpop.xlane.xlu1 %4373  ;;  %v13320_v58 = vpop.eup %8951  ;;  %v4749_v1 = vmul.f32 %v8950_v12, %v16567_v48  ;;  %8969 = vpow2.f32 %v4117_v51  ;;  %v4748_v31 = vmul.f32 %v8950_v12, %v16569_v35  ;;  %v16575_v12 = vsub.f32 %v16439_v38, %v13040_v7  ;;  %v16581_v38 = vld [vmem:[#allocation35_spill] sm:$0xff] }
 0x66c   : > { %16566 = vst [vmem:[#allocation47_spill] sm:$0xff] %v13320_v58  ;;  %v13325_v45 = vpop.eup %8953  ;;  %8971 = vrcp.f32 %v4374_v39  ;;  %v4123_v51 = vmul.f32 1.442695, %v16574_v18  ;;  %v16576_v39 = vld [vmem:[#allocation17_spill] sm:$0xff] }
 0x66d   : > { %4628 = vadd.xlane.f32.xlu1 %v4627_v30  ;;  %16568 = vst [vmem:[#allocation206_spill] sm:$0xff] %v13325_v45  ;;  %v13328_v62 = vpop.eup %8955  ;;  %v16572_v30 = vsub.f32 %v16404_v42, %v16571_v44  ;;  %8973 = vpow2.f32 %v4119_v11  ;;  %v4125_v48 = vmul.f32 1.442695, %v16575_v12  ;;  %v4537_v42 = vadd.f32 %v13325_v45, %v13320_v58  ;;  %v16578_v11 = vld [vmem:[#allocation93_spill] sm:$0xff]  ;;  %v16648_v58 = vld [vmem:[#allocation210_spill] sm:$0xff] }
 0x66e   : > { %5235 = vmatmul.mubr.f32.gmra.mrb[178].mxu0 %v4745_v54  ;;  %16570 = vst [vmem:[#allocation211_spill] sm:$0xff] %v13328_v62  ;;  %v8958_v8 = vpop.eup %8957  ;;  %v3701_v12 = vsub.f32 %v16581_v38, %v13106_v25  ;;  %v4449_v23 = vpop.xlane.xlu0 %4448 }
 0x66f   : > { %v4121_v60 = vmul.f32 1.442695, %v16572_v30  ;;  %5239 = vmatprep.mubr.f32.mxu0 %v4749_v1  ;;  %v4377_v54 = vpop.xlane.xlu1 %4376  ;;  %v8960_v43 = vpop.eup %8959  ;;  %v16579_v30 = vld [vmem:[#allocation28_spill] sm:$0xff] }
 0x670   : > { %8975 = vrcp.f32 %v4377_v54  ;;  %v13344_v35 = vpop.eup %8961  ;;  %v4830_v1 = vmul.f32 %v8960_v43, %v16578_v11  ;;  %v4751_v44 = vmul.f32 %v8958_v8, %v16579_v30  ;;  %v4829_v18 = vmul.f32 %v8960_v43, %v16580_v32  ;;  %v16584_v30 = vld [vmem:[#allocation171_spill] sm:$0xff] }
 0x671   : > { %4535 = vadd.xlane.f32.xlu1 %v4534_v55  ;;  %v4752_v55 = vmul.f32 %v8958_v8, %v16576_v39  ;;  %16577 = vst [vmem:[#allocation160_spill] sm:$0xff] %v13344_v35  ;;  %8977 = vpow2.f32 %v4121_v60  ;;  %v16582_v54 = vsub.f32 %v16440_v21, %v13040_v7  ;;  %v16586_v60 = vld [vmem:[#allocation247_spill] sm:$0xff]  ;;  %v16588_v7 = vld [vmem:[#allocation45_spill] sm:$0xff]  ;;  %v4129_v38 = vmul.f32 1.442695, %v3701_v12  ;;  %v16595_v12 = vld [vmem:[#allocation128_spill] sm:$0xff] }
 0x672   : > { %5240 = vmatmul.mubr.f32.gmra.mrb[180].mxu0 %v4748_v31  ;;  %v8964_v0 = vpop.eup %8963  ;;  %8979 = vpow2.f32 %v4123_v51  ;;  %v16583_v31 = vld [vmem:[#allocation246_spill] sm:$0xff]  ;;  %5439 = vmatprep.mubr.f32.mxu1 %v4830_v1  ;;  %v4540_v51 = vadd.f32 %v13344_v35, %v13328_v62  ;;  %v3704_v21 = vsub.f32 %v16588_v7, %v13171_v49 }
 0x673   : > { %5244 = vmatprep.mubr.f32.mxu0 %v4752_v55  ;;  %v4127_v39 = vmul.f32 1.442695, %v16582_v54  ;;  %v3702_v11 = vsub.f32 %v16583_v31, %v13106_v25  ;;  %v4380_v8 = vpop.xlane.xlu1 %4379  ;;  %v4755_v43 = vmul.f32 %v8964_v0, %v16584_v30  ;;  %v13357_v32 = vpop.eup %8965  ;;  %8981 = vpow2.f32 %v4125_v48  ;;  %5440 = vmatmul.mubr.f32.gmra.mrb[186].mxu1 %v4829_v18  ;;  %v16589_v25 = vld [vmem:[#allocation159_spill] sm:$0xff]  ;;  %v16591_v31 = vld [vmem:[#allocation14_spill] sm:$0xff]  ;;  %v16592_v30 = vld [vmem:[#allocation13_spill] sm:$0xff] }
 0x674   : > { %16585 = vst [vmem:[#allocation150_spill] sm:$0xff] %v13357_v32  ;;  %v13363_v55 = vpop.eup %8967  ;;  %8983 = vrcp.f32 %v4449_v23  ;;  %v4754_v1 = vmul.f32 %v8964_v0, %v16589_v25  ;;  %v13368_v48 = vpop.xlane.xlu0 %3512  ;;  %v16645_v35 = vld [vmem:[#allocation198_spill] sm:$0xff] }
 0x675   : > { %4538 = vadd.xlane.f32.xlu1 %v4537_v42  ;;  %v3703_v42 = vsub.f32 %v16586_v60, %v13171_v49  ;;  %16587 = vst [vmem:[#allocation161_spill] sm:$0xff] %v13363_v55  ;;  %8985 = vrcp.f32 %v4380_v8  ;;  %v13370_v54 = vpop.eup %8969  ;;  %v4131_v18 = vmul.f32 1.442695, %v3702_v11  ;;  %v16593_v60 = vpack.i.bf16 %v16591_v31, %v16592_v30  ;;  %v16598_v31 = vld [vmem:[#allocation79_spill] sm:$0xff] }
 0x676   : > { %5245 = vmatmul.mubr.f32.gmra.mrb[182].mxu0 %v4751_v44  ;;  %16590 = vst [vmem:[#allocation256_spill] sm:$0xff] %v13370_v54  ;;  %8987 = vpow2.f32 %v4127_v39  ;;  %v8972_v62 = vpop.eup %8971  ;;  %v4543_v23 = vadd.f32 %v13363_v55, %v13357_v32  ;;  %v4135_v44 = vmul.f32 1.442695, %v3704_v21  ;;  %v16597_v39 = vld [vmem:[#allocation25_spill] sm:$0xff]  ;;  %v3706_v30 = vsub.f32 %v16598_v31, %v13225_v34  ;;  %v16599_v21 = vld [vmem:[#allocation182_spill] sm:$0xff] }
 0x677   : > { %5249 = vmatprep.mubr.f32.mxu0 %v4755_v43  ;;  %v4133_v49 = vmul.f32 1.442695, %v3703_v42  ;;  %v13377_v0 = vpop.eup %8973  ;;  %v4758_v8 = vmul.f32 %v8972_v62, %v16595_v12  ;;  %v16596_v43 = vld [vmem:[#allocation164_spill] sm:$0xff]  ;;  %8989 = vpow2.f32 %v4129_v38  ;;  %v3705_v11 = vsub.f32 %v16597_v39, %v13225_v34  ;;  %v13383_v25 = vpop.xlane.xlu1 %4487  ;;  %v16604_v34 = vld [vmem:[#allocation81_spill] sm:$0xff] }
 0x678   : > { %8262 = vxpose.xlu0.b32.start.end [1/1] (short) %v16593_v60, 128  ;;  %16594 = vst [vmem:[#allocation55_spill] sm:$0xff] %v13377_v0  ;;  %v4452_v42 = vpop.xlane.xlu0 %4451  ;;  %8991 = vpow2.f32 %v4131_v18 }
 0x679   : > { %4541 = vadd.xlane.f32.xlu1 %v4540_v51  ;;  %v4757_v51 = vmul.f32 %v8972_v62, %v16596_v43  ;;  %8993 = vpow2.f32 %v4133_v49  ;;  %v4546_v62 = vadd.f32 %v13377_v0, %v13370_v54  ;;  %v4137_v18 = vmul.f32 1.442695, %v3705_v11  ;;  %v16605_v54 = vld [vmem:[#allocation49_spill] sm:$0xff] }
 0x67a   : > { %5250 = vmatmul.mubr.f32.gmra.mrb[184].mxu0 %v4754_v1  ;;  %v8976_v7 = vpop.eup %8975  ;;  %8995 = vpow2.f32 %v4135_v44  ;;  %v3708_v0 = vsub.f32 %v16605_v54, %v13271_v20 }
 0x67b   : > { %5254 = vmatprep.mubr.f32.mxu0 %v4758_v8  ;;  %v4761_v1 = vmul.f32 %v8976_v7, %v16599_v21  ;;  %v13388_v60 = vpop.eup %8977  ;;  %v3707_v8 = vsub.f32 %v16604_v34, %v13271_v20  ;;  %8997 = vrcp.f32 %v4452_v42  ;;  %v4139_v21 = vmul.f32 1.442695, %v3706_v30  ;;  %v16609_v42 = vld [vmem:[#allocation31_spill] sm:$0xff]  ;;  %v16611_v20 = vld [vmem:[#allocation253_spill] sm:$0xff] }
 0x67c   : > { %16600 = vst [vmem:[#allocation59_spill] sm:$0xff] %v13388_v60  ;;  %v13392_v38 = vpop.eup %8979  ;;  %v4455_v39 = vpop.xlane.xlu0 %4454  ;;  %v3709_v54 = vsub.f32 %v16611_v20, %v13333_v47 }
 0x67d   : > { %4544 = vadd.xlane.f32.xlu1 %v4543_v23  ;;  %16601 = vst [vmem:[#allocation263_spill] sm:$0xff] %v13392_v38  ;;  %v16602_v23 = vld [vmem:[#allocation30_spill] sm:$0xff]  ;;  %v13395_v43 = vpop.eup %8981  ;;  %v3420_v31 = vpop.xlane.xlu1 %3419  ;;  %8999 = vrcp.f32 %v4455_v39  ;;  %v4549_v11 = vadd.f32 %v13392_v38, %v13388_v60  ;;  %v4141_v30 = vmul.f32 1.442695, %v3707_v8 }
 0x67e   : > { %5255 = vmatmul.mubr.f32.gmra.mrb[186].mxu0 %v4757_v51  ;;  %v4760_v12 = vmul.f32 %v8976_v7, %v16602_v23  ;;  %16603 = vst [vmem:[#allocation29_spill] sm:$0xff] %v13395_v43  ;;  %v8984_v49 = vpop.eup %8983  ;;  %v16606_v51 = vld [vmem:[#allocation103_spill] sm:$0xff]  ;;  %9001 = vpow2.f32 %v4137_v18 }
 0x67f   : > { %5259 = vmatprep.mubr.f32.mxu0 %v4761_v1  ;;  %v8986_v44 = vpop.eup %8985  ;;  %v4833_v7 = vmul.f32 %v8984_v49, %v16606_v51  ;;  %v16607_v23 = vld [vmem:[#allocation99_spill] sm:$0xff]  ;;  %v16610_v1 = vld [vmem:[#allocation180_spill] sm:$0xff]  ;;  %9003 = vpow2.f32 %v4139_v21  ;;  %v16617_v21 = vld [vmem:[#allocation53_spill] sm:$0xff] }
 0x680   : > { %v4832_v32 = vmul.f32 %v8984_v49, %v16607_v23  ;;  %v13405_v34 = vpop.eup %8987  ;;  %v4763_v55 = vmul.f32 %v8986_v44, %v16610_v1  ;;  %v4458_v39 = vpop.xlane.xlu0 %4457  ;;  %v4143_v49 = vmul.f32 1.442695, %v3708_v0  ;;  %v16612_v23 = vld [vmem:[#allocation83_spill] sm:$0xff]  ;;  %v4145_v0 = vmul.f32 1.442695, %v3709_v54 }
 0x681   : > { %4547 = vadd.xlane.f32.xlu1 %v4546_v62  ;;  %16608 = vst [vmem:[#allocation163_spill] sm:$0xff] %v13405_v34  ;;  %v4764_v62 = vmul.f32 %v8986_v44, %v16609_v42  ;;  %5444 = vmatprep.mubr.f32.mxu1 %v4833_v7  ;;  %v3710_v60 = vsub.f32 %v16612_v23, %v13333_v47  ;;  %v16614_v44 = vld [vmem:[#allocation40_spill] sm:$0xff]  ;;  %9005 = vrcp.f32 %v4458_v39 }
 0x682   : > { %5260 = vmatmul.mubr.f32.gmra.mrb[188].mxu0 %v4760_v12  ;;  %v13411_v51 = vpop.xlane.xlu1 %3515  ;;  %5445 = vmatmul.mubr.f32.gmra.mrb[188].mxu1 %v4832_v32  ;;  %v13415_v12 = vpop.eup %8989  ;;  %v3711_v18 = vsub.f32 %v16614_v44, %v3420_v31  ;;  %v4552_v8 = vadd.f32 %v13405_v34, %v13395_v43  ;;  %9007 = vpow2.f32 %v4141_v30  ;;  %v16619_v44 = vld [vmem:[#allocation107_spill] sm:$0xff]  ;;  %v16621_v43 = vld [vmem:[#allocation16_spill] sm:$0xff] }
 0x683   : > { %5264 = vmatprep.mubr.f32.mxu0 %v4764_v62  ;;  %16613 = vst [vmem:[#allocation162_spill] sm:$0xff] %v13415_v12  ;;  %v13420_v42 = vpop.eup %8991  ;;  %9009 = vpow2.f32 %v4143_v49  ;;  %v4147_v1 = vmul.f32 1.442695, %v3710_v60 }
 0x684   : > { %16615 = vst [vmem:[#allocation166_spill] sm:$0xff] %v13420_v42  ;;  %v13422_v7 = vpop.eup %8993  ;;  %v4461_v47 = vpop.xlane.xlu0 %4460  ;;  %v4149_v23 = vmul.f32 1.442695, %v3711_v18  ;;  %v4555_v39 = vadd.f32 %v13420_v42, %v13415_v12  ;;  %v16624_v18 = vld [vmem:[#allocation27_spill] sm:$0xff]  ;;  %v16640_v12 = vld [vmem:[#allocation58_spill] sm:$0xff] }
 0x685   : > { %4550 = vadd.xlane.f32.xlu1 %v4549_v11  ;;  %16616 = vst [vmem:[#allocation232_spill] sm:$0xff] %v13422_v7  ;;  %v3712_v11 = vsub.f32 %v16617_v21, %v3420_v31  ;;  %v13427_v62 = vpop.eup %8995  ;;  %9011 = vrcp.f32 %v4461_v47  ;;  %v16620_v31 = vld [vmem:[#allocation147_spill] sm:$0xff] }
 0x686   : > { %5265 = vmatmul.mubr.f32.gmra.mrb[190].mxu0 %v4763_v55  ;;  %v13425_v32 = vpop.xlane.xlu1 %3518  ;;  %16618 = vst [vmem:[#allocation165_spill] sm:$0xff] %v13427_v62  ;;  %v8998_v20 = vpop.eup %8997  ;;  %9013 = vpow2.f32 %v4145_v0  ;;  %v4558_v0 = vadd.f32 %v13427_v62, %v13422_v7 }
 0x687   : > { %v9000_v55 = vpop.eup %8999  ;;  %v4836_v30 = vmul.f32 %v8998_v20, %v16619_v44  ;;  %v4151_v54 = vmul.f32 1.442695, %v3712_v11  ;;  %9015 = vpow2.f32 %v4147_v1 }
 0x688   : > { %v4464_v21 = vpop.xlane.xlu0 %4463  ;;  %v4839_v34 = vmul.f32 %v9000_v55, %v16621_v43  ;;  %v13436_v49 = vpop.eup %9001  ;;  %9017 = vpow2.f32 %v4149_v23  ;;  %v4838_v47 = vmul.f32 %v9000_v55, %v16624_v18  ;;  %v16627_v23 = vld [vmem:[#allocation130_spill] sm:$0xff] }
 0x689   : > { %4553 = vadd.xlane.f32.xlu1 %v4552_v8  ;;  %v4835_v8 = vmul.f32 %v8998_v20, %v16620_v31  ;;  %5449 = vmatprep.mubr.f32.mxu1 %v4836_v30  ;;  %16623 = vst [vmem:[#allocation217_spill] sm:$0xff] %v13436_v49  ;;  %v13441_v11 = vpop.eup %9003  ;;  %9019 = vrcp.f32 %v4464_v21  ;;  %v16629_v31 = vld [vmem:[#allocation169_spill] sm:$0xff] }
 0x68a   : > { %v13434_v60 = vpop.xlane.xlu1 %3425  ;;  %16625 = vst [vmem:[#allocation141_spill] sm:$0xff] %v13441_v11  ;;  %9021 = vpow2.f32 %v4151_v54  ;;  %v4561_v55 = vadd.f32 %v13441_v11, %v13436_v49  ;;  %v16634_v49 = vld [vmem:[#allocation115_spill] sm:$0xff] }
 0x68b   : > { %16622 = vst [vmem:[#allocation212_spill] sm:$0xff] %v13434_v60  ;;  %5450 = vmatmul.mubr.f32.gmra.mrb[190].mxu1 %v4835_v8  ;;  %v9006_v1 = vpop.eup %9005 }
 0x68c   : > { %5454 = vmatprep.mubr.f32.mxu1 %v4839_v34  ;;  %v4467_v43 = vpop.xlane.xlu0 %4466  ;;  %v4842_v44 = vmul.f32 %v9006_v1, %v16627_v23  ;;  %v4841_v8 = vmul.f32 %v9006_v1, %v16629_v31 }
 0x68d   : > { %4556 = vadd.xlane.f32.xlu1 %v4555_v39  ;;  %9023 = vrcp.f32 %v4467_v43  ;;  %v13445_v39 = vpop.eup %9007 }
 0x68e   : > { %v13443_v20 = vpop.xlane.xlu1 %3521  ;;  %16626 = vst [vmem:[#allocation167_spill] sm:$0xff] %v13445_v39  ;;  %v13450_v30 = vpop.eup %9009 }
 0x68f   : > { %5455 = vmatmul.mubr.f32.gmra.mrb[192].mxu1 %v4838_v47  ;;  %16628 = vst [vmem:[#allocation18_spill] sm:$0xff] %v13450_v30  ;;  %v9012_v54 = vpop.eup %9011  ;;  %v4564_v1 = vadd.f32 %v13450_v30, %v13445_v39 }
 0x690   : > { %5459 = vmatprep.mubr.f32.mxu1 %v4842_v44  ;;  %v4470_v34 = vpop.xlane.xlu0 %4469  ;;  %v13455_v18 = vpop.eup %9013  ;;  %v4845_v11 = vmul.f32 %v9012_v54, %v16634_v49  ;;  %v16639_v49 = vld [vmem:[#allocation102_spill] sm:$0xff] }
 0x691   : > { %4559 = vadd.xlane.f32.xlu1 %v4558_v0  ;;  %9025 = vrcp.f32 %v4470_v34  ;;  %16631 = vst [vmem:[#allocation268_spill] sm:$0xff] %v13455_v18  ;;  %v13464_v44 = vpop.eup %9015 }
 0x692   : > { %v13453_v21 = vpop.xlane.xlu1 %3428  ;;  %16635 = vst [vmem:[#allocation267_spill] sm:$0xff] %v13464_v44  ;;  %v13467_v34 = vpop.eup %9017  ;;  %v4567_v39 = vadd.f32 %v13464_v44, %v13455_v18 }
 0x693   : > { %16630 = vst [vmem:[#allocation172_spill] sm:$0xff] %v13453_v21  ;;  %5460 = vmatmul.mubr.f32.gmra.mrb[194].mxu1 %v4841_v8  ;;  %16637 = vst [vmem:[#allocation143_spill] sm:$0xff] %v13467_v34  ;;  %v9020_v7 = vpop.eup %9019 }
 0x694   : > { %5464 = vmatprep.mubr.f32.mxu1 %v4845_v11  ;;  %v4473_v8 = vpop.xlane.xlu0 %4472  ;;  %v13471_v62 = vpop.eup %9021  ;;  %v4848_v23 = vmul.f32 %v9020_v7, %v16639_v49 }
 0x695   : > { %4562 = vadd.xlane.f32.xlu1 %v4561_v55  ;;  %v16636_v55 = vld [vmem:[#allocation188_spill] sm:$0xff]  ;;  %9027 = vrcp.f32 %v4473_v8  ;;  %16638 = vst [vmem:[#allocation271_spill] sm:$0xff] %v13471_v62 }
 0x696   : > { %v4844_v31 = vmul.f32 %v9012_v54, %v16636_v55  ;;  %v4847_v54 = vmul.f32 %v9020_v7, %v16640_v12  ;;  %v4570_v12 = vadd.f32 %v13471_v62, %v13467_v34 }
 0x697   : > { %v9024_v30 = vpop.eup %9023 }
 0x698   : > { %v13469_v0 = vpop.xlane.xlu1 %3524  ;;  %5465 = vmatmul.mubr.f32.gmra.mrb[196].mxu1 %v4844_v31  ;;  %v4476_v11 = vpop.xlane.xlu0 %4475  ;;  %v4850_v18 = vmul.f32 %v9024_v30, %v16645_v35  ;;  %v16649_v35 = vld [vmem:[#allocation22_spill] sm:$0xff] }
 0x699   : > { %4565 = vadd.xlane.f32.xlu1 %v4564_v1  ;;  %5469 = vmatprep.mubr.f32.mxu1 %v4848_v23  ;;  %v16641_v1 = vld [vmem:[#allocation196_spill] sm:$0xff]  ;;  %9029 = vrcp.f32 %v4476_v11  ;;  %v16646_v23 = vld [vmem:[#allocation90_spill] sm:$0xff] }
 0x69a   : > { %v4851_v55 = vmul.f32 %v9024_v30, %v16641_v1 }
 0x69b   : > { %v9026_v7 = vpop.eup %9025 }
 0x69c   : > { %5470 = vmatmul.mubr.f32.gmra.mrb[198].mxu1 %v4847_v54  ;;  %v4854_v11 = vmul.f32 %v9026_v7, %v16646_v23  ;;  %v16647_v54 = vld [vmem:[#allocation104_spill] sm:$0xff] }
 0x69d   : > { %4568 = vadd.xlane.f32.xlu1 %v4567_v39  ;;  %5474 = vmatprep.mubr.f32.mxu1 %v4851_v55  ;;  %v4383_v39 = vpop.xlane.xlu0 %4382  ;;  %v4853_v1 = vmul.f32 %v9026_v7, %v16647_v54 }
 0x69e   : > { %v13478_v8 = vpop.xlane.xlu1 %3431  ;;  %9031 = vrcp.f32 %v4383_v39 }
 0x69f   : > { %16642 = vst [vmem:[#allocation234_spill] sm:$0xff] %v13478_v8  ;;  %v9028_v44 = vpop.eup %9027 }
 0x6a0   : > { %5475 = vmatmul.mubr.f32.gmra.mrb[200].mxu1 %v4850_v18  ;;  %v4857_v38 = vmul.f32 %v9028_v44, %v16648_v58  ;;  %v4856_v30 = vmul.f32 %v9028_v44, %v16649_v35  ;;  %v16651_v18 = vld [vmem:[#allocation78_spill] sm:$0xff]  ;;  %v16652_v58 = vld [vmem:[#allocation119_spill] sm:$0xff]  ;;  %v16654_v35 = vld [vmem:[#allocation121_spill] sm:$0xff] }
 0x6a1   : > { %4571 = vadd.xlane.f32.xlu1 %v4570_v12  ;;  %5479 = vmatprep.mubr.f32.mxu1 %v4854_v11  ;;  %v4479_v31 = vpop.xlane.xlu0 %4478  ;;  %v16650_v12 = vld [vmem:[#allocation20_spill] sm:$0xff] }
 0x6a2   : > { %9033 = vrcp.f32 %v4479_v31  ;;  %v13492_v39 = vpop.f32.mrb[136].mxu0 }
 0x6a3   : > { %v9030_v34 = vpop.eup %9029  ;;  %v5133_v11 = vpop.f32.mrb[137].mxu0 }
 0x6a4   : > { %5480 = vmatmul.mubr.f32.gmra.mrb[202].mxu1 %v4853_v1  ;;  %v4860_v62 = vmul.f32 %v9030_v34, %v16650_v12  ;;  %v4859_v7 = vmul.f32 %v9030_v34, %v16651_v18  ;;  %v16653_v1 = vld [vmem:[#allocation21_spill] sm:$0xff] }
 0x6a5   : > { %5484 = vmatprep.mubr.f32.mxu1 %v4857_v38  ;;  %v4386_v55 = vpop.xlane.xlu0 %4385 }
 0x6a6   : > { %9035 = vrcp.f32 %v4386_v55  ;;  %v16655_v55 = vld [vmem:[#allocation82_spill] sm:$0xff] }
 0x6a8   : > { %5485 = vmatmul.mubr.f32.gmra.mrb[204].mxu1 %v4856_v30  ;;  %v9032_v23 = vpop.eup %9031 }
 0x6a9   : > { %5489 = vmatprep.mubr.f32.mxu1 %v4860_v62  ;;  %v4482_v54 = vpop.xlane.xlu0 %4481  ;;  %v4767_v31 = vmul.f32 %v9032_v23, %v16652_v58  ;;  %v4766_v49 = vmul.f32 %v9032_v23, %v16653_v1  ;;  %v13499_v34 = vpop.f32.mrb[152].mxu1  ;;  %v16656_v23 = vld [vmem:[#allocation118_spill] sm:$0xff] }
 0x6aa   : > { %9037 = vrcp.f32 %v4482_v54  ;;  %v5358_v11 = vpop.f32.mrb[153].mxu1  ;;  %v16657_v54 = vld [vmem:[#allocation120_spill] sm:$0xff] }
 0x6ab   : > { %5269 = vmatprep.mubr.f32.mxu0 %v4767_v31 }
 0x6ac   : > { %5490 = vmatmul.mubr.f32.gmra.mrb[206].mxu1 %v4859_v7  ;;  %v9034_v38 = vpop.eup %9033  ;;  %5270 = vmatmul.mubr.f32.gmra.mrb[192].mxu0 %v4766_v49 }
 0x6ad   : > { %v4389_v44 = vpop.xlane.xlu0 %4388  ;;  %v4863_v30 = vmul.f32 %v9034_v38, %v16654_v35  ;;  %v4862_v12 = vmul.f32 %v9034_v38, %v16655_v55  ;;  %v13506_v31 = vpop.f32.mrb[138].mxu0  ;;  %v16658_v35 = vld [vmem:[#allocation184_spill] sm:$0xff]  ;;  %v16659_v55 = vld [vmem:[#allocation122_spill] sm:$0xff] }
 0x6ae   : > { %9039 = vrcp.f32 %v4389_v44  ;;  %v5138_v1 = vpop.f32.mrb[139].mxu0 }
 0x6af   : > { %5494 = vmatprep.mubr.f32.mxu1 %v4863_v30  ;;  %9041 = vrcp.f32 %v13383_v25 }
 0x6b0   : > { %v9036_v62 = vpop.eup %9035  ;;  %5495 = vmatmul.mubr.f32.gmra.mrb[208].mxu1 %v4862_v12 }
 0x6b1   : > { %v4485_v7 = vpop.xlane.xlu0 %4484  ;;  %v4770_v49 = vmul.f32 %v9036_v62, %v16656_v23  ;;  %v4769_v58 = vmul.f32 %v9036_v62, %v16657_v54  ;;  %v16660_v23 = vld [vmem:[#allocation33_spill] sm:$0xff]  ;;  %v16661_v62 = vld [vmem:[#allocation204_spill] sm:$0xff]  ;;  %v13512_v54 = vpop.xlane.xlu1 %3527 }
 0x6b2   : > { %9043 = vrcp.f32 %v4485_v7 }
 0x6b3   : > { %5274 = vmatprep.mubr.f32.mxu0 %v4770_v49 }
 0x6b4   : > { %v9038_v38 = vpop.eup %9037  ;;  %5275 = vmatmul.mubr.f32.gmra.mrb[194].mxu0 %v4769_v58 }
 0x6b5   : > { %v4392_v44 = vpop.xlane.xlu0 %4391  ;;  %v4866_v30 = vmul.f32 %v9038_v38, %v16658_v35  ;;  %v4865_v11 = vmul.f32 %v9038_v38, %v16659_v55  ;;  %v16663_v55 = vld [vmem:[#allocation106_spill] sm:$0xff] }
 0x6b6   : > { %9045 = vrcp.f32 %v4392_v44  ;;  %v13514_v1 = vpop.f32.mrb[140].mxu0  ;;  %v16662_v44 = vld [vmem:[#allocation202_spill] sm:$0xff] }
 0x6b7   : > { %5499 = vmatprep.mubr.f32.mxu1 %v4866_v30  ;;  %v5143_v35 = vpop.f32.mrb[141].mxu0 }
 0x6b8   : > { %v9040_v25 = vpop.eup %9039  ;;  %5500 = vmatmul.mubr.f32.gmra.mrb[210].mxu1 %v4865_v11 }
 0x6b9   : > { %v4491_v12 = vpop.xlane.xlu0 %4490  ;;  %v4773_v18 = vmul.f32 %v9040_v25, %v16660_v23  ;;  %v4772_v7 = vmul.f32 %v9040_v25, %v16661_v62  ;;  %v9042_v49 = vpop.eup %9041  ;;  %v16664_v23 = vld [vmem:[#allocation32_spill] sm:$0xff] }
 0x6ba   : > { %9047 = vrcp.f32 %v4491_v12  ;;  %v4872_v62 = vmul.f32 %v9042_v49, %v16664_v23  ;;  %v16668_v23 = vld [vmem:[#allocation96_spill] sm:$0xff] }
 0x6bb   : > { %5279 = vmatprep.mubr.f32.mxu0 %v4773_v18  ;;  %v13518_v8 = vpop.f32.mrb[154].mxu1  ;;  %v13523_v18 = vpop.xlane.xlu1 %4502 }
 0x6bc   : > { %v9044_v58 = vpop.eup %9043  ;;  %5280 = vmatmul.mubr.f32.gmra.mrb[196].mxu0 %v4772_v7  ;;  %v5363_v12 = vpop.f32.mrb[155].mxu1  ;;  %v16665_v7 = vld [vmem:[#allocation216_spill] sm:$0xff] }
 0x6bd   : > { %v4869_v30 = vmul.f32 %v9044_v58, %v16662_v44  ;;  %v4868_v11 = vmul.f32 %v9044_v58, %v16663_v55  ;;  %v16666_v44 = vld [vmem:[#allocation123_spill] sm:$0xff] }
 0x6be   : > { %v4587_v38 = vpop.xlane.xlu0 %4586 }
 0x6bf   : > { %9049 = vrcp.f32 %v4587_v38  ;;  %5504 = vmatprep.mubr.f32.mxu1 %v4869_v30  ;;  %v13527_v58 = vpop.f32.mrb[156].mxu1  ;;  %v16667_v38 = vld [vmem:[#allocation117_spill] sm:$0xff] }
 0x6c0   : > { %v9046_v42 = vpop.eup %9045  ;;  %5505 = vmatmul.mubr.f32.gmra.mrb[212].mxu1 %v4868_v11  ;;  %v4871_v55 = vmul.f32 %v9042_v49, %v16667_v38  ;;  %v5368_v12 = vpop.f32.mrb[157].mxu1  ;;  %v16669_v38 = vld [vmem:[#allocation201_spill] sm:$0xff] }
 0x6c1   : > { %5509 = vmatprep.mubr.f32.mxu1 %v4872_v62  ;;  %v4776_v35 = vmul.f32 %v9046_v42, %v16665_v7  ;;  %v4775_v45 = vmul.f32 %v9046_v42, %v16666_v44  ;;  %v13536_v62 = vpop.xlane.xlu1 %4598 }
 0x6c2   : > { %v13538_v7 = vpop.f32.mrb[142].mxu0 }
 0x6c3   : > { %5284 = vmatprep.mubr.f32.mxu0 %v4776_v35  ;;  %v5148_v42 = vpop.f32.mrb[143].mxu0 }
 0x6c4   : > { %v13532_v25 = vpop.eup %9047  ;;  %5285 = vmatmul.mubr.f32.gmra.mrb[198].mxu0 %v4775_v45  ;;  %5510 = vmatmul.mubr.f32.gmra.mrb[214].mxu1 %v4871_v55  ;;  %v16670_v45 = vld [vmem:[#allocation208_spill] sm:$0xff] }
 0x6c5   : > { %v4875_v11 = vmul.f32 %v13532_v25, %v16668_v23  ;;  %v13544_v35 = vpop.xlane.xlu1 %4505  ;;  %v16671_v55 = vsub.f32 %v16669_v38, %v16670_v45  ;;  %v16672_v23 = vld [vmem:[#allocation203_spill] sm:$0xff] }
 0x6c6   : > { %v16673_v43 = vsub.f32 %v16672_v23, %v16670_v45  ;;  %v16679_v45 = vld [vmem:[#allocation209_spill] sm:$0xff] }
 0x6c7   : > { %5579 = vmatprep.mubr.f32.mxu0 %v4875_v11  ;;  %v4229_v12 = vmul.f32 1.442695, %v16671_v55 }
 0x6c8   : > { %v4231_v21 = vmul.f32 1.442695, %v16673_v43  ;;  %v16680_v43 = vsub.f32 %v16679_v45, %v16675_v22 }
 0x6c9   : > { %v13540_v44 = vpop.eup %9049  ;;  %v13556_v47 = vpop.xlane.xlu1 %4601  ;;  %9051 = vpow2.f32 %v4229_v12  ;;  %v16681_v12 = vld [vmem:[#allocation213_spill] sm:$0xff] }
 0x6ca   : > { %v4971_v49 = vmul.f32 %v13540_v44, %v12918_v50  ;;  %v13558_v50 = vpop.xlane.xlu0 %4493  ;;  %9053 = vpow2.f32 %v4231_v21  ;;  %v4235_v23 = vmul.f32 1.442695, %v16680_v43  ;;  %v16683_v19 = vsub.f32 %v16681_v12, %v16682_v26  ;;  %v16690_v12 = vld [vmem:[#allocation220_spill] sm:$0xff] }
 0x6cb   : > { %v16686_v21 = vsub.f32 %v16685_v15, %v16682_v26 }
 0x6cc   : > { %5804 = vmatprep.mubr.f32.mxu1 %v4971_v49  ;;  %v16674_v49 = vld [vmem:[#allocation207_spill] sm:$0xff] }
 0x6cd   : > { %v13549_v30 = vpop.f32.mrb[158].mxu1  ;;  %v16676_v16 = vsub.f32 %v16674_v49, %v16675_v22  ;;  %v4237_v49 = vmul.f32 1.442695, %v16683_v19  ;;  %v4239_v60 = vmul.f32 1.442695, %v16686_v21  ;;  %v13580_v57 = vpop.xlane.xlu1 %4508 }
 0x6ce   : > { %v5373_v42 = vpop.f32.mrb[159].mxu1  ;;  %v13582_v45 = vpop.xlane.xlu0 %4589 }
 0x6cf   : > { %v4233_v38 = vmul.f32 1.442695, %v16676_v16  ;;  %v13563_v55 = vpop.f32.mrb[144].mxu0 }
 0x6d0   : > { %16677 = vst [vmem:[#allocation113_spill] sm:$0xff] %v13563_v55  ;;  %v5153_v11 = vpop.f32.mrb[145].mxu0 }
 0x6d1   : > { %v13565_v13 = vpop.f32.mrb[160].mxu1  ;;  %9055 = vpow2.f32 %v4233_v38  ;;  %v16687_v11 = vld [vmem:[#allocation219_spill] sm:$0xff]  ;;  %v13596_v26 = vpop.xlane.xlu1 %4604 }
 0x6d2   : > { %16678 = vst [vmem:[#allocation111_spill] sm:$0xff] %v13565_v13  ;;  %v5378_v46 = vpop.f32.mrb[161].mxu1  ;;  %9057 = vpow2.f32 %v4235_v23  ;;  %v13611_v2 = vpop.xlane.xlu0 %4496 }
 0x6d3   : > { %v13575_v16 = vpop.f32.mrb[146].mxu0  ;;  %9059 = vpow2.f32 %v4237_v49  ;;  %v16688_v46 = vld [vmem:[#allocation190_spill] sm:$0xff]  ;;  %v13590_v23 = vpop.eup %9051 }
 0x6d4   : > { %16684 = vst [vmem:[#allocation168_spill] sm:$0xff] %v13575_v16  ;;  %v5158_v22 = vpop.f32.mrb[147].mxu0  ;;  %v16689_v38 = vsub.f32 %v16687_v11, %v16688_v46  ;;  %9061 = vpow2.f32 %v4239_v60  ;;  %v16691_v19 = vsub.f32 %v16690_v12, %v16688_v46  ;;  %16692 = vst [vmem:[#allocation19_spill] sm:$0xff] %v13590_v23  ;;  %v13594_v15 = vpop.eup %9053  ;;  %v16696_v11 = vld [vmem:[#allocation192_spill] sm:$0xff]  ;;  %v16699_v46 = vld [vmem:[#allocation259_spill] sm:$0xff] }
 0x6d5   : > { %16694 = vst [vmem:[#allocation179_spill] sm:$0xff] %v13594_v15  ;;  %v16695_v22 = vld [vmem:[#allocation225_spill] sm:$0xff]  ;;  %v16700_v12 = vmax.f32 %v16698_v3, %v16699_v46  ;;  %v16703_v55 = vsub.f32 %v16702_v5, %v16696_v11 }
 0x6d6   : > { %v4241_v43 = vmul.f32 1.442695, %v16689_v38  ;;  %v4243_v42 = vmul.f32 1.442695, %v16691_v19  ;;  %v16697_v60 = vsub.f32 %v16695_v22, %v16696_v11  ;;  %v13625_v11 = vpop.xlane.xlu1 %4511 }
 0x6d7   : > { %v4247_v13 = vmul.f32 1.442695, %v16703_v55 }
 0x6d8   : > { %9063 = vpow2.f32 %v4241_v43  ;;  %v4245_v38 = vmul.f32 1.442695, %v16697_v60  ;;  %v4630_v43 = vadd.f32 %v13594_v15, %v13590_v23  ;;  %v16706_v60 = vld [vmem:[#allocation144_spill] sm:$0xff] }
 0x6d9   : > { %9065 = vpow2.f32 %v4243_v42  ;;  %v16708_v42 = vld [vmem:[#allocation237_spill] sm:$0xff] }
 0x6da   : > { %9067 = vpow2.f32 %v4245_v38  ;;  %v16709_v5 = vsub.f32 %v16708_v42, %v16706_v60  ;;  %v13633_v38 = vpop.xlane.xlu0 %4592 }
 0x6db   : > { %9069 = vpow2.f32 %v4247_v13 }
 0x6dc   : > { %v13592_v28 = vpop.f32.mrb[162].mxu1  ;;  %v4251_v55 = vmul.f32 1.442695, %v16709_v5 }
 0x6dd   : > { %16693 = vst [vmem:[#allocation170_spill] sm:$0xff] %v13592_v28  ;;  %v5383_v21 = vpop.f32.mrb[163].mxu1  ;;  %v13606_v19 = vpop.f32.mrb[148].mxu0  ;;  %v16752_v28 = vld [vmem:[#allocation54_spill] sm:$0xff] }
 0x6de   : > { %16701 = vst [vmem:[#allocation241_spill] sm:$0xff] %v13606_v19  ;;  %v5163_v49 = vpop.f32.mrb[149].mxu0  ;;  %v13613_v21 = vpop.eup %9055 }
 0x6df   : > { %16704 = vst [vmem:[#allocation145_spill] sm:$0xff] %v13613_v21  ;;  %v13617_v22 = vpop.eup %9057 }
 0x6e0   : > { %16705 = vst [vmem:[#allocation173_spill] sm:$0xff] %v13617_v22  ;;  %v13627_v49 = vpop.eup %9059  ;;  %v4633_v23 = vadd.f32 %v13617_v22, %v13613_v21 }
 0x6e1   : > { %3422 = vmax.xlane.f32.xlu0 %v16700_v12  ;;  %v16707_v12 = vsub.f32 %v16427_v53, %v16706_v60  ;;  %16710 = vst [vmem:[#allocation67_spill] sm:$0xff] %v13627_v49  ;;  %v13631_v15 = vpop.eup %9061  ;;  %v16712_v53 = vsub.f32 %v16459_v17, %v13087_v37 }
 0x6e2   : > { %16711 = vst [vmem:[#allocation176_spill] sm:$0xff] %v13631_v15  ;;  %v4636_v5 = vadd.f32 %v13631_v15, %v13627_v49  ;;  %v13661_v49 = vpop.xlane.xlu0 %4499 }
 0x6e3   : > { %v4249_v46 = vmul.f32 1.442695, %v16707_v12  ;;  %v4253_v13 = vmul.f32 1.442695, %v16712_v53  ;;  %v13641_v12 = vpop.eup %9063  ;;  %v16719_v53 = vsub.f32 %v16488_v63, %v13149_v56 }
 0x6e4   : > { %16714 = vst [vmem:[#allocation174_spill] sm:$0xff] %v13641_v12  ;;  %v13647_v21 = vpop.eup %9065 }
 0x6e5   : > { %4631 = vadd.xlane.f32.xlu0 %v4630_v43  ;;  %9071 = vpow2.f32 %v4249_v46  ;;  %v16713_v43 = vsub.f32 %v16460_v29, %v13087_v37  ;;  %16716 = vst [vmem:[#allocation112_spill] sm:$0xff] %v13647_v21  ;;  %v13649_v46 = vpop.xlane.xlu1 %4607  ;;  %v16717_v37 = vsub.f32 %v16487_v41, %v13149_v56  ;;  %v13663_v22 = vpop.eup %9067  ;;  %v16722_v41 = vsub.f32 %v16513_v9, %v13203_v36 }
 0x6e6   : > { %9073 = vpow2.f32 %v4251_v55  ;;  %16720 = vst [vmem:[#allocation175_spill] sm:$0xff] %v13663_v22  ;;  %v16724_v56 = vsub.f32 %v16514_v10, %v13203_v36 }
 0x6e7   : > { %v4255_v60 = vmul.f32 1.442695, %v16713_v43  ;;  %9075 = vpow2.f32 %v4253_v13  ;;  %v4257_v29 = vmul.f32 1.442695, %v16717_v37  ;;  %v4259_v43 = vmul.f32 1.442695, %v16719_v53 }
 0x6e8   : > { %v4639_v13 = vadd.f32 %v13647_v21, %v13641_v12  ;;  %v4263_v63 = vmul.f32 1.442695, %v16724_v56 }
 0x6e9   : > { %4634 = vadd.xlane.f32.xlu0 %v4633_v23  ;;  %9077 = vpow2.f32 %v4255_v60  ;;  %v16723_v60 = vld [vmem:[#allocation44_spill] sm:$0xff]  ;;  %v13679_v17 = vpop.xlane.xlu1 %4514 }
 0x6ea   : > { %9079 = vpow2.f32 %v4257_v29  ;;  %v3769_v37 = vsub.f32 %v16723_v60, %v13255_v6 }
 0x6eb   : > { %v13656_v55 = vpop.f32.mrb[150].mxu0  ;;  %9081 = vpow2.f32 %v4259_v43  ;;  %v13689_v43 = vpop.xlane.xlu0 %4595 }
 0x6ec   : > { %v13643_v42 = vpop.f32.mrb[164].mxu1  ;;  %16718 = vst [vmem:[#allocation80_spill] sm:$0xff] %v13656_v55  ;;  %v5168_v15 = vpop.f32.mrb[151].mxu0  ;;  %v4265_v36 = vmul.f32 1.442695, %v3769_v37  ;;  %v16733_v37 = vld [vmem:[#allocation254_spill] sm:$0xff] }
 0x6ed   : > { %16715 = vst [vmem:[#allocation116_spill] sm:$0xff] %v13643_v42  ;;  %v5388_v23 = vpop.f32.mrb[165].mxu1  ;;  %4637 = vadd.xlane.f32.xlu0 %v4636_v5  ;;  %v4261_v5 = vmul.f32 1.442695, %v16722_v41  ;;  %v16725_v15 = vld [vmem:[#allocation46_spill] sm:$0xff]  ;;  %v16728_v41 = vld [vmem:[#allocation37_spill] sm:$0xff] }
 0x6ee   : > { %v13667_v23 = vpop.eup %9069  ;;  %v3770_v53 = vsub.f32 %v16725_v15, %v13255_v6  ;;  %v16729_v6 = vld [vmem:[#allocation252_spill] sm:$0xff] }
 0x6ef   : > { %16721 = vst [vmem:[#allocation34_spill] sm:$0xff] %v13667_v23  ;;  %v13681_v12 = vpop.eup %9071  ;;  %v4642_v9 = vadd.f32 %v13667_v23, %v13663_v22  ;;  %9083 = vpow2.f32 %v4261_v5  ;;  %v3772_v60 = vsub.f32 %v16729_v6, %v13309_v27 }
 0x6f0   : > { %16726 = vst [vmem:[#allocation240_spill] sm:$0xff] %v13681_v12  ;;  %v13685_v29 = vpop.eup %9073  ;;  %9085 = vpow2.f32 %v4263_v63  ;;  %v4267_v10 = vmul.f32 1.442695, %v3770_v53  ;;  %v3773_v63 = vsub.f32 %v16733_v37, %v13368_v48  ;;  %v13705_v53 = vpop.xlane.xlu1 %4610 }
 0x6f1   : > { %4640 = vadd.xlane.f32.xlu0 %v4639_v13  ;;  %16727 = vst [vmem:[#allocation260_spill] sm:$0xff] %v13685_v29  ;;  %v3771_v13 = vsub.f32 %v16728_v41, %v13309_v27  ;;  %v13695_v15 = vpop.eup %9075  ;;  %v4645_v41 = vadd.f32 %v13685_v29, %v13681_v12  ;;  %9087 = vpow2.f32 %v4265_v36  ;;  %v4271_v6 = vmul.f32 1.442695, %v3772_v60 }
 0x6f2   : > { %16731 = vst [vmem:[#allocation65_spill] sm:$0xff] %v13695_v15  ;;  %9089 = vpow2.f32 %v4267_v10  ;;  %v4273_v36 = vmul.f32 1.442695, %v3773_v63 }
 0x6f3   : > { %v13701_v21 = vpop.eup %9077  ;;  %v4269_v5 = vmul.f32 1.442695, %v3771_v13 }
 0x6f4   : > { %16732 = vst [vmem:[#allocation177_spill] sm:$0xff] %v13701_v21  ;;  %v13711_v12 = vpop.eup %9079  ;;  %v4648_v37 = vadd.f32 %v13701_v21, %v13695_v15 }
 0x6f5   : > { %4643 = vadd.xlane.f32.xlu0 %v4642_v9  ;;  %v13693_v56 = vpop.f32.mrb[166].mxu1  ;;  %16736 = vst [vmem:[#allocation183_spill] sm:$0xff] %v13711_v12  ;;  %v13715_v55 = vpop.eup %9081  ;;  %9091 = vpow2.f32 %v4269_v5 }
 0x6f6   : > { %16730 = vst [vmem:[#allocation84_spill] sm:$0xff] %v13693_v56  ;;  %v5393_v23 = vpop.f32.mrb[167].mxu1  ;;  %v13707_v9 = vpop.f32.mrb[152].mxu0  ;;  %16737 = vst [vmem:[#allocation257_spill] sm:$0xff] %v13715_v55  ;;  %9093 = vpow2.f32 %v4271_v6  ;;  %v4651_v5 = vadd.f32 %v13715_v55, %v13711_v12 }
 0x6f7   : > { %16734 = vst [vmem:[#allocation186_spill] sm:$0xff] %v13707_v9  ;;  %v16735_v23 = vld [vmem:[#allocation38_spill] sm:$0xff]  ;;  %v5173_v3 = vpop.f32.mrb[153].mxu0  ;;  %9095 = vpow2.f32 %v4273_v36 }
 0x6f8   : > { %v8263_v27 = vpop.trf.xlu0  ;;  %v3774_v22 = vsub.f32 %v16735_v23, %v13368_v48  ;;  %v16739_v48 = vld [vmem:[#allocation50_spill] sm:$0xff] }
 0x6f9   : > { %4646 = vadd.xlane.f32.xlu0 %v4645_v41  ;;  %v8267_v29 = vunpack.i.h.bf16 %v8263_v27  ;;  %v8264_v13 = vunpack.i.l.bf16 %v8263_v27  ;;  %v16738_v41 = vld [vmem:[#allocation48_spill] sm:$0xff]  ;;  %v3776_v23 = vsub.f32 %v16739_v48, %v13411_v51  ;;  %v13721_v27 = vpop.xlane.xlu1 %4517  ;;  %v13723_v42 = vpop.eup %9083  ;;  %v16744_v48 = vld [vmem:[#allocation258_spill] sm:$0xff] }
 0x6fa   : > { %v3775_v56 = vsub.f32 %v16738_v41, %v13411_v51  ;;  %v4275_v3 = vmul.f32 1.442695, %v3774_v22  ;;  %16740 = vst [vmem:[#allocation61_spill] sm:$0xff] %v13723_v42  ;;  %v13727_v21 = vpop.eup %9085  ;;  %v3778_v16 = vsub.f32 %v16744_v48, %v13425_v32 }
 0x6fb   : > { %16741 = vst [vmem:[#allocation269_spill] sm:$0xff] %v13727_v21  ;;  %v4279_v51 = vmul.f32 1.442695, %v3776_v23  ;;  %v16748_v23 = vld [vmem:[#allocation262_spill] sm:$0xff] }
 0x6fc   : > { %v8268_v10 = vpop.trf.xlu0  ;;  %v4277_v41 = vmul.f32 1.442695, %v3775_v56  ;;  %9097 = vpow2.f32 %v4275_v3  ;;  %v16745_v56 = vmov 0.0|0.0  }
 0x6fd   : > { %v8272_v60 = vunpack.i.h.bf16 %v8268_v10  ;;  %v8269_v19 = vunpack.i.l.bf16 %v8268_v10  ;;  %4649 = vadd.xlane.f32.xlu0 %v4648_v37  ;;  %v16742_v10 = vld [vmem:[#allocation42_spill] sm:$0xff] }
 0x6fe   : > { %v3777_v37 = vsub.f32 %v16742_v10, %v13425_v32  ;;  %9099 = vpow2.f32 %v4277_v41  ;;  %v13749_v10 = vpop.xlane.xlu1 %4613 }
 0x6ff   : > { %v7554_v63 = vpack.c.bf16 %v8269_v19, %v8264_v13  ;;  %v7602_v15 = vpack.c.bf16 %v8272_v60, %v8267_v29  ;;  %v13738_v13 = vpop.eup %9087  ;;  %9101 = vpow2.f32 %v4279_v51  ;;  %v16753_v51 = vld [vmem:[#allocation265_spill] sm:$0xff] }
 0x700   : > { %v8273_v6 = vpop.trf.xlu0  ;;  %16746 = vst [vmem:[#allocation69_spill] sm:$0xff] %v13738_v13  ;;  %v13745_v3 = vpop.eup %9089  ;;  %v4281_v32 = vmul.f32 1.442695, %v3777_v37 }
 0x701   : > { %4652 = vadd.xlane.f32.xlu0 %v4651_v5  ;;  %v13731_v22 = vpop.f32.mrb[168].mxu1  ;;  %7555 = vmatpush1.bf16.msra.mxu0 %v7554_v63  ;;  %v8277_v60 = vunpack.i.h.bf16 %v8273_v6  ;;  %v8274_v36 = vunpack.i.l.bf16 %v8273_v6  ;;  %v4654_v5 = vadd.f32 %v13727_v21, %v13723_v42  ;;  %16747 = vst [vmem:[#allocation189_spill] sm:$0xff] %v13745_v3  ;;  %v13751_v12 = vpop.eup %9091  ;;  %v4283_v42 = vmul.f32 1.442695, %v3778_v16  ;;  %v16750_v21 = vld [vmem:[#allocation264_spill] sm:$0xff] }
 0x702   : > { %16743 = vst [vmem:[#allocation56_spill] sm:$0xff] %v13731_v22  ;;  %v5398_v29 = vpop.f32.mrb[169].mxu1  ;;  %7603 = vmatpush1.bf16.msra.mxu1 %v7602_v15  ;;  %7556 = vmatprep.subr.bf16.mxu0 %v16745_v56  ;;  %v13742_v63 = vpop.f32.mrb[154].mxu0  ;;  %v3779_v15 = vsub.f32 %v16748_v23, %v13443_v20  ;;  %16749 = vst [vmem:[#allocation88_spill] sm:$0xff] %v13751_v12  ;;  %v3780_v55 = vsub.f32 %v16750_v21, %v13443_v20  ;;  %9103 = vpow2.f32 %v4281_v32 }
 0x703   : > { %7604 = vmatprep.subr.bf16.mxu1 %v16745_v56  ;;  %v5178_v6 = vpop.f32.mrb[155].mxu0  ;;  %v4657_v41 = vadd.f32 %v13745_v3, %v13738_v13  ;;  %v13757_v23 = vpop.eup %9093  ;;  %9105 = vpow2.f32 %v4283_v42  ;;  %v3782_v20 = vsub.f32 %v16753_v51, %v13469_v0 }
 0x704   : > { %v8278_v48 = vpop.trf.xlu0  ;;  %16751 = vst [vmem:[#allocation86_spill] sm:$0xff] %v13757_v23  ;;  %v4285_v22 = vmul.f32 1.442695, %v3779_v15  ;;  %v4287_v16 = vmul.f32 1.442695, %v3780_v55  ;;  %v13763_v21 = vpop.xlane.xlu1 %4520 }
 0x705   : > { %v8282_v29 = vunpack.i.h.bf16 %v8278_v48  ;;  %v8279_v19 = vunpack.i.l.bf16 %v8278_v48  ;;  %4655 = vadd.xlane.f32.xlu0 %v4654_v5  ;;  %v3781_v48 = vsub.f32 %v16752_v28, %v13469_v0  ;;  %v4660_v28 = vadd.f32 %v13757_v23, %v13751_v12  ;;  %v16756_v0 = vld [vmem:[#allocation76_spill] sm:$0xff] }
 0x706   : > { %9107 = vpow2.f32 %v4285_v22  ;;  %v3783_v55 = vsub.f32 %v16756_v0, %v13512_v54 }
 0x707   : > { %v7557_v37 = vpack.c.bf16 %v8279_v19, %v8274_v36  ;;  %v7605_v9 = vpack.c.bf16 %v8282_v29, %v8277_v60  ;;  %v13766_v19 = vpop.eup %9095  ;;  %v4289_v42 = vmul.f32 1.442695, %v3781_v48  ;;  %9109 = vpow2.f32 %v4287_v16 }
 0x708   : > { %v8283_v5 = vpop.trf.xlu0  ;;  %16754 = vst [vmem:[#allocation114_spill] sm:$0xff] %v13766_v19  ;;  %v13771_v32 = vpop.eup %9097 }
 0x709   : > { %4658 = vadd.xlane.f32.xlu0 %v4657_v41  ;;  %7558 = vmatpush1.bf16.msra.mxu0 %v7557_v37  ;;  %v8287_v60 = vunpack.i.h.bf16 %v8283_v5  ;;  %v8284_v36 = vunpack.i.l.bf16 %v8283_v5  ;;  %16755 = vst [vmem:[#allocation36_spill] sm:$0xff] %v13771_v32  ;;  %v13777_v41 = vpop.eup %9099  ;;  %v4291_v37 = vmul.f32 1.442695, %v3782_v20  ;;  %v16758_v5 = vld [vmem:[#allocation270_spill] sm:$0xff]  ;;  %v4663_v0 = vadd.f32 %v13771_v32, %v13766_v19  ;;  %v13787_v13 = vpop.xlane.xlu1 %4616 }
 0x70a   : > { %7606 = vmatpush1.bf16.msra.mxu1 %v7605_v9  ;;  %7559 = vmatprep.subr.bf16.mxu0 %v16745_v56  ;;  %16757 = vst [vmem:[#allocation244_spill] sm:$0xff] %v13777_v41  ;;  %v3784_v51 = vsub.f32 %v16758_v5, %v13512_v54  ;;  %9111 = vpow2.f32 %v4289_v42 }
 0x70b   : > { %7607 = vmatprep.subr.bf16.mxu1 %v16745_v56  ;;  %9113 = vpow2.f32 %v4291_v37 }
 0x70c   : > { %v8288_v15 = vpop.trf.xlu0  ;;  %v13775_v6 = vpop.f32.mrb[170].mxu1  ;;  %v4295_v20 = vmul.f32 1.442695, %v3784_v51 }
 0x70d   : > { %v8292_v9 = vunpack.i.h.bf16 %v8288_v15  ;;  %v8289_v29 = vunpack.i.l.bf16 %v8288_v15  ;;  %4661 = vadd.xlane.f32.xlu0 %v4660_v28  ;;  %v5403_v48 = vpop.f32.mrb[171].mxu1  ;;  %v13785_v15 = vpop.eup %9101  ;;  %v4293_v28 = vmul.f32 1.442695, %v3783_v55 }
 0x70e   : > { %16759 = vst [vmem:[#allocation62_spill] sm:$0xff] %v13785_v15  ;;  %v13796_v55 = vpop.eup %9103 }
 0x70f   : > { %v7560_v12 = vpack.c.bf16 %v8289_v29, %v8284_v36  ;;  %v7608_v23 = vpack.c.bf16 %v8292_v9, %v8287_v60  ;;  %v13789_v16 = vpop.f32.mrb[156].mxu0  ;;  %16762 = vst [vmem:[#allocation187_spill] sm:$0xff] %v13796_v55  ;;  %v4666_v29 = vadd.f32 %v13785_v15, %v13777_v41  ;;  %9115 = vpow2.f32 %v4293_v28 }
 0x710   : > { %v8293_v3 = vpop.trf.xlu0  ;;  %16760 = vst [vmem:[#allocation60_spill] sm:$0xff] %v13789_v16  ;;  %v13791_v54 = vpop.f32.mrb[172].mxu1  ;;  %9117 = vpow2.f32 %v4295_v20 }
 0x711   : > { %4664 = vadd.xlane.f32.xlu0 %v4663_v0  ;;  %16761 = vst [vmem:[#allocation226_spill] sm:$0xff] %v13791_v54  ;;  %7561 = vmatpush1.bf16.msra.mxu0 %v7560_v12  ;;  %v5183_v36 = vpop.f32.mrb[157].mxu0  ;;  %v5408_v60 = vpop.f32.mrb[173].mxu1  ;;  %v8297_v9 = vunpack.i.h.bf16 %v8293_v3  ;;  %v8294_v42 = vunpack.i.l.bf16 %v8293_v3  ;;  %9119 = vrcp.f32 %v13558_v50 }
 0x712   : > { %7609 = vmatpush1.bf16.msra.mxu1 %v7608_v23  ;;  %7562 = vmatprep.subr.bf16.mxu0 %v16745_v56  ;;  %v13801_v12 = vpop.eup %9105  ;;  %v13807_v36 = vpop.xlane.xlu1 %4523  ;;  %9121 = vrcp.f32 %v13582_v45 }
 0x713   : > { %7610 = vmatprep.subr.bf16.mxu1 %v16745_v56  ;;  %16763 = vst [vmem:[#allocation92_spill] sm:$0xff] %v13801_v12  ;;  %v13805_v23 = vpop.eup %9107  ;;  %v4669_v60 = vadd.f32 %v13801_v12, %v13796_v55  ;;  %9123 = vrcp.f32 %v13611_v2 }
 0x714   : > { %v8298_v37 = vpop.trf.xlu0  ;;  %v13803_v0 = vpop.f32.mrb[174].mxu1  ;;  %16765 = vst [vmem:[#allocation100_spill] sm:$0xff] %v13805_v23  ;;  %9125 = vrcp.f32 %v13633_v38 }
 0x715   : > { %v8302_v51 = vunpack.i.h.bf16 %v8298_v37  ;;  %v8299_v48 = vunpack.i.l.bf16 %v8298_v37  ;;  %4667 = vadd.xlane.f32.xlu0 %v4666_v29  ;;  %16764 = vst [vmem:[#allocation193_spill] sm:$0xff] %v13803_v0  ;;  %v5413_v3 = vpop.f32.mrb[175].mxu1  ;;  %v13811_v41 = vpop.eup %9109  ;;  %9127 = vrcp.f32 %v13661_v49  ;;  %v16775_v49 = vld [vmem:[#allocation108_spill] sm:$0xff] }
 0x716   : > { %16766 = vst [vmem:[#allocation98_spill] sm:$0xff] %v13811_v41  ;;  %v13820_v3 = vpop.eup %9111  ;;  %9129 = vrcp.f32 %v13689_v43 }
 0x717   : > { %v7563_v5 = vpack.c.bf16 %v8299_v48, %v8294_v42  ;;  %v7611_v22 = vpack.c.bf16 %v8302_v51, %v8297_v9  ;;  %16768 = vst [vmem:[#allocation66_spill] sm:$0xff] %v13820_v3  ;;  %v4672_v51 = vadd.f32 %v13811_v41, %v13805_v23  ;;  %v13825_v48 = vpop.eup %9113  ;;  %9131 = vrcp.f32 %v13523_v18 }
 0x718   : > { %v8303_v28 = vpop.trf.xlu0  ;;  %16769 = vst [vmem:[#allocation64_spill] sm:$0xff] %v13825_v48  ;;  %v4675_v12 = vadd.f32 %v13825_v48, %v13820_v3  ;;  %9133 = vrcp.f32 %v13536_v62 }
 0x719   : > { %4670 = vadd.xlane.f32.xlu0 %v4669_v60  ;;  %v13813_v15 = vpop.f32.mrb[158].mxu0  ;;  %v13815_v29 = vpop.f32.mrb[176].mxu1  ;;  %7564 = vmatpush1.bf16.msra.mxu0 %v7563_v5  ;;  %v8307_v9 = vunpack.i.h.bf16 %v8303_v28  ;;  %v8304_v42 = vunpack.i.l.bf16 %v8303_v28  ;;  %9135 = vrcp.f32 %v13544_v35 }
 0x71a   : > { %16767 = vst [vmem:[#allocation235_spill] sm:$0xff] %v13813_v15  ;;  %v5188_v37 = vpop.f32.mrb[159].mxu0  ;;  %v5418_v19 = vpop.f32.mrb[177].mxu1  ;;  %7612 = vmatpush1.bf16.msra.mxu1 %v7611_v22  ;;  %7565 = vmatprep.subr.bf16.mxu0 %v16745_v56  ;;  %9137 = vrcp.f32 %v13556_v47 }
 0x71b   : > { %7613 = vmatprep.subr.bf16.mxu1 %v16745_v56  ;;  %v13827_v5 = vpop.xlane.xlu1 %4619  ;;  %v13833_v55 = vpop.eup %9115  ;;  %9139 = vrcp.f32 %v13580_v57 }
 0x71c   : > { %v8308_v60 = vpop.trf.xlu0  ;;  %16770 = vst [vmem:[#allocation73_spill] sm:$0xff] %v13833_v55  ;;  %v13839_v0 = vpop.eup %9117  ;;  %9141 = vrcp.f32 %v13596_v26 }
 0x71d   : > { %v8312_v20 = vunpack.i.h.bf16 %v8308_v60  ;;  %v8309_v37 = vunpack.i.l.bf16 %v8308_v60  ;;  %4673 = vadd.xlane.f32.xlu0 %v4672_v51  ;;  %v13829_v19 = vpop.f32.mrb[160].mxu0  ;;  %v13831_v22 = vpop.f32.mrb[178].mxu1  ;;  %16771 = vst [vmem:[#allocation248_spill] sm:$0xff] %v13839_v0  ;;  %9143 = vrcp.f32 %v13625_v11 }
 0x71e   : > { %v5193_v23 = vpop.f32.mrb[161].mxu0  ;;  %v5423_v41 = vpop.f32.mrb[179].mxu1  ;;  %9145 = vrcp.f32 %v13649_v46 }
 0x71f   : > { %v7566_v32 = vpack.c.bf16 %v8309_v37, %v8304_v42  ;;  %v7614_v15 = vpack.c.bf16 %v8312_v20, %v8307_v9  ;;  %v4678_v42 = vadd.f32 %v13839_v0, %v13833_v55  ;;  %v13849_v20 = vpop.xlane.xlu1 %4526  ;;  %v9120_v38 = vpop.eup %9119  ;;  %9147 = vrcp.f32 %v13679_v17 }
 0x720   : > { %v8313_v60 = vpop.trf.xlu0  ;;  %9149 = vrcp.f32 %v13705_v53 }
 0x721   : > { %4676 = vadd.xlane.f32.xlu0 %v4675_v12  ;;  %v13841_v51 = vpop.f32.mrb[162].mxu0  ;;  %7567 = vmatpush1.bf16.msra.mxu0 %v7566_v32  ;;  %v8317_v41 = vunpack.i.h.bf16 %v8313_v60  ;;  %v8314_v23 = vunpack.i.l.bf16 %v8313_v60  ;;  %9151 = vrcp.f32 %v13721_v27 }
 0x722   : > { %16772 = vst [vmem:[#allocation24_spill] sm:$0xff] %v13841_v51  ;;  %v5198_v54 = vpop.f32.mrb[163].mxu0  ;;  %7615 = vmatpush1.bf16.msra.mxu1 %v7614_v15  ;;  %7568 = vmatprep.subr.bf16.mxu0 %v16745_v56 }
 0x723   : > { %7616 = vmatprep.subr.bf16.mxu1 %v16745_v56  ;;  %v13862_v51 = vpop.xlane.xlu1 %4622 }
 0x724   : > { %v8318_v12 = vpop.trf.xlu0  ;;  %v13853_v16 = vpop.f32.mrb[180].mxu1 }
 0x725   : > { %v8322_v9 = vunpack.i.h.bf16 %v8318_v12  ;;  %v8319_v37 = vunpack.i.l.bf16 %v8318_v12  ;;  %4679 = vadd.xlane.f32.xlu0 %v4678_v42  ;;  %v13851_v32 = vpop.f32.mrb[164].mxu0  ;;  %v5428_v60 = vpop.f32.mrb[181].mxu1 }
 0x726   : > { %v5203_v54 = vpop.f32.mrb[165].mxu0 }
 0x727   : > { %v7569_v28 = vpack.c.bf16 %v8319_v37, %v8314_v23  ;;  %v7617_v3 = vpack.c.bf16 %v8322_v9, %v8317_v41 }
 0x728   : > { %v8323_v55 = vpop.trf.xlu0 }
 0x729   : > { %v13857_v0 = vpop.f32.mrb[166].mxu0  ;;  %7570 = vmatpush1.bf16.msra.mxu0 %v7569_v28  ;;  %7618 = vmatpush1.bf16.msra.mxu1 %v7617_v3  ;;  %v8327_v42 = vunpack.i.h.bf16 %v8323_v55  ;;  %v8324_v12 = vunpack.i.l.bf16 %v8323_v55 }
 0x72a   : > { %16773 = vst [vmem:[#allocation23_spill] sm:$0xff] %v13857_v0  ;;  %v5208_v48 = vpop.f32.mrb[167].mxu0  ;;  %7571 = vmatprep.subr.bf16.mxu0 %v16745_v56  ;;  %7619 = vmatprep.subr.bf16.mxu1 %v16745_v56 }
 0x72c   : > { %v8328_v54 = vpop.trf.xlu0 }
 0x72d   : > { %v8332_v60 = vunpack.i.h.bf16 %v8328_v54  ;;  %v8329_v23 = vunpack.i.l.bf16 %v8328_v54  ;;  %v13864_v41 = vpop.f32.mrb[168].mxu0  ;;  %v13873_v54 = vpop.xlane.xlu1 %4529 }
 0x72e   : > { %v5213_v28 = vpop.f32.mrb[169].mxu0 }
 0x72f   : > { %v7572_v3 = vpack.c.bf16 %v8329_v23, %v8324_v12  ;;  %v7620_v48 = vpack.c.bf16 %v8332_v60, %v8327_v42 }
 0x730   : > { %v8333_v9 = vpop.trf.xlu0  ;;  %v13867_v37 = vpop.f32.mrb[182].mxu1 }
 0x731   : > { %16774 = vst [vmem:[#allocation68_spill] sm:$0xff] %v13867_v37  ;;  %v13870_v55 = vpop.f32.mrb[170].mxu0  ;;  %v5433_v50 = vpop.f32.mrb[183].mxu1  ;;  %7573 = vmatpush1.bf16.msra.mxu0 %v7572_v3  ;;  %7621 = vmatpush1.bf16.msra.mxu1 %v7620_v48  ;;  %v8337_v42 = vunpack.i.h.bf16 %v8333_v9  ;;  %v8334_v12 = vunpack.i.l.bf16 %v8333_v9  ;;  %v4874_v9 = vmul.f32 %v13532_v25, %v16775_v49 }
 0x732   : > { %v5218_v28 = vpop.f32.mrb[171].mxu0  ;;  %7574 = vmatprep.subr.bf16.mxu0 %v16745_v56  ;;  %7622 = vmatprep.subr.bf16.mxu1 %v16745_v56  ;;  %v13883_v15 = vpop.xlane.xlu1 %4625 }
 0x733   : > { %v9122_v28 = vpop.eup %9121  ;;  %9153 = vrcp.f32 %v13749_v10  ;;  %v16792_v10 = vpack.i.bf16 %v13499_v34, %v13492_v39  ;;  %v16797_v34 = vpack.i.bf16 %v13518_v8, %v13506_v31  ;;  %v16802_v31 = vpack.i.bf16 %v13527_v58, %v13514_v1  ;;  %v16808_v58 = vld [vmem:[#allocation243_spill] sm:$0xff] }
 0x734   : > { %v8338_v2 = vpop.trf.xlu0  ;;  %v16807_v1 = vpack.i.bf16 %v13549_v30, %v13538_v7 }
 0x735   : > { %v8342_v60 = vunpack.i.h.bf16 %v8338_v2  ;;  %v8339_v23 = vunpack.i.l.bf16 %v8338_v2  ;;  %v13880_v3 = vpop.f32.mrb[172].mxu0  ;;  %v16776_v2 = vld [vmem:[#allocation71_spill] sm:$0xff] }
 0x736   : > { %v5223_v48 = vpop.f32.mrb[173].mxu0  ;;  %v4970_v43 = vmul.f32 %v13540_v44, %v16776_v2 }
 0x737   : > { %v7575_v50 = vpack.c.bf16 %v8339_v23, %v8334_v12  ;;  %v7623_v45 = vpack.c.bf16 %v8342_v60, %v8337_v42  ;;  %v9124_v12 = vpop.eup %9123  ;;  %v16777_v42 = vld [vmem:[#allocation227_spill] sm:$0xff]  ;;  %v16778_v23 = vld [vmem:[#allocation214_spill] sm:$0xff]  ;;  %9155 = vrcp.f32 %v13763_v21 }
 0x738   : > { %v4878_v60 = vmul.f32 %v9120_v38, %v16777_v42  ;;  %v4974_v0 = vmul.f32 %v9122_v28, %v16778_v23  ;;  %v9126_v37 = vpop.eup %9125  ;;  %v4881_v35 = vmul.f32 %v9124_v12, %v13070_v59  ;;  %9157 = vrcp.f32 %v13787_v13 }
 0x739   : > { %7576 = vmatpush1.bf16.msra.mxu0 %v7575_v50  ;;  %7624 = vmatpush1.bf16.msra.mxu1 %v7623_v45  ;;  %v13886_v56 = vpop.f32.mrb[174].mxu0  ;;  %v9128_v45 = vpop.eup %9127  ;;  %9159 = vrcp.f32 %v13807_v36  ;;  %v16800_v36 = vld [vmem:[#allocation146_spill] sm:$0xff] }
 0x73a   : > { %v5228_v48 = vpop.f32.mrb[175].mxu0  ;;  %v13895_v18 = vpop.f32.mrb[184].mxu1  ;;  %v4884_v59 = vmul.f32 %v9128_v45, %v13124_v52 }
 0x73b   : > { %v8380_v25 = vpack.i.bf16 %v13895_v18, %v13864_v41  ;;  %v5438_v44 = vpop.f32.mrb[185].mxu1  ;;  %v13903_v50 = vpop.xlane.xlu1 %4532 }
 0x73c   : > { %5580 = vmatmul.mubr.f32.vlgmr.msra.gmra.mrb[200].mxu0 %v4874_v9  ;;  %5805 = vmatmul.mubr.f32.vlgmr.msra.gmra.mrb[216].mxu1 %v4970_v43  ;;  %v16779_v9 = vld [vmem:[#allocation224_spill] sm:$0xff]  ;;  %v16780_v43 = vld [vmem:[#allocation125_spill] sm:$0xff]  ;;  %v9130_v42 = vpop.eup %9129  ;;  %9161 = vrcp.f32 %v13827_v5 }
 0x73d   : > { %5584 = vmatprep.mubr.f32.mxu0 %v4878_v60  ;;  %5809 = vmatprep.mubr.f32.mxu1 %v4974_v0  ;;  %v13898_v62 = vpop.f32.mrb[176].mxu0  ;;  %v4877_v2 = vmul.f32 %v9120_v38, %v16779_v9  ;;  %v4973_v48 = vmul.f32 %v9122_v28, %v16780_v43  ;;  %v4977_v0 = vmul.f32 %v9126_v37, %v12817_v14  ;;  %v9132_v23 = vpop.eup %9131  ;;  %v16783_v9 = vld [vmem:[#allocation127_spill] sm:$0xff]  ;;  %9163 = vrcp.f32 %v13849_v20 }
 0x73e   : > { %v5233_v49 = vpop.f32.mrb[177].mxu0  ;;  %v4880_v38 = vmul.f32 %v9124_v12, %v12996_v61  ;;  %v4976_v28 = vmul.f32 %v9126_v37, %v12806_v4  ;;  %v4980_v14 = vmul.f32 %v9130_v42, %v12881_v24  ;;  %v9134_v44 = vpop.eup %9133  ;;  %v16781_v4 = vld [vmem:[#allocation39_spill] sm:$0xff]  ;;  %v4979_v52 = vmul.f32 %v9130_v42, %v12841_v40  ;;  %v16782_v24 = vld [vmem:[#allocation181_spill] sm:$0xff] }
 0x73f   : > { %v13917_v49 = vpop.xlane.xlu1 %4628  ;;  %v4883_v26 = vmul.f32 %v9128_v45, %v16781_v4  ;;  %v9136_v37 = vpop.eup %9135  ;;  %v4887_v12 = vmul.f32 %v9132_v23, %v16782_v24  ;;  %9165 = vrcp.f32 %v13862_v51 }
 0x740   : > { %5585 = vmatmul.mubr.f32.gmra.mrb[202].mxu0 %v4877_v2  ;;  %5810 = vmatmul.mubr.f32.gmra.mrb[218].mxu1 %v4973_v48  ;;  %v4983_v2 = vmul.f32 %v9134_v44, %v16783_v9  ;;  %v9138_v43 = vpop.eup %9137  ;;  %v16790_v9 = vld [vmem:[#allocation233_spill] sm:$0xff]  ;;  %9167 = vrcp.f32 %v13873_v54 }
 0x741   : > { %5589 = vmatprep.mubr.f32.mxu0 %v4881_v35  ;;  %5814 = vmatprep.mubr.f32.mxu1 %v4977_v0  ;;  %v13910_v60 = vpop.f32.mrb[178].mxu0  ;;  %v16784_v0 = vld [vmem:[#allocation178_spill] sm:$0xff]  ;;  %9169 = vrcp.f32 %v13883_v15  ;;  %v16812_v54 = vld [vmem:[#allocation113_spill] sm:$0xff] }
 0x742   : > { %v5238_v47 = vpop.f32.mrb[179].mxu0  ;;  %v4886_v42 = vmul.f32 %v9132_v23, %v16784_v0  ;;  %v16788_v23 = vld [vmem:[#allocation185_spill] sm:$0xff] }
 0x743   : > { %v13935_v48 = vpop.xlane.xlu1 %4535  ;;  %v16785_v47 = vld [vmem:[#allocation110_spill] sm:$0xff] }
 0x744   : > { %5590 = vmatmul.mubr.f32.gmra.mrb[204].mxu0 %v4880_v38  ;;  %5815 = vmatmul.mubr.f32.gmra.mrb[220].mxu1 %v4976_v28  ;;  %v4982_v38 = vmul.f32 %v9134_v44, %v16785_v47  ;;  %v9140_v28 = vpop.eup %9139  ;;  %v16789_v44 = vld [vmem:[#allocation222_spill] sm:$0xff]  ;;  %9171 = vrcp.f32 %v13903_v50  ;;  %v16816_v50 = vld [vmem:[#allocation131_spill] sm:$0xff] }
 0x745   : > { %5594 = vmatprep.mubr.f32.mxu0 %v4884_v59  ;;  %5819 = vmatprep.mubr.f32.mxu1 %v4980_v14  ;;  %v13920_v57 = vpop.f32.mrb[180].mxu0  ;;  %v16786_v59 = vld [vmem:[#allocation138_spill] sm:$0xff]  ;;  %v16787_v14 = vld [vmem:[#allocation191_spill] sm:$0xff]  ;;  %v9142_v4 = vpop.eup %9141  ;;  %v4985_v24 = vmul.f32 %v9138_v43, %v16789_v44  ;;  %v16799_v44 = vld [vmem:[#allocation77_spill] sm:$0xff]  ;;  %9173 = vrcp.f32 %v13917_v49 }
 0x746   : > { %v5243_v61 = vpop.f32.mrb[181].mxu0  ;;  %v13927_v11 = vpop.f32.mrb[186].mxu1  ;;  %v4890_v17 = vmul.f32 %v9136_v37, %v16786_v59  ;;  %v16910_v49 = vld [vmem:[#allocation167_spill] sm:$0xff] }
 0x747   : > { %v8382_v45 = vpack.i.bf16 %v13927_v11, %v13870_v55  ;;  %v5443_v40 = vpop.f32.mrb[187].mxu1  ;;  %v4986_v61 = vmul.f32 %v9138_v43, %v16787_v14  ;;  %v16793_v43 = vld [vmem:[#allocation229_spill] sm:$0xff]  ;;  %v16795_v14 = vld [vmem:[#allocation199_spill] sm:$0xff] }
 0x748   : > { %5595 = vmatmul.mubr.f32.gmra.mrb[206].mxu0 %v4883_v26  ;;  %5820 = vmatmul.mubr.f32.gmra.mrb[222].mxu1 %v4979_v52  ;;  %v4889_v52 = vmul.f32 %v9136_v37, %v16788_v23  ;;  %v16791_v40 = vld [vmem:[#allocation238_spill] sm:$0xff]  ;;  %v4892_v47 = vmul.f32 %v9140_v28, %v16793_v43 }
 0x749   : > { %5599 = vmatprep.mubr.f32.mxu0 %v4887_v12  ;;  %5824 = vmatprep.mubr.f32.mxu1 %v4983_v2  ;;  %v13930_v46 = vpop.f32.mrb[182].mxu0  ;;  %v9144_v12 = vpop.eup %9143  ;;  %v4893_v2 = vmul.f32 %v9140_v28, %v16790_v9  ;;  %9175 = vrcp.f32 %v13935_v48 }
 0x74a   : > { %v5248_v35 = vpop.f32.mrb[183].mxu0  ;;  %v9146_v0 = vpop.eup %9145 }
 0x74b   : > { %v4989_v35 = vmul.f32 %v9142_v4, %v16791_v40 }
 0x74c   : > { %5600 = vmatmul.mubr.f32.gmra.mrb[208].mxu0 %v4886_v42  ;;  %5825 = vmatmul.mubr.f32.gmra.mrb[224].mxu1 %v4982_v38  ;;  %v13949_v42 = vpop.xlane.xlu1 %4538  ;;  %v16794_v38 = vld [vmem:[#allocation195_spill] sm:$0xff] }
 0x74d   : > { %5604 = vmatprep.mubr.f32.mxu0 %v4890_v17  ;;  %5829 = vmatprep.mubr.f32.mxu1 %v4986_v61  ;;  %v13942_v53 = vpop.f32.mrb[184].mxu0  ;;  %v4988_v59 = vmul.f32 %v9142_v4, %v16794_v38  ;;  %v9148_v17 = vpop.eup %9147  ;;  %v4896_v61 = vmul.f32 %v9144_v12, %v16795_v14  ;;  %v16798_v4 = vld [vmem:[#allocation194_spill] sm:$0xff]  ;;  %9177 = vrcp.f32 %v13949_v42 }
 0x74e   : > { %v5253_v26 = vpop.f32.mrb[185].mxu0  ;;  %v9150_v23 = vpop.eup %9149  ;;  %v4899_v40 = vmul.f32 %v9148_v17, %v16800_v36  ;;  %v16804_v38 = vld [vmem:[#allocation142_spill] sm:$0xff] }
 0x74f   : > { %v16796_v26 = vld [vmem:[#allocation236_spill] sm:$0xff]  ;;  %v9152_v9 = vpop.eup %9151 }
 0x750   : > { %5605 = vmatmul.mubr.f32.gmra.mrb[210].mxu0 %v4889_v52  ;;  %5830 = vmatmul.mubr.f32.gmra.mrb[226].mxu1 %v4985_v24  ;;  %v4992_v21 = vmul.f32 %v9146_v0, %v16796_v26  ;;  %v13966_v39 = vpop.xlane.xlu1 %4541  ;;  %v4895_v52 = vmul.f32 %v9144_v12, %v16798_v4  ;;  %v4991_v24 = vmul.f32 %v9146_v0, %v16799_v44  ;;  %v16803_v0 = vld [vmem:[#allocation149_spill] sm:$0xff]  ;;  %v16810_v44 = vld [vmem:[#allocation200_spill] sm:$0xff] }
 0x751   : > { %5609 = vmatprep.mubr.f32.mxu0 %v4893_v2  ;;  %5834 = vmatprep.mubr.f32.mxu1 %v4989_v35  ;;  %v13952_v27 = vpop.f32.mrb[186].mxu0  ;;  %v16801_v35 = vld [vmem:[#allocation245_spill] sm:$0xff]  ;;  %v4901_v51 = vmul.f32 %v9152_v9, %v16808_v58  ;;  %9179 = vrcp.f32 %v13966_v39 }
 0x752   : > { %8344 = vxpose.xlu0.b32.start [1/16] (narrow) %v16792_v10, 8  ;;  %v5258_v37 = vpop.f32.mrb[187].mxu0  ;;  %v4995_v10 = vmul.f32 %v9150_v23, %v16801_v35  ;;  %v16814_v35 = vld [vmem:[#allocation154_spill] sm:$0xff] }
 0x753   : > { %v9154_v37 = vpop.eup %9153 }
 0x754   : > { %5610 = vmatmul.mubr.f32.gmra.mrb[212].mxu0 %v4892_v47  ;;  %5835 = vmatmul.mubr.f32.gmra.mrb[228].mxu1 %v4988_v59  ;;  %v4898_v47 = vmul.f32 %v9148_v17, %v16803_v0  ;;  %v4994_v59 = vmul.f32 %v9150_v23, %v16804_v38  ;;  %v9156_v14 = vpop.eup %9155  ;;  %v16809_v17 = vld [vmem:[#allocation251_spill] sm:$0xff] }
 0x755   : > { %5614 = vmatprep.mubr.f32.mxu0 %v4896_v61  ;;  %5839 = vmatprep.mubr.f32.mxu1 %v4992_v21  ;;  %v13963_v13 = vpop.f32.mrb[188].mxu0  ;;  %v13973_v2 = vpop.f32.mrb[188].mxu1  ;;  %v16805_v61 = vld [vmem:[#allocation132_spill] sm:$0xff]  ;;  %v16806_v21 = vld [vmem:[#allocation250_spill] sm:$0xff]  ;;  %v4997_v23 = vmul.f32 %v9154_v37, %v16809_v17  ;;  %v16817_v0 = vld [vmem:[#allocation87_spill] sm:$0xff] }
 0x756   : > { %8346 = vxpose.xlu0.b32.cont [2/16] (narrow) %v16797_v34, 8  ;;  %v5263_v28 = vpop.f32.mrb[189].mxu0  ;;  %v8384_v5 = vpack.i.bf16 %v13973_v2, %v13880_v3  ;;  %v5448_v43 = vpop.f32.mrb[189].mxu1  ;;  %v4902_v26 = vmul.f32 %v9152_v9, %v16805_v61  ;;  %v4998_v20 = vmul.f32 %v9154_v37, %v16806_v21  ;;  %v16815_v37 = vld [vmem:[#allocation134_spill] sm:$0xff]  ;;  %v16823_v17 = vld [vmem:[#allocation155_spill] sm:$0xff] }
 0x757   : > { %v9158_v34 = vpop.eup %9157  ;;  %v13990_v28 = vpop.xlane.xlu1 %4544 }
 0x758   : > { %5615 = vmatmul.mubr.f32.gmra.mrb[214].mxu0 %v4895_v52  ;;  %5840 = vmatmul.mubr.f32.gmra.mrb[230].mxu1 %v4991_v24  ;;  %v9160_v4 = vpop.eup %9159  ;;  %v4905_v52 = vmul.f32 %v9156_v14, %v13134_v33  ;;  %v5001_v24 = vmul.f32 %v9158_v34, %v16810_v44  ;;  %v16811_v33 = vld [vmem:[#allocation111_spill] sm:$0xff]  ;;  %v5000_v43 = vmul.f32 %v9158_v34, %v16815_v37  ;;  %v16828_v37 = vld [vmem:[#allocation116_spill] sm:$0xff] }
 0x759   : > { %5619 = vmatprep.mubr.f32.mxu0 %v4899_v40  ;;  %5844 = vmatprep.mubr.f32.mxu1 %v4995_v10  ;;  %v13980_v8 = vpop.f32.mrb[190].mxu0  ;;  %v9162_v36 = vpop.eup %9161  ;;  %v16813_v9 = vpack.i.bf16 %v16811_v33, %v16812_v54  ;;  %v4904_v10 = vmul.f32 %v9156_v14, %v16814_v35  ;;  %v16818_v14 = vld [vmem:[#allocation170_spill] sm:$0xff]  ;;  %v16826_v33 = vld [vmem:[#allocation261_spill] sm:$0xff] }
 0x75a   : > { %8348 = vxpose.xlu0.b32.cont [3/16] (narrow) %v16802_v31, 8  ;;  %v5268_v12 = vpop.f32.mrb[191].mxu0  ;;  %v9164_v31 = vpop.eup %9163  ;;  %v16827_v35 = vld [vmem:[#allocation57_spill] sm:$0xff] }
 0x75b   : > { %v14007_v15 = vpop.xlane.xlu1 %4547  ;;  %v4908_v12 = vmul.f32 %v9160_v4, %v16816_v50  ;;  %v9166_v38 = vpop.eup %9165 }
 0x75c   : > { %5620 = vmatmul.mubr.f32.gmra.mrb[216].mxu0 %v4898_v47  ;;  %5845 = vmatmul.mubr.f32.gmra.mrb[232].mxu1 %v4994_v59  ;;  %v5004_v47 = vmul.f32 %v9162_v36, %v16817_v0 }
 0x75d   : > { %5624 = vmatprep.mubr.f32.mxu0 %v4902_v26  ;;  %5849 = vmatprep.mubr.f32.mxu1 %v4998_v20  ;;  %v16819_v26 = vld [vmem:[#allocation168_spill] sm:$0xff]  ;;  %v16821_v20 = vld [vmem:[#allocation135_spill] sm:$0xff] }
 0x75e   : > { %8350 = vxpose.xlu0.b32.cont [4/16] (narrow) %v16807_v1, 8  ;;  %v14001_v40 = vpop.f32.mrb[190].mxu1  ;;  %v16820_v21 = vpack.i.bf16 %v16818_v14, %v16819_v26  ;;  %v4907_v34 = vmul.f32 %v9160_v4, %v16821_v20  ;;  %v16822_v1 = vld [vmem:[#allocation152_spill] sm:$0xff]  ;;  %v16833_v26 = vld [vmem:[#allocation70_spill] sm:$0xff]  ;;  %v16834_v20 = vld [vmem:[#allocation85_spill] sm:$0xff] }
 0x75f   : > { %v5453_v7 = vpop.f32.mrb[191].mxu1  ;;  %v5003_v58 = vmul.f32 %v9162_v36, %v16822_v1 }
 0x760   : > { %5625 = vmatmul.mubr.f32.gmra.mrb[218].mxu0 %v4901_v51  ;;  %5850 = vmatmul.mubr.f32.gmra.mrb[234].mxu1 %v4997_v23  ;;  %v9168_v51 = vpop.eup %9167  ;;  %v4911_v23 = vmul.f32 %v9164_v31, %v16823_v17  ;;  %v16825_v7 = vld [vmem:[#allocation212_spill] sm:$0xff] }
 0x761   : > { %5629 = vmatprep.mubr.f32.mxu0 %v4905_v52  ;;  %5854 = vmatprep.mubr.f32.mxu1 %v5001_v24  ;;  %v16824_v52 = vld [vmem:[#allocation51_spill] sm:$0xff]  ;;  %v9170_v24 = vpop.eup %9169  ;;  %v3715_v54 = vsub.f32 %v16826_v33, %v16825_v7  ;;  %v3716_v4 = vsub.f32 %v16827_v35, %v16825_v7  ;;  %v16836_v7 = vld [vmem:[#allocation80_spill] sm:$0xff] }
 0x762   : > { %8352 = vxpose.xlu0.b32.cont [5/16] (narrow) %v16813_v9, 8  ;;  %v14016_v59 = vpop.f32.mrb[192].mxu1  ;;  %v5007_v44 = vmul.f32 %v9166_v38, %v16824_v52  ;;  %v14030_v9 = vpop.xlane.xlu1 %4550 }
 0x763   : > { %v5458_v61 = vpop.f32.mrb[193].mxu1  ;;  %v9172_v14 = vpop.eup %9171  ;;  %v4159_v42 = vmul.f32 1.442695, %v3716_v4  ;;  %v16840_v4 = vld [vmem:[#allocation72_spill] sm:$0xff]  ;;  %v16935_v41 = vpack.i.bf16 %v14016_v59, %v13898_v62 }
 0x764   : > { %5630 = vmatmul.mubr.f32.gmra.mrb[220].mxu0 %v4904_v10  ;;  %5855 = vmatmul.mubr.f32.gmra.mrb[236].mxu1 %v5000_v43  ;;  %v16829_v43 = vld [vmem:[#allocation241_spill] sm:$0xff]  ;;  %v9174_v1 = vpop.eup %9173 }
 0x765   : > { %5634 = vmatprep.mubr.f32.mxu0 %v4908_v12  ;;  %5859 = vmatprep.mubr.f32.mxu1 %v5004_v47  ;;  %v16830_v50 = vpack.i.bf16 %v16828_v37, %v16829_v43  ;;  %v16831_v12 = vld [vmem:[#allocation153_spill] sm:$0xff]  ;;  %v16832_v47 = vld [vmem:[#allocation158_spill] sm:$0xff]  ;;  %v9176_v39 = vpop.eup %9175 }
 0x766   : > { %8354 = vxpose.xlu0.b32.cont [6/16] (narrow) %v16820_v21, 8  ;;  %v14032_v48 = vpop.f32.mrb[194].mxu1  ;;  %v4910_v0 = vmul.f32 %v9164_v31, %v16831_v12  ;;  %v5006_v61 = vmul.f32 %v9166_v38, %v16832_v47  ;;  %v4914_v21 = vmul.f32 %v9168_v51, %v16833_v26  ;;  %v14051_v31 = vpop.xlane.xlu1 %4553 }
 0x767   : > { %v5463_v10 = vpop.f32.mrb[195].mxu1  ;;  %v16936_v18 = vpack.i.bf16 %v14032_v48, %v13910_v60 }
 0x768   : > { %5635 = vmatmul.mubr.f32.gmra.mrb[222].mxu0 %v4907_v34  ;;  %5860 = vmatmul.mubr.f32.gmra.mrb[238].mxu1 %v5003_v58  ;;  %v5010_v34 = vmul.f32 %v9170_v24, %v16834_v20  ;;  %v4157_v58 = vmul.f32 1.442695, %v3715_v54  ;;  %v16838_v54 = vld [vmem:[#allocation15_spill] sm:$0xff]  ;;  %v16839_v10 = vld [vmem:[#allocation137_spill] sm:$0xff] }
 0x769   : > { %5639 = vmatprep.mubr.f32.mxu0 %v4911_v23  ;;  %5864 = vmatprep.mubr.f32.mxu1 %v5007_v44  ;;  %v16835_v44 = vld [vmem:[#allocation84_spill] sm:$0xff]  ;;  %v4913_v35 = vmul.f32 %v9168_v51, %v16838_v54  ;;  %v5009_v37 = vmul.f32 %v9170_v24, %v16839_v10  ;;  %v16848_v54 = vld [vmem:[#allocation255_spill] sm:$0xff] }
 0x76a   : > { %8356 = vxpose.xlu0.b32.cont [7/16] (narrow) %v16830_v50, 8  ;;  %v16837_v33 = vpack.i.bf16 %v16835_v44, %v16836_v7  ;;  %v16841_v50 = vld [vmem:[#allocation259_spill] sm:$0xff]  ;;  %9181 = vpow2.f32 %v4157_v58  ;;  %v16845_v44 = vld [vmem:[#allocation186_spill] sm:$0xff]  ;;  %v16847_v58 = vld [vmem:[#allocation156_spill] sm:$0xff] }
 0x76b   : > { %v14046_v17 = vpop.f32.mrb[196].mxu1  ;;  %9183 = vpow2.f32 %v4159_v42  ;;  %v16849_v42 = vld [vmem:[#allocation139_spill] sm:$0xff] }
 0x76c   : > { %5640 = vmatmul.mubr.f32.gmra.mrb[224].mxu0 %v4910_v0  ;;  %5865 = vmatmul.mubr.f32.gmra.mrb[240].mxu1 %v5006_v61  ;;  %v5468_v52 = vpop.f32.mrb[197].mxu1  ;;  %v16842_v0 = vld [vmem:[#allocation95_spill] sm:$0xff]  ;;  %v16843_v61 = vld [vmem:[#allocation157_spill] sm:$0xff]  ;;  %9185 = vrcp.f32 %v13990_v28  ;;  %v4920_v10 = vmul.f32 %v9176_v39, %v16849_v42  ;;  %v16937_v55 = vpack.i.bf16 %v14046_v17, %v13920_v57 }
 0x76d   : > { %5644 = vmatprep.mubr.f32.mxu0 %v4914_v21  ;;  %5869 = vmatprep.mubr.f32.mxu1 %v5010_v34  ;;  %v4917_v47 = vmul.f32 %v9172_v14, %v16842_v0  ;;  %v5013_v26 = vmul.f32 %v9174_v1, %v16843_v61  ;;  %v14076_v0 = vpop.xlane.xlu1 %4556 }
 0x76e   : > { %v3423_v38 = vpop.xlane.xlu0 %3422  ;;  %8358 = vxpose.xlu0.b32.cont [8/16] (narrow) %v16837_v33, 8  ;;  %v4916_v33 = vmul.f32 %v9172_v14, %v16847_v58 }
 0x76f   : > { %v3713_v43 = vsub.f32 %v16840_v4, %v3423_v38  ;;  %v3714_v12 = vsub.f32 %v16841_v50, %v3423_v38  ;;  %v14062_v21 = vpop.f32.mrb[198].mxu1  ;;  %v16844_v38 = vld [vmem:[#allocation56_spill] sm:$0xff] }
 0x770   : > { %5645 = vmatmul.mubr.f32.gmra.mrb[226].mxu0 %v4913_v35  ;;  %5870 = vmatmul.mubr.f32.gmra.mrb[242].mxu1 %v5009_v37  ;;  %v5473_v34 = vpop.f32.mrb[199].mxu1  ;;  %v16846_v7 = vpack.i.bf16 %v16844_v38, %v16845_v44  ;;  %v5012_v35 = vmul.f32 %v9174_v1, %v16848_v54  ;;  %v9178_v37 = vpop.eup %9177  ;;  %v16850_v4 = vld [vmem:[#allocation52_spill] sm:$0xff]  ;;  %v16857_v44 = vld [vmem:[#allocation206_spill] sm:$0xff]  ;;  %v16938_v3 = vpack.i.bf16 %v14062_v21, %v13930_v46 }
 0x771   : > { %v4153_v20 = vmul.f32 1.442695, %v3713_v43  ;;  %v4155_v24 = vmul.f32 1.442695, %v3714_v12  ;;  %5649 = vmatprep.mubr.f32.mxu0 %v4917_v47  ;;  %5874 = vmatprep.mubr.f32.mxu1 %v5013_v26  ;;  %v16851_v43 = vld [vmem:[#allocation172_spill] sm:$0xff]  ;;  %v16853_v47 = vld [vmem:[#allocation266_spill] sm:$0xff]  ;;  %v9180_v58 = vpop.eup %9179 }
 0x772   : > { %v4632_v52 = vpop.xlane.xlu0 %4631  ;;  %8360 = vxpose.xlu0.b32.cont [9/16] (narrow) %v16846_v7, 8  ;;  %v16852_v50 = vsub.f32 %v16850_v4, %v16851_v43  ;;  %v16854_v14 = vsub.f32 %v16853_v47, %v16851_v43  ;;  %v16856_v34 = vld [vmem:[#allocation223_spill] sm:$0xff]  ;;  %v4923_v7 = vmul.f32 %v9178_v37, %v16857_v44  ;;  %v16859_v54 = vld [vmem:[#allocation234_spill] sm:$0xff]  ;;  %v4560_v43 = vpop.xlane.xlu1 %4559  ;;  %v16864_v47 = vld [vmem:[#allocation60_spill] sm:$0xff] }
 0x773   : > { %9187 = vpow2.f32 %v4153_v20  ;;  %v14078_v28 = vpop.f32.mrb[200].mxu1  ;;  %v4919_v38 = vmul.f32 %v9176_v39, %v16856_v34 }
 0x774   : > { %v4161_v12 = vmul.f32 1.442695, %v16852_v50  ;;  %9189 = vpow2.f32 %v4155_v24  ;;  %5650 = vmatmul.mubr.f32.gmra.mrb[228].mxu0 %v4916_v33  ;;  %5875 = vmatmul.mubr.f32.gmra.mrb[244].mxu1 %v5012_v35  ;;  %v4163_v61 = vmul.f32 1.442695, %v16854_v14  ;;  %v5478_v26 = vpop.f32.mrb[201].mxu1  ;;  %v16855_v24 = vpack.i.bf16 %v13775_v6, %v13742_v63  ;;  %v16858_v33 = vld [vmem:[#allocation74_spill] sm:$0xff]  ;;  %v14101_v4 = vpop.eup %9181 }
 0x775   : > { %9191 = vrcp.f32 %v4632_v52  ;;  %5654 = vmatprep.mubr.f32.mxu0 %v4920_v10  ;;  %v16860_v35 = vsub.f32 %v16858_v33, %v16859_v54 }
 0x776   : > { %9193 = vrcp.f32 %v14007_v15  ;;  %v4635_v20 = vpop.xlane.xlu0 %4634  ;;  %8362 = vxpose.xlu0.b32.cont [10/16] (narrow) %v16855_v24, 8  ;;  %v16861_v15 = vld [vmem:[#allocation63_spill] sm:$0xff]  ;;  %v16867_v24 = vld [vmem:[#allocation160_spill] sm:$0xff] }
 0x777   : > { %9195 = vrcp.f32 %v4635_v20  ;;  %v4165_v52 = vmul.f32 1.442695, %v16860_v35  ;;  %v14094_v42 = vpop.f32.mrb[202].mxu1  ;;  %v16862_v10 = vsub.f32 %v16861_v15, %v16859_v54  ;;  %v14108_v20 = vpop.eup %9183  ;;  %v4926_v34 = vmul.f32 %v9180_v58, %v16867_v24  ;;  %v16868_v35 = vld [vmem:[#allocation193_spill] sm:$0xff]  ;;  %v16869_v15 = vld [vmem:[#allocation235_spill] sm:$0xff] }
 0x778   : > { %9197 = vpow2.f32 %v4161_v12  ;;  %5655 = vmatmul.mubr.f32.gmra.mrb[230].mxu0 %v4919_v38  ;;  %v5483_v39 = vpop.f32.mrb[203].mxu1  ;;  %v16863_v12 = vld [vmem:[#allocation226_spill] sm:$0xff]  ;;  %v9186_v38 = vpop.eup %9185  ;;  %v16940_v62 = vpack.i.bf16 %v14094_v42, %v13952_v27 }
 0x779   : > { %9199 = vpow2.f32 %v4163_v61  ;;  %v4167_v63 = vmul.f32 1.442695, %v16862_v10  ;;  %5659 = vmatprep.mubr.f32.mxu0 %v4923_v7  ;;  %v16865_v14 = vpack.i.bf16 %v16863_v12, %v16864_v47  ;;  %v16866_v61 = vld [vmem:[#allocation47_spill] sm:$0xff]  ;;  %v16870_v10 = vpack.i.bf16 %v16868_v35, %v16869_v15  ;;  %v16872_v12 = vld [vmem:[#allocation161_spill] sm:$0xff] }
 0x77a   : > { %9201 = vrcp.f32 %v14030_v9  ;;  %v4638_v50 = vpop.xlane.xlu0 %4637  ;;  %v4922_v26 = vmul.f32 %v9178_v37, %v16866_v61  ;;  %v4929_v47 = vmul.f32 %v9186_v38, %v16872_v12  ;;  %v4563_v61 = vpop.xlane.xlu1 %4562  ;;  %v16876_v12 = vld [vmem:[#allocation150_spill] sm:$0xff] }
 0x77b   : > { %8364 = vxpose.xlu0.b32.cont [11/16] (narrow) %v16865_v14, 8  ;;  %9203 = vrcp.f32 %v4638_v50  ;;  %v14111_v44 = vpop.f32.mrb[204].mxu1 }
 0x77c   : > { %9205 = vpow2.f32 %v4165_v52  ;;  %5660 = vmatmul.mubr.f32.gmra.mrb[232].mxu0 %v4922_v26  ;;  %v5488_v33 = vpop.f32.mrb[205].mxu1  ;;  %v16871_v52 = vld [vmem:[#allocation211_spill] sm:$0xff] }
 0x77d   : > { %v14113_v7 = vpop.eup %9187  ;;  %9207 = vpow2.f32 %v4167_v63  ;;  %5664 = vmatprep.mubr.f32.mxu0 %v4926_v34  ;;  %v4925_v39 = vmul.f32 %v9180_v58, %v16871_v52  ;;  %v16874_v34 = vld [vmem:[#allocation19_spill] sm:$0xff] }
 0x77e   : > { %v14117_v54 = vpop.eup %9189  ;;  %9209 = vrcp.f32 %v14051_v31  ;;  %v4641_v37 = vpop.xlane.xlu0 %4640  ;;  %v16873_v31 = vld [vmem:[#allocation179_spill] sm:$0xff] }
 0x77f   : > { %8366 = vxpose.xlu0.b32.cont [12/16] (narrow) %v16870_v10, 8  ;;  %v9192_v50 = vpop.eup %9191  ;;  %9211 = vrcp.f32 %v4641_v37  ;;  %v4573_v63 = vadd.f32 %v14117_v54, %v14113_v7  ;;  %v14127_v26 = vpop.f32.mrb[206].mxu1 }
 0x780   : > { %v9194_v14 = vpop.eup %9193  ;;  %5665 = vmatmul.mubr.f32.gmra.mrb[234].mxu0 %v4925_v39  ;;  %v5016_v24 = vmul.f32 %v9192_v50, %v16873_v31  ;;  %v5015_v33 = vmul.f32 %v9192_v50, %v16874_v34  ;;  %v5493_v15 = vpop.f32.mrb[207].mxu1  ;;  %9213 = vrcp.f32 %v14076_v0  ;;  %v16875_v39 = vpack.i.bf16 %v13815_v29, %v13829_v19  ;;  %v16877_v34 = vld [vmem:[#allocation173_spill] sm:$0xff] }
 0x781   : > { %v9196_v35 = vpop.eup %9195  ;;  %4574 = vadd.xlane.f32.xlu1 %v4573_v63  ;;  %5669 = vmatprep.mubr.f32.mxu0 %v4929_v47  ;;  %v14133_v37 = vpop.f32.mrb[192].mxu0  ;;  %v4928_v31 = vmul.f32 %v9186_v38, %v16876_v12  ;;  %v4576_v63 = vadd.f32 %v14108_v20, %v14101_v4  ;;  %v16878_v47 = vld [vmem:[#allocation55_spill] sm:$0xff]  ;;  %v16882_v12 = vld [vmem:[#allocation256_spill] sm:$0xff]  ;;  %v16942_v60 = vpack.i.bf16 %v14127_v26, %v13980_v8 }
 0x782   : > { %v14135_v10 = vpop.eup %9197  ;;  %5879 = vmatprep.mubr.f32.mxu1 %v5016_v24  ;;  %v4644_v52 = vpop.xlane.xlu0 %4643  ;;  %v5019_v58 = vmul.f32 %v9196_v35, %v16877_v34  ;;  %v4932_v0 = vmul.f32 %v9194_v14, %v16878_v47  ;;  %v16879_v24 = vld [vmem:[#allocation145_spill] sm:$0xff] }
 0x783   : > { %8368 = vxpose.xlu0.b32.cont [13/16] (narrow) %v16875_v39, 8  ;;  %v5273_v50 = vpop.f32.mrb[193].mxu0  ;;  %v14143_v15 = vpop.eup %9199  ;;  %5880 = vmatmul.mubr.f32.gmra.mrb[246].mxu1 %v5015_v33  ;;  %9215 = vrcp.f32 %v4644_v52  ;;  %v5018_v9 = vmul.f32 %v9196_v35, %v16879_v24  ;;  %v16880_v39 = vld [vmem:[#allocation24_spill] sm:$0xff]  ;;  %v16885_v33 = vld [vmem:[#allocation67_spill] sm:$0xff] }
 0x784   : > { %v9202_v6 = vpop.eup %9201  ;;  %5670 = vmatmul.mubr.f32.gmra.mrb[236].mxu0 %v4928_v31  ;;  %5884 = vmatprep.mubr.f32.mxu1 %v5019_v58  ;;  %v14149_v19 = vpop.f32.mrb[208].mxu1  ;;  %9217 = vrcp.f32 %v4560_v43  ;;  %v16881_v50 = vpack.i.bf16 %v13831_v22, %v16880_v39  ;;  %v4931_v31 = vmul.f32 %v9194_v14, %v16882_v12  ;;  %v16883_v58 = vld [vmem:[#allocation176_spill] sm:$0xff]  ;;  %v4579_v43 = vadd.f32 %v14143_v15, %v14135_v10 }
 0x785   : > { %v9204_v29 = vpop.eup %9203  ;;  %4577 = vadd.xlane.f32.xlu1 %v4576_v63  ;;  %5674 = vmatprep.mubr.f32.mxu0 %v4932_v0  ;;  %v5498_v35 = vpop.f32.mrb[209].mxu1  ;;  %v16884_v0 = vld [vmem:[#allocation263_spill] sm:$0xff]  ;;  %v16888_v12 = vld [vmem:[#allocation112_spill] sm:$0xff]  ;;  %v16943_v57 = vpack.i.bf16 %v14149_v19, %v14133_v37 }
 0x786   : > { %v14151_v38 = vpop.eup %9205  ;;  %v4647_v52 = vpop.xlane.xlu0 %4646  ;;  %v5022_v34 = vmul.f32 %v9204_v29, %v16883_v58  ;;  %v4935_v24 = vmul.f32 %v9202_v6, %v16884_v0  ;;  %v5021_v1 = vmul.f32 %v9204_v29, %v16885_v33  ;;  %v16889_v33 = vld [vmem:[#allocation163_spill] sm:$0xff] }
 0x787   : > { %8370 = vxpose.xlu0.b32.cont [14/16] (narrow) %v16881_v50, 8  ;;  %v14160_v63 = vpop.eup %9207  ;;  %v4566_v47 = vpop.xlane.xlu1 %4565  ;;  %5885 = vmatmul.mubr.f32.gmra.mrb[248].mxu1 %v5018_v9  ;;  %9219 = vrcp.f32 %v4647_v52  ;;  %v16886_v9 = vpack.i.bf16 %v13853_v16, %v13851_v32  ;;  %v16887_v50 = vld [vmem:[#allocation59_spill] sm:$0xff] }
 0x788   : > { %v9210_v51 = vpop.eup %9209  ;;  %5675 = vmatmul.mubr.f32.gmra.mrb[238].mxu0 %v4931_v31  ;;  %5889 = vmatprep.mubr.f32.mxu1 %v5022_v34  ;;  %v14166_v14 = vpop.f32.mrb[194].mxu0  ;;  %9221 = vrcp.f32 %v4563_v61  ;;  %v4934_v35 = vmul.f32 %v9202_v6, %v16887_v50  ;;  %v4582_v29 = vadd.f32 %v14160_v63, %v14151_v38  ;;  %v16890_v34 = vld [vmem:[#allocation174_spill] sm:$0xff] }
 0x789   : > { %v9212_v22 = vpop.eup %9211  ;;  %4580 = vadd.xlane.f32.xlu1 %v4579_v43  ;;  %5679 = vmatprep.mubr.f32.mxu0 %v4935_v24  ;;  %v5278_v52 = vpop.f32.mrb[195].mxu0  ;;  %v4938_v31 = vmul.f32 %v9210_v51, %v16889_v33  ;;  %v16891_v24 = vld [vmem:[#allocation68_spill] sm:$0xff]  ;;  %v16897_v33 = vld [vmem:[#allocation175_spill] sm:$0xff] }
 0x78a   : > { %v4650_v39 = vpop.xlane.xlu0 %4649  ;;  %v5025_v58 = vmul.f32 %v9212_v22, %v16888_v12  ;;  %v5024_v43 = vmul.f32 %v9212_v22, %v16890_v34  ;;  %v9214_v61 = vpop.eup %9213  ;;  %v16894_v22 = vld [vmem:[#allocation29_spill] sm:$0xff] }
 0x78b   : > { %8372 = vxpose.xlu0.b32.cont [15/16] (narrow) %v16886_v9, 8  ;;  %5890 = vmatmul.mubr.f32.gmra.mrb[250].mxu1 %v5021_v1  ;;  %9223 = vrcp.f32 %v4650_v39  ;;  %v4569_v16 = vpop.xlane.xlu1 %4568  ;;  %v14177_v32 = vpop.f32.mrb[210].mxu1  ;;  %v16892_v39 = vld [vmem:[#allocation23_spill] sm:$0xff]  ;;  %v4937_v50 = vmul.f32 %v9210_v51, %v16894_v22 }
 0x78c   : > { %5680 = vmatmul.mubr.f32.gmra.mrb[240].mxu0 %v4934_v35  ;;  %5894 = vmatprep.mubr.f32.mxu1 %v5025_v58  ;;  %9225 = vrcp.f32 %v4566_v47  ;;  %v16893_v9 = vpack.i.bf16 %v16891_v24, %v16892_v39  ;;  %v5503_v52 = vpop.f32.mrb[211].mxu1  ;;  %v16895_v35 = vld [vmem:[#allocation34_spill] sm:$0xff]  ;;  %v16944_v11 = vpack.i.bf16 %v14177_v32, %v14166_v14 }
 0x78d   : > { %v9216_v0 = vpop.eup %9215  ;;  %4583 = vadd.xlane.f32.xlu1 %v4582_v29  ;;  %5684 = vmatprep.mubr.f32.mxu0 %v4938_v31  ;;  %v16896_v58 = vld [vmem:[#allocation166_spill] sm:$0xff]  ;;  %v16899_v52 = vld [vmem:[#allocation260_spill] sm:$0xff] }
 0x78e   : > { %v4653_v6 = vpop.xlane.xlu0 %4652  ;;  %v5028_v12 = vmul.f32 %v9216_v0, %v16895_v35  ;;  %v4941_v29 = vmul.f32 %v9214_v61, %v16896_v58  ;;  %v5027_v31 = vmul.f32 %v9216_v0, %v16897_v33  ;;  %v9218_v47 = vpop.eup %9217  ;;  %v16901_v0 = vld [vmem:[#allocation165_spill] sm:$0xff] }
 0x78f   : > { %8374 = vxpose.xlu0.b32.end [16/16] (narrow) %v16893_v9, 8  ;;  %5895 = vmatmul.mubr.f32.gmra.mrb[252].mxu1 %v5024_v43  ;;  %9227 = vrcp.f32 %v4653_v6  ;;  %v14188_v1 = vpop.f32.mrb[196].mxu0  ;;  %v16898_v9 = vld [vmem:[#allocation162_spill] sm:$0xff]  ;;  %v4572_v43 = vpop.xlane.xlu1 %4571  ;;  %v16900_v6 = vld [vmem:[#allocation240_spill] sm:$0xff]  ;;  %v4944_v58 = vmul.f32 %v9218_v47, %v16901_v0 }
 0x790   : > { %5685 = vmatmul.mubr.f32.gmra.mrb[242].mxu0 %v4937_v50  ;;  %5899 = vmatprep.mubr.f32.mxu1 %v5028_v12  ;;  %9229 = vrcp.f32 %v4569_v16  ;;  %v5283_v39 = vpop.f32.mrb[197].mxu0  ;;  %v4940_v51 = vmul.f32 %v9214_v61, %v16898_v9 }
 0x791   : > { %v9220_v34 = vpop.eup %9219  ;;  %5689 = vmatprep.mubr.f32.mxu0 %v4941_v29  ;;  %v16902_v39 = vld [vmem:[#allocation232_spill] sm:$0xff] }
 0x792   : > { %v4656_v24 = vpop.xlane.xlu0 %4655  ;;  %v5031_v22 = vmul.f32 %v9220_v34, %v16899_v52  ;;  %v5030_v35 = vmul.f32 %v9220_v34, %v16900_v6  ;;  %v9222_v50 = vpop.eup %9221  ;;  %v4943_v9 = vmul.f32 %v9218_v47, %v16902_v39  ;;  %v16903_v34 = vld [vmem:[#allocation177_spill] sm:$0xff] }
 0x793   : > { %5900 = vmatmul.mubr.f32.gmra.mrb[254].mxu1 %v5027_v31  ;;  %9231 = vrcp.f32 %v4656_v24  ;;  %v14194_v29 = vpop.f32.mrb[212].mxu1  ;;  %v16904_v24 = vld [vmem:[#allocation65_spill] sm:$0xff] }
 0x794   : > { %5690 = vmatmul.mubr.f32.gmra.mrb[244].mxu0 %v4940_v51  ;;  %5904 = vmatprep.mubr.f32.mxu1 %v5031_v22  ;;  %9233 = vrcp.f32 %v4572_v43  ;;  %v5508_v33 = vpop.f32.mrb[213].mxu1  ;;  %v16905_v51 = vld [vmem:[#allocation141_spill] sm:$0xff]  ;;  %v16945_v46 = vpack.i.bf16 %v14194_v29, %v14188_v1 }
 0x795   : > { %v9224_v12 = vpop.eup %9223  ;;  %5694 = vmatprep.mubr.f32.mxu0 %v4944_v58  ;;  %v4947_v22 = vmul.f32 %v9222_v50, %v16905_v51 }
 0x796   : > { %v4659_v16 = vpop.xlane.xlu0 %4658  ;;  %v5034_v31 = vmul.f32 %v9224_v12, %v16903_v34  ;;  %v5033_v52 = vmul.f32 %v9224_v12, %v16904_v24  ;;  %v9226_v6 = vpop.eup %9225  ;;  %v16906_v34 = vld [vmem:[#allocation217_spill] sm:$0xff]  ;;  %v16908_v24 = vld [vmem:[#allocation183_spill] sm:$0xff] }
 0x797   : > { %5905 = vmatmul.mubr.f32.gmra.mrb[0].mxu1 %v5030_v35  ;;  %9235 = vrcp.f32 %v4659_v16  ;;  %v14202_v43 = vpop.f32.mrb[214].mxu1  ;;  %v14204_v58 = vpop.f32.mrb[198].mxu0  ;;  %v4946_v12 = vmul.f32 %v9222_v50, %v16906_v34  ;;  %v16907_v35 = vld [vmem:[#allocation257_spill] sm:$0xff]  ;;  %v4949_v47 = vmul.f32 %v9226_v6, %v16910_v49 }
 0x798   : > { %5695 = vmatmul.mubr.f32.gmra.mrb[246].mxu0 %v4943_v9  ;;  %5909 = vmatprep.mubr.f32.mxu1 %v5034_v31  ;;  %v5288_v39 = vpop.f32.mrb[199].mxu0  ;;  %v5513_v9 = vpop.f32.mrb[215].mxu1  ;;  %v16909_v31 = vld [vmem:[#allocation18_spill] sm:$0xff]  ;;  %v16912_v50 = vld [vmem:[#allocation61_spill] sm:$0xff] }
 0x799   : > { %v9228_v0 = vpop.eup %9227  ;;  %5699 = vmatprep.mubr.f32.mxu0 %v4947_v22  ;;  %v4950_v22 = vmul.f32 %v9226_v6, %v16909_v31  ;;  %v16911_v39 = vld [vmem:[#allocation269_spill] sm:$0xff]  ;;  %v16917_v6 = vld [vmem:[#allocation271_spill] sm:$0xff] }
 0x79a   : > { %v4662_v33 = vpop.xlane.xlu0 %4661  ;;  %v5037_v16 = vmul.f32 %v9228_v0, %v16907_v35  ;;  %v5036_v51 = vmul.f32 %v9228_v0, %v16908_v24  ;;  %v9230_v61 = vpop.eup %9229  ;;  %v16913_v0 = vld [vmem:[#allocation267_spill] sm:$0xff]  ;;  %v16915_v9 = vld [vmem:[#allocation189_spill] sm:$0xff] }
 0x79b   : > { %5910 = vmatmul.mubr.f32.gmra.mrb[2].mxu1 %v5033_v52  ;;  %9237 = vrcp.f32 %v4662_v33  ;;  %v4953_v52 = vmul.f32 %v9230_v61, %v16913_v0  ;;  %v16920_v0 = vld [vmem:[#allocation88_spill] sm:$0xff] }
 0x79c   : > { %5700 = vmatmul.mubr.f32.gmra.mrb[248].mxu0 %v4946_v12  ;;  %5914 = vmatprep.mubr.f32.mxu1 %v5037_v16  ;;  %v16914_v16 = vld [vmem:[#allocation268_spill] sm:$0xff] }
 0x79d   : > { %v9232_v23 = vpop.eup %9231  ;;  %5704 = vmatprep.mubr.f32.mxu0 %v4950_v22  ;;  %v4952_v24 = vmul.f32 %v9230_v61, %v16914_v16  ;;  %v16916_v22 = vld [vmem:[#allocation69_spill] sm:$0xff]  ;;  %v16922_v16 = vld [vmem:[#allocation114_spill] sm:$0xff] }
 0x79e   : > { %v4665_v36 = vpop.xlane.xlu0 %4664  ;;  %v5040_v30 = vmul.f32 %v9232_v23, %v16911_v39  ;;  %v5039_v34 = vmul.f32 %v9232_v23, %v16912_v50  ;;  %v9234_v33 = vpop.eup %9233  ;;  %v16919_v39 = vld [vmem:[#allocation86_spill] sm:$0xff] }
 0x79f   : > { %5915 = vmatmul.mubr.f32.gmra.mrb[4].mxu1 %v5036_v51  ;;  %9239 = vrcp.f32 %v4665_v36  ;;  %v4956_v23 = vmul.f32 %v9234_v33, %v16917_v6  ;;  %v16924_v6 = vld [vmem:[#allocation244_spill] sm:$0xff] }
 0x7a0   : > { %5705 = vmatmul.mubr.f32.gmra.mrb[250].mxu0 %v4949_v47  ;;  %5919 = vmatprep.mubr.f32.mxu1 %v5040_v30  ;;  %v16918_v47 = vld [vmem:[#allocation143_spill] sm:$0xff] }
 0x7a1   : > { %v9236_v35 = vpop.eup %9235  ;;  %5709 = vmatprep.mubr.f32.mxu0 %v4953_v52  ;;  %v4955_v30 = vmul.f32 %v9234_v33, %v16918_v47  ;;  %v16923_v33 = vld [vmem:[#allocation62_spill] sm:$0xff] }
 0x7a2   : > { %v4668_v12 = vpop.xlane.xlu0 %4667  ;;  %v5043_v31 = vmul.f32 %v9236_v35, %v16915_v9  ;;  %v5042_v49 = vmul.f32 %v9236_v35, %v16916_v22  ;;  %v16921_v35 = vld [vmem:[#allocation36_spill] sm:$0xff] }
 0x7a3   : > { %5920 = vmatmul.mubr.f32.gmra.mrb[6].mxu1 %v5039_v34  ;;  %9241 = vrcp.f32 %v4668_v12 }
 0x7a4   : > { %5710 = vmatmul.mubr.f32.gmra.mrb[252].mxu0 %v4952_v24  ;;  %5924 = vmatprep.mubr.f32.mxu1 %v5043_v31 }
 0x7a5   : > { %v9238_v36 = vpop.eup %9237  ;;  %5714 = vmatprep.mubr.f32.mxu0 %v4956_v23 }
 0x7a6   : > { %v4671_v51 = vpop.xlane.xlu0 %4670  ;;  %v5046_v50 = vmul.f32 %v9238_v36, %v16919_v39  ;;  %v5045_v52 = vmul.f32 %v9238_v36, %v16920_v0  ;;  %v16927_v0 = vld [vmem:[#allocation98_spill] sm:$0xff] }
 0x7a7   : > { %5925 = vmatmul.mubr.f32.gmra.mrb[8].mxu1 %v5042_v49  ;;  %9243 = vrcp.f32 %v4671_v51  ;;  %v16925_v51 = vld [vmem:[#allocation92_spill] sm:$0xff] }
 0x7a8   : > { %5715 = vmatmul.mubr.f32.gmra.mrb[254].mxu0 %v4955_v30  ;;  %5929 = vmatprep.mubr.f32.mxu1 %v5046_v50  ;;  %v16926_v30 = vld [vmem:[#allocation187_spill] sm:$0xff] }
 0x7a9   : > { %v9240_v61 = vpop.eup %9239 }
 0x7aa   : > { %v4674_v34 = vpop.xlane.xlu0 %4673  ;;  %v5049_v12 = vmul.f32 %v9240_v61, %v16921_v35  ;;  %v5048_v24 = vmul.f32 %v9240_v61, %v16922_v16  ;;  %v16928_v61 = vld [vmem:[#allocation100_spill] sm:$0xff] }
 0x7ab   : > { %5930 = vmatmul.mubr.f32.gmra.mrb[10].mxu1 %v5045_v52  ;;  %9245 = vrcp.f32 %v4674_v34 }
 0x7ac   : > { %5934 = vmatprep.mubr.f32.mxu1 %v5049_v12  ;;  %v16929_v12 = vld [vmem:[#allocation64_spill] sm:$0xff] }
 0x7ad   : > { %v9242_v9 = vpop.eup %9241 }
 0x7ae   : > { %v4677_v31 = vpop.xlane.xlu0 %4676  ;;  %v5052_v22 = vmul.f32 %v9242_v9, %v16923_v33  ;;  %v5051_v23 = vmul.f32 %v9242_v9, %v16924_v6  ;;  %v16931_v33 = vld [vmem:[#allocation248_spill] sm:$0xff]  ;;  %v16932_v6 = vld [vmem:[#allocation73_spill] sm:$0xff] }
 0x7af   : > { %5935 = vmatmul.mubr.f32.gmra.mrb[12].mxu1 %v5048_v24  ;;  %9247 = vrcp.f32 %v4677_v31  ;;  %v16930_v24 = vld [vmem:[#allocation66_spill] sm:$0xff] }
 0x7b0   : > { %5939 = vmatprep.mubr.f32.mxu1 %v5052_v22 }
 0x7b1   : > { %v9244_v49 = vpop.eup %9243 }
 0x7b2   : > { %v4680_v36 = vpop.xlane.xlu0 %4679  ;;  %v5055_v47 = vmul.f32 %v9244_v49, %v16925_v51  ;;  %v5054_v39 = vmul.f32 %v9244_v49, %v16926_v30  ;;  %v16933_v49 = vmov 0.0  }
 0x7b3   : > { %5940 = vmatmul.mubr.f32.gmra.mrb[14].mxu1 %v5051_v23  ;;  %9249 = vrcp.f32 %v4680_v36  ;;  %v16934_v36 = vpack.i.bf16 %v14001_v40, %v13886_v56  ;;  %v16939_v56 = vpack.i.bf16 %v14078_v28, %v13942_v53 }
 0x7b4   : > { %5944 = vmatprep.mubr.f32.mxu1 %v5055_v47 }
 0x7b5   : > { %v9246_v50 = vpop.eup %9245 }
 0x7b6   : > { %v5058_v52 = vmul.f32 %v9246_v50, %v16927_v0  ;;  %v5057_v34 = vmul.f32 %v9246_v50, %v16928_v61 }
 0x7b7   : > { %5945 = vmatmul.mubr.f32.gmra.mrb[16].mxu1 %v5054_v39 }
 0x7b8   : > { %5949 = vmatprep.mubr.f32.mxu1 %v5058_v52 }
 0x7b9   : > { %v9248_v35 = vpop.eup %9247 }
 0x7ba   : > { %v5061_v16 = vmul.f32 %v9248_v35, %v16929_v12  ;;  %v5060_v9 = vmul.f32 %v9248_v35, %v16930_v24 }
 0x7bb   : > { %5950 = vmatmul.mubr.f32.gmra.mrb[18].mxu1 %v5057_v34 }
 0x7bc   : > { %5954 = vmatprep.mubr.f32.mxu1 %v5061_v16 }
 0x7bd   : > { %v9250_v31 = vpop.eup %9249 }
 0x7be   : > { %v5064_v22 = vmul.f32 %v9250_v31, %v16931_v33  ;;  %v5063_v23 = vmul.f32 %v9250_v31, %v16932_v6 }
 0x7bf   : > { %5955 = vmatmul.mubr.f32.gmra.mrb[20].mxu1 %v5060_v9 }
 0x7c0   : > { %8381 = vxpose.xlu1.b32.start [1/16] (narrow) %v8380_v25, 8  ;;  %5959 = vmatprep.mubr.f32.mxu1 %v5064_v22  ;;  %v16941_v25 = vpack.i.bf16 %v14111_v44, %v13963_v13 }
 0x7c3   : > { %5960 = vmatmul.mubr.f32.gmra.mrb[22].mxu1 %v5063_v23 }
 0x7c4   : > { %8383 = vxpose.xlu1.b32.cont [2/16] (narrow) %v8382_v45, 8  ;;  %6438 = vmatprep.mubr.f32.mxu1 %v16933_v49  ;;  %v16946_v45 = vpack.i.bf16 %v14202_v43, %v14204_v58 }
 0x7c8   : > { %8385 = vxpose.xlu1.b32.cont [3/16] (narrow) %v8384_v5, 8 }
 0x7cc   : > { %8387 = vxpose.xlu1.b32.cont [4/16] (narrow) %v16934_v36, 8 }
 0x7d0   : > { %8389 = vxpose.xlu1.b32.cont [5/16] (narrow) %v16935_v41, 8 }
 0x7d4   : > { %8391 = vxpose.xlu1.b32.cont [6/16] (narrow) %v16936_v18, 8 }
 0x7d8   : > { %8393 = vxpose.xlu1.b32.cont [7/16] (narrow) %v16937_v55, 8 }
 0x7dc   : > { %8395 = vxpose.xlu1.b32.cont [8/16] (narrow) %v16938_v3, 8 }
 0x7e0   : > { %8397 = vxpose.xlu1.b32.cont [9/16] (narrow) %v16939_v56, 8 }
 0x7e4   : > { %8399 = vxpose.xlu1.b32.cont [10/16] (narrow) %v16940_v62, 8 }
 0x7e8   : > { %8401 = vxpose.xlu1.b32.cont [11/16] (narrow) %v16941_v25, 8 }
 0x7ec   : > { %8403 = vxpose.xlu1.b32.cont [12/16] (narrow) %v16942_v60, 8 }
 0x7f0   : > { %8405 = vxpose.xlu1.b32.cont [13/16] (narrow) %v16943_v57, 8 }
 0x7f4   : > { %8407 = vxpose.xlu1.b32.cont [14/16] (narrow) %v16944_v11, 8 }
 0x7f8   : > { %8409 = vxpose.xlu1.b32.cont [15/16] (narrow) %v16945_v46, 8 }
 0x7fc   : > { %8411 = vxpose.xlu1.b32.end [16/16] (narrow) %v16946_v45, 8 }
 0x80e   : > { %v4575_v53 = vpop.xlane.xlu1 %4574 }
 0x80f   : > { %9251 = vrcp.f32 %v4575_v53  ;;  %v5581_v27 = vpop.f32.mrb[200].mxu0  ;;  %v5806_v13 = vpop.f32.mrb[216].mxu1 }
 0x810   : > { %v8454_v2 = vpack.i.bf16 %v5806_v13, %v5581_v27  ;;  %v5583_v5 = vpop.f32.mrb[201].mxu0  ;;  %v5808_v8 = vpop.f32.mrb[217].mxu1 }
 0x812   : > { %v4578_v40 = vpop.xlane.xlu1 %4577  ;;  %8455 = vxpose.xlu1.b32.start [1/16] (narrow) %v8454_v2, 8 }
 0x813   : > { %9253 = vrcp.f32 %v4578_v40  ;;  %v5586_v59 = vpop.f32.mrb[202].mxu0  ;;  %v5811_v48 = vpop.f32.mrb[218].mxu1 }
 0x814   : > { %v8456_v17 = vpack.i.bf16 %v5811_v48, %v5586_v59  ;;  %v5588_v21 = vpop.f32.mrb[203].mxu0  ;;  %v5813_v28 = vpop.f32.mrb[219].mxu1 }
 0x816   : > { %v4581_v42 = vpop.xlane.xlu1 %4580  ;;  %8457 = vxpose.xlu1.b32.cont [2/16] (narrow) %v8456_v17, 8 }
 0x817   : > { %9255 = vrcp.f32 %v4581_v42  ;;  %v5591_v44 = vpop.f32.mrb[204].mxu0  ;;  %v5816_v26 = vpop.f32.mrb[220].mxu1 }
 0x818   : > { %v8458_v37 = vpack.i.bf16 %v5816_v26, %v5591_v44  ;;  %v5593_v19 = vpop.f32.mrb[205].mxu0  ;;  %v5818_v14 = vpop.f32.mrb[221].mxu1 }
 0x819   : > { %v9252_v32 = vpop.eup %9251 }
 0x81a   : > { %v4958_v1 = vmul.f32 %v9252_v32, %v14113_v7  ;;  %v4584_v29 = vpop.xlane.xlu1 %4583  ;;  %8459 = vxpose.xlu1.b32.cont [3/16] (narrow) %v8458_v37, 8  ;;  %v4959_v43 = vmul.f32 %v9252_v32, %v14117_v54 }
 0x81b   : > { %9257 = vrcp.f32 %v4584_v29  ;;  %v5596_v58 = vpop.f32.mrb[206].mxu0  ;;  %v5821_v51 = vpop.f32.mrb[222].mxu1 }
 0x81c   : > { %5719 = vmatprep.mubr.f32.mxu0 %v4959_v43  ;;  %v8460_v47 = vpack.i.bf16 %v5821_v51, %v5596_v58  ;;  %v5598_v30 = vpop.f32.mrb[207].mxu0  ;;  %v5823_v39 = vpop.f32.mrb[223].mxu1 }
 0x81d   : > { %v9254_v50 = vpop.eup %9253  ;;  %5720 = vmatmul.mubr.f32.gmra.mrb[0].mxu0 %v4958_v1 }
 0x81e   : > { %v4961_v0 = vmul.f32 %v9254_v50, %v14101_v4  ;;  %8461 = vxpose.xlu1.b32.cont [4/16] (narrow) %v8460_v47, 8  ;;  %v4962_v52 = vmul.f32 %v9254_v50, %v14108_v20 }
 0x81f   : > { %v5601_v61 = vpop.f32.mrb[208].mxu0  ;;  %v5826_v7 = vpop.f32.mrb[224].mxu1 }
 0x820   : > { %5724 = vmatprep.mubr.f32.mxu0 %v4962_v52  ;;  %v8462_v34 = vpack.i.bf16 %v5826_v7, %v5601_v61  ;;  %v5603_v35 = vpop.f32.mrb[209].mxu0  ;;  %v5828_v54 = vpop.f32.mrb[225].mxu1 }
 0x821   : > { %v9256_v12 = vpop.eup %9255  ;;  %5725 = vmatmul.mubr.f32.gmra.mrb[2].mxu0 %v4961_v0 }
 0x822   : > { %v4964_v16 = vmul.f32 %v9256_v12, %v14135_v10  ;;  %8463 = vxpose.xlu1.b32.cont [5/16] (narrow) %v8462_v34, 8  ;;  %v4965_v24 = vmul.f32 %v9256_v12, %v14143_v15 }
 0x823   : > { %v5606_v9 = vpop.f32.mrb[210].mxu0  ;;  %v5831_v31 = vpop.f32.mrb[226].mxu1 }
 0x824   : > { %5729 = vmatprep.mubr.f32.mxu0 %v4965_v24  ;;  %v8464_v4 = vpack.i.bf16 %v5831_v31, %v5606_v9  ;;  %v5608_v33 = vpop.f32.mrb[211].mxu0  ;;  %v5833_v22 = vpop.f32.mrb[227].mxu1 }
 0x825   : > { %v9258_v20 = vpop.eup %9257  ;;  %5730 = vmatmul.mubr.f32.gmra.mrb[4].mxu0 %v4964_v16 }
 0x826   : > { %v4967_v6 = vmul.f32 %v9258_v20, %v14151_v38  ;;  %8465 = vxpose.xlu1.b32.cont [6/16] (narrow) %v8464_v4, 8  ;;  %v4968_v23 = vmul.f32 %v9258_v20, %v14160_v63 }
 0x827   : > { %v5611_v36 = vpop.f32.mrb[212].mxu0  ;;  %v5836_v41 = vpop.f32.mrb[228].mxu1 }
 0x828   : > { %5734 = vmatprep.mubr.f32.mxu0 %v4968_v23  ;;  %v8466_v10 = vpack.i.bf16 %v5836_v41, %v5611_v36  ;;  %v5613_v18 = vpop.f32.mrb[213].mxu0  ;;  %v5838_v55 = vpop.f32.mrb[229].mxu1 }
 0x829   : > { %5735 = vmatmul.mubr.f32.gmra.mrb[6].mxu0 %v4967_v6 }
 0x82a   : > { %8467 = vxpose.xlu1.b32.cont [7/16] (narrow) %v8466_v10, 8  ;;  %6325 = vmatprep.mubr.f32.mxu0 %v16933_v49 }
 0x82b   : > { %v5616_v15 = vpop.f32.mrb[214].mxu0  ;;  %v5841_v3 = vpop.f32.mrb[230].mxu1 }
 0x82c   : > { %v8468_v56 = vpack.i.bf16 %v5841_v3, %v5616_v15  ;;  %v5618_v62 = vpop.f32.mrb[215].mxu0  ;;  %v5843_v25 = vpop.f32.mrb[231].mxu1 }
 0x82e   : > { %8469 = vxpose.xlu1.b32.cont [8/16] (narrow) %v8468_v56, 8 }
 0x82f   : > { %v5621_v38 = vpop.f32.mrb[216].mxu0  ;;  %v5846_v60 = vpop.f32.mrb[232].mxu1 }
 0x830   : > { %v8470_v57 = vpack.i.bf16 %v5846_v60, %v5621_v38  ;;  %v5623_v63 = vpop.f32.mrb[217].mxu0  ;;  %v5848_v11 = vpop.f32.mrb[233].mxu1 }
 0x832   : > { %8471 = vxpose.xlu1.b32.cont [9/16] (narrow) %v8470_v57, 8 }
 0x833   : > { %v5626_v46 = vpop.f32.mrb[218].mxu0  ;;  %v5851_v45 = vpop.f32.mrb[234].mxu1 }
 0x834   : > { %v8472_v53 = vpack.i.bf16 %v5851_v45, %v5626_v46  ;;  %v5628_v27 = vpop.f32.mrb[219].mxu0  ;;  %v5853_v13 = vpop.f32.mrb[235].mxu1 }
 0x836   : > { %8473 = vxpose.xlu1.b32.cont [10/16] (narrow) %v8472_v53, 8 }
 0x837   : > { %v5631_v2 = vpop.f32.mrb[220].mxu0  ;;  %v5856_v5 = vpop.f32.mrb[236].mxu1 }
 0x838   : > { %v8474_v8 = vpack.i.bf16 %v5856_v5, %v5631_v2  ;;  %v5633_v40 = vpop.f32.mrb[221].mxu0  ;;  %v5858_v59 = vpop.f32.mrb[237].mxu1 }
 0x83a   : > { %8475 = vxpose.xlu1.b32.cont [11/16] (narrow) %v8474_v8, 8 }
 0x83b   : > { %v5636_v48 = vpop.f32.mrb[222].mxu0  ;;  %v5861_v17 = vpop.f32.mrb[238].mxu1 }
 0x83c   : > { %v8476_v21 = vpack.i.bf16 %v5861_v17, %v5636_v48  ;;  %v5638_v28 = vpop.f32.mrb[223].mxu0  ;;  %v5863_v42 = vpop.f32.mrb[239].mxu1 }
 0x83d   : > { %v6226_v42 = vld [vmem:[%s14411_s2 + $0x88] sm:$0xff] }
 0x83e   : > { %8477 = vxpose.xlu1.b32.cont [12/16] (narrow) %v8476_v21, 8 }
 0x83f   : > { %v5641_v44 = vpop.f32.mrb[224].mxu0  ;;  %v5866_v26 = vpop.f32.mrb[240].mxu1 }
 0x840   : > { %v8478_v37 = vpack.i.bf16 %v5866_v26, %v5641_v44  ;;  %v5643_v19 = vpop.f32.mrb[225].mxu0  ;;  %v5868_v14 = vpop.f32.mrb[241].mxu1 }
 0x841   : > { %v14293_v32 = vpop.trf.xlu1 }
 0x842   : > { %8479 = vxpose.xlu1.b32.cont [13/16] (narrow) %v8478_v37, 8 }
 0x843   : > { %v5646_v1 = vpop.f32.mrb[226].mxu0  ;;  %v5871_v29 = vpop.f32.mrb[242].mxu1 }
 0x844   : > { %v8480_v43 = vpack.i.bf16 %v5871_v29, %v5646_v1  ;;  %v5648_v58 = vpop.f32.mrb[227].mxu0  ;;  %v5873_v51 = vpop.f32.mrb[243].mxu1  ;;  %v6227_v1 = vld [vmem:[%s14411_s2 + $0x90] sm:$0xff] }
 0x846   : > { %8481 = vxpose.xlu1.b32.cont [14/16] (narrow) %v8480_v43, 8 }
 0x847   : > { %v5651_v47 = vpop.f32.mrb[228].mxu0  ;;  %v5876_v30 = vpop.f32.mrb[244].mxu1 }
 0x848   : > { %v8482_v39 = vpack.i.bf16 %v5876_v30, %v5651_v47  ;;  %v5653_v50 = vpop.f32.mrb[229].mxu0  ;;  %v5878_v0 = vpop.f32.mrb[245].mxu1  ;;  %v6228_v30 = vld [vmem:[%s14411_s2 + $0x98] sm:$0xff] }
 0x84a   : > { %8483 = vxpose.xlu1.b32.cont [15/16] (narrow) %v8482_v39, 8 }
 0x84b   : > { %v5656_v52 = vpop.f32.mrb[230].mxu0 }
 0x84c   : > { %v5658_v61 = vpop.f32.mrb[231].mxu0 }
 0x84f   : > { %v5661_v7 = vpop.f32.mrb[232].mxu0 }
 0x850   : > { %v5663_v34 = vpop.f32.mrb[233].mxu0 }
 0x853   : > { %v5666_v35 = vpop.f32.mrb[234].mxu0 }
 0x854   : > { %v5668_v54 = vpop.f32.mrb[235].mxu0 }
 0x856   : > { %v5881_v12 = vpop.f32.mrb[246].mxu1 }
 0x857   : > { %v8484_v16 = vpack.i.bf16 %v5881_v12, %v5656_v52  ;;  %v5883_v24 = vpop.f32.mrb[247].mxu1  ;;  %v5671_v9 = vpop.f32.mrb[236].mxu0 }
 0x858   : > { %v5673_v31 = vpop.f32.mrb[237].mxu0 }
 0x859   : > { %8485 = vxpose.xlu1.b32.end [16/16] (narrow) %v8484_v16, 8 }
 0x85a   : > { %v5886_v4 = vpop.f32.mrb[248].mxu1 }
 0x85b   : > { %v8417_v33 = vpack.i.bf16 %v5886_v4, %v5661_v7  ;;  %v5888_v22 = vpop.f32.mrb[249].mxu1  ;;  %v5676_v20 = vpop.f32.mrb[238].mxu0 }
 0x85c   : > { %v5678_v6 = vpop.f32.mrb[239].mxu0 }
 0x85d   : > { %8418 = vxpose.xlu0.b32.start [1/16] (narrow) %v8417_v33, 8  ;;  %v8416_v6 = vunpack.i.h.bf16 %v14293_v32 }
 0x85e   : > { %v5891_v23 = vpop.f32.mrb[250].mxu1 }
 0x85f   : > { %v8419_v36 = vpack.i.bf16 %v5891_v23, %v5666_v35  ;;  %v5893_v41 = vpop.f32.mrb[251].mxu1  ;;  %v5681_v10 = vpop.f32.mrb[240].mxu0  ;;  %v8413_v23 = vunpack.i.l.bf16 %v14293_v32 }
 0x860   : > { %v5683_v18 = vpop.f32.mrb[241].mxu0 }
 0x861   : > { %8420 = vxpose.xlu0.b32.cont [2/16] (narrow) %v8419_v36, 8  ;;  %v8375_v36 = vpop.trf.xlu0  ;;  %v7625_v41 = vpack.c.bf16 %v8416_v6, %v8413_v23  ;;  %v16952_v6 = vld [vmem:[#allocation10_spill] sm:$0xff] }
 0x862   : > { %v5896_v55 = vpop.f32.mrb[252].mxu1  ;;  %v8376_v18 = vunpack.i.l.bf16 %v8375_v36 }
 0x863   : > { %v8421_v15 = vpack.i.bf16 %v5896_v55, %v5671_v9  ;;  %v5898_v3 = vpop.f32.mrb[253].mxu1  ;;  %v5686_v56 = vpop.f32.mrb[242].mxu0  ;;  %7626 = vmatprep.subr.bf16.mxu0 %v7625_v41 }
 0x864   : > { %v5688_v62 = vpop.f32.mrb[243].mxu0 }
 0x865   : > { %8422 = vxpose.xlu0.b32.cont [3/16] (narrow) %v8421_v15, 8 }
 0x866   : > { %v5901_v25 = vpop.f32.mrb[254].mxu1 }
 0x867   : > { %v8423_v38 = vpack.i.bf16 %v5901_v25, %v5676_v20  ;;  %v5903_v60 = vpop.f32.mrb[255].mxu1  ;;  %v5691_v57 = vpop.f32.mrb[244].mxu0 }
 0x868   : > { %v5693_v63 = vpop.f32.mrb[245].mxu0 }
 0x869   : > { %8424 = vxpose.xlu0.b32.cont [4/16] (narrow) %v8423_v38, 8 }
 0x86a   : > { %v5906_v11 = vpop.f32.mrb[0].mxu1 }
 0x86b   : > { %v8425_v46 = vpack.i.bf16 %v5906_v11, %v5681_v10  ;;  %v5908_v45 = vpop.f32.mrb[1].mxu1  ;;  %v5696_v53 = vpop.f32.mrb[246].mxu0  ;;  %v8379_v10 = vunpack.i.h.bf16 %v8375_v36  ;;  %v16953_v36 = vld [vmem:[#allocation11_spill] sm:$0xff] }
 0x86c   : > { %v5698_v27 = vpop.f32.mrb[247].mxu0  ;;  %v6225_v45 = vld [vmem:[%s14411_s2 + $0x80] sm:$0xff] }
 0x86d   : > { %8426 = vxpose.xlu0.b32.cont [5/16] (narrow) %v8425_v46, 8  ;;  %v7627_v55 = vpack.c.bf16 %v8379_v10, %v8376_v18  ;;  %v16954_v10 = vld [vmem:[#allocation12_spill] sm:$0xff] }
 0x86e   : > { %v5911_v13 = vpop.f32.mrb[2].mxu1 }
 0x86f   : > { %v8427_v2 = vpack.i.bf16 %v5911_v13, %v5686_v56  ;;  %v5913_v5 = vpop.f32.mrb[3].mxu1  ;;  %v5701_v8 = vpop.f32.mrb[248].mxu0  ;;  %7628 = vmatpush1.bf16.msra.mxu0 %v7627_v55 }
 0x870   : > { %v5703_v40 = vpop.f32.mrb[249].mxu0 }
 0x871   : > { %8428 = vxpose.xlu0.b32.cont [6/16] (narrow) %v8427_v2, 8 }
 0x872   : > { %v5916_v59 = vpop.f32.mrb[4].mxu1 }
 0x873   : > { %v8429_v48 = vpack.i.bf16 %v5916_v59, %v5691_v57  ;;  %v5918_v17 = vpop.f32.mrb[5].mxu1  ;;  %v5706_v21 = vpop.f32.mrb[250].mxu0  ;;  %v6221_v59 = vld [vmem:[%s14410_s1 + $0x80] sm:$0xff] }
 0x874   : > { %v5708_v28 = vpop.f32.mrb[251].mxu0  ;;  %v6223_v17 = vld [vmem:[%s14410_s1 + $0x90] sm:$0xff] }
 0x875   : > { %8430 = vxpose.xlu0.b32.cont [7/16] (narrow) %v8429_v48, 8  ;;  %v6222_v48 = vld [vmem:[%s14410_s1 + $0x88] sm:$0xff] }
 0x876   : > { %v5921_v44 = vpop.f32.mrb[6].mxu1 }
 0x877   : > { %v8431_v26 = vpack.i.bf16 %v5921_v44, %v5696_v53  ;;  %v5923_v37 = vpop.f32.mrb[7].mxu1  ;;  %6236 = vperm.xlu1 %7686, %v6226_v42   ;;  %v5711_v19 = vpop.f32.mrb[252].mxu0 }
 0x878   : > { %v5713_v14 = vpop.f32.mrb[253].mxu0 }
 0x879   : > { %8432 = vxpose.xlu0.b32.cont [8/16] (narrow) %v8431_v26, 8 }
 0x87a   : > { %v5926_v29 = vpop.f32.mrb[8].mxu1 }
 0x87b   : > { %v8433_v43 = vpack.i.bf16 %v5926_v29, %v5701_v8  ;;  %v5928_v58 = vpop.f32.mrb[9].mxu1  ;;  %6241 = vperm.xlu1 %7686, %v6227_v1   ;;  %v5716_v51 = vpop.f32.mrb[254].mxu0 }
 0x87c   : > { %v5718_v47 = vpop.f32.mrb[255].mxu0 }
 0x87d   : > { %8434 = vxpose.xlu0.b32.cont [9/16] (narrow) %v8433_v43, 8 }
 0x87e   : > { %v5931_v39 = vpop.f32.mrb[10].mxu1 }
 0x87f   : > { %v8435_v50 = vpack.i.bf16 %v5931_v39, %v5706_v21  ;;  %v5933_v0 = vpop.f32.mrb[11].mxu1  ;;  %6246 = vperm.xlu1 %7686, %v6228_v30   ;;  %v6224_v21 = vld [vmem:[%s14410_s1 + $0x98] sm:$0xff]  ;;  %v16948_v30 = vld [vmem:[#allocation6_spill] sm:$0xff] }
 0x881   : > { %8436 = vxpose.xlu0.b32.cont [10/16] (narrow) %v8435_v50, 8  ;;  %v16949_v50 = vld [vmem:[#allocation7_spill] sm:$0xff] }
 0x882   : > { %v5936_v52 = vpop.f32.mrb[12].mxu1 }
 0x883   : > { %v8437_v61 = vpack.i.bf16 %v5936_v52, %v5711_v19  ;;  %v5938_v7 = vpop.f32.mrb[13].mxu1 }
 0x885   : > { %8438 = vxpose.xlu0.b32.cont [11/16] (narrow) %v8437_v61, 8  ;;  %v16950_v61 = vld [vmem:[#allocation8_spill] sm:$0xff] }
 0x886   : > { %v5941_v34 = vpop.f32.mrb[14].mxu1 }
 0x887   : > { %v8439_v35 = vpack.i.bf16 %v5941_v34, %v5716_v51  ;;  %v5943_v54 = vpop.f32.mrb[15].mxu1  ;;  %v16947_v51 = vld [vmem:[#allocation5_spill] sm:$0xff] }
 0x889   : > { %8440 = vxpose.xlu0.b32.cont [12/16] (narrow) %v8439_v35, 8 }
 0x88a   : > { %v5946_v12 = vpop.f32.mrb[16].mxu1 }
 0x88b   : > { %v5948_v16 = vpop.f32.mrb[17].mxu1 }
 0x88e   : > { %v5951_v24 = vpop.f32.mrb[18].mxu1 }
 0x88f   : > { %v5953_v9 = vpop.f32.mrb[19].mxu1 }
 0x892   : > { %v5956_v31 = vpop.f32.mrb[20].mxu1 }
 0x893   : > { %v5958_v4 = vpop.f32.mrb[21].mxu1 }
 0x896   : > { %v5961_v33 = vpop.f32.mrb[22].mxu1 }
 0x897   : > { %v5963_v22 = vpop.f32.mrb[23].mxu1 }
 0x898   : > { %v16951_v22 = vld [vmem:[#allocation9_spill] sm:$0xff] }
 0x89d   : > { %v8486_v20 = vpop.trf.xlu1 }
 0x89e   : > { %v8490_v53 = vunpack.i.h.bf16 %v8486_v20  ;;  %v8487_v27 = vunpack.i.l.bf16 %v8486_v20 }
 0x8a0   : > { %v7631_v8 = vpack.c.bf16 %v8490_v53, %v8487_v27 }
 0x8f0   : > { %v5721_v15 = vpop.f32.mrb[0].mxu0 }
 0x8f1   : > { %v8441_v3 = vpack.i.bf16 %v5946_v12, %v5721_v15  ;;  %v5723_v56 = vpop.f32.mrb[1].mxu0 }
 0x8f2   : > { %v6359_v56 = vld [vmem:[%s14410_s1 + $0xa8] sm:$0xff] }
 0x8f3   : > { %8442 = vxpose.xlu0.b32.cont [13/16] (narrow) %v8441_v3, 8  ;;  %v6358_v3 = vld [vmem:[%s14410_s1 + $0xa0] sm:$0xff] }
 0x8f4   : > { %v5726_v62 = vpop.f32.mrb[2].mxu0 }
 0x8f5   : > { %v8443_v25 = vpack.i.bf16 %v5951_v24, %v5726_v62  ;;  %v5728_v38 = vpop.f32.mrb[3].mxu0  ;;  %v6360_v62 = vld [vmem:[%s14410_s1 + $0xb0] sm:$0xff] }
 0x8f6   : > { %v6237_v28 = vpop.permute.xlu1 %6236 }
 0x8f7   : > { %8444 = vxpose.xlu0.b32.cont [14/16] (narrow) %v8443_v25, 8  ;;  %v6361_v25 = vld [vmem:[%s14410_s1 + $0xb8] sm:$0xff] }
 0x8f8   : > { %v5731_v60 = vpop.f32.mrb[4].mxu0 }
 0x8f9   : > { %v8445_v57 = vpack.i.bf16 %v5956_v31, %v5731_v60  ;;  %v5733_v63 = vpop.f32.mrb[5].mxu0 }
 0x8fa   : > { %v6242_v43 = vpop.permute.xlu1 %6241 }
 0x8fb   : > { %8446 = vxpose.xlu0.b32.cont [15/16] (narrow) %v8445_v57, 8 }
 0x8fc   : > { %v5736_v32 = vpop.f32.mrb[6].mxu0 }
 0x8fd   : > { %v8447_v11 = vpack.i.bf16 %v5961_v33, %v5736_v32  ;;  %v5738_v46 = vpop.f32.mrb[7].mxu0 }
 0x8fe   : > { %v6247_v12 = vpop.permute.xlu1 %6246 }
 0x8ff   : > { %8448 = vxpose.xlu0.b32.end [16/16] (narrow) %v8447_v11, 8 }
 0x928   : > { %6231 = vperm.xlu0 %7685, %v6225_v45  }
 0x943   : > { %v8449_v13 = vpop.trf.xlu0 }
 0x944   : > { %v8453_v2 = vunpack.i.h.bf16 %v8449_v13  ;;  %v8450_v5 = vunpack.i.l.bf16 %v8449_v13 }
 0x946   : > { %v7629_v40 = vpack.c.bf16 %v8453_v2, %v8450_v5 }
 0x948   : > { %7630 = vmatprep.subr.bf16.mxu0 %v7629_v40 }
 0x949   : > { %7632 = vmatpush1.bf16.msra.mxu0 %v7631_v8 }
 0x94c   : > { %6826 = vmatmul.mubr.msk.f32.vlgmr.msra.gmra.mrb[8].mxu0 %vm181_vm0, %v6221_v59 }
 0x94d   : > { %6331 = vmatprep.mubr.f32.mxu0 %v16933_v49 }
 0x950   : > { %6827 = vmatmul.mubr.msk.f32.gmra.mrb[10].mxu0 %vm181_vm0, %v6222_v48 }
 0x951   : > { %6337 = vmatprep.mubr.f32.mxu0 %v16933_v49 }
 0x954   : > { %6828 = vmatmul.mubr.msk.f32.gmra.mrb[12].mxu0 %vm181_vm0, %v6223_v17 }
 0x955   : > { %6343 = vmatprep.mubr.f32.mxu0 %v16933_v49 }
 0x958   : > { %6829 = vmatmul.mubr.msk.f32.gmra.mrb[14].mxu0 %vm181_vm0, %v6224_v21 }
 0x9a7   : > { %v6232_v26 = vpop.permute.xlu0 %6231 }
 0xa1f   : > { %v6327_v42 = vpop.f32.mrb[8].mxu0 }
 0xa20   : > { %v6329_v44 = vpop.f32.mrb[9].mxu0  ;;  %v6328_v14 = vadd.f32 %v6327_v42, %v6232_v26 }
 0xa21   : > { %v6330_v37 = vadd.f32 %v6329_v44, %v6232_v26 }
 0xa22   : > { %v6350_v7 = vadd.f32 %v6328_v14, %v16950_v61 }
 0xa23   : > { %v6333_v19 = vpop.f32.mrb[10].mxu0  ;;  %v6351_v39 = vadd.f32 %v6330_v37, %v16948_v30 }
 0xa24   : > { %v6334_v1 = vadd.f32 %v6333_v19, %v6237_v28  ;;  %v6335_v29 = vpop.f32.mrb[11].mxu0 }
 0xa25   : > { %v6336_v58 = vadd.f32 %v6335_v29, %v6237_v28 }
 0xa26   : > { %v6352_v47 = vadd.f32 %v6334_v1, %v16947_v51 }
 0xa27   : > { %v6353_v0 = vadd.f32 %v6336_v58, %v16949_v50  ;;  %v6339_v52 = vpop.f32.mrb[12].mxu0 }
 0xa28   : > { %v6341_v34 = vpop.f32.mrb[13].mxu0  ;;  %v7635_v54 = vpack.c.bf16 %v6352_v47, %v6350_v7  ;;  %v6340_v9 = vadd.f32 %v6339_v52, %v6242_v43 }
 0xa29   : > { %v7633_v35 = vpack.c.bf16 %v6353_v0, %v6351_v39  ;;  %v6342_v16 = vadd.f32 %v6341_v34, %v6242_v43 }
 0xa2a   : > { %v6354_v18 = vadd.f32 %v6340_v9, %v16954_v10 }
 0xa2b   : > { %v6345_v24 = vpop.f32.mrb[14].mxu0  ;;  %7634 = vmatprep.subr.bf16.mxu1 %v7633_v35  ;;  %v6355_v23 = vadd.f32 %v6342_v16, %v16952_v6 }
 0xa2c   : > { %v6346_v31 = vadd.f32 %v6345_v24, %v6247_v12  ;;  %v6347_v4 = vpop.f32.mrb[15].mxu0  ;;  %7636 = vmatpush1.bf16.msra.mxu1 %v7635_v54 }
 0xa2d   : > { %v6348_v33 = vadd.f32 %v6347_v4, %v6247_v12 }
 0xa2e   : > { %v6356_v20 = vadd.f32 %v6346_v31, %v16951_v22 }
 0xa2f   : > { %v6357_v41 = vadd.f32 %v6348_v33, %v16953_v36 }
 0xa30   : > { %v7639_v15 = vpack.c.bf16 %v6356_v20, %v6354_v18 }
 0xa31   : > { %v7637_v55 = vpack.c.bf16 %v6357_v41, %v6355_v23 }
 0xa33   : > { %7638 = vmatprep.subr.bf16.mxu1 %v7637_v55 }
 0xa34   : > { %7640 = vmatpush1.bf16.msra.mxu1 %v7639_v15 }
 0xa37   : > { %6830 = vmatmul.mubr.msk.f32.vlgmr.msra.gmra.mrb[24].mxu1 %vm181_vm0, %v6358_v3 }
 0xa38   : > { %6444 = vmatprep.mubr.f32.mxu1 %v16933_v49 }
 0xa3b   : > { %6831 = vmatmul.mubr.msk.f32.gmra.mrb[26].mxu1 %vm181_vm0, %v6359_v56 }
 0xa3c   : > { %6450 = vmatprep.mubr.f32.mxu1 %v16933_v49 }
 0xa3f   : > { %6832 = vmatmul.mubr.msk.f32.gmra.mrb[28].mxu1 %vm181_vm0, %v6360_v62 }
 0xa40   : > { %6456 = vmatprep.mubr.f32.mxu1 %v16933_v49 }
 0xa43   : > { %6833 = vmatmul.mubr.msk.f32.gmra.mrb[30].mxu1 %vm181_vm0, %v6361_v25 }
 0xb0a   : > { %v6440_v38 = vpop.f32.mrb[24].mxu1 }
 0xb0b   : > { %v6441_v60 = vadd.f32 %v6440_v38, %v6350_v7  ;;  %v6442_v57 = vpop.f32.mrb[25].mxu1 }
 0xb0c   : > { %v6443_v63 = vadd.f32 %v6442_v57, %v6351_v39 }
 0xb0d   : > { %6463 = vst [vmem:[%s163_s29] sm:$0xff] %v6441_v60 }
 0xb0e   : > { %6464 = vst [vmem:[%s163_s29 + $0x8] sm:$0xff] %v6443_v63  ;;  %v6446_v32 = vpop.f32.mrb[26].mxu1 }
 0xb0f   : > { %v6447_v11 = vadd.f32 %v6446_v32, %v6352_v47  ;;  %v6448_v49 = vpop.f32.mrb[27].mxu1 }
 0xb10   : > { %v6449_v46 = vadd.f32 %v6448_v49, %v6353_v0 }
 0xb11   : > { %6465 = vst [vmem:[%s163_s29 + $0x10] sm:$0xff] %v6447_v11 }
 0xb12   : > { %6466 = vst [vmem:[%s163_s29 + $0x18] sm:$0xff] %v6449_v46  ;;  %v6452_v45 = vpop.f32.mrb[28].mxu1 }
 0xb13   : > { %v6453_v53 = vadd.f32 %v6452_v45, %v6354_v18  ;;  %v6454_v27 = vpop.f32.mrb[29].mxu1 }
 0xb14   : > { %v6455_v13 = vadd.f32 %v6454_v27, %v6355_v23 }
 0xb15   : > { %6467 = vst [vmem:[%s163_s29 + $0x20] sm:$0xff] %v6453_v53 }
 0xb16   : > { %6468 = vst [vmem:[%s163_s29 + $0x28] sm:$0xff] %v6455_v13  ;;  %v6458_v2 = vpop.f32.mrb[30].mxu1 }
 0xb17   : > { %v6459_v5 = vadd.f32 %v6458_v2, %v6356_v20  ;;  %v6460_v8 = vpop.f32.mrb[31].mxu1 }
 0xb18   : > { %v6461_v40 = vadd.f32 %v6460_v8, %v6357_v41 }
 0xb19   : > { %6469 = vst [vmem:[%s163_s29 + $0x30] sm:$0xff] %v6459_v5 }
 0xb1a   : > { %6470 = vst [vmem:[%s163_s29 + $0x38] sm:$0xff] %v6461_v40 }
 0xb1b   : > { %9272 = shalt.err (!%p9269_p3)
}
 0xb1c   : > { %s9273_s17 = scalar_lea.hbm %s14362_s7, 1024  ;;  %s9277_s24 = scalar_lea.hbm %s14412_s3, 2048 }
 0xb1d   : > { %p9274_p4 = scmp.ne.s32.totalorder %s14362_s7, %s9273_s17  ;;  %p9278_p9 = scmp.lt.u32.totalorder %s14362_s7, %s14412_s3 }
 0xb1e   : > { %p9279_p10 = scmp.lt.u32.totalorder %s9277_s24, %s9273_s17  ;;  %p9281_p12 = scmp.lt.u32.totalorder %s9273_s17, %s14362_s7 }
 0xb1f   : > { %p9275_p7 = pnand %p9274_p4, %p9387_p5 }
 0xb20   : > { %p9280_p11 = por %p9279_p10, %p9278_p9 }
 0xb21   : > { %p9276_p8 = pneg %p9275_p7 }
 0xb22   : > { %p9282_p13 = por %p9281_p12, %p9280_p11 }
 0xb24   : > { %p9283_p0 = pnand %p9282_p13, %p9276_p8 }
 0xb26   : > { %9286 = shalt.err (!%p9283_p0)
}
 0xb27   : > { %s9327_s27 = smov 256   ;;  %s9328_s28 = smov 16  }
 0xb28   : > { %7641 = dma.vmem_to_hbm [thread:$0]  (%p9387_p5), %s14364_s4, 1024, %s14362_s7, %s14368_s16, %s9327_s27, %s9327_s27, %s9328_s28  }
 0xb29 PF: > { %p7647_p1 = scmp.ge.s32.totalorder %s9321_s15, 2  ;;  %s6500_s29 = sand.u32 1, %s9309_s12  }
 0xb2a   : > { %s6501_s30 = scalar_lea.sflag [#allocation3], %s6500_s29 }
 0xb2b   : > { %p7644_p2 = pnand %p7647_p1, %p9391_p6 }
 0xb2d   : > { %9304 = dma.done.wait (!%p7644_p2), %s6501_s30, 1024  }
 0xb2e   : > { %9306 = vsyncadd (!%p7644_p2), %s6501_s30, 4294966272  ;;  %p13_p3 = scmp.ge.s32.totalorder %s9374_s18, 4   ;;  %s16955_s12 = smov %s9313_s13 }
 0xb2f   : > { %s16956_s13 = smov %s9317_s14  ;;  %s16957_s14 = smov %s9385_s21 }
 0xb30   : > { %s16958_s15 = smov %s9374_s18  ;;  %15 = sbr.rel (!%p13_p3) target bundleno = 3 (0x3), region = 67 }
 0xb37   :  { %6506 = vsyncpa [#allocation3], 1 }
 0xb38   :  { %6508 = vsyncpa [#allocation3 + $0x1], 1 }

</bundles_post_ra>
